<compile_context>
chip_gen: v6e
topology: v6e:2x2x1
jax: 0.10.0
libtpu: 0.0.40
codegen_flags: <defaults>
</compile_context>

<pallas_src>
import math

import jax
import jax.numpy as jnp
from jax import lax
from jax.experimental import pallas as pl
from jax.experimental.pallas import tpu as pltpu

d_k = d_v = 64
d_model = 512
n_heads = 8
d_ff = 2048
LN_EPS = 1e-5  # torch.nn.LayerNorm default


def _layernorm(y):
    """LayerNorm over last dim, gamma=1 beta=0 (freshly-constructed nn.LayerNorm)."""
    mean = jnp.mean(y, axis=-1, keepdims=True)
    var = jnp.mean((y - mean) ** 2, axis=-1, keepdims=True)
    return (y - mean) * lax.rsqrt(var + LN_EPS)


# ---------------------------------------------------------------------------
# Fused kernel: fused QKV projection -> per-head-pair attention -> output
# projection -> add&LN -> FFN -> add&LN.  One batch tile (TB items) per step.
# ---------------------------------------------------------------------------
def encoder_layer_kernel(x_ref, wqkv_ref, wo_ref, w1_ref, w2_ref,
                         out_ref, atten_ref, qkv_scr, ctx_scr):
    TB, S, D = x_ref.shape
    R = TB * S

    x = x_ref[...].reshape(R, D)                       # f32 residual

    # Fused QKV projection: one MXU weight push (N = 3*D), bf16 inputs,
    # f32 accumulation; the bf16 cast is folded into the expression so no
    # (R, 512) f32 q/k/v temporaries stay live.
    qkv_scr[...] = jnp.dot(
        x.astype(jnp.bfloat16), wqkv_ref[...],
        preferred_element_type=jnp.float32).astype(jnp.bfloat16)

    scale = 1.0 / math.sqrt(d_k)

    def attend_one_batch(b, r0):
        # Head-PAIR loop (only 4 unrolled bodies): every qkv load and every
        # ctx store spans a full, aligned 128-lane group (2 heads x 64).
        for hp in range(n_heads // 2):
            c0 = 2 * hp * d_k
            q2 = qkv_scr[pl.ds(r0, S), c0:c0 + 2 * d_k]                  # (S,128)
            k2 = qkv_scr[pl.ds(r0, S), D + c0:D + c0 + 2 * d_k]
            v2 = qkv_scr[pl.ds(r0, S), 2 * D + c0:2 * D + c0 + 2 * d_v]

            qp = jnp.stack([q2[:, :d_k], q2[:, d_k:]], axis=0)           # (2,S,64)
            kp = jnp.stack([k2[:, :d_k], k2[:, d_k:]], axis=0)
            vp = jnp.stack([v2[:, :d_v], v2[:, d_v:]], axis=0)

            # Batched QK^T for both heads of the pair (single MXU stream).
            s = jnp.einsum("hqd,hkd->hqk", qp, kp,
                           preferred_element_type=jnp.float32) * scale
            # Padding mask intentionally NOT applied: mirrors the non-in-place
            # masked_fill in the PyTorch reference (result discarded).
            m = jnp.max(s, axis=-1, keepdims=True)
            e = jnp.exp(s - m)
            # Exact softmax (the probabilities are a returned module output).
            p = e / jnp.sum(e, axis=-1, keepdims=True)

            # One coalesced (2, S, S) probability store per head pair.
            atten_ref[b, pl.ds(2 * hp, 2)] = p.astype(atten_ref.dtype)

            ctx = jnp.einsum("hqk,hkd->hqd", p.astype(jnp.bfloat16), vp,
                             preferred_element_type=jnp.float32)
            # One aligned 128-lane ctx store (both heads concatenated).
            ctx_scr[pl.ds(r0, S), c0:c0 + 2 * d_v] = jnp.concatenate(
                [ctx[0], ctx[1]], axis=-1).astype(jnp.bfloat16)

    if TB == 1:
        attend_one_batch(0, 0)
    else:
        def _body(b, carry):
            attend_one_batch(b, pl.multiple_of(b * S, S))
            return carry
        lax.fori_loop(0, TB, _body, 0, unroll=False)

    # Attention output projection + residual + LayerNorm (f32 math).
    proj = jnp.dot(ctx_scr[...], wo_ref[...], preferred_element_type=jnp.float32)
    y = _layernorm(proj + x)

    # Position-wise FFN + residual + LayerNorm.
    h1 = jnp.maximum(jnp.dot(y.astype(jnp.bfloat16), w1_ref[...],
                             preferred_element_type=jnp.float32), 0.0)   # ReLU
    z = jnp.dot(h1.astype(jnp.bfloat16), w2_ref[...],
                preferred_element_type=jnp.float32) + y
    out_ref[...] = _layernorm(z).reshape(TB, S, D).astype(out_ref.dtype)


# ---------------------------------------------------------------------------
# Tiling / wrapper helpers.
# ---------------------------------------------------------------------------
def _step_vmem_bytes(tb, S):
    """Rough per-grid-step VMEM footprint (double-buffered blocks + scratch)."""
    R = tb * S
    D = d_model
    xb = tb * S * D * 4 * 2                       # x block (f32, 2 buffers)
    ob = tb * S * D * 4 * 2                       # out block
    ab = tb * n_heads * S * S * 4 * 2             # atten block
    wt = (D * 3 * D + n_heads * d_v * D + D * d_ff + d_ff * D) * 2  # bf16, 1 buf
    scr = R * 3 * D * 2 + R * n_heads * d_v * 2   # qkv + ctx scratch (bf16)
    inter = R * d_ff * 4                          # h1 intermediate (f32)
    return xb + ob + ab + wt + scr + inter


def _batch_tile(B, S):
    """Pack batch items so matmuls see >= 256 rows (v6e/v7x MXUs are 256-deep),
    while keeping grid length >= 2 (both v7x TensorCores busy) and the per-step
    working set inside a conservative VMEM budget (fits v7x's 64 MiB)."""
    target_rows = 256
    tb = max(1, min(B, target_rows // max(S, 1)))
    if B >= 2:
        tb = min(tb, max(1, B // 2))              # grid >= 2 for v7x megacore
    budget = 40 << 20
    while tb > 1 and _step_vmem_bytes(tb, S) > budget:
        tb = max(1, tb // 2)
    return tb


def _vmem_limit_bytes():
    """Generation-aware VMEM limit: 3/4 of physical, capped at 96 MiB."""
    cap = 64 << 20  # conservative default (v7x physical VMEM per TensorCore)
    try:
        cap = int(pltpu.get_tpu_info().vmem_capacity_bytes)
    except Exception:
        pass
    return min((cap * 3) // 4, 96 << 20)


def _weight_spec(shape):
    # Constant index_map -> fetched once; single-buffer to save VMEM.
    return pl.BlockSpec(shape, lambda i: (0, 0), pipeline_mode=pl.Buffered(1))


def encoder_layer(enc_inputs, mask, params):
    """enc_inputs: (B, S, d_model) f32; mask: (B, S, S) bool (unused, see NOTE)."""
    del mask  # ignored: original PyTorch masked_fill result is discarded
    B, S, D = enc_inputs.shape
    assert D == d_model
    # Per-batch row slices of the qkv/ctx scratch assume sublane alignment.
    assert S % 8 == 0, "sequence length must be a multiple of 8"

    bf = jnp.bfloat16
    # Fused QKV weight (one MXU weight push, one DMA) + bf16 weights.
    wqkv = jnp.concatenate(
        [params["wq"], params["wk"], params["wv"]], axis=1).astype(bf)
    wo = params["wo"].astype(bf)
    w1 = params["w1"].astype(bf)
    w2 = params["w2"].astype(bf)

    TB = _batch_tile(B, S)
    grid_b = -(-B // TB)
    B_pad = grid_b * TB
    x = enc_inputs
    if B_pad != B:
        # Pad the batch instead of collapsing TB to 1 for awkward B.
        x = jnp.pad(x, ((0, B_pad - B), (0, 0), (0, 0)))
    R = TB * S

    # TODO(synk): for very long S the (TB, 8, S, S) f32 atten block should get
    # a head-axis grid dim (or bf16 storage) so it still fits v7x's 64 MiB VMEM.
    out, atten = pl.pallas_call(
        encoder_layer_kernel,
        out_shape=(
            jax.ShapeDtypeStruct((B_pad, S, D), jnp.float32),
            jax.ShapeDtypeStruct((B_pad, n_heads, S, S), jnp.float32),
        ),
        grid_spec=pltpu.PrefetchScalarGridSpec(
            num_scalar_prefetch=0,
            grid=(grid_b,),
            in_specs=[
                pl.BlockSpec((TB, S, D), lambda i: (i, 0, 0)),
                _weight_spec((D, 3 * D)),
                _weight_spec((n_heads * d_v, D)),
                _weight_spec((D, d_ff)),
                _weight_spec((d_ff, D)),
            ],
            out_specs=[
                pl.BlockSpec((TB, S, D), lambda i: (i, 0, 0)),
                pl.BlockSpec((TB, n_heads, S, S), lambda i: (i, 0, 0, 0)),
            ],
            scratch_shapes=[
                pltpu.VMEM((R, 3 * d_model), jnp.bfloat16),     # fused qkv
                pltpu.VMEM((R, n_heads * d_v), jnp.bfloat16),   # attention ctx
            ],
        ),
        compiler_params=pltpu.CompilerParams(
            dimension_semantics=("parallel",),
            vmem_limit_bytes=_vmem_limit_bytes(),
        ),
    )(x, wqkv, wo, w1, w2)

    if B_pad != B:
        out = out[:B]
        atten = atten[:B]
    return out, atten


# ---------------------------------------------------------------------------
# Pure-JAX reference (mirrors the kernel's bf16 matmul-input precision).
# ---------------------------------------------------------------------------
def encoder_layer_ref(x, mask, params):
    del mask
    B, S, D = x.shape
    bf, f32 = jnp.bfloat16, jnp.float32
    w = {k: params[k].astype(bf) for k in params}
    x_bf = x.astype(bf)

    q = jnp.einsum("bsd,df->bsf", x_bf, w["wq"], preferred_element_type=f32)
    k = jnp.einsum("bsd,df->bsf", x_bf, w["wk"], preferred_element_type=f32)
    v = jnp.einsum("bsd,df->bsf", x_bf, w["wv"], preferred_element_type=f32)
    q = q.reshape(B, S, n_heads, d_k).transpose(0, 2, 1, 3).astype(bf)
    k = k.reshape(B, S, n_heads, d_k).transpose(0, 2, 1, 3).astype(bf)
    v = v.reshape(B, S, n_heads, d_v).transpose(0, 2, 1, 3).astype(bf)

    s = jnp.einsum("bhqd,bhkd->bhqk", q, k,
                   preferred_element_type=f32) / math.sqrt(d_k)
    p = jax.nn.softmax(s, axis=-1)
    ctx = jnp.einsum("bhqk,bhkd->bhqd", p.astype(bf), v,
                     preferred_element_type=f32)
    ctx = ctx.astype(bf).transpose(0, 2, 1, 3).reshape(B, S, n_heads * d_v)

    proj = jnp.einsum("bsd,df->bsf", ctx, w["wo"], preferred_element_type=f32)
    y = _layernorm(proj + x)
    h = jnp.maximum(
        jnp.einsum("bsd,df->bsf", y.astype(bf), w["w1"],
                   preferred_element_type=f32), 0.0)
    out = _layernorm(
        jnp.einsum("bsd,df->bsf", h.astype(bf), w["w2"],
                   preferred_element_type=f32) + y)
    return out, p


if __name__ == "__main__":
    key = jax.random.PRNGKey(0)
    B, S = 2, 8

    keys = jax.random.split(key, 8)
    params = {
        "wq": jax.random.normal(keys[0], (d_model, n_heads * d_k), jnp.float32) * 0.02,
        "wk": jax.random.normal(keys[1], (d_model, n_heads * d_k), jnp.float32) * 0.02,
        "wv": jax.random.normal(keys[2], (d_model, n_heads * d_v), jnp.float32) * 0.02,
        "wo": jax.random.normal(keys[3], (n_heads * d_v, d_model), jnp.float32) * 0.02,
        "w1": jax.random.normal(keys[4], (d_model, d_ff), jnp.float32) * 0.02,
        "w2": jax.random.normal(keys[5], (d_ff, d_model), jnp.float32) * 0.02,
    }

    enc_inputs = jax.random.normal(keys[6], (B, S, d_model), jnp.float32)
    # padding-style mask (bool); has no effect on the forward pass (see NOTE above)
    mask = jax.random.bernoulli(keys[7], p=0.2, shape=(B, S, S))

    out, atten = jax.jit(encoder_layer)(enc_inputs, mask, params)
    jax.block_until_ready((out, atten))

    ref_out, ref_atten = encoder_layer_ref(enc_inputs, mask, params)
    assert out.shape == (B, S, d_model)
    assert atten.shape == (B, n_heads, S, S)
    assert jnp.allclose(out, ref_out, atol=5e-3, rtol=5e-3)
    assert jnp.allclose(atten, ref_atten, atol=1e-3, rtol=1e-3)

    print("KERNEL_OK")
</pallas_src>

<mosaic_0001>
module attributes {stable_mosaic.version = 11 : i64} {
  func.func @encoder_layer_kernel(%arg0: i32, %arg1: memref<1x8x512xf32, #tpu.memory_space<vmem>>, %arg2: memref<512x1536xbf16, #tpu.memory_space<vmem>>, %arg3: memref<512x512xbf16, #tpu.memory_space<vmem>>, %arg4: memref<512x2048xbf16, #tpu.memory_space<vmem>>, %arg5: memref<2048x512xbf16, #tpu.memory_space<vmem>>, %arg6: memref<1x8x512xf32, #tpu.memory_space<vmem>>, %arg7: memref<1x8x8x8xf32, #tpu.memory_space<vmem>>, %arg8: memref<8x1536xbf16, #tpu.memory_space<vmem>>, %arg9: memref<8x512xbf16, #tpu.memory_space<vmem>>) attributes {dimension_semantics = [#tpu.dimension_semantics<parallel>], iteration_bounds = array<i64: 2>, scalar_prefetch = 0 : i64, scratch_operands = 2 : i64, tpu.core_type = #tpu.core_type<tc>, window_params = [{transform_indices = @transform_0, window_bounds = array<i64: 1, 8, 512>}, {pipeline_mode = #tpu.pipeline_mode<synchronous>, transform_indices = @transform_1, window_bounds = array<i64: 512, 1536>}, {pipeline_mode = #tpu.pipeline_mode<synchronous>, transform_indices = @transform_2, window_bounds = array<i64: 512, 512>}, {pipeline_mode = #tpu.pipeline_mode<synchronous>, transform_indices = @transform_3, window_bounds = array<i64: 512, 2048>}, {pipeline_mode = #tpu.pipeline_mode<synchronous>, transform_indices = @transform_4, window_bounds = array<i64: 2048, 512>}, {transform_indices = @transform_5, window_bounds = array<i64: 1, 8, 512>}, {transform_indices = @transform_6, window_bounds = array<i64: 1, 8, 8, 8>}]} {
    %c0 = arith.constant 0 : index
    %c0_0 = arith.constant 0 : index
    %c0_1 = arith.constant 0 : index
    %0 = vector.load %arg1[%c0, %c0_0, %c0_1] : memref<1x8x512xf32, #tpu.memory_space<vmem>>, vector<1x8x512xf32>
    %1 = vector.shape_cast %0 : vector<1x8x512xf32> to vector<8x512xf32>
    %2 = arith.truncf %1 : vector<8x512xf32> to vector<8x512xbf16>
    %c0_2 = arith.constant 0 : index
    %c0_3 = arith.constant 0 : index
    %3 = vector.load %arg2[%c0_2, %c0_3] : memref<512x1536xbf16, #tpu.memory_space<vmem>>, vector<512x1536xbf16>
    %cst = arith.constant dense<0.000000e+00> : vector<8x1536xf32>
    %4 = tpu.matmul %2, %3, %cst {dimension_numbers = #tpu.dot_dimension_numbers<[1], [0], [0], [1], [0, 0, 1, 1], [], []>} : vector<8x512xbf16>, vector<512x1536xbf16>, vector<8x1536xf32> -> vector<8x1536xf32>
    %5 = arith.truncf %4 : vector<8x1536xf32> to vector<8x1536xbf16>
    %c0_4 = arith.constant 0 : index
    %c0_5 = arith.constant 0 : index
    %6 = vector.load %arg8[%c0_4, %c0_5] : memref<8x1536xbf16, #tpu.memory_space<vmem>>, vector<8x1536xbf16>
    tpu.vector_store %arg8[%c0_4, %c0_5], %5 {strides = array<i32>} : memref<8x1536xbf16, #tpu.memory_space<vmem>>, vector<8x1536xbf16>,
    %c0_6 = arith.constant 0 : index
    %c0_7 = arith.constant 0 : index
    %7 = vector.load %arg8[%c0_6, %c0_7] : memref<8x1536xbf16, #tpu.memory_space<vmem>>, vector<8x128xbf16>
    %c0_8 = arith.constant 0 : index
    %c512 = arith.constant 512 : index
    %8 = vector.load %arg8[%c0_8, %c512] : memref<8x1536xbf16, #tpu.memory_space<vmem>>, vector<8x128xbf16>
    %c0_9 = arith.constant 0 : index
    %c1024 = arith.constant 1024 : index
    %9 = vector.load %arg8[%c0_9, %c1024] : memref<8x1536xbf16, #tpu.memory_space<vmem>>, vector<8x128xbf16>
    %10 = vector.extract_strided_slice %7 {offsets = [0, 0], sizes = [8, 64], strides = [1, 1]} : vector<8x128xbf16> to vector<8x64xbf16>
    %11 = vector.extract_strided_slice %7 {offsets = [0, 64], sizes = [8, 64], strides = [1, 1]} : vector<8x128xbf16> to vector<8x64xbf16>
    %12 = vector.shape_cast %10 : vector<8x64xbf16> to vector<1x8x64xbf16>
    %13 = vector.shape_cast %11 : vector<8x64xbf16> to vector<1x8x64xbf16>
    %14 = tpu.concatenate %12, %13 in 0 : vector<1x8x64xbf16>, vector<1x8x64xbf16> -> vector<2x8x64xbf16>
    %15 = vector.extract_strided_slice %8 {offsets = [0, 0], sizes = [8, 64], strides = [1, 1]} : vector<8x128xbf16> to vector<8x64xbf16>
    %16 = vector.extract_strided_slice %8 {offsets = [0, 64], sizes = [8, 64], strides = [1, 1]} : vector<8x128xbf16> to vector<8x64xbf16>
    %17 = vector.shape_cast %15 : vector<8x64xbf16> to vector<1x8x64xbf16>
    %18 = vector.shape_cast %16 : vector<8x64xbf16> to vector<1x8x64xbf16>
    %19 = tpu.concatenate %17, %18 in 0 : vector<1x8x64xbf16>, vector<1x8x64xbf16> -> vector<2x8x64xbf16>
    %20 = vector.extract_strided_slice %9 {offsets = [0, 0], sizes = [8, 64], strides = [1, 1]} : vector<8x128xbf16> to vector<8x64xbf16>
    %21 = vector.extract_strided_slice %9 {offsets = [0, 64], sizes = [8, 64], strides = [1, 1]} : vector<8x128xbf16> to vector<8x64xbf16>
    %22 = vector.shape_cast %20 : vector<8x64xbf16> to vector<1x8x64xbf16>
    %23 = vector.shape_cast %21 : vector<8x64xbf16> to vector<1x8x64xbf16>
    %24 = tpu.concatenate %22, %23 in 0 : vector<1x8x64xbf16>, vector<1x8x64xbf16> -> vector<2x8x64xbf16>
    "tpu.trace_start"() <{level = 10 : i32, message = "hqd,hkd->hqk"}> : () -> ()
    %cst_10 = arith.constant dense<0.000000e+00> : vector<2x8x8xf32>
    %25 = tpu.matmul %14, %19, %cst_10 {dimension_numbers = #tpu.dot_dimension_numbers<[2], [2], [1], [1], [0, 0, 0, 1, 1, 1], [0], [0]>} : vector<2x8x64xbf16>, vector<2x8x64xbf16>, vector<2x8x8xf32> -> vector<2x8x8xf32>
    "tpu.trace_stop"() : () -> ()
    %cst_11 = arith.constant 1.250000e-01 : f32
    %26 = vector.broadcast %cst_11 : f32 to vector<2x8x8xf32>
    %27 = arith.mulf %25, %26 : vector<2x8x8xf32>
    %cst_12 = arith.constant dense<0xFF800000> : vector<2x8xf32>
    %28 = vector.multi_reduction <maximumf>, %27, %cst_12 [2] : vector<2x8x8xf32> to vector<2x8xf32>
    %29 = vector.shape_cast %28 : vector<2x8xf32> to vector<2x8x1xf32>
    %30 = vector.broadcast %29 : vector<2x8x1xf32> to vector<2x8x8xf32>
    %31 = arith.subf %27, %30 : vector<2x8x8xf32>
    %32 = math.exp %31 : vector<2x8x8xf32>
    %cst_13 = arith.constant dense<0.000000e+00> : vector<2x8xf32>
    %33 = vector.multi_reduction <add>, %32, %cst_13 [2] : vector<2x8x8xf32> to vector<2x8xf32>
    %34 = vector.shape_cast %33 : vector<2x8xf32> to vector<2x8x1xf32>
    %35 = vector.broadcast %34 : vector<2x8x1xf32> to vector<2x8x8xf32>
    %36 = arith.divf %32, %35 : vector<2x8x8xf32>
    %c0_14 = arith.constant 0 : index
    %c0_15 = arith.constant 0 : index
    %c0_16 = arith.constant 0 : index
    %c0_17 = arith.constant 0 : index
    %37 = vector.load %arg7[%c0_14, %c0_15, %c0_16, %c0_17] : memref<1x8x8x8xf32, #tpu.memory_space<vmem>>, vector<1x2x8x8xf32>
    %38 = vector.shape_cast %37 : vector<1x2x8x8xf32> to vector<2x8x8xf32>
    %39 = vector.shape_cast %36 : vector<2x8x8xf32> to vector<1x2x8x8xf32>
    tpu.vector_store %arg7[%c0_14, %c0_15, %c0_16, %c0_17], %39 {strides = array<i32>} : memref<1x8x8x8xf32, #tpu.memory_space<vmem>>, vector<1x2x8x8xf32>,
    %40 = arith.truncf %36 : vector<2x8x8xf32> to vector<2x8x8xbf16>
    "tpu.trace_start"() <{level = 10 : i32, message = "hqk,hkd->hqd"}> : () -> ()
    %cst_18 = arith.constant dense<0.000000e+00> : vector<2x8x64xf32>
    %41 = tpu.matmul %40, %24, %cst_18 {dimension_numbers = #tpu.dot_dimension_numbers<[2], [1], [1], [2], [0, 0, 0, 1, 1, 2], [0], [0]>} : vector<2x8x8xbf16>, vector<2x8x64xbf16>, vector<2x8x64xf32> -> vector<2x8x64xf32>
    "tpu.trace_stop"() : () -> ()
    %42 = vector.extract_strided_slice %41 {offsets = [0, 0, 0], sizes = [1, 8, 64], strides = [1, 1, 1]} : vector<2x8x64xf32> to vector<1x8x64xf32>
    %43 = vector.shape_cast %42 : vector<1x8x64xf32> to vector<8x64xf32>
    %44 = vector.extract_strided_slice %41 {offsets = [1, 0, 0], sizes = [1, 8, 64], strides = [1, 1, 1]} : vector<2x8x64xf32> to vector<1x8x64xf32>
    %45 = vector.shape_cast %44 : vector<1x8x64xf32> to vector<8x64xf32>
    %46 = tpu.concatenate %43, %45 in 1 : vector<8x64xf32>, vector<8x64xf32> -> vector<8x128xf32>
    %47 = arith.truncf %46 : vector<8x128xf32> to vector<8x128xbf16>
    %c0_19 = arith.constant 0 : index
    %c0_20 = arith.constant 0 : index
    %48 = vector.load %arg9[%c0_19, %c0_20] : memref<8x512xbf16, #tpu.memory_space<vmem>>, vector<8x128xbf16>
    tpu.vector_store %arg9[%c0_19, %c0_20], %47 {strides = array<i32>} : memref<8x512xbf16, #tpu.memory_space<vmem>>, vector<8x128xbf16>,
    %c0_21 = arith.constant 0 : index
    %c128 = arith.constant 128 : index
    %49 = vector.load %arg8[%c0_21, %c128] : memref<8x1536xbf16, #tpu.memory_space<vmem>>, vector<8x128xbf16>
    %c0_22 = arith.constant 0 : index
    %c640 = arith.constant 640 : index
    %50 = vector.load %arg8[%c0_22, %c640] : memref<8x1536xbf16, #tpu.memory_space<vmem>>, vector<8x128xbf16>
    %c0_23 = arith.constant 0 : index
    %c1152 = arith.constant 1152 : index
    %51 = vector.load %arg8[%c0_23, %c1152] : memref<8x1536xbf16, #tpu.memory_space<vmem>>, vector<8x128xbf16>
    %52 = vector.extract_strided_slice %49 {offsets = [0, 0], sizes = [8, 64], strides = [1, 1]} : vector<8x128xbf16> to vector<8x64xbf16>
    %53 = vector.extract_strided_slice %49 {offsets = [0, 64], sizes = [8, 64], strides = [1, 1]} : vector<8x128xbf16> to vector<8x64xbf16>
    %54 = vector.shape_cast %52 : vector<8x64xbf16> to vector<1x8x64xbf16>
    %55 = vector.shape_cast %53 : vector<8x64xbf16> to vector<1x8x64xbf16>
    %56 = tpu.concatenate %54, %55 in 0 : vector<1x8x64xbf16>, vector<1x8x64xbf16> -> vector<2x8x64xbf16>
    %57 = vector.extract_strided_slice %50 {offsets = [0, 0], sizes = [8, 64], strides = [1, 1]} : vector<8x128xbf16> to vector<8x64xbf16>
    %58 = vector.extract_strided_slice %50 {offsets = [0, 64], sizes = [8, 64], strides = [1, 1]} : vector<8x128xbf16> to vector<8x64xbf16>
    %59 = vector.shape_cast %57 : vector<8x64xbf16> to vector<1x8x64xbf16>
    %60 = vector.shape_cast %58 : vector<8x64xbf16> to vector<1x8x64xbf16>
    %61 = tpu.concatenate %59, %60 in 0 : vector<1x8x64xbf16>, vector<1x8x64xbf16> -> vector<2x8x64xbf16>
    %62 = vector.extract_strided_slice %51 {offsets = [0, 0], sizes = [8, 64], strides = [1, 1]} : vector<8x128xbf16> to vector<8x64xbf16>
    %63 = vector.extract_strided_slice %51 {offsets = [0, 64], sizes = [8, 64], strides = [1, 1]} : vector<8x128xbf16> to vector<8x64xbf16>
    %64 = vector.shape_cast %62 : vector<8x64xbf16> to vector<1x8x64xbf16>
    %65 = vector.shape_cast %63 : vector<8x64xbf16> to vector<1x8x64xbf16>
    %66 = tpu.concatenate %64, %65 in 0 : vector<1x8x64xbf16>, vector<1x8x64xbf16> -> vector<2x8x64xbf16>
    "tpu.trace_start"() <{level = 10 : i32, message = "hqd,hkd->hqk"}> : () -> ()
    %cst_24 = arith.constant dense<0.000000e+00> : vector<2x8x8xf32>
    %67 = tpu.matmul %56, %61, %cst_24 {dimension_numbers = #tpu.dot_dimension_numbers<[2], [2], [1], [1], [0, 0, 0, 1, 1, 1], [0], [0]>} : vector<2x8x64xbf16>, vector<2x8x64xbf16>, vector<2x8x8xf32> -> vector<2x8x8xf32>
    "tpu.trace_stop"() : () -> ()
    %cst_25 = arith.constant 1.250000e-01 : f32
    %68 = vector.broadcast %cst_25 : f32 to vector<2x8x8xf32>
    %69 = arith.mulf %67, %68 : vector<2x8x8xf32>
    %cst_26 = arith.constant dense<0xFF800000> : vector<2x8xf32>
    %70 = vector.multi_reduction <maximumf>, %69, %cst_26 [2] : vector<2x8x8xf32> to vector<2x8xf32>
    %71 = vector.shape_cast %70 : vector<2x8xf32> to vector<2x8x1xf32>
    %72 = vector.broadcast %71 : vector<2x8x1xf32> to vector<2x8x8xf32>
    %73 = arith.subf %69, %72 : vector<2x8x8xf32>
    %74 = math.exp %73 : vector<2x8x8xf32>
    %cst_27 = arith.constant dense<0.000000e+00> : vector<2x8xf32>
    %75 = vector.multi_reduction <add>, %74, %cst_27 [2] : vector<2x8x8xf32> to vector<2x8xf32>
    %76 = vector.shape_cast %75 : vector<2x8xf32> to vector<2x8x1xf32>
    %77 = vector.broadcast %76 : vector<2x8x1xf32> to vector<2x8x8xf32>
    %78 = arith.divf %74, %77 : vector<2x8x8xf32>
    %c0_28 = arith.constant 0 : index
    %c2 = arith.constant 2 : index
    %c0_29 = arith.constant 0 : index
    %c0_30 = arith.constant 0 : index
    %79 = vector.load %arg7[%c0_28, %c2, %c0_29, %c0_30] : memref<1x8x8x8xf32, #tpu.memory_space<vmem>>, vector<1x2x8x8xf32>
    %80 = vector.shape_cast %79 : vector<1x2x8x8xf32> to vector<2x8x8xf32>
    %81 = vector.shape_cast %78 : vector<2x8x8xf32> to vector<1x2x8x8xf32>
    tpu.vector_store %arg7[%c0_28, %c2, %c0_29, %c0_30], %81 {strides = array<i32>} : memref<1x8x8x8xf32, #tpu.memory_space<vmem>>, vector<1x2x8x8xf32>,
    %82 = arith.truncf %78 : vector<2x8x8xf32> to vector<2x8x8xbf16>
    "tpu.trace_start"() <{level = 10 : i32, message = "hqk,hkd->hqd"}> : () -> ()
    %cst_31 = arith.constant dense<0.000000e+00> : vector<2x8x64xf32>
    %83 = tpu.matmul %82, %66, %cst_31 {dimension_numbers = #tpu.dot_dimension_numbers<[2], [1], [1], [2], [0, 0, 0, 1, 1, 2], [0], [0]>} : vector<2x8x8xbf16>, vector<2x8x64xbf16>, vector<2x8x64xf32> -> vector<2x8x64xf32>
    "tpu.trace_stop"() : () -> ()
    %84 = vector.extract_strided_slice %83 {offsets = [0, 0, 0], sizes = [1, 8, 64], strides = [1, 1, 1]} : vector<2x8x64xf32> to vector<1x8x64xf32>
    %85 = vector.shape_cast %84 : vector<1x8x64xf32> to vector<8x64xf32>
    %86 = vector.extract_strided_slice %83 {offsets = [1, 0, 0], sizes = [1, 8, 64], strides = [1, 1, 1]} : vector<2x8x64xf32> to vector<1x8x64xf32>
    %87 = vector.shape_cast %86 : vector<1x8x64xf32> to vector<8x64xf32>
    %88 = tpu.concatenate %85, %87 in 1 : vector<8x64xf32>, vector<8x64xf32> -> vector<8x128xf32>
    %89 = arith.truncf %88 : vector<8x128xf32> to vector<8x128xbf16>
    %c0_32 = arith.constant 0 : index
    %c128_33 = arith.constant 128 : index
    %90 = vector.load %arg9[%c0_32, %c128_33] : memref<8x512xbf16, #tpu.memory_space<vmem>>, vector<8x128xbf16>
    tpu.vector_store %arg9[%c0_32, %c128_33], %89 {strides = array<i32>} : memref<8x512xbf16, #tpu.memory_space<vmem>>, vector<8x128xbf16>,
    %c0_34 = arith.constant 0 : index
    %c256 = arith.constant 256 : index
    %91 = vector.load %arg8[%c0_34, %c256] : memref<8x1536xbf16, #tpu.memory_space<vmem>>, vector<8x128xbf16>
    %c0_35 = arith.constant 0 : index
    %c768 = arith.constant 768 : index
    %92 = vector.load %arg8[%c0_35, %c768] : memref<8x1536xbf16, #tpu.memory_space<vmem>>, vector<8x128xbf16>
    %c0_36 = arith.constant 0 : index
    %c1280 = arith.constant 1280 : index
    %93 = vector.load %arg8[%c0_36, %c1280] : memref<8x1536xbf16, #tpu.memory_space<vmem>>, vector<8x128xbf16>
    %94 = vector.extract_strided_slice %91 {offsets = [0, 0], sizes = [8, 64], strides = [1, 1]} : vector<8x128xbf16> to vector<8x64xbf16>
    %95 = vector.extract_strided_slice %91 {offsets = [0, 64], sizes = [8, 64], strides = [1, 1]} : vector<8x128xbf16> to vector<8x64xbf16>
    %96 = vector.shape_cast %94 : vector<8x64xbf16> to vector<1x8x64xbf16>
    %97 = vector.shape_cast %95 : vector<8x64xbf16> to vector<1x8x64xbf16>
    %98 = tpu.concatenate %96, %97 in 0 : vector<1x8x64xbf16>, vector<1x8x64xbf16> -> vector<2x8x64xbf16>
    %99 = vector.extract_strided_slice %92 {offsets = [0, 0], sizes = [8, 64], strides = [1, 1]} : vector<8x128xbf16> to vector<8x64xbf16>
    %100 = vector.extract_strided_slice %92 {offsets = [0, 64], sizes = [8, 64], strides = [1, 1]} : vector<8x128xbf16> to vector<8x64xbf16>
    %101 = vector.shape_cast %99 : vector<8x64xbf16> to vector<1x8x64xbf16>
    %102 = vector.shape_cast %100 : vector<8x64xbf16> to vector<1x8x64xbf16>
    %103 = tpu.concatenate %101, %102 in 0 : vector<1x8x64xbf16>, vector<1x8x64xbf16> -> vector<2x8x64xbf16>
    %104 = vector.extract_strided_slice %93 {offsets = [0, 0], sizes = [8, 64], strides = [1, 1]} : vector<8x128xbf16> to vector<8x64xbf16>
    %105 = vector.extract_strided_slice %93 {offsets = [0, 64], sizes = [8, 64], strides = [1, 1]} : vector<8x128xbf16> to vector<8x64xbf16>
    %106 = vector.shape_cast %104 : vector<8x64xbf16> to vector<1x8x64xbf16>
    %107 = vector.shape_cast %105 : vector<8x64xbf16> to vector<1x8x64xbf16>
    %108 = tpu.concatenate %106, %107 in 0 : vector<1x8x64xbf16>, vector<1x8x64xbf16> -> vector<2x8x64xbf16>
    "tpu.trace_start"() <{level = 10 : i32, message = "hqd,hkd->hqk"}> : () -> ()
    %cst_37 = arith.constant dense<0.000000e+00> : vector<2x8x8xf32>
    %109 = tpu.matmul %98, %103, %cst_37 {dimension_numbers = #tpu.dot_dimension_numbers<[2], [2], [1], [1], [0, 0, 0, 1, 1, 1], [0], [0]>} : vector<2x8x64xbf16>, vector<2x8x64xbf16>, vector<2x8x8xf32> -> vector<2x8x8xf32>
    "tpu.trace_stop"() : () -> ()
    %cst_38 = arith.constant 1.250000e-01 : f32
    %110 = vector.broadcast %cst_38 : f32 to vector<2x8x8xf32>
    %111 = arith.mulf %109, %110 : vector<2x8x8xf32>
    %cst_39 = arith.constant dense<0xFF800000> : vector<2x8xf32>
    %112 = vector.multi_reduction <maximumf>, %111, %cst_39 [2] : vector<2x8x8xf32> to vector<2x8xf32>
    %113 = vector.shape_cast %112 : vector<2x8xf32> to vector<2x8x1xf32>
    %114 = vector.broadcast %113 : vector<2x8x1xf32> to vector<2x8x8xf32>
    %115 = arith.subf %111, %114 : vector<2x8x8xf32>
    %116 = math.exp %115 : vector<2x8x8xf32>
    %cst_40 = arith.constant dense<0.000000e+00> : vector<2x8xf32>
    %117 = vector.multi_reduction <add>, %116, %cst_40 [2] : vector<2x8x8xf32> to vector<2x8xf32>
    %118 = vector.shape_cast %117 : vector<2x8xf32> to vector<2x8x1xf32>
    %119 = vector.broadcast %118 : vector<2x8x1xf32> to vector<2x8x8xf32>
    %120 = arith.divf %116, %119 : vector<2x8x8xf32>
    %c0_41 = arith.constant 0 : index
    %c4 = arith.constant 4 : index
    %c0_42 = arith.constant 0 : index
    %c0_43 = arith.constant 0 : index
    %121 = vector.load %arg7[%c0_41, %c4, %c0_42, %c0_43] : memref<1x8x8x8xf32, #tpu.memory_space<vmem>>, vector<1x2x8x8xf32>
    %122 = vector.shape_cast %121 : vector<1x2x8x8xf32> to vector<2x8x8xf32>
    %123 = vector.shape_cast %120 : vector<2x8x8xf32> to vector<1x2x8x8xf32>
    tpu.vector_store %arg7[%c0_41, %c4, %c0_42, %c0_43], %123 {strides = array<i32>} : memref<1x8x8x8xf32, #tpu.memory_space<vmem>>, vector<1x2x8x8xf32>,
    %124 = arith.truncf %120 : vector<2x8x8xf32> to vector<2x8x8xbf16>
    "tpu.trace_start"() <{level = 10 : i32, message = "hqk,hkd->hqd"}> : () -> ()
    %cst_44 = arith.constant dense<0.000000e+00> : vector<2x8x64xf32>
    %125 = tpu.matmul %124, %108, %cst_44 {dimension_numbers = #tpu.dot_dimension_numbers<[2], [1], [1], [2], [0, 0, 0, 1, 1, 2], [0], [0]>} : vector<2x8x8xbf16>, vector<2x8x64xbf16>, vector<2x8x64xf32> -> vector<2x8x64xf32>
    "tpu.trace_stop"() : () -> ()
    %126 = vector.extract_strided_slice %125 {offsets = [0, 0, 0], sizes = [1, 8, 64], strides = [1, 1, 1]} : vector<2x8x64xf32> to vector<1x8x64xf32>
    %127 = vector.shape_cast %126 : vector<1x8x64xf32> to vector<8x64xf32>
    %128 = vector.extract_strided_slice %125 {offsets = [1, 0, 0], sizes = [1, 8, 64], strides = [1, 1, 1]} : vector<2x8x64xf32> to vector<1x8x64xf32>
    %129 = vector.shape_cast %128 : vector<1x8x64xf32> to vector<8x64xf32>
    %130 = tpu.concatenate %127, %129 in 1 : vector<8x64xf32>, vector<8x64xf32> -> vector<8x128xf32>
    %131 = arith.truncf %130 : vector<8x128xf32> to vector<8x128xbf16>
    %c0_45 = arith.constant 0 : index
    %c256_46 = arith.constant 256 : index
    %132 = vector.load %arg9[%c0_45, %c256_46] : memref<8x512xbf16, #tpu.memory_space<vmem>>, vector<8x128xbf16>
    tpu.vector_store %arg9[%c0_45, %c256_46], %131 {strides = array<i32>} : memref<8x512xbf16, #tpu.memory_space<vmem>>, vector<8x128xbf16>,
    %c0_47 = arith.constant 0 : index
    %c384 = arith.constant 384 : index
    %133 = vector.load %arg8[%c0_47, %c384] : memref<8x1536xbf16, #tpu.memory_space<vmem>>, vector<8x128xbf16>
    %c0_48 = arith.constant 0 : index
    %c896 = arith.constant 896 : index
    %134 = vector.load %arg8[%c0_48, %c896] : memref<8x1536xbf16, #tpu.memory_space<vmem>>, vector<8x128xbf16>
    %c0_49 = arith.constant 0 : index
    %c1408 = arith.constant 1408 : index
    %135 = vector.load %arg8[%c0_49, %c1408] : memref<8x1536xbf16, #tpu.memory_space<vmem>>, vector<8x128xbf16>
    %136 = vector.extract_strided_slice %133 {offsets = [0, 0], sizes = [8, 64], strides = [1, 1]} : vector<8x128xbf16> to vector<8x64xbf16>
    %137 = vector.extract_strided_slice %133 {offsets = [0, 64], sizes = [8, 64], strides = [1, 1]} : vector<8x128xbf16> to vector<8x64xbf16>
    %138 = vector.shape_cast %136 : vector<8x64xbf16> to vector<1x8x64xbf16>
    %139 = vector.shape_cast %137 : vector<8x64xbf16> to vector<1x8x64xbf16>
    %140 = tpu.concatenate %138, %139 in 0 : vector<1x8x64xbf16>, vector<1x8x64xbf16> -> vector<2x8x64xbf16>
    %141 = vector.extract_strided_slice %134 {offsets = [0, 0], sizes = [8, 64], strides = [1, 1]} : vector<8x128xbf16> to vector<8x64xbf16>
    %142 = vector.extract_strided_slice %134 {offsets = [0, 64], sizes = [8, 64], strides = [1, 1]} : vector<8x128xbf16> to vector<8x64xbf16>
    %143 = vector.shape_cast %141 : vector<8x64xbf16> to vector<1x8x64xbf16>
    %144 = vector.shape_cast %142 : vector<8x64xbf16> to vector<1x8x64xbf16>
    %145 = tpu.concatenate %143, %144 in 0 : vector<1x8x64xbf16>, vector<1x8x64xbf16> -> vector<2x8x64xbf16>
    %146 = vector.extract_strided_slice %135 {offsets = [0, 0], sizes = [8, 64], strides = [1, 1]} : vector<8x128xbf16> to vector<8x64xbf16>
    %147 = vector.extract_strided_slice %135 {offsets = [0, 64], sizes = [8, 64], strides = [1, 1]} : vector<8x128xbf16> to vector<8x64xbf16>
    %148 = vector.shape_cast %146 : vector<8x64xbf16> to vector<1x8x64xbf16>
    %149 = vector.shape_cast %147 : vector<8x64xbf16> to vector<1x8x64xbf16>
    %150 = tpu.concatenate %148, %149 in 0 : vector<1x8x64xbf16>, vector<1x8x64xbf16> -> vector<2x8x64xbf16>
    "tpu.trace_start"() <{level = 10 : i32, message = "hqd,hkd->hqk"}> : () -> ()
    %cst_50 = arith.constant dense<0.000000e+00> : vector<2x8x8xf32>
    %151 = tpu.matmul %140, %145, %cst_50 {dimension_numbers = #tpu.dot_dimension_numbers<[2], [2], [1], [1], [0, 0, 0, 1, 1, 1], [0], [0]>} : vector<2x8x64xbf16>, vector<2x8x64xbf16>, vector<2x8x8xf32> -> vector<2x8x8xf32>
    "tpu.trace_stop"() : () -> ()
    %cst_51 = arith.constant 1.250000e-01 : f32
    %152 = vector.broadcast %cst_51 : f32 to vector<2x8x8xf32>
    %153 = arith.mulf %151, %152 : vector<2x8x8xf32>
    %cst_52 = arith.constant dense<0xFF800000> : vector<2x8xf32>
    %154 = vector.multi_reduction <maximumf>, %153, %cst_52 [2] : vector<2x8x8xf32> to vector<2x8xf32>
    %155 = vector.shape_cast %154 : vector<2x8xf32> to vector<2x8x1xf32>
    %156 = vector.broadcast %155 : vector<2x8x1xf32> to vector<2x8x8xf32>
    %157 = arith.subf %153, %156 : vector<2x8x8xf32>
    %158 = math.exp %157 : vector<2x8x8xf32>
    %cst_53 = arith.constant dense<0.000000e+00> : vector<2x8xf32>
    %159 = vector.multi_reduction <add>, %158, %cst_53 [2] : vector<2x8x8xf32> to vector<2x8xf32>
    %160 = vector.shape_cast %159 : vector<2x8xf32> to vector<2x8x1xf32>
    %161 = vector.broadcast %160 : vector<2x8x1xf32> to vector<2x8x8xf32>
    %162 = arith.divf %158, %161 : vector<2x8x8xf32>
    %c0_54 = arith.constant 0 : index
    %c6 = arith.constant 6 : index
    %c0_55 = arith.constant 0 : index
    %c0_56 = arith.constant 0 : index
    %163 = vector.load %arg7[%c0_54, %c6, %c0_55, %c0_56] : memref<1x8x8x8xf32, #tpu.memory_space<vmem>>, vector<1x2x8x8xf32>
    %164 = vector.shape_cast %163 : vector<1x2x8x8xf32> to vector<2x8x8xf32>
    %165 = vector.shape_cast %162 : vector<2x8x8xf32> to vector<1x2x8x8xf32>
    tpu.vector_store %arg7[%c0_54, %c6, %c0_55, %c0_56], %165 {strides = array<i32>} : memref<1x8x8x8xf32, #tpu.memory_space<vmem>>, vector<1x2x8x8xf32>,
    %166 = arith.truncf %162 : vector<2x8x8xf32> to vector<2x8x8xbf16>
    "tpu.trace_start"() <{level = 10 : i32, message = "hqk,hkd->hqd"}> : () -> ()
    %cst_57 = arith.constant dense<0.000000e+00> : vector<2x8x64xf32>
    %167 = tpu.matmul %166, %150, %cst_57 {dimension_numbers = #tpu.dot_dimension_numbers<[2], [1], [1], [2], [0, 0, 0, 1, 1, 2], [0], [0]>} : vector<2x8x8xbf16>, vector<2x8x64xbf16>, vector<2x8x64xf32> -> vector<2x8x64xf32>
    "tpu.trace_stop"() : () -> ()
    %168 = vector.extract_strided_slice %167 {offsets = [0, 0, 0], sizes = [1, 8, 64], strides = [1, 1, 1]} : vector<2x8x64xf32> to vector<1x8x64xf32>
    %169 = vector.shape_cast %168 : vector<1x8x64xf32> to vector<8x64xf32>
    %170 = vector.extract_strided_slice %167 {offsets = [1, 0, 0], sizes = [1, 8, 64], strides = [1, 1, 1]} : vector<2x8x64xf32> to vector<1x8x64xf32>
    %171 = vector.shape_cast %170 : vector<1x8x64xf32> to vector<8x64xf32>
    %172 = tpu.concatenate %169, %171 in 1 : vector<8x64xf32>, vector<8x64xf32> -> vector<8x128xf32>
    %173 = arith.truncf %172 : vector<8x128xf32> to vector<8x128xbf16>
    %c0_58 = arith.constant 0 : index
    %c384_59 = arith.constant 384 : index
    %174 = vector.load %arg9[%c0_58, %c384_59] : memref<8x512xbf16, #tpu.memory_space<vmem>>, vector<8x128xbf16>
    tpu.vector_store %arg9[%c0_58, %c384_59], %173 {strides = array<i32>} : memref<8x512xbf16, #tpu.memory_space<vmem>>, vector<8x128xbf16>,
    %c0_60 = arith.constant 0 : index
    %c0_61 = arith.constant 0 : index
    %175 = vector.load %arg9[%c0_60, %c0_61] : memref<8x512xbf16, #tpu.memory_space<vmem>>, vector<8x512xbf16>
    %c0_62 = arith.constant 0 : index
    %c0_63 = arith.constant 0 : index
    %176 = vector.load %arg3[%c0_62, %c0_63] : memref<512x512xbf16, #tpu.memory_space<vmem>>, vector<512x512xbf16>
    %cst_64 = arith.constant dense<0.000000e+00> : vector<8x512xf32>
    %177 = tpu.matmul %175, %176, %cst_64 {dimension_numbers = #tpu.dot_dimension_numbers<[1], [0], [0], [1], [0, 0, 1, 1], [], []>} : vector<8x512xbf16>, vector<512x512xbf16>, vector<8x512xf32> -> vector<8x512xf32>
    %178 = arith.addf %177, %1 : vector<8x512xf32>
    %cst_65 = arith.constant dense<0.000000e+00> : vector<8xf32>
    %179 = vector.multi_reduction <add>, %178, %cst_65 [1] : vector<8x512xf32> to vector<8xf32>
    %180 = vector.shape_cast %179 : vector<8xf32> to vector<8x1xf32>
    %cst_66 = arith.constant 5.120000e+02 : f32
    %181 = vector.broadcast %cst_66 : f32 to vector<8x1xf32>
    %182 = arith.divf %180, %181 : vector<8x1xf32>
    %183 = vector.broadcast %182 : vector<8x1xf32> to vector<8x512xf32>
    %184 = arith.subf %178, %183 : vector<8x512xf32>
    %185 = arith.mulf %184, %184 : vector<8x512xf32>
    %cst_67 = arith.constant dense<0.000000e+00> : vector<8xf32>
    %186 = vector.multi_reduction <add>, %185, %cst_67 [1] : vector<8x512xf32> to vector<8xf32>
    %187 = vector.shape_cast %186 : vector<8xf32> to vector<8x1xf32>
    %cst_68 = arith.constant 5.120000e+02 : f32
    %188 = vector.broadcast %cst_68 : f32 to vector<8x1xf32>
    %189 = arith.divf %187, %188 : vector<8x1xf32>
    %190 = vector.broadcast %182 : vector<8x1xf32> to vector<8x512xf32>
    %191 = arith.subf %178, %190 : vector<8x512xf32>
    %cst_69 = arith.constant 9.99999974E-6 : f32
    %192 = vector.broadcast %cst_69 : f32 to vector<8x1xf32>
    %193 = arith.addf %189, %192 : vector<8x1xf32>
    %194 = math.rsqrt %193 : vector<8x1xf32>
    %195 = vector.broadcast %194 : vector<8x1xf32> to vector<8x512xf32>
    %196 = arith.mulf %191, %195 : vector<8x512xf32>
    %197 = arith.truncf %196 : vector<8x512xf32> to vector<8x512xbf16>
    %c0_70 = arith.constant 0 : index
    %c0_71 = arith.constant 0 : index
    %198 = vector.load %arg4[%c0_70, %c0_71] : memref<512x2048xbf16, #tpu.memory_space<vmem>>, vector<512x2048xbf16>
    %cst_72 = arith.constant dense<0.000000e+00> : vector<8x2048xf32>
    %199 = tpu.matmul %197, %198, %cst_72 {dimension_numbers = #tpu.dot_dimension_numbers<[1], [0], [0], [1], [0, 0, 1, 1], [], []>} : vector<8x512xbf16>, vector<512x2048xbf16>, vector<8x2048xf32> -> vector<8x2048xf32>
    %cst_73 = arith.constant 0.000000e+00 : f32
    %200 = vector.broadcast %cst_73 : f32 to vector<8x2048xf32>
    %201 = arith.maximumf %199, %200 : vector<8x2048xf32>
    %202 = arith.truncf %201 : vector<8x2048xf32> to vector<8x2048xbf16>
    %c0_74 = arith.constant 0 : index
    %c0_75 = arith.constant 0 : index
    %203 = vector.load %arg5[%c0_74, %c0_75] : memref<2048x512xbf16, #tpu.memory_space<vmem>>, vector<2048x512xbf16>
    %cst_76 = arith.constant dense<0.000000e+00> : vector<8x512xf32>
    %204 = tpu.matmul %202, %203, %cst_76 {dimension_numbers = #tpu.dot_dimension_numbers<[1], [0], [0], [1], [0, 0, 1, 1], [], []>} : vector<8x2048xbf16>, vector<2048x512xbf16>, vector<8x512xf32> -> vector<8x512xf32>
    %205 = arith.addf %204, %196 : vector<8x512xf32>
    %cst_77 = arith.constant dense<0.000000e+00> : vector<8xf32>
    %206 = vector.multi_reduction <add>, %205, %cst_77 [1] : vector<8x512xf32> to vector<8xf32>
    %207 = vector.shape_cast %206 : vector<8xf32> to vector<8x1xf32>
    %cst_78 = arith.constant 5.120000e+02 : f32
    %208 = vector.broadcast %cst_78 : f32 to vector<8x1xf32>
    %209 = arith.divf %207, %208 : vector<8x1xf32>
    %210 = vector.broadcast %209 : vector<8x1xf32> to vector<8x512xf32>
    %211 = arith.subf %205, %210 : vector<8x512xf32>
    %212 = arith.mulf %211, %211 : vector<8x512xf32>
    %cst_79 = arith.constant dense<0.000000e+00> : vector<8xf32>
    %213 = vector.multi_reduction <add>, %212, %cst_79 [1] : vector<8x512xf32> to vector<8xf32>
    %214 = vector.shape_cast %213 : vector<8xf32> to vector<8x1xf32>
    %cst_80 = arith.constant 5.120000e+02 : f32
    %215 = vector.broadcast %cst_80 : f32 to vector<8x1xf32>
    %216 = arith.divf %214, %215 : vector<8x1xf32>
    %217 = vector.broadcast %209 : vector<8x1xf32> to vector<8x512xf32>
    %218 = arith.subf %205, %217 : vector<8x512xf32>
    %cst_81 = arith.constant 9.99999974E-6 : f32
    %219 = vector.broadcast %cst_81 : f32 to vector<8x1xf32>
    %220 = arith.addf %216, %219 : vector<8x1xf32>
    %221 = math.rsqrt %220 : vector<8x1xf32>
    %222 = vector.broadcast %221 : vector<8x1xf32> to vector<8x512xf32>
    %223 = arith.mulf %218, %222 : vector<8x512xf32>
    %224 = vector.shape_cast %223 : vector<8x512xf32> to vector<1x8x512xf32>
    %c0_82 = arith.constant 0 : index
    %c0_83 = arith.constant 0 : index
    %c0_84 = arith.constant 0 : index
    %225 = vector.load %arg6[%c0_82, %c0_83, %c0_84] : memref<1x8x512xf32, #tpu.memory_space<vmem>>, vector<1x8x512xf32>
    tpu.vector_store %arg6[%c0_82, %c0_83, %c0_84], %224 {strides = array<i32>} : memref<1x8x512xf32, #tpu.memory_space<vmem>>, vector<1x8x512xf32>,
    return
  }
  func.func @transform_0(%arg0: i32) -> (i32, i32, i32) {
    %c0_i32 = arith.constant 0 : i32
    %c0_i32_0 = arith.constant 0 : i32
    %c0_i32_1 = arith.constant 0 : i32
    return %arg0, %c0_i32, %c0_i32_0 : i32, i32, i32
  }
  func.func @transform_1(%arg0: i32) -> (i32, i32) {
    %c0_i32 = arith.constant 0 : i32
    %c0_i32_0 = arith.constant 0 : i32
    %c0_i32_1 = arith.constant 0 : i32
    return %c0_i32, %c0_i32_0 : i32, i32
  }
  func.func @transform_2(%arg0: i32) -> (i32, i32) {
    %c0_i32 = arith.constant 0 : i32
    %c0_i32_0 = arith.constant 0 : i32
    %c0_i32_1 = arith.constant 0 : i32
    return %c0_i32, %c0_i32_0 : i32, i32
  }
  func.func @transform_3(%arg0: i32) -> (i32, i32) {
    %c0_i32 = arith.constant 0 : i32
    %c0_i32_0 = arith.constant 0 : i32
    %c0_i32_1 = arith.constant 0 : i32
    return %c0_i32, %c0_i32_0 : i32, i32
  }
  func.func @transform_4(%arg0: i32) -> (i32, i32) {
    %c0_i32 = arith.constant 0 : i32
    %c0_i32_0 = arith.constant 0 : i32
    %c0_i32_1 = arith.constant 0 : i32
    return %c0_i32, %c0_i32_0 : i32, i32
  }
  func.func @transform_5(%arg0: i32) -> (i32, i32, i32) {
    %c0_i32 = arith.constant 0 : i32
    %c0_i32_0 = arith.constant 0 : i32
    %c0_i32_1 = arith.constant 0 : i32
    return %arg0, %c0_i32, %c0_i32_0 : i32, i32, i32
  }
  func.func @transform_6(%arg0: i32) -> (i32, i32, i32, i32) {
    %c0_i32 = arith.constant 0 : i32
    %c0_i32_0 = arith.constant 0 : i32
    %c0_i32_1 = arith.constant 0 : i32
    %c0_i32_2 = arith.constant 0 : i32
    return %arg0, %c0_i32, %c0_i32_0, %c0_i32_1 : i32, i32, i32, i32
  }
}

</mosaic_0001>

<bundles_post_ra>
// kernel: encoder_layer.1
= control target key start
LH: loop header
LB: loop body
LE: loop exit
PB: predicated region body
PF: predicated region fallthrough
CT: control target
= control target key end

     0   :  { %12 = vsyncpa [#allocation5], 0  ;;  %s21372_s0 = inlined_call_operand.vmem [shape: f32[2,8,512], index: 0, kind: input, shape index: {}]   ;;  %s21373_s1 = inlined_call_operand.vmem [shape: bf16[512,1536], index: 1, kind: input, shape index: {}]   ;;  %s21374_s2 = inlined_call_operand.vmem [shape: bf16[512,512], index: 2, kind: input, shape index: {}]   ;;  %s21375_s3 = inlined_call_operand.vmem [shape: bf16[512,2048], index: 3, kind: input, shape index: {}]   ;;  %s21376_s4 = inlined_call_operand.vmem [shape: bf16[2048,512], index: 4, kind: input, shape index: {}]   ;;  %s21377_s5 = inlined_call_operand.hbm [shape: f32[2,8,512], index: 5, kind: output, shape index: {0}]   ;;  %s21378_s6 = inlined_call_operand.hbm [shape: f32[2,8,8,8], index: 6, kind: output, shape index: {1}]  }
   0x1   :  { %14 = vsyncpa [#allocation5 + $0x1], 0 }
   0x2   :  { %15 = vsyncpa [#allocation7], 0 }
   0x3   :  { %17 = vsyncpa [#allocation7 + $0x1], 0  ;;  %s16168_s21 = smov 0   ;;  %s16170_s22 = smov 0  }
   0x4   :  { %s16172_s23 = smov 0   ;;  %s16174_s24 = smov 0  }
   0x5 LB: > { %s16189_s25 = sadd.s32 4294967295, %s16124_s24   ;;  %s12674_s26 = sadd.s32 4294967294, %s16124_s24   ;;  %s16124_s24 = sphi %s16174_s24, %s21384_s24   ;;  %s16120_s23 = sphi %s16172_s23, %s21383_s23   ;;  %s16116_s22 = sphi %s16170_s22, %s21382_s22   ;;  %s16112_s21 = sphi %s16168_s21, %s21381_s21  }
   0x6   : > { %s16193_s27 = sadd.s32 1, %s16124_s24   ;;  %s140_s28 = sadd.s32 1, %s16120_s23 }
   0x7   : > { %s137_s29 = ssub.s32 %s16124_s24, %s16193_s27  ;;  %p150_p0 = scmp.ne.s32.totalorder %s16120_s23, %s16116_s22 }
   0x8   : > { %p138_p1 = scmp.eq.s32.totalorder %s137_s29, 0  ;;  %p151_p2 = scmp.eq.s32.totalorder %s16189_s25, 1 }
   0x9   : > { %p156_p3 = scmp.ne.s32.totalorder %s16116_s22, %s16112_s21  ;;  %p157_p4 = scmp.eq.s32.totalorder %s12674_s26, 1 }
   0xa   : > { %s16204_s30 = scalar_select %p138_p1, %s16120_s23, %s140_s28  }
   0xb   : > { %p16206_p5 = por %p151_p2, %p150_p0  ;;  %p16210_p6 = por %p157_p4, %p156_p3 }
   0xc   : > { %p12677_p7 = scmp.ge.s32.totalorder %s16124_s24, 1  ;;  %p221_p8 = scmp.lt.s32.totalorder %s16124_s24, 3 }
   0xe   : > { %p222_p9 = pnand %p12677_p7, %p221_p8 }
   0xf   : > { %p256_p10 = scmp.lt.s32.totalorder (!%p222_p9), %s16189_s25, 1  ;;  %s16128_s20 = smov (!%p222_p9), 64  }
  0x10   : > { %225 = sbr.rel (%p222_p9) target bundleno = 4988 (0x137c), region = 40  ;;  %s17445_s26 = sand.u32 (!%p222_p9), 1, %s16116_s22  }
  0x11   : > { %s12679_s28 = sshll.u32 (!%p222_p9), %s17445_s26, 6  ;;  %s14266_s14 = sshll.u32 (!%p222_p9), %s16189_s25, 10 }
  0x12   : > { %s17448_s9 = scalar_lea.vmem (!%p222_p9), [#allocation6], %s12679_s28  ;;  %s12553_s18 = scalar_lea.sflag (!%p222_p9), [#allocation7], %s17445_s26 }
  0x13   : > { %s12580_s13 = sshll.u32 (!%p222_p9), %s17448_s9, 4  ;;  %s16129_s19 = smov (!%p222_p9), [#allocation6]   ;;  %s21295_s13 = int_to_ptr.vmem [resolvable:$true] %s12580_s13 }
  0x15   : > { %v14454_v0 = vld [vmem:[%s21373_s1 + $0x2a4] ss:$48 sps:$4 sm:$0xff]   ;;  %v14458_v2 = vld [vmem:[%s21373_s1 + $0x2a0] ss:$48 sps:$4 sm:$0xff]   ;;  %s257_s29 = scalar_select %p256_p10, %s16189_s25, 1  ;;  %vm16127_vm0 = vmmov 0  }
  0x16   : > { %v14456_v1 = vld [vmem:[%s21373_s1 + $0x8a4] ss:$48 sps:$4 sm:$0xff]   ;;  %2574 = vmatprep.subr.bf16.mxu0 %v14454_v0  ;;  %v14459_v3 = vld [vmem:[%s21373_s1 + $0x8a0] ss:$48 sps:$4 sm:$0xff]   ;;  %vm3132_vm1 = vcmask 523264   ;;  %vm3257_vm2 = vcmask 1043456  }
  0x17   : > { %2615 = vmatprep.subr.bf16.mxu1 %v14456_v1  ;;  %v14460_v4 = vld [vmem:[%s21373_s1 + $0x244] ss:$48 sps:$4 sm:$0xff]   ;;  %2575 = vmatpush1.bf16.msra.mxu0 %v14458_v2  ;;  %v14464_v6 = vld [vmem:[%s21373_s1 + $0x240] ss:$48 sps:$4 sm:$0xff]   ;;  %s14258_s17 = sshll.u32 %s257_s29, 5  ;;  %vm3227_vm3 = vcmask 64512  }
  0x18   : > { %2616 = vmatpush1.bf16.msra.mxu1 %v14459_v3  ;;  %v14462_v5 = vld [vmem:[%s21373_s1 + $0x844] ss:$48 sps:$4 sm:$0xff]   ;;  %2576 = vmatprep.subr.bf16.mxu0 %v14460_v4  ;;  %v14465_v7 = vld [vmem:[%s21373_s1 + $0x840] ss:$48 sps:$4 sm:$0xff]   ;;  %s16353_s12 = scalar_lea.vmem %s21372_s0, %s14258_s17  ;;  %s16034_s17 = scalar_lea.vmem %s21295_s13, 1024 }
  0x19   : > { %2617 = vmatprep.subr.bf16.mxu1 %v14462_v5  ;;  %v14466_v8 = vld [vmem:[%s21373_s1 + $0x1e4] ss:$48 sps:$4 sm:$0xff]   ;;  %v14470_v10 = vld [vmem:[%s21373_s1 + $0x1e0] ss:$48 sps:$4 sm:$0xff]   ;;  %v263_v46 = vld [vmem:[%s16353_s12 + $0x8] sm:$0xff]  ;;  %p16035_p11 = scmp.ne.s32.totalorder %s21295_s13, %s16034_s17 }
  0x1a   : > { %v14468_v9 = vld [vmem:[%s21373_s1 + $0x7e4] ss:$48 sps:$4 sm:$0xff]   ;;  %v14471_v11 = vld [vmem:[%s21373_s1 + $0x7e0] ss:$48 sps:$4 sm:$0xff]   ;;  %v16368_v49 = vpack.c.bf16 %v263_v46, %v263_v46  ;;  %v265_v50 = vld [vmem:[%s16353_s12 + $0x18] sm:$0xff] }
  0x1b   : > { %2577 = vmatpush1.bf16.msra.mxu0 %v14464_v6  ;;  %v14472_v12 = vld [vmem:[%s21373_s1 + $0x184] ss:$48 sps:$4 sm:$0xff]   ;;  %v14476_v14 = vld [vmem:[%s21373_s1 + $0x180] ss:$48 sps:$4 sm:$0xff]   ;;  %v16374_v52 = vpack.c.bf16 %v265_v50, %v265_v50  ;;  %v14552_v6 = vld [vmem:[%s21373_s1 + $0x2ac] ss:$48 sps:$4 sm:$0xff]   ;;  %p16036_p12 = pnand %p16035_p11, %p16206_p5 }
  0x1c   : > { %2618 = vmatpush1.bf16.msra.mxu1 %v14465_v7  ;;  %2578 = vmatprep.subr.bf16.mxu0 %v14466_v8  ;;  %v14474_v13 = vld [vmem:[%s21373_s1 + $0x784] ss:$48 sps:$4 sm:$0xff]   ;;  %v14477_v15 = vld [vmem:[%s21373_s1 + $0x780] ss:$48 sps:$4 sm:$0xff]   ;;  %v14555_v7 = vld [vmem:[%s21373_s1 + $0x8ac] ss:$48 sps:$4 sm:$0xff]  }
  0x1d   : > { %2619 = vmatprep.subr.bf16.mxu1 %v14468_v9  ;;  %v14478_v16 = vld [vmem:[%s21373_s1 + $0x124] ss:$48 sps:$4 sm:$0xff]   ;;  %v14482_v18 = vld [vmem:[%s21373_s1 + $0x120] ss:$48 sps:$4 sm:$0xff]   ;;  %2606 = vmatprep.mubr.bf16.mxu0 %v16368_v49  ;;  %v14604_v46 = vld [vmem:[%s21373_s1 + $0x548] ss:$48 sps:$4 sm:$0xff]   ;;  %p16037_p13 = pneg %p16036_p12 }
  0x1e   : > { %v14480_v17 = vld [vmem:[%s21373_s1 + $0x724] ss:$48 sps:$4 sm:$0xff]   ;;  %v14483_v19 = vld [vmem:[%s21373_s1 + $0x720] ss:$48 sps:$4 sm:$0xff]   ;;  %2647 = vmatprep.mubr.bf16.mxu1 %v16374_v52  ;;  %v14615_v50 = vld [vmem:[%s21373_s1 + $0xaec] ss:$48 sps:$4 sm:$0xff]  }
  0x1f   : > { %2579 = vmatpush1.bf16.msra.mxu0 %v14470_v10  ;;  %v14484_v20 = vld [vmem:[%s21373_s1 + $0xc4] ss:$48 sps:$4 sm:$0xff]   ;;  %v14488_v22 = vld [vmem:[%s21373_s1 + $0xc0] ss:$48 sps:$4 sm:$0xff]   ;;  %v14550_v10 = vld [vmem:[%s21373_s1 + $0x2a8] ss:$48 sps:$4 sm:$0xff]  }
  0x20   : > { %2620 = vmatpush1.bf16.msra.mxu1 %v14471_v11  ;;  %2580 = vmatprep.subr.bf16.mxu0 %v14472_v12  ;;  %v14486_v21 = vld [vmem:[%s21373_s1 + $0x6c4] ss:$48 sps:$4 sm:$0xff]   ;;  %v14489_v23 = vld [vmem:[%s21373_s1 + $0x6c0] ss:$48 sps:$4 sm:$0xff]   ;;  %v14553_v11 = vld [vmem:[%s21373_s1 + $0x8a8] ss:$48 sps:$4 sm:$0xff]  }
  0x21   : > { %2621 = vmatprep.subr.bf16.mxu1 %v14474_v13  ;;  %v14490_v24 = vld [vmem:[%s21373_s1 + $0x64] ss:$48 sps:$4 sm:$0xff]   ;;  %v14494_v26 = vld [vmem:[%s21373_s1 + $0x60] ss:$48 sps:$4 sm:$0xff]   ;;  %v14558_v12 = vld [vmem:[%s21373_s1 + $0x24c] ss:$48 sps:$4 sm:$0xff]  }
  0x22   : > { %v14492_v25 = vld [vmem:[%s21373_s1 + $0x664] ss:$48 sps:$4 sm:$0xff]   ;;  %v14495_v27 = vld [vmem:[%s21373_s1 + $0x660] ss:$48 sps:$4 sm:$0xff]   ;;  %v14561_v13 = vld [vmem:[%s21373_s1 + $0x84c] ss:$48 sps:$4 sm:$0xff]  }
  0x23   : > { %2581 = vmatpush1.bf16.msra.mxu0 %v14476_v14  ;;  %v14496_v28 = vld [vmem:[%s21373_s1 + $0x4] ss:$48 sps:$4 sm:$0xff]   ;;  %v14500_v30 = vld [vmem:[%s21373_s1] ss:$48 sps:$4 sm:$0xff]   ;;  %v14556_v14 = vld [vmem:[%s21373_s1 + $0x248] ss:$48 sps:$4 sm:$0xff]  }
  0x24   : > { %2622 = vmatpush1.bf16.msra.mxu1 %v14477_v15  ;;  %2582 = vmatprep.subr.bf16.mxu0 %v14478_v16  ;;  %v14498_v29 = vld [vmem:[%s21373_s1 + $0x604] ss:$48 sps:$4 sm:$0xff]   ;;  %v14501_v31 = vld [vmem:[%s21373_s1 + $0x600] ss:$48 sps:$4 sm:$0xff]   ;;  %v14559_v15 = vld [vmem:[%s21373_s1 + $0x848] ss:$48 sps:$4 sm:$0xff]  }
  0x25   : > { %2623 = vmatprep.subr.bf16.mxu1 %v14480_v17  ;;  %v14502_v32 = vld [vmem:[%s21373_s1 + $0x5a4] ss:$48 sps:$4 sm:$0xff]   ;;  %v14506_v34 = vld [vmem:[%s21373_s1 + $0x5a0] ss:$48 sps:$4 sm:$0xff]   ;;  %v14564_v16 = vld [vmem:[%s21373_s1 + $0x1ec] ss:$48 sps:$4 sm:$0xff]  }
  0x26   : > { %v14504_v33 = vld [vmem:[%s21373_s1 + $0xba4] ss:$48 sps:$4 sm:$0xff]   ;;  %v14507_v35 = vld [vmem:[%s21373_s1 + $0xba0] ss:$48 sps:$4 sm:$0xff]   ;;  %v14567_v17 = vld [vmem:[%s21373_s1 + $0x7ec] ss:$48 sps:$4 sm:$0xff]  }
  0x27   : > { %2583 = vmatpush1.bf16.msra.mxu0 %v14482_v18  ;;  %v14508_v36 = vld [vmem:[%s21373_s1 + $0x544] ss:$48 sps:$4 sm:$0xff]   ;;  %v14512_v38 = vld [vmem:[%s21373_s1 + $0x540] ss:$48 sps:$4 sm:$0xff]   ;;  %v14562_v18 = vld [vmem:[%s21373_s1 + $0x1e8] ss:$48 sps:$4 sm:$0xff]  }
  0x28   : > { %2624 = vmatpush1.bf16.msra.mxu1 %v14483_v19  ;;  %2584 = vmatprep.subr.bf16.mxu0 %v14484_v20  ;;  %v14510_v37 = vld [vmem:[%s21373_s1 + $0xb44] ss:$48 sps:$4 sm:$0xff]   ;;  %v14513_v39 = vld [vmem:[%s21373_s1 + $0xb40] ss:$48 sps:$4 sm:$0xff]   ;;  %v14565_v19 = vld [vmem:[%s21373_s1 + $0x7e8] ss:$48 sps:$4 sm:$0xff]  }
  0x29   : > { %2625 = vmatprep.subr.bf16.mxu1 %v14486_v21  ;;  %v14514_v40 = vld [vmem:[%s21373_s1 + $0x4e4] ss:$48 sps:$4 sm:$0xff]   ;;  %v14518_v42 = vld [vmem:[%s21373_s1 + $0x4e0] ss:$48 sps:$4 sm:$0xff]   ;;  %v14570_v20 = vld [vmem:[%s21373_s1 + $0x18c] ss:$48 sps:$4 sm:$0xff]  }
  0x2a   : > { %v14516_v41 = vld [vmem:[%s21373_s1 + $0xae4] ss:$48 sps:$4 sm:$0xff]   ;;  %v14519_v43 = vld [vmem:[%s21373_s1 + $0xae0] ss:$48 sps:$4 sm:$0xff]   ;;  %v14573_v21 = vld [vmem:[%s21373_s1 + $0x78c] ss:$48 sps:$4 sm:$0xff]  }
  0x2b   : > { %2585 = vmatpush1.bf16.msra.mxu0 %v14488_v22  ;;  %v14520_v44 = vld [vmem:[%s21373_s1 + $0x484] ss:$48 sps:$4 sm:$0xff]   ;;  %v14524_v47 = vld [vmem:[%s21373_s1 + $0x480] ss:$48 sps:$4 sm:$0xff]   ;;  %v14568_v22 = vld [vmem:[%s21373_s1 + $0x188] ss:$48 sps:$4 sm:$0xff]  }
  0x2c   : > { %2626 = vmatpush1.bf16.msra.mxu1 %v14489_v23  ;;  %2586 = vmatprep.subr.bf16.mxu0 %v14490_v24  ;;  %v14522_v45 = vld [vmem:[%s21373_s1 + $0xa84] ss:$48 sps:$4 sm:$0xff]   ;;  %v14525_v48 = vld [vmem:[%s21373_s1 + $0xa80] ss:$48 sps:$4 sm:$0xff]   ;;  %v14571_v23 = vld [vmem:[%s21373_s1 + $0x788] ss:$48 sps:$4 sm:$0xff]  }
  0x2d   : > { %2627 = vmatprep.subr.bf16.mxu1 %v14492_v25  ;;  %v14526_v51 = vld [vmem:[%s21373_s1 + $0x424] ss:$48 sps:$4 sm:$0xff]   ;;  %v14530_v54 = vld [vmem:[%s21373_s1 + $0x420] ss:$48 sps:$4 sm:$0xff]   ;;  %v14576_v24 = vld [vmem:[%s21373_s1 + $0x12c] ss:$48 sps:$4 sm:$0xff]  }
  0x2e   : > { %v14528_v53 = vld [vmem:[%s21373_s1 + $0xa24] ss:$48 sps:$4 sm:$0xff]   ;;  %v14531_v55 = vld [vmem:[%s21373_s1 + $0xa20] ss:$48 sps:$4 sm:$0xff]   ;;  %v14579_v25 = vld [vmem:[%s21373_s1 + $0x72c] ss:$48 sps:$4 sm:$0xff]  }
  0x2f   : > { %2587 = vmatpush1.bf16.msra.mxu0 %v14494_v26  ;;  %v14532_v56 = vld [vmem:[%s21373_s1 + $0x3c4] ss:$48 sps:$4 sm:$0xff]   ;;  %v14536_v58 = vld [vmem:[%s21373_s1 + $0x3c0] ss:$48 sps:$4 sm:$0xff]   ;;  %v14574_v26 = vld [vmem:[%s21373_s1 + $0x128] ss:$48 sps:$4 sm:$0xff]  }
  0x30   : > { %2628 = vmatpush1.bf16.msra.mxu1 %v14495_v27  ;;  %2588 = vmatprep.subr.bf16.mxu0 %v14496_v28  ;;  %v14534_v57 = vld [vmem:[%s21373_s1 + $0x9c4] ss:$48 sps:$4 sm:$0xff]   ;;  %v14537_v59 = vld [vmem:[%s21373_s1 + $0x9c0] ss:$48 sps:$4 sm:$0xff]   ;;  %v14577_v27 = vld [vmem:[%s21373_s1 + $0x728] ss:$48 sps:$4 sm:$0xff]  }
  0x31   : > { %2629 = vmatprep.subr.bf16.mxu1 %v14498_v29  ;;  %v14538_v60 = vld [vmem:[%s21373_s1 + $0x364] ss:$48 sps:$4 sm:$0xff]   ;;  %v14542_v62 = vld [vmem:[%s21373_s1 + $0x360] ss:$48 sps:$4 sm:$0xff]   ;;  %v14582_v28 = vld [vmem:[%s21373_s1 + $0xcc] ss:$48 sps:$4 sm:$0xff]  }
  0x32   : > { %v14540_v61 = vld [vmem:[%s21373_s1 + $0x964] ss:$48 sps:$4 sm:$0xff]   ;;  %v14543_v63 = vld [vmem:[%s21373_s1 + $0x960] ss:$48 sps:$4 sm:$0xff]   ;;  %v14585_v29 = vld [vmem:[%s21373_s1 + $0x6cc] ss:$48 sps:$4 sm:$0xff]  }
  0x33   : > { %2589 = vmatpush1.bf16.msra.mxu0 %v14500_v30  ;;  %v14544_v0 = vld [vmem:[%s21373_s1 + $0x304] ss:$48 sps:$4 sm:$0xff]   ;;  %v14548_v2 = vld [vmem:[%s21373_s1 + $0x300] ss:$48 sps:$4 sm:$0xff]   ;;  %v14580_v30 = vld [vmem:[%s21373_s1 + $0xc8] ss:$48 sps:$4 sm:$0xff]  }
  0x34   : > { %2630 = vmatpush1.bf16.msra.mxu1 %v14501_v31  ;;  %2590 = vmatprep.subr.bf16.mxu0 %v14502_v32  ;;  %v14546_v1 = vld [vmem:[%s21373_s1 + $0x904] ss:$48 sps:$4 sm:$0xff]   ;;  %v14549_v3 = vld [vmem:[%s21373_s1 + $0x900] ss:$48 sps:$4 sm:$0xff]   ;;  %v14583_v31 = vld [vmem:[%s21373_s1 + $0x6c8] ss:$48 sps:$4 sm:$0xff]  }
  0x35   : > { %2631 = vmatprep.subr.bf16.mxu1 %v14504_v33  ;;  %v262_v4 = vld [vmem:[%s16353_s12] sm:$0xff]  ;;  %v264_v5 = vld [vmem:[%s16353_s12 + $0x10] sm:$0xff]  ;;  %v14588_v32 = vld [vmem:[%s21373_s1 + $0x6c] ss:$48 sps:$4 sm:$0xff]  }
  0x36   : > { %v16431_v8 = vpack.c.bf16 %v262_v4, %v262_v4  ;;  %v16433_v9 = vpack.c.bf16 %v264_v5, %v264_v5  ;;  %v14591_v33 = vld [vmem:[%s21373_s1 + $0x66c] ss:$48 sps:$4 sm:$0xff]   ;;  %v14634_v4 = vld [vmem:[%s21373_s1 + $0x368] ss:$48 sps:$4 sm:$0xff]  }
  0x37   : > { %2591 = vmatpush2.bf16.msra.mxu0 %v14506_v34  ;;  %v14586_v34 = vld [vmem:[%s21373_s1 + $0x68] ss:$48 sps:$4 sm:$0xff]  }
  0x38   : > { %2632 = vmatpush2.bf16.msra.mxu1 %v14507_v35  ;;  %2592 = vmatprep.subr.bf16.mxu0 %v14508_v36  ;;  %v14589_v35 = vld [vmem:[%s21373_s1 + $0x668] ss:$48 sps:$4 sm:$0xff]   ;;  %v14594_v36 = vld [vmem:[%s21373_s1 + $0xc] ss:$48 sps:$4 sm:$0xff]  }
  0x39   : > { %2633 = vmatprep.subr.bf16.mxu1 %v14510_v37  ;;  %v14597_v37 = vld [vmem:[%s21373_s1 + $0x60c] ss:$48 sps:$4 sm:$0xff]   ;;  %v14637_v5 = vld [vmem:[%s21373_s1 + $0x968] ss:$48 sps:$4 sm:$0xff]  }
  0x3b   : > { %2593 = vmatpush2.bf16.msra.mxu0 %v14512_v38  ;;  %v14592_v38 = vld [vmem:[%s21373_s1 + $0x8] ss:$48 sps:$4 sm:$0xff]  }
  0x3c   : > { %2634 = vmatpush2.bf16.msra.mxu1 %v14513_v39  ;;  %2594 = vmatprep.subr.bf16.mxu0 %v14514_v40  ;;  %v14595_v39 = vld [vmem:[%s21373_s1 + $0x608] ss:$48 sps:$4 sm:$0xff]   ;;  %v14600_v40 = vld [vmem:[%s21373_s1 + $0x5ac] ss:$48 sps:$4 sm:$0xff]  }
  0x3d   : > { %2635 = vmatprep.subr.bf16.mxu1 %v14516_v41  ;;  %v14603_v41 = vld [vmem:[%s21373_s1 + $0xbac] ss:$48 sps:$4 sm:$0xff]  }
  0x3f   : > { %2595 = vmatpush2.bf16.msra.mxu0 %v14518_v42  ;;  %v14598_v42 = vld [vmem:[%s21373_s1 + $0x5a8] ss:$48 sps:$4 sm:$0xff]  }
  0x40   : > { %2636 = vmatpush2.bf16.msra.mxu1 %v14519_v43  ;;  %2596 = vmatprep.subr.bf16.mxu0 %v14520_v44  ;;  %v14601_v43 = vld [vmem:[%s21373_s1 + $0xba8] ss:$48 sps:$4 sm:$0xff]   ;;  %v14606_v44 = vld [vmem:[%s21373_s1 + $0x54c] ss:$48 sps:$4 sm:$0xff]  }
  0x41   : > { %2637 = vmatprep.subr.bf16.mxu1 %v14522_v45  ;;  %v14609_v45 = vld [vmem:[%s21373_s1 + $0xb4c] ss:$48 sps:$4 sm:$0xff]  }
  0x43   : > { %2597 = vmatpush2.bf16.msra.mxu0 %v14524_v47  ;;  %v14607_v47 = vld [vmem:[%s21373_s1 + $0xb48] ss:$48 sps:$4 sm:$0xff]  }
  0x44   : > { %2638 = vmatpush2.bf16.msra.mxu1 %v14525_v48  ;;  %2598 = vmatprep.subr.bf16.mxu0 %v14526_v51  ;;  %v14612_v48 = vld [vmem:[%s21373_s1 + $0x4ec] ss:$48 sps:$4 sm:$0xff]   ;;  %v14610_v51 = vld [vmem:[%s21373_s1 + $0x4e8] ss:$48 sps:$4 sm:$0xff]  }
  0x45   : > { %2639 = vmatprep.subr.bf16.mxu1 %v14528_v53  ;;  %v14613_v53 = vld [vmem:[%s21373_s1 + $0xae8] ss:$48 sps:$4 sm:$0xff]  }
  0x47   : > { %2599 = vmatpush2.bf16.msra.mxu0 %v14530_v54  ;;  %v14618_v54 = vld [vmem:[%s21373_s1 + $0x48c] ss:$48 sps:$4 sm:$0xff]  }
  0x48   : > { %2640 = vmatpush2.bf16.msra.mxu1 %v14531_v55  ;;  %2600 = vmatprep.subr.bf16.mxu0 %v14532_v56  ;;  %v14621_v55 = vld [vmem:[%s21373_s1 + $0xa8c] ss:$48 sps:$4 sm:$0xff]   ;;  %v14616_v56 = vld [vmem:[%s21373_s1 + $0x488] ss:$48 sps:$4 sm:$0xff]  }
  0x49   : > { %2641 = vmatprep.subr.bf16.mxu1 %v14534_v57  ;;  %v14619_v57 = vld [vmem:[%s21373_s1 + $0xa88] ss:$48 sps:$4 sm:$0xff]  }
  0x4b   : > { %2601 = vmatpush2.bf16.msra.mxu0 %v14536_v58  ;;  %v14624_v58 = vld [vmem:[%s21373_s1 + $0x42c] ss:$48 sps:$4 sm:$0xff]  }
  0x4c   : > { %2642 = vmatpush2.bf16.msra.mxu1 %v14537_v59  ;;  %2602 = vmatprep.subr.bf16.mxu0 %v14538_v60  ;;  %v14627_v59 = vld [vmem:[%s21373_s1 + $0xa2c] ss:$48 sps:$4 sm:$0xff]   ;;  %v14622_v60 = vld [vmem:[%s21373_s1 + $0x428] ss:$48 sps:$4 sm:$0xff]  }
  0x4d   : > { %2643 = vmatprep.subr.bf16.mxu1 %v14540_v61  ;;  %v14625_v61 = vld [vmem:[%s21373_s1 + $0xa28] ss:$48 sps:$4 sm:$0xff]  }
  0x4f   : > { %2603 = vmatpush2.bf16.msra.mxu0 %v14542_v62  ;;  %v14630_v62 = vld [vmem:[%s21373_s1 + $0x3cc] ss:$48 sps:$4 sm:$0xff]  }
  0x50   : > { %2644 = vmatpush2.bf16.msra.mxu1 %v14543_v63  ;;  %2604 = vmatprep.subr.bf16.mxu0 %v14544_v0  ;;  %v14633_v63 = vld [vmem:[%s21373_s1 + $0x9cc] ss:$48 sps:$4 sm:$0xff]   ;;  %v14628_v0 = vld [vmem:[%s21373_s1 + $0x3c8] ss:$48 sps:$4 sm:$0xff]  }
  0x51   : > { %2645 = vmatprep.subr.bf16.mxu1 %v14546_v1  ;;  %v14631_v1 = vld [vmem:[%s21373_s1 + $0x9c8] ss:$48 sps:$4 sm:$0xff]  }
  0x53   : > { %2605 = vmatpush2.bf16.msra.mxu0 %v14548_v2  ;;  %v14636_v2 = vld [vmem:[%s21373_s1 + $0x36c] ss:$48 sps:$4 sm:$0xff]  }
  0x54   : > { %2646 = vmatpush2.bf16.msra.mxu1 %v14549_v3  ;;  %2656 = vmatprep.subr.bf16.mxu0 %v14552_v6  ;;  %v14639_v3 = vld [vmem:[%s21373_s1 + $0x96c] ss:$48 sps:$4 sm:$0xff]  }
  0x55   : > { %2697 = vmatprep.subr.bf16.mxu1 %v14555_v7  ;;  %v14642_v6 = vld [vmem:[%s21373_s1 + $0x30c] ss:$48 sps:$4 sm:$0xff]  }
  0x56   : > { %2607 = vmatmul.mubr.bf16.vlgmr.msra.gmra.mxu0 %v16431_v8  ;;  %v14645_v7 = vld [vmem:[%s21373_s1 + $0x90c] ss:$48 sps:$4 sm:$0xff]  }
  0x57   : > { %2648 = vmatmul.mubr.bf16.vlgmr.msra.gmra.mxu1 %v16433_v9  ;;  %2657 = vmatpush1.bf16.msra.mxu0 %v14550_v10  ;;  %v14640_v10 = vld [vmem:[%s21373_s1 + $0x308] ss:$48 sps:$4 sm:$0xff]  }
  0x58   : > { %2698 = vmatpush1.bf16.msra.mxu1 %v14553_v11  ;;  %2658 = vmatprep.subr.bf16.mxu0 %v14558_v12  ;;  %v14643_v11 = vld [vmem:[%s21373_s1 + $0x908] ss:$48 sps:$4 sm:$0xff]   ;;  %v14648_v12 = vld [vmem:[%s21373_s1 + $0x2b4] ss:$48 sps:$4 sm:$0xff]  }
  0x59   : > { %2699 = vmatprep.subr.bf16.mxu1 %v14561_v13  ;;  %2688 = vmatprep.mubr.bf16.mxu0 %v16368_v49  ;;  %v14651_v13 = vld [vmem:[%s21373_s1 + $0x8b4] ss:$48 sps:$4 sm:$0xff]  }
  0x5a   : > { %2729 = vmatprep.mubr.bf16.mxu1 %v16374_v52 }
  0x5b   : > { %2659 = vmatpush1.bf16.msra.mxu0 %v14556_v14  ;;  %v14646_v14 = vld [vmem:[%s21373_s1 + $0x2b0] ss:$48 sps:$4 sm:$0xff]  }
  0x5c   : > { %2700 = vmatpush1.bf16.msra.mxu1 %v14559_v15  ;;  %2660 = vmatprep.subr.bf16.mxu0 %v14564_v16  ;;  %v14649_v15 = vld [vmem:[%s21373_s1 + $0x8b0] ss:$48 sps:$4 sm:$0xff]   ;;  %v14654_v16 = vld [vmem:[%s21373_s1 + $0x254] ss:$48 sps:$4 sm:$0xff]  }
  0x5d   : > { %2701 = vmatprep.subr.bf16.mxu1 %v14567_v17  ;;  %v14657_v17 = vld [vmem:[%s21373_s1 + $0x854] ss:$48 sps:$4 sm:$0xff]  }
  0x5f   : > { %2661 = vmatpush1.bf16.msra.mxu0 %v14562_v18  ;;  %v14652_v18 = vld [vmem:[%s21373_s1 + $0x250] ss:$48 sps:$4 sm:$0xff]  }
  0x60   : > { %2702 = vmatpush1.bf16.msra.mxu1 %v14565_v19  ;;  %2662 = vmatprep.subr.bf16.mxu0 %v14570_v20  ;;  %v14655_v19 = vld [vmem:[%s21373_s1 + $0x850] ss:$48 sps:$4 sm:$0xff]   ;;  %v14660_v20 = vld [vmem:[%s21373_s1 + $0x1f4] ss:$48 sps:$4 sm:$0xff]  }
  0x61   : > { %2703 = vmatprep.subr.bf16.mxu1 %v14573_v21  ;;  %v14663_v21 = vld [vmem:[%s21373_s1 + $0x7f4] ss:$48 sps:$4 sm:$0xff]  }
  0x63   : > { %2663 = vmatpush1.bf16.msra.mxu0 %v14568_v22  ;;  %v14658_v22 = vld [vmem:[%s21373_s1 + $0x1f0] ss:$48 sps:$4 sm:$0xff]  }
  0x64   : > { %2704 = vmatpush1.bf16.msra.mxu1 %v14571_v23  ;;  %2664 = vmatprep.subr.bf16.mxu0 %v14576_v24  ;;  %v14661_v23 = vld [vmem:[%s21373_s1 + $0x7f0] ss:$48 sps:$4 sm:$0xff]   ;;  %v14666_v24 = vld [vmem:[%s21373_s1 + $0x194] ss:$48 sps:$4 sm:$0xff]  }
  0x65   : > { %2705 = vmatprep.subr.bf16.mxu1 %v14579_v25  ;;  %v14669_v25 = vld [vmem:[%s21373_s1 + $0x794] ss:$48 sps:$4 sm:$0xff]  }
  0x67   : > { %2665 = vmatpush1.bf16.msra.mxu0 %v14574_v26  ;;  %v14664_v26 = vld [vmem:[%s21373_s1 + $0x190] ss:$48 sps:$4 sm:$0xff]  }
  0x68   : > { %2706 = vmatpush1.bf16.msra.mxu1 %v14577_v27  ;;  %2666 = vmatprep.subr.bf16.mxu0 %v14582_v28  ;;  %v14667_v27 = vld [vmem:[%s21373_s1 + $0x790] ss:$48 sps:$4 sm:$0xff]   ;;  %v14672_v28 = vld [vmem:[%s21373_s1 + $0x134] ss:$48 sps:$4 sm:$0xff]  }
  0x69   : > { %2707 = vmatprep.subr.bf16.mxu1 %v14585_v29  ;;  %v14675_v29 = vld [vmem:[%s21373_s1 + $0x734] ss:$48 sps:$4 sm:$0xff]  }
  0x6b   : > { %2667 = vmatpush1.bf16.msra.mxu0 %v14580_v30  ;;  %v14670_v30 = vld [vmem:[%s21373_s1 + $0x130] ss:$48 sps:$4 sm:$0xff]  }
  0x6c   : > { %2708 = vmatpush1.bf16.msra.mxu1 %v14583_v31  ;;  %2668 = vmatprep.subr.bf16.mxu0 %v14588_v32  ;;  %v14673_v31 = vld [vmem:[%s21373_s1 + $0x730] ss:$48 sps:$4 sm:$0xff]   ;;  %v14678_v32 = vld [vmem:[%s21373_s1 + $0xd4] ss:$48 sps:$4 sm:$0xff]  }
  0x6d   : > { %2709 = vmatprep.subr.bf16.mxu1 %v14591_v33  ;;  %v14681_v33 = vld [vmem:[%s21373_s1 + $0x6d4] ss:$48 sps:$4 sm:$0xff]  }
  0x6f   : > { %2669 = vmatpush1.bf16.msra.mxu0 %v14586_v34  ;;  %v14676_v34 = vld [vmem:[%s21373_s1 + $0xd0] ss:$48 sps:$4 sm:$0xff]  }
  0x70   : > { %2710 = vmatpush1.bf16.msra.mxu1 %v14589_v35  ;;  %2670 = vmatprep.subr.bf16.mxu0 %v14594_v36  ;;  %v14679_v35 = vld [vmem:[%s21373_s1 + $0x6d0] ss:$48 sps:$4 sm:$0xff]   ;;  %v14684_v36 = vld [vmem:[%s21373_s1 + $0x74] ss:$48 sps:$4 sm:$0xff]  }
  0x71   : > { %2711 = vmatprep.subr.bf16.mxu1 %v14597_v37  ;;  %v14687_v37 = vld [vmem:[%s21373_s1 + $0x674] ss:$48 sps:$4 sm:$0xff]  }
  0x73   : > { %2671 = vmatpush1.bf16.msra.mxu0 %v14592_v38  ;;  %v14682_v38 = vld [vmem:[%s21373_s1 + $0x70] ss:$48 sps:$4 sm:$0xff]  }
  0x74   : > { %2712 = vmatpush1.bf16.msra.mxu1 %v14595_v39  ;;  %2672 = vmatprep.subr.bf16.mxu0 %v14600_v40  ;;  %v14685_v39 = vld [vmem:[%s21373_s1 + $0x670] ss:$48 sps:$4 sm:$0xff]   ;;  %v14690_v40 = vld [vmem:[%s21373_s1 + $0x14] ss:$48 sps:$4 sm:$0xff]  }
  0x75   : > { %2713 = vmatprep.subr.bf16.mxu1 %v14603_v41  ;;  %v14693_v41 = vld [vmem:[%s21373_s1 + $0x614] ss:$48 sps:$4 sm:$0xff]  }
  0x77   : > { %2673 = vmatpush2.bf16.msra.mxu0 %v14598_v42  ;;  %v14688_v42 = vld [vmem:[%s21373_s1 + $0x10] ss:$48 sps:$4 sm:$0xff]  }
  0x78   : > { %2714 = vmatpush2.bf16.msra.mxu1 %v14601_v43  ;;  %2674 = vmatprep.subr.bf16.mxu0 %v14606_v44  ;;  %v14691_v43 = vld [vmem:[%s21373_s1 + $0x610] ss:$48 sps:$4 sm:$0xff]   ;;  %v14696_v44 = vld [vmem:[%s21373_s1 + $0x5b4] ss:$48 sps:$4 sm:$0xff]  }
  0x79   : > { %2715 = vmatprep.subr.bf16.mxu1 %v14609_v45  ;;  %v14699_v45 = vld [vmem:[%s21373_s1 + $0xbb4] ss:$48 sps:$4 sm:$0xff]  }
  0x7b   : > { %2675 = vmatpush2.bf16.msra.mxu0 %v14604_v46  ;;  %v14694_v46 = vld [vmem:[%s21373_s1 + $0x5b0] ss:$48 sps:$4 sm:$0xff]  }
  0x7c   : > { %2716 = vmatpush2.bf16.msra.mxu1 %v14607_v47  ;;  %2676 = vmatprep.subr.bf16.mxu0 %v14612_v48  ;;  %v14697_v47 = vld [vmem:[%s21373_s1 + $0xbb0] ss:$48 sps:$4 sm:$0xff]   ;;  %v14702_v48 = vld [vmem:[%s21373_s1 + $0x554] ss:$48 sps:$4 sm:$0xff]  }
  0x7d   : > { %2717 = vmatprep.subr.bf16.mxu1 %v14615_v50  ;;  %v14705_v50 = vld [vmem:[%s21373_s1 + $0xb54] ss:$48 sps:$4 sm:$0xff]  }
  0x7f   : > { %2677 = vmatpush2.bf16.msra.mxu0 %v14610_v51  ;;  %v14700_v51 = vld [vmem:[%s21373_s1 + $0x550] ss:$48 sps:$4 sm:$0xff]  }
  0x80   : > { %2718 = vmatpush2.bf16.msra.mxu1 %v14613_v53  ;;  %2678 = vmatprep.subr.bf16.mxu0 %v14618_v54  ;;  %v14703_v53 = vld [vmem:[%s21373_s1 + $0xb50] ss:$48 sps:$4 sm:$0xff]   ;;  %v14708_v54 = vld [vmem:[%s21373_s1 + $0x4f4] ss:$48 sps:$4 sm:$0xff]  }
  0x81   : > { %2719 = vmatprep.subr.bf16.mxu1 %v14621_v55  ;;  %v14711_v55 = vld [vmem:[%s21373_s1 + $0xaf4] ss:$48 sps:$4 sm:$0xff]  }
  0x83   : > { %2679 = vmatpush2.bf16.msra.mxu0 %v14616_v56  ;;  %v14706_v56 = vld [vmem:[%s21373_s1 + $0x4f0] ss:$48 sps:$4 sm:$0xff]  }
  0x84   : > { %2720 = vmatpush2.bf16.msra.mxu1 %v14619_v57  ;;  %2680 = vmatprep.subr.bf16.mxu0 %v14624_v58  ;;  %v14709_v57 = vld [vmem:[%s21373_s1 + $0xaf0] ss:$48 sps:$4 sm:$0xff]   ;;  %v14714_v58 = vld [vmem:[%s21373_s1 + $0x494] ss:$48 sps:$4 sm:$0xff]  }
  0x85   : > { %2721 = vmatprep.subr.bf16.mxu1 %v14627_v59  ;;  %v14717_v59 = vld [vmem:[%s21373_s1 + $0xa94] ss:$48 sps:$4 sm:$0xff]  }
  0x87   : > { %2681 = vmatpush2.bf16.msra.mxu0 %v14622_v60  ;;  %v14712_v60 = vld [vmem:[%s21373_s1 + $0x490] ss:$48 sps:$4 sm:$0xff]  }
  0x88   : > { %2722 = vmatpush2.bf16.msra.mxu1 %v14625_v61  ;;  %2682 = vmatprep.subr.bf16.mxu0 %v14630_v62  ;;  %v14715_v61 = vld [vmem:[%s21373_s1 + $0xa90] ss:$48 sps:$4 sm:$0xff]   ;;  %v14720_v62 = vld [vmem:[%s21373_s1 + $0x434] ss:$48 sps:$4 sm:$0xff]  }
  0x89   : > { %2723 = vmatprep.subr.bf16.mxu1 %v14633_v63  ;;  %v14723_v63 = vld [vmem:[%s21373_s1 + $0xa34] ss:$48 sps:$4 sm:$0xff]  }
  0x8b   : > { %2683 = vmatpush2.bf16.msra.mxu0 %v14628_v0  ;;  %v14718_v0 = vld [vmem:[%s21373_s1 + $0x430] ss:$48 sps:$4 sm:$0xff]  }
  0x8c   : > { %2724 = vmatpush2.bf16.msra.mxu1 %v14631_v1  ;;  %2684 = vmatprep.subr.bf16.mxu0 %v14636_v2  ;;  %v14721_v1 = vld [vmem:[%s21373_s1 + $0xa30] ss:$48 sps:$4 sm:$0xff]   ;;  %v14726_v2 = vld [vmem:[%s21373_s1 + $0x3d4] ss:$48 sps:$4 sm:$0xff]  }
  0x8d   : > { %2725 = vmatprep.subr.bf16.mxu1 %v14639_v3  ;;  %v14729_v3 = vld [vmem:[%s21373_s1 + $0x9d4] ss:$48 sps:$4 sm:$0xff]  }
  0x8f   : > { %2685 = vmatpush2.bf16.msra.mxu0 %v14634_v4  ;;  %v14724_v4 = vld [vmem:[%s21373_s1 + $0x3d0] ss:$48 sps:$4 sm:$0xff]  }
  0x90   : > { %2726 = vmatpush2.bf16.msra.mxu1 %v14637_v5  ;;  %2686 = vmatprep.subr.bf16.mxu0 %v14642_v6  ;;  %v14727_v5 = vld [vmem:[%s21373_s1 + $0x9d0] ss:$48 sps:$4 sm:$0xff]   ;;  %v14732_v6 = vld [vmem:[%s21373_s1 + $0x374] ss:$48 sps:$4 sm:$0xff]  }
  0x91   : > { %2727 = vmatprep.subr.bf16.mxu1 %v14645_v7  ;;  %v14735_v7 = vld [vmem:[%s21373_s1 + $0x974] ss:$48 sps:$4 sm:$0xff]  }
  0x93   : > { %2687 = vmatpush2.bf16.msra.mxu0 %v14640_v10  ;;  %v14730_v10 = vld [vmem:[%s21373_s1 + $0x370] ss:$48 sps:$4 sm:$0xff]  }
  0x94   : > { %2728 = vmatpush2.bf16.msra.mxu1 %v14643_v11  ;;  %2738 = vmatprep.subr.bf16.mxu0 %v14648_v12  ;;  %v14733_v11 = vld [vmem:[%s21373_s1 + $0x970] ss:$48 sps:$4 sm:$0xff]   ;;  %v14738_v12 = vld [vmem:[%s21373_s1 + $0x314] ss:$48 sps:$4 sm:$0xff]  }
  0x95   : > { %2779 = vmatprep.subr.bf16.mxu1 %v14651_v13  ;;  %v14741_v13 = vld [vmem:[%s21373_s1 + $0x914] ss:$48 sps:$4 sm:$0xff]  }
  0x96   : > { %2689 = vmatmul.mubr.bf16.vlgmr.msra.gmra.mxu0 %v16431_v8 }
  0x97   : > { %2730 = vmatmul.mubr.bf16.vlgmr.msra.gmra.mxu1 %v16433_v9  ;;  %2739 = vmatpush1.bf16.msra.mxu0 %v14646_v14  ;;  %v14736_v14 = vld [vmem:[%s21373_s1 + $0x310] ss:$48 sps:$4 sm:$0xff]  }
  0x98   : > { %2780 = vmatpush1.bf16.msra.mxu1 %v14649_v15  ;;  %2740 = vmatprep.subr.bf16.mxu0 %v14654_v16  ;;  %v14739_v15 = vld [vmem:[%s21373_s1 + $0x910] ss:$48 sps:$4 sm:$0xff]   ;;  %v14744_v16 = vld [vmem:[%s21373_s1 + $0x2bc] ss:$48 sps:$4 sm:$0xff]  }
  0x99   : > { %2781 = vmatprep.subr.bf16.mxu1 %v14657_v17  ;;  %2770 = vmatprep.mubr.bf16.mxu0 %v16368_v49  ;;  %v14828_v17 = vld [vmem:[%s21373_s1 + $0x8bc] ss:$48 sps:$4 sm:$0xff]  }
  0x9a   : > { %2811 = vmatprep.mubr.bf16.mxu1 %v16374_v52 }
  0x9b   : > { %2741 = vmatpush1.bf16.msra.mxu0 %v14652_v18  ;;  %v14742_v18 = vld [vmem:[%s21373_s1 + $0x2b8] ss:$48 sps:$4 sm:$0xff]  }
  0x9c   : > { %2782 = vmatpush1.bf16.msra.mxu1 %v14655_v19  ;;  %2742 = vmatprep.subr.bf16.mxu0 %v14660_v20  ;;  %v14747_v19 = vld [vmem:[%s21373_s1 + $0x25c] ss:$48 sps:$4 sm:$0xff]   ;;  %v14826_v20 = vld [vmem:[%s21373_s1 + $0x8b8] ss:$48 sps:$4 sm:$0xff]  }
  0x9d   : > { %2783 = vmatprep.subr.bf16.mxu1 %v14663_v21  ;;  %v14834_v21 = vld [vmem:[%s21373_s1 + $0x85c] ss:$48 sps:$4 sm:$0xff]  }
  0x9f   : > { %2743 = vmatpush1.bf16.msra.mxu0 %v14658_v22  ;;  %v14745_v22 = vld [vmem:[%s21373_s1 + $0x258] ss:$48 sps:$4 sm:$0xff]  }
  0xa0   : > { %2784 = vmatpush1.bf16.msra.mxu1 %v14661_v23  ;;  %2744 = vmatprep.subr.bf16.mxu0 %v14666_v24  ;;  %v14750_v23 = vld [vmem:[%s21373_s1 + $0x1fc] ss:$48 sps:$4 sm:$0xff]   ;;  %v14832_v24 = vld [vmem:[%s21373_s1 + $0x858] ss:$48 sps:$4 sm:$0xff]  }
  0xa1   : > { %2785 = vmatprep.subr.bf16.mxu1 %v14669_v25  ;;  %v14840_v25 = vld [vmem:[%s21373_s1 + $0x7fc] ss:$48 sps:$4 sm:$0xff]  }
  0xa3   : > { %2745 = vmatpush1.bf16.msra.mxu0 %v14664_v26  ;;  %v14748_v26 = vld [vmem:[%s21373_s1 + $0x1f8] ss:$48 sps:$4 sm:$0xff]  }
  0xa4   : > { %2786 = vmatpush1.bf16.msra.mxu1 %v14667_v27  ;;  %2746 = vmatprep.subr.bf16.mxu0 %v14672_v28  ;;  %v14753_v27 = vld [vmem:[%s21373_s1 + $0x19c] ss:$48 sps:$4 sm:$0xff]   ;;  %v14838_v28 = vld [vmem:[%s21373_s1 + $0x7f8] ss:$48 sps:$4 sm:$0xff]  }
  0xa5   : > { %2787 = vmatprep.subr.bf16.mxu1 %v14675_v29  ;;  %v14846_v29 = vld [vmem:[%s21373_s1 + $0x79c] ss:$48 sps:$4 sm:$0xff]  }
  0xa7   : > { %2747 = vmatpush1.bf16.msra.mxu0 %v14670_v30  ;;  %v14751_v30 = vld [vmem:[%s21373_s1 + $0x198] ss:$48 sps:$4 sm:$0xff]  }
  0xa8   : > { %2788 = vmatpush1.bf16.msra.mxu1 %v14673_v31  ;;  %2748 = vmatprep.subr.bf16.mxu0 %v14678_v32  ;;  %v14756_v31 = vld [vmem:[%s21373_s1 + $0x13c] ss:$48 sps:$4 sm:$0xff]   ;;  %v14844_v32 = vld [vmem:[%s21373_s1 + $0x798] ss:$48 sps:$4 sm:$0xff]  }
  0xa9   : > { %2789 = vmatprep.subr.bf16.mxu1 %v14681_v33  ;;  %v14852_v33 = vld [vmem:[%s21373_s1 + $0x73c] ss:$48 sps:$4 sm:$0xff]  }
  0xab   : > { %2749 = vmatpush1.bf16.msra.mxu0 %v14676_v34  ;;  %v14754_v34 = vld [vmem:[%s21373_s1 + $0x138] ss:$48 sps:$4 sm:$0xff]  }
  0xac   : > { %2790 = vmatpush1.bf16.msra.mxu1 %v14679_v35  ;;  %2750 = vmatprep.subr.bf16.mxu0 %v14684_v36  ;;  %v14759_v35 = vld [vmem:[%s21373_s1 + $0xdc] ss:$48 sps:$4 sm:$0xff]   ;;  %v14850_v36 = vld [vmem:[%s21373_s1 + $0x738] ss:$48 sps:$4 sm:$0xff]  }
  0xad   : > { %2791 = vmatprep.subr.bf16.mxu1 %v14687_v37  ;;  %v14858_v37 = vld [vmem:[%s21373_s1 + $0x6dc] ss:$48 sps:$4 sm:$0xff]  }
  0xaf   : > { %2751 = vmatpush1.bf16.msra.mxu0 %v14682_v38  ;;  %v14757_v38 = vld [vmem:[%s21373_s1 + $0xd8] ss:$48 sps:$4 sm:$0xff]  }
  0xb0   : > { %2792 = vmatpush1.bf16.msra.mxu1 %v14685_v39  ;;  %2752 = vmatprep.subr.bf16.mxu0 %v14690_v40  ;;  %v14762_v39 = vld [vmem:[%s21373_s1 + $0x7c] ss:$48 sps:$4 sm:$0xff]   ;;  %v14856_v40 = vld [vmem:[%s21373_s1 + $0x6d8] ss:$48 sps:$4 sm:$0xff]  }
  0xb1   : > { %2793 = vmatprep.subr.bf16.mxu1 %v14693_v41  ;;  %v14864_v41 = vld [vmem:[%s21373_s1 + $0x67c] ss:$48 sps:$4 sm:$0xff]  }
  0xb3   : > { %2753 = vmatpush1.bf16.msra.mxu0 %v14688_v42  ;;  %v14760_v42 = vld [vmem:[%s21373_s1 + $0x78] ss:$48 sps:$4 sm:$0xff]  }
  0xb4   : > { %2794 = vmatpush1.bf16.msra.mxu1 %v14691_v43  ;;  %2754 = vmatprep.subr.bf16.mxu0 %v14696_v44  ;;  %v14765_v43 = vld [vmem:[%s21373_s1 + $0x1c] ss:$48 sps:$4 sm:$0xff]   ;;  %v14862_v44 = vld [vmem:[%s21373_s1 + $0x678] ss:$48 sps:$4 sm:$0xff]  }
  0xb5   : > { %2795 = vmatprep.subr.bf16.mxu1 %v14699_v45  ;;  %v14870_v45 = vld [vmem:[%s21373_s1 + $0x61c] ss:$48 sps:$4 sm:$0xff]  }
  0xb7   : > { %2755 = vmatpush2.bf16.msra.mxu0 %v14694_v46  ;;  %v14763_v46 = vld [vmem:[%s21373_s1 + $0x18] ss:$48 sps:$4 sm:$0xff]  }
  0xb8   : > { %2796 = vmatpush2.bf16.msra.mxu1 %v14697_v47  ;;  %2756 = vmatprep.subr.bf16.mxu0 %v14702_v48  ;;  %v14768_v47 = vld [vmem:[%s21373_s1 + $0x5bc] ss:$48 sps:$4 sm:$0xff]   ;;  %v14868_v48 = vld [vmem:[%s21373_s1 + $0x618] ss:$48 sps:$4 sm:$0xff]  }
  0xb9   : > { %2797 = vmatprep.subr.bf16.mxu1 %v14705_v50  ;;  %v14876_v50 = vld [vmem:[%s21373_s1 + $0xbbc] ss:$48 sps:$4 sm:$0xff]  }
  0xbb   : > { %2757 = vmatpush2.bf16.msra.mxu0 %v14700_v51  ;;  %v14766_v51 = vld [vmem:[%s21373_s1 + $0x5b8] ss:$48 sps:$4 sm:$0xff]  }
  0xbc   : > { %2798 = vmatpush2.bf16.msra.mxu1 %v14703_v53  ;;  %2758 = vmatprep.subr.bf16.mxu0 %v14708_v54  ;;  %v14771_v53 = vld [vmem:[%s21373_s1 + $0x55c] ss:$48 sps:$4 sm:$0xff]   ;;  %v14874_v54 = vld [vmem:[%s21373_s1 + $0xbb8] ss:$48 sps:$4 sm:$0xff]  }
  0xbd   : > { %2799 = vmatprep.subr.bf16.mxu1 %v14711_v55  ;;  %v14882_v55 = vld [vmem:[%s21373_s1 + $0xb5c] ss:$48 sps:$4 sm:$0xff]  }
  0xbf   : > { %2759 = vmatpush2.bf16.msra.mxu0 %v14706_v56  ;;  %v14769_v56 = vld [vmem:[%s21373_s1 + $0x558] ss:$48 sps:$4 sm:$0xff]  }
  0xc0   : > { %2800 = vmatpush2.bf16.msra.mxu1 %v14709_v57  ;;  %2760 = vmatprep.subr.bf16.mxu0 %v14714_v58  ;;  %v14774_v57 = vld [vmem:[%s21373_s1 + $0x4fc] ss:$48 sps:$4 sm:$0xff]   ;;  %v14880_v58 = vld [vmem:[%s21373_s1 + $0xb58] ss:$48 sps:$4 sm:$0xff]  }
  0xc1   : > { %2801 = vmatprep.subr.bf16.mxu1 %v14717_v59  ;;  %v14888_v59 = vld [vmem:[%s21373_s1 + $0xafc] ss:$48 sps:$4 sm:$0xff]  }
  0xc3   : > { %2761 = vmatpush2.bf16.msra.mxu0 %v14712_v60  ;;  %v14772_v60 = vld [vmem:[%s21373_s1 + $0x4f8] ss:$48 sps:$4 sm:$0xff]  }
  0xc4   : > { %2802 = vmatpush2.bf16.msra.mxu1 %v14715_v61  ;;  %2762 = vmatprep.subr.bf16.mxu0 %v14720_v62  ;;  %v14777_v61 = vld [vmem:[%s21373_s1 + $0x49c] ss:$48 sps:$4 sm:$0xff]   ;;  %v14886_v62 = vld [vmem:[%s21373_s1 + $0xaf8] ss:$48 sps:$4 sm:$0xff]  }
  0xc5   : > { %2803 = vmatprep.subr.bf16.mxu1 %v14723_v63  ;;  %v14894_v63 = vld [vmem:[%s21373_s1 + $0xa9c] ss:$48 sps:$4 sm:$0xff]  }
  0xc7   : > { %2763 = vmatpush2.bf16.msra.mxu0 %v14718_v0  ;;  %v14775_v0 = vld [vmem:[%s21373_s1 + $0x498] ss:$48 sps:$4 sm:$0xff]  }
  0xc8   : > { %2804 = vmatpush2.bf16.msra.mxu1 %v14721_v1  ;;  %2764 = vmatprep.subr.bf16.mxu0 %v14726_v2  ;;  %v14780_v1 = vld [vmem:[%s21373_s1 + $0x43c] ss:$48 sps:$4 sm:$0xff]   ;;  %v14892_v2 = vld [vmem:[%s21373_s1 + $0xa98] ss:$48 sps:$4 sm:$0xff]  }
  0xc9   : > { %2805 = vmatprep.subr.bf16.mxu1 %v14729_v3  ;;  %v14900_v3 = vld [vmem:[%s21373_s1 + $0xa3c] ss:$48 sps:$4 sm:$0xff]  }
  0xcb   : > { %2765 = vmatpush2.bf16.msra.mxu0 %v14724_v4  ;;  %v14778_v4 = vld [vmem:[%s21373_s1 + $0x438] ss:$48 sps:$4 sm:$0xff]  }
  0xcc   : > { %2806 = vmatpush2.bf16.msra.mxu1 %v14727_v5  ;;  %2766 = vmatprep.subr.bf16.mxu0 %v14732_v6  ;;  %v14783_v5 = vld [vmem:[%s21373_s1 + $0x3dc] ss:$48 sps:$4 sm:$0xff]   ;;  %v14898_v6 = vld [vmem:[%s21373_s1 + $0xa38] ss:$48 sps:$4 sm:$0xff]  }
  0xcd   : > { %2807 = vmatprep.subr.bf16.mxu1 %v14735_v7  ;;  %v14906_v7 = vld [vmem:[%s21373_s1 + $0x9dc] ss:$48 sps:$4 sm:$0xff]  }
  0xcf   : > { %2767 = vmatpush2.bf16.msra.mxu0 %v14730_v10  ;;  %v14781_v10 = vld [vmem:[%s21373_s1 + $0x3d8] ss:$48 sps:$4 sm:$0xff]  }
  0xd0   : > { %2808 = vmatpush2.bf16.msra.mxu1 %v14733_v11  ;;  %2768 = vmatprep.subr.bf16.mxu0 %v14738_v12  ;;  %v14786_v11 = vld [vmem:[%s21373_s1 + $0x37c] ss:$48 sps:$4 sm:$0xff]   ;;  %v14904_v12 = vld [vmem:[%s21373_s1 + $0x9d8] ss:$48 sps:$4 sm:$0xff]  }
  0xd1   : > { %2809 = vmatprep.subr.bf16.mxu1 %v14741_v13  ;;  %v14912_v13 = vld [vmem:[%s21373_s1 + $0x97c] ss:$48 sps:$4 sm:$0xff]  }
  0xd3   : > { %2769 = vmatpush2.bf16.msra.mxu0 %v14736_v14  ;;  %v14784_v14 = vld [vmem:[%s21373_s1 + $0x378] ss:$48 sps:$4 sm:$0xff]  }
  0xd4   : > { %2810 = vmatpush2.bf16.msra.mxu1 %v14739_v15  ;;  %2820 = vmatprep.subr.bf16.mxu0 %v14744_v16  ;;  %v14789_v15 = vld [vmem:[%s21373_s1 + $0x31c] ss:$48 sps:$4 sm:$0xff]   ;;  %v14910_v16 = vld [vmem:[%s21373_s1 + $0x978] ss:$48 sps:$4 sm:$0xff]  }
  0xd5   : > { %2861 = vmatprep.subr.bf16.mxu1 %v14828_v17  ;;  %v14918_v17 = vld [vmem:[%s21373_s1 + $0x91c] ss:$48 sps:$4 sm:$0xff]  }
  0xd6   : > { %2771 = vmatmul.mubr.bf16.vlgmr.msra.gmra.mxu0 %v16431_v8 }
  0xd7   : > { %2812 = vmatmul.mubr.bf16.vlgmr.msra.gmra.mxu1 %v16433_v9  ;;  %2821 = vmatpush1.bf16.msra.mxu0 %v14742_v18  ;;  %v14787_v18 = vld [vmem:[%s21373_s1 + $0x318] ss:$48 sps:$4 sm:$0xff]  }
  0xd8   : > { %2852 = vmatprep.mubr.bf16.mxu0 %v16368_v49  ;;  %2822 = vmatprep.subr.bf16.mxu0 %v14747_v19  ;;  %v14792_v19 = vld [vmem:[%s21373_s1 + $0x2c4] ss:$48 sps:$4 sm:$0xff]  }
  0xd9   : > { %2862 = vmatpush1.bf16.msra.mxu1 %v14826_v20  ;;  %2893 = vmatprep.mubr.bf16.mxu1 %v16374_v52  ;;  %v14916_v20 = vld [vmem:[%s21373_s1 + $0x918] ss:$48 sps:$4 sm:$0xff]  }
  0xda   : > { %2863 = vmatprep.subr.bf16.mxu1 %v14834_v21  ;;  %v14924_v21 = vld [vmem:[%s21373_s1 + $0x8c4] ss:$48 sps:$4 sm:$0xff]  }
  0xdb   : > { %2823 = vmatpush1.bf16.msra.mxu0 %v14745_v22  ;;  %v14790_v22 = vld [vmem:[%s21373_s1 + $0x2c0] ss:$48 sps:$4 sm:$0xff]  }
  0xdc   : > { %2824 = vmatprep.subr.bf16.mxu0 %v14750_v23  ;;  %v14795_v23 = vld [vmem:[%s21373_s1 + $0x264] ss:$48 sps:$4 sm:$0xff]  }
  0xdd   : > { %2864 = vmatpush1.bf16.msra.mxu1 %v14832_v24  ;;  %v14922_v24 = vld [vmem:[%s21373_s1 + $0x8c0] ss:$48 sps:$4 sm:$0xff]  }
  0xde   : > { %2865 = vmatprep.subr.bf16.mxu1 %v14840_v25  ;;  %v14930_v25 = vld [vmem:[%s21373_s1 + $0x864] ss:$48 sps:$4 sm:$0xff]  }
  0xdf   : > { %2825 = vmatpush1.bf16.msra.mxu0 %v14748_v26 }
  0xe0   : > { %2826 = vmatprep.subr.bf16.mxu0 %v14753_v27 }
  0xe1   : > { %2866 = vmatpush1.bf16.msra.mxu1 %v14838_v28 }
  0xe2   : > { %2867 = vmatprep.subr.bf16.mxu1 %v14846_v29  ;;  %v14793_v29 = vld [vmem:[%s21373_s1 + $0x260] ss:$48 sps:$4 sm:$0xff]  }
  0xe3   : > { %2827 = vmatpush1.bf16.msra.mxu0 %v14751_v30 }
  0xe4   : > { %2828 = vmatprep.subr.bf16.mxu0 %v14756_v31 }
  0xe5   : > { %2868 = vmatpush1.bf16.msra.mxu1 %v14844_v32  ;;  %v14798_v32 = vld [vmem:[%s21373_s1 + $0x204] ss:$48 sps:$4 sm:$0xff]  }
  0xe6   : > { %2869 = vmatprep.subr.bf16.mxu1 %v14852_v33  ;;  %v14928_v33 = vld [vmem:[%s21373_s1 + $0x860] ss:$48 sps:$4 sm:$0xff]  }
  0xe7   : > { %2829 = vmatpush1.bf16.msra.mxu0 %v14754_v34 }
  0xe8   : > { %2830 = vmatprep.subr.bf16.mxu0 %v14759_v35  ;;  %v14936_v35 = vld [vmem:[%s21373_s1 + $0x804] ss:$48 sps:$4 sm:$0xff]  }
  0xe9   : > { %2870 = vmatpush1.bf16.msra.mxu1 %v14850_v36 }
  0xea   : > { %2871 = vmatprep.subr.bf16.mxu1 %v14858_v37 }
  0xeb   : > { %2831 = vmatpush1.bf16.msra.mxu0 %v14757_v38 }
  0xec   : > { %2832 = vmatprep.subr.bf16.mxu0 %v14762_v39  ;;  %v14796_v39 = vld [vmem:[%s21373_s1 + $0x200] ss:$48 sps:$4 sm:$0xff]  }
  0xed   : > { %2872 = vmatpush1.bf16.msra.mxu1 %v14856_v40 }
  0xee   : > { %2873 = vmatprep.subr.bf16.mxu1 %v14864_v41 }
  0xef   : > { %2833 = vmatpush1.bf16.msra.mxu0 %v14760_v42  ;;  %v14801_v42 = vld [vmem:[%s21373_s1 + $0x1a4] ss:$48 sps:$4 sm:$0xff]  }
  0xf0   : > { %2834 = vmatprep.subr.bf16.mxu0 %v14765_v43  ;;  %v14799_v43 = vld [vmem:[%s21373_s1 + $0x1a0] ss:$48 sps:$4 sm:$0xff]  }
  0xf1   : > { %2874 = vmatpush1.bf16.msra.mxu1 %v14862_v44  ;;  %v14934_v44 = vld [vmem:[%s21373_s1 + $0x800] ss:$48 sps:$4 sm:$0xff]  }
  0xf2   : > { %2875 = vmatprep.subr.bf16.mxu1 %v14870_v45  ;;  %v14804_v45 = vld [vmem:[%s21373_s1 + $0x144] ss:$48 sps:$4 sm:$0xff]  }
  0xf3   : > { %2835 = vmatpush1.bf16.msra.mxu0 %v14763_v46  ;;  %v14942_v46 = vld [vmem:[%s21373_s1 + $0x7a4] ss:$48 sps:$4 sm:$0xff]  }
  0xf4   : > { %2836 = vmatprep.subr.bf16.mxu0 %v14768_v47  ;;  %v14940_v47 = vld [vmem:[%s21373_s1 + $0x7a0] ss:$48 sps:$4 sm:$0xff]  }
  0xf5   : > { %2876 = vmatpush1.bf16.msra.mxu1 %v14868_v48  ;;  %v14948_v48 = vld [vmem:[%s21373_s1 + $0x744] ss:$48 sps:$4 sm:$0xff]  }
  0xf6   : > { %2877 = vmatprep.subr.bf16.mxu1 %v14876_v50  ;;  %v14802_v50 = vld [vmem:[%s21373_s1 + $0x140] ss:$48 sps:$4 sm:$0xff]  }
  0xf7   : > { %2837 = vmatpush2.bf16.msra.mxu0 %v14766_v51  ;;  %v14807_v51 = vld [vmem:[%s21373_s1 + $0xe4] ss:$48 sps:$4 sm:$0xff]  }
  0xf8   : > { %2838 = vmatprep.subr.bf16.mxu0 %v14771_v53  ;;  %v14805_v53 = vld [vmem:[%s21373_s1 + $0xe0] ss:$48 sps:$4 sm:$0xff]  }
  0xf9   : > { %2878 = vmatpush2.bf16.msra.mxu1 %v14874_v54  ;;  %v14946_v54 = vld [vmem:[%s21373_s1 + $0x740] ss:$48 sps:$4 sm:$0xff]  }
  0xfa   : > { %2879 = vmatprep.subr.bf16.mxu1 %v14882_v55  ;;  %v14951_v55 = vld [vmem:[%s21373_s1 + $0x6e4] ss:$48 sps:$4 sm:$0xff]  }
  0xfb   : > { %2839 = vmatpush2.bf16.msra.mxu0 %v14769_v56  ;;  %v14810_v56 = vld [vmem:[%s21373_s1 + $0x84] ss:$48 sps:$4 sm:$0xff]  }
  0xfc   : > { %2840 = vmatprep.subr.bf16.mxu0 %v14774_v57  ;;  %v14949_v57 = vld [vmem:[%s21373_s1 + $0x6e0] ss:$48 sps:$4 sm:$0xff]  }
  0xfd   : > { %2880 = vmatpush2.bf16.msra.mxu1 %v14880_v58  ;;  %v14808_v58 = vld [vmem:[%s21373_s1 + $0x80] ss:$48 sps:$4 sm:$0xff]  }
  0xfe   : > { %2881 = vmatprep.subr.bf16.mxu1 %v14888_v59  ;;  %v14954_v59 = vld [vmem:[%s21373_s1 + $0x684] ss:$48 sps:$4 sm:$0xff]  }
  0xff   : > { %2841 = vmatpush2.bf16.msra.mxu0 %v14772_v60  ;;  %v14813_v60 = vld [vmem:[%s21373_s1 + $0x24] ss:$48 sps:$4 sm:$0xff]  }
 0x100   : > { %2842 = vmatprep.subr.bf16.mxu0 %v14777_v61  ;;  %v14952_v61 = vld [vmem:[%s21373_s1 + $0x680] ss:$48 sps:$4 sm:$0xff]  }
 0x101   : > { %2882 = vmatpush2.bf16.msra.mxu1 %v14886_v62  ;;  %v14957_v62 = vld [vmem:[%s21373_s1 + $0x624] ss:$48 sps:$4 sm:$0xff]  }
 0x102   : > { %2883 = vmatprep.subr.bf16.mxu1 %v14894_v63  ;;  %v14811_v63 = vld [vmem:[%s21373_s1 + $0x20] ss:$48 sps:$4 sm:$0xff]  }
 0x103   : > { %2843 = vmatpush2.bf16.msra.mxu0 %v14775_v0  ;;  %v14816_v0 = vld [vmem:[%s21373_s1 + $0x5c4] ss:$48 sps:$4 sm:$0xff]  }
 0x104   : > { %2844 = vmatprep.subr.bf16.mxu0 %v14780_v1  ;;  %v14955_v1 = vld [vmem:[%s21373_s1 + $0x620] ss:$48 sps:$4 sm:$0xff]  }
 0x105   : > { %2884 = vmatpush2.bf16.msra.mxu1 %v14892_v2  ;;  %v14960_v2 = vld [vmem:[%s21373_s1 + $0xbc4] ss:$48 sps:$4 sm:$0xff]  }
 0x106   : > { %2885 = vmatprep.subr.bf16.mxu1 %v14900_v3  ;;  %v14814_v3 = vld [vmem:[%s21373_s1 + $0x5c0] ss:$48 sps:$4 sm:$0xff]  }
 0x107   : > { %2845 = vmatpush2.bf16.msra.mxu0 %v14778_v4  ;;  %v14819_v4 = vld [vmem:[%s21373_s1 + $0x564] ss:$48 sps:$4 sm:$0xff]  }
 0x108   : > { %2846 = vmatprep.subr.bf16.mxu0 %v14783_v5  ;;  %v14958_v5 = vld [vmem:[%s21373_s1 + $0xbc0] ss:$48 sps:$4 sm:$0xff]  }
 0x109   : > { %2886 = vmatpush2.bf16.msra.mxu1 %v14898_v6  ;;  %v14963_v6 = vld [vmem:[%s21373_s1 + $0xb64] ss:$48 sps:$4 sm:$0xff]  }
 0x10a   : > { %2887 = vmatprep.subr.bf16.mxu1 %v14906_v7  ;;  %v14817_v7 = vld [vmem:[%s21373_s1 + $0x560] ss:$48 sps:$4 sm:$0xff]  }
 0x10b   : > { %2847 = vmatpush2.bf16.msra.mxu0 %v14781_v10  ;;  %v14822_v10 = vld [vmem:[%s21373_s1 + $0x504] ss:$48 sps:$4 sm:$0xff]  }
 0x10c   : > { %2848 = vmatprep.subr.bf16.mxu0 %v14786_v11  ;;  %v14961_v11 = vld [vmem:[%s21373_s1 + $0xb60] ss:$48 sps:$4 sm:$0xff]  }
 0x10d   : > { %2888 = vmatpush2.bf16.msra.mxu1 %v14904_v12  ;;  %v14966_v12 = vld [vmem:[%s21373_s1 + $0xb04] ss:$48 sps:$4 sm:$0xff]  }
 0x10e   : > { %2889 = vmatprep.subr.bf16.mxu1 %v14912_v13  ;;  %v14820_v13 = vld [vmem:[%s21373_s1 + $0x500] ss:$48 sps:$4 sm:$0xff]  }
 0x10f   : > { %2849 = vmatpush2.bf16.msra.mxu0 %v14784_v14  ;;  %v14825_v14 = vld [vmem:[%s21373_s1 + $0x4a4] ss:$48 sps:$4 sm:$0xff]  }
 0x110   : > { %2850 = vmatprep.subr.bf16.mxu0 %v14789_v15  ;;  %v14964_v15 = vld [vmem:[%s21373_s1 + $0xb00] ss:$48 sps:$4 sm:$0xff]  }
 0x111   : > { %2890 = vmatpush2.bf16.msra.mxu1 %v14910_v16  ;;  %v14823_v16 = vld [vmem:[%s21373_s1 + $0x4a0] ss:$48 sps:$4 sm:$0xff]  }
 0x112   : > { %2891 = vmatprep.subr.bf16.mxu1 %v14918_v17  ;;  %v14969_v17 = vld [vmem:[%s21373_s1 + $0xaa4] ss:$48 sps:$4 sm:$0xff]  }
 0x113   : > { %2851 = vmatpush2.bf16.msra.mxu0 %v14787_v18  ;;  %v14831_v18 = vld [vmem:[%s21373_s1 + $0x444] ss:$48 sps:$4 sm:$0xff]  }
 0x114   : > { %2902 = vmatprep.subr.bf16.mxu0 %v14792_v19  ;;  %v14967_v19 = vld [vmem:[%s21373_s1 + $0xaa0] ss:$48 sps:$4 sm:$0xff]  }
 0x115   : > { %2892 = vmatpush2.bf16.msra.mxu1 %v14916_v20  ;;  %v14972_v20 = vld [vmem:[%s21373_s1 + $0xa44] ss:$48 sps:$4 sm:$0xff]  }
 0x116   : > { %2943 = vmatprep.subr.bf16.mxu1 %v14924_v21  ;;  %v2608_v26 = vpop.f32.mrf.mxu0  ;;  %2853 = vmatmul.mubr.bf16.vlgmr.msra.gmra.mxu0 %v16431_v8  ;;  %v14829_v21 = vld [vmem:[%s21373_s1 + $0x440] ss:$48 sps:$4 sm:$0xff]  }
 0x117   : > { %v2649_v27 = vpop.f32.mrf.mxu1  ;;  %2903 = vmatpush1.bf16.msra.mxu0 %v14790_v22  ;;  %2934 = vmatprep.mubr.bf16.mxu0 %v16368_v49  ;;  %v14837_v22 = vld [vmem:[%s21373_s1 + $0x3e4] ss:$48 sps:$4 sm:$0xff]  }
 0x118   : > { %v2650_v28 = vadd.f32 %v2649_v27, %v2608_v26  ;;  %v2610_v30 = vpop.f32.mrf.mxu0  ;;  %2904 = vmatprep.subr.bf16.mxu0 %v14795_v23  ;;  %2894 = vmatmul.mubr.bf16.vlgmr.msra.gmra.mxu1 %v16433_v9  ;;  %v14970_v23 = vld [vmem:[%s21373_s1 + $0xa40] ss:$48 sps:$4 sm:$0xff]   ;;  %v14843_v26 = vld [vmem:[%s21373_s1 + $0x384] ss:$48 sps:$4 sm:$0xff]  }
 0x119   : > { %v2651_v31 = vpop.f32.mrf.mxu1  ;;  %2944 = vmatpush1.bf16.msra.mxu1 %v14922_v24  ;;  %2975 = vmatprep.mubr.bf16.mxu1 %v16374_v52  ;;  %v14975_v24 = vld [vmem:[%s21373_s1 + $0x9e4] ss:$48 sps:$4 sm:$0xff]   ;;  %v14973_v27 = vld [vmem:[%s21373_s1 + $0x9e0] ss:$48 sps:$4 sm:$0xff]  }
 0x11a   : > { %v2652_v34 = vadd.f32 %v2651_v31, %v2610_v30  ;;  %v2612_v36 = vpop.f32.mrf.mxu0  ;;  %2945 = vmatprep.subr.bf16.mxu1 %v14930_v25  ;;  %v14835_v25 = vld [vmem:[%s21373_s1 + $0x3e0] ss:$48 sps:$4 sm:$0xff]   ;;  %v14849_v30 = vld [vmem:[%s21373_s1 + $0x324] ss:$48 sps:$4 sm:$0xff]  }
 0x11b   : > { %v2653_v37 = vpop.f32.mrf.mxu1  ;;  %2905 = vmatpush1.bf16.msra.mxu0 %v14793_v29  ;;  %v14841_v29 = vld [vmem:[%s21373_s1 + $0x380] ss:$48 sps:$4 sm:$0xff]   ;;  %v14984_v36 = vld [vmem:[%s21373_s1 + $0x8cc] ss:$48 sps:$4 sm:$0xff]  }
 0x11c   : > { %v14259_v38 = vpack.c.bf16 %v2652_v34, %v2650_v28  ;;  %v2613_v40 = vpop.f32.mrf.mxu0  ;;  %2906 = vmatprep.subr.bf16.mxu0 %v14798_v32  ;;  %v14978_v28 = vld [vmem:[%s21373_s1 + $0x984] ss:$48 sps:$4 sm:$0xff]   ;;  %v14976_v31 = vld [vmem:[%s21373_s1 + $0x980] ss:$48 sps:$4 sm:$0xff]   ;;  %v14855_v34 = vld [vmem:[%s21373_s1 + $0x2cc] ss:$48 sps:$4 sm:$0xff]  }
 0x11d   : > { %v2654_v41 = vpop.f32.mrf.mxu1  ;;  %2946 = vmatpush1.bf16.msra.mxu1 %v14928_v33  ;;  %v14981_v32 = vld [vmem:[%s21373_s1 + $0x924] ss:$48 sps:$4 sm:$0xff]   ;;  %v14847_v33 = vld [vmem:[%s21373_s1 + $0x320] ss:$48 sps:$4 sm:$0xff]   ;;  %v14853_v37 = vld [vmem:[%s21373_s1 + $0x2c8] ss:$48 sps:$4 sm:$0xff]  }
 0x11e   : > { %3114 = vst [vmem:[#allocation2] sm:$0xff] %v14259_v38  ;;  %2947 = vmatprep.subr.bf16.mxu1 %v14936_v35  ;;  %v14979_v35 = vld [vmem:[%s21373_s1 + $0x920] ss:$48 sps:$4 sm:$0xff]   ;;  %v14861_v38 = vld [vmem:[%s21373_s1 + $0x26c] ss:$48 sps:$4 sm:$0xff]  }
 0x11f   : > { %2907 = vmatpush1.bf16.msra.mxu0 %v14796_v39  ;;  %v14982_v39 = vld [vmem:[%s21373_s1 + $0x8c8] ss:$48 sps:$4 sm:$0xff]   ;;  %v14987_v40 = vld [vmem:[%s21373_s1 + $0x86c] ss:$48 sps:$4 sm:$0xff]  }
 0x120   : > { %2908 = vmatprep.subr.bf16.mxu0 %v14801_v42  ;;  %v14859_v41 = vld [vmem:[%s21373_s1 + $0x268] ss:$48 sps:$4 sm:$0xff]  }
 0x121   : > { %2948 = vmatpush1.bf16.msra.mxu1 %v14934_v44  ;;  %v14867_v44 = vld [vmem:[%s21373_s1 + $0x20c] ss:$48 sps:$4 sm:$0xff]  }
 0x122   : > { %2949 = vmatprep.subr.bf16.mxu1 %v14942_v46  ;;  %v14985_v46 = vld [vmem:[%s21373_s1 + $0x868] ss:$48 sps:$4 sm:$0xff]  }
 0x123   : > { %2909 = vmatpush1.bf16.msra.mxu0 %v14799_v43 }
 0x124   : > { %2910 = vmatprep.subr.bf16.mxu0 %v14804_v45 }
 0x125   : > { %2950 = vmatpush1.bf16.msra.mxu1 %v14940_v47 }
 0x126   : > { %2951 = vmatprep.subr.bf16.mxu1 %v14948_v48 }
 0x127   : > { %2911 = vmatpush1.bf16.msra.mxu0 %v14802_v50  ;;  %v14990_v50 = vld [vmem:[%s21373_s1 + $0x80c] ss:$48 sps:$4 sm:$0xff]  }
 0x128   : > { %2912 = vmatprep.subr.bf16.mxu0 %v14807_v51 }
 0x129   : > { %2952 = vmatpush1.bf16.msra.mxu1 %v14946_v54 }
 0x12a   : > { %2953 = vmatprep.subr.bf16.mxu1 %v14951_v55  ;;  %v14873_v55 = vld [vmem:[%s21373_s1 + $0x1ac] ss:$48 sps:$4 sm:$0xff]  }
 0x12b   : > { %2913 = vmatpush1.bf16.msra.mxu0 %v14805_v53  ;;  %v14865_v53 = vld [vmem:[%s21373_s1 + $0x208] ss:$48 sps:$4 sm:$0xff]  }
 0x12c   : > { %2914 = vmatprep.subr.bf16.mxu0 %v14810_v56 }
 0x12d   : > { %2954 = vmatpush1.bf16.msra.mxu1 %v14949_v57  ;;  %v14988_v57 = vld [vmem:[%s21373_s1 + $0x808] ss:$48 sps:$4 sm:$0xff]  }
 0x12e   : > { %2955 = vmatprep.subr.bf16.mxu1 %v14954_v59 }
 0x12f   : > { %2915 = vmatpush1.bf16.msra.mxu0 %v14808_v58 }
 0x130   : > { %2916 = vmatprep.subr.bf16.mxu0 %v14813_v60  ;;  %v14871_v60 = vld [vmem:[%s21373_s1 + $0x1a8] ss:$48 sps:$4 sm:$0xff]  }
 0x131   : > { %2956 = vmatpush1.bf16.msra.mxu1 %v14952_v61  ;;  %v14879_v61 = vld [vmem:[%s21373_s1 + $0x14c] ss:$48 sps:$4 sm:$0xff]  }
 0x132   : > { %2957 = vmatprep.subr.bf16.mxu1 %v14957_v62  ;;  %v14991_v62 = vld [vmem:[%s21373_s1 + $0x7a8] ss:$48 sps:$4 sm:$0xff]  }
 0x133   : > { %2917 = vmatpush1.bf16.msra.mxu0 %v14811_v63  ;;  %v14996_v63 = vld [vmem:[%s21373_s1 + $0x74c] ss:$48 sps:$4 sm:$0xff]  }
 0x134   : > { %2918 = vmatprep.subr.bf16.mxu0 %v14816_v0  ;;  %v14877_v0 = vld [vmem:[%s21373_s1 + $0x148] ss:$48 sps:$4 sm:$0xff]  }
 0x135   : > { %2958 = vmatpush1.bf16.msra.mxu1 %v14955_v1  ;;  %v14885_v1 = vld [vmem:[%s21373_s1 + $0xec] ss:$48 sps:$4 sm:$0xff]  }
 0x136   : > { %2959 = vmatprep.subr.bf16.mxu1 %v14960_v2  ;;  %v14994_v2 = vld [vmem:[%s21373_s1 + $0x748] ss:$48 sps:$4 sm:$0xff]  }
 0x137   : > { %2919 = vmatpush2.bf16.msra.mxu0 %v14814_v3  ;;  %v14999_v3 = vld [vmem:[%s21373_s1 + $0x6ec] ss:$48 sps:$4 sm:$0xff]  }
 0x138   : > { %2920 = vmatprep.subr.bf16.mxu0 %v14819_v4  ;;  %v14883_v4 = vld [vmem:[%s21373_s1 + $0xe8] ss:$48 sps:$4 sm:$0xff]  }
 0x139   : > { %2960 = vmatpush2.bf16.msra.mxu1 %v14958_v5  ;;  %v14891_v5 = vld [vmem:[%s21373_s1 + $0x8c] ss:$48 sps:$4 sm:$0xff]  }
 0x13a   : > { %2961 = vmatprep.subr.bf16.mxu1 %v14963_v6  ;;  %v14997_v6 = vld [vmem:[%s21373_s1 + $0x6e8] ss:$48 sps:$4 sm:$0xff]  }
 0x13b   : > { %2921 = vmatpush2.bf16.msra.mxu0 %v14817_v7  ;;  %v15002_v7 = vld [vmem:[%s21373_s1 + $0x68c] ss:$48 sps:$4 sm:$0xff]  }
 0x13c   : > { %2922 = vmatprep.subr.bf16.mxu0 %v14822_v10  ;;  %v14889_v10 = vld [vmem:[%s21373_s1 + $0x88] ss:$48 sps:$4 sm:$0xff]  }
 0x13d   : > { %2962 = vmatpush2.bf16.msra.mxu1 %v14961_v11  ;;  %v14897_v11 = vld [vmem:[%s21373_s1 + $0x2c] ss:$48 sps:$4 sm:$0xff]  }
 0x13e   : > { %2963 = vmatprep.subr.bf16.mxu1 %v14966_v12  ;;  %v15000_v12 = vld [vmem:[%s21373_s1 + $0x688] ss:$48 sps:$4 sm:$0xff]  }
 0x13f   : > { %2923 = vmatpush2.bf16.msra.mxu0 %v14820_v13  ;;  %v15005_v13 = vld [vmem:[%s21373_s1 + $0x62c] ss:$48 sps:$4 sm:$0xff]  }
 0x140   : > { %2924 = vmatprep.subr.bf16.mxu0 %v14825_v14  ;;  %v14895_v14 = vld [vmem:[%s21373_s1 + $0x28] ss:$48 sps:$4 sm:$0xff]  }
 0x141   : > { %2964 = vmatpush2.bf16.msra.mxu1 %v14964_v15  ;;  %v14903_v15 = vld [vmem:[%s21373_s1 + $0x5cc] ss:$48 sps:$4 sm:$0xff]  }
 0x142   : > { %2965 = vmatprep.subr.bf16.mxu1 %v14969_v17  ;;  %v15008_v17 = vld [vmem:[%s21373_s1 + $0xbcc] ss:$48 sps:$4 sm:$0xff]  }
 0x143   : > { %2925 = vmatpush2.bf16.msra.mxu0 %v14823_v16  ;;  %v15003_v16 = vld [vmem:[%s21373_s1 + $0x628] ss:$48 sps:$4 sm:$0xff]  }
 0x144   : > { %2926 = vmatprep.subr.bf16.mxu0 %v14831_v18  ;;  %v14901_v18 = vld [vmem:[%s21373_s1 + $0x5c8] ss:$48 sps:$4 sm:$0xff]  }
 0x145   : > { %2966 = vmatpush2.bf16.msra.mxu1 %v14967_v19  ;;  %v14909_v19 = vld [vmem:[%s21373_s1 + $0x56c] ss:$48 sps:$4 sm:$0xff]  }
 0x146   : > { %2967 = vmatprep.subr.bf16.mxu1 %v14972_v20  ;;  %v15006_v20 = vld [vmem:[%s21373_s1 + $0xbc8] ss:$48 sps:$4 sm:$0xff]  }
 0x147   : > { %2927 = vmatpush2.bf16.msra.mxu0 %v14829_v21  ;;  %v15011_v21 = vld [vmem:[%s21373_s1 + $0xb6c] ss:$48 sps:$4 sm:$0xff]  }
 0x148   : > { %2928 = vmatprep.subr.bf16.mxu0 %v14837_v22  ;;  %v14907_v22 = vld [vmem:[%s21373_s1 + $0x568] ss:$48 sps:$4 sm:$0xff]  }
 0x149   : > { %2968 = vmatpush2.bf16.msra.mxu1 %v14970_v23  ;;  %v14915_v23 = vld [vmem:[%s21373_s1 + $0x50c] ss:$48 sps:$4 sm:$0xff]  }
 0x14a   : > { %2969 = vmatprep.subr.bf16.mxu1 %v14975_v24  ;;  %v15009_v24 = vld [vmem:[%s21373_s1 + $0xb68] ss:$48 sps:$4 sm:$0xff]  }
 0x14b   : > { %2929 = vmatpush2.bf16.msra.mxu0 %v14835_v25  ;;  %v15014_v25 = vld [vmem:[%s21373_s1 + $0xb0c] ss:$48 sps:$4 sm:$0xff]  }
 0x14c   : > { %2930 = vmatprep.subr.bf16.mxu0 %v14843_v26  ;;  %v14913_v26 = vld [vmem:[%s21373_s1 + $0x508] ss:$48 sps:$4 sm:$0xff]  }
 0x14d   : > { %2970 = vmatpush2.bf16.msra.mxu1 %v14973_v27  ;;  %v14921_v27 = vld [vmem:[%s21373_s1 + $0x4ac] ss:$48 sps:$4 sm:$0xff]  }
 0x14e   : > { %2971 = vmatprep.subr.bf16.mxu1 %v14978_v28  ;;  %v15012_v28 = vld [vmem:[%s21373_s1 + $0xb08] ss:$48 sps:$4 sm:$0xff]  }
 0x14f   : > { %2931 = vmatpush2.bf16.msra.mxu0 %v14841_v29  ;;  %v15017_v29 = vld [vmem:[%s21373_s1 + $0xaac] ss:$48 sps:$4 sm:$0xff]  }
 0x150   : > { %2932 = vmatprep.subr.bf16.mxu0 %v14849_v30  ;;  %v14919_v30 = vld [vmem:[%s21373_s1 + $0x4a8] ss:$48 sps:$4 sm:$0xff]  }
 0x151   : > { %2972 = vmatpush2.bf16.msra.mxu1 %v14976_v31  ;;  %v14927_v31 = vld [vmem:[%s21373_s1 + $0x44c] ss:$48 sps:$4 sm:$0xff]  }
 0x152   : > { %2973 = vmatprep.subr.bf16.mxu1 %v14981_v32  ;;  %v15015_v32 = vld [vmem:[%s21373_s1 + $0xaa8] ss:$48 sps:$4 sm:$0xff]  }
 0x153   : > { %2933 = vmatpush2.bf16.msra.mxu0 %v14847_v33  ;;  %v15020_v33 = vld [vmem:[%s21373_s1 + $0xa4c] ss:$48 sps:$4 sm:$0xff]  }
 0x154   : > { %2984 = vmatprep.subr.bf16.mxu0 %v14855_v34  ;;  %v14925_v34 = vld [vmem:[%s21373_s1 + $0x448] ss:$48 sps:$4 sm:$0xff]  }
 0x155   : > { %2974 = vmatpush2.bf16.msra.mxu1 %v14979_v35  ;;  %v14933_v35 = vld [vmem:[%s21373_s1 + $0x3ec] ss:$48 sps:$4 sm:$0xff]  }
 0x156   : > { %v2690_v42 = vpop.f32.mrf.mxu0  ;;  %2935 = vmatmul.mubr.bf16.vlgmr.msra.gmra.mxu0 %v16431_v8  ;;  %3025 = vmatprep.subr.bf16.mxu1 %v14984_v36  ;;  %v15018_v36 = vld [vmem:[%s21373_s1 + $0xa48] ss:$48 sps:$4 sm:$0xff]  }
 0x157   : > { %v2731_v43 = vpop.f32.mrf.mxu1  ;;  %2985 = vmatpush1.bf16.msra.mxu0 %v14853_v37  ;;  %3016 = vmatprep.mubr.bf16.mxu0 %v16368_v49  ;;  %v15023_v37 = vld [vmem:[%s21373_s1 + $0x9ec] ss:$48 sps:$4 sm:$0xff]  }
 0x158   : > { %v2732_v45 = vadd.f32 %v2731_v43, %v2690_v42  ;;  %v2692_v47 = vpop.f32.mrf.mxu0  ;;  %2986 = vmatprep.subr.bf16.mxu0 %v14861_v38  ;;  %2976 = vmatmul.mubr.bf16.vlgmr.msra.gmra.mxu1 %v16433_v9  ;;  %v14931_v38 = vld [vmem:[%s21373_s1 + $0x3e8] ss:$48 sps:$4 sm:$0xff]   ;;  %v14945_v43 = vld [vmem:[%s21373_s1 + $0x32c] ss:$48 sps:$4 sm:$0xff]  }
 0x159   : > { %v2733_v48 = vpop.f32.mrf.mxu1  ;;  %3026 = vmatpush1.bf16.msra.mxu1 %v14982_v39  ;;  %3057 = vmatprep.mubr.bf16.mxu1 %v16374_v52  ;;  %v14993_v52 = vld [vmem:[%s21373_s1 + $0x7ac] ss:$48 sps:$4 sm:$0xff]   ;;  %v14937_v42 = vld [vmem:[%s21373_s1 + $0x388] ss:$48 sps:$4 sm:$0xff]  }
 0x15a   : > { %v2734_v51 = vadd.f32 %v2733_v48, %v2692_v47  ;;  %v2694_v49 = vpop.f32.mrf.mxu0  ;;  %3027 = vmatprep.subr.bf16.mxu1 %v14987_v40  ;;  %v14939_v39 = vld [vmem:[%s21373_s1 + $0x38c] ss:$48 sps:$4 sm:$0xff]   ;;  %v15021_v40 = vld [vmem:[%s21373_s1 + $0x9e8] ss:$48 sps:$4 sm:$0xff]   ;;  %v16126_v48 = vmov 0.0  }
 0x15b   : > { %v2735_v54 = vpop.f32.mrf.mxu1  ;;  %2987 = vmatpush1.bf16.msra.mxu0 %v14859_v41  ;;  %v15026_v41 = vld [vmem:[%s21373_s1 + $0x98c] ss:$48 sps:$4 sm:$0xff]   ;;  %v15027_v47 = vld [vmem:[%s21373_s1 + $0x928] ss:$48 sps:$4 sm:$0xff]  }
 0x15c   : > { %v14260_v56 = vpack.c.bf16 %v2734_v51, %v2732_v45  ;;  %v2695_v58 = vpop.f32.mrf.mxu0  ;;  %2988 = vmatprep.subr.bf16.mxu0 %v14867_v44  ;;  %v15024_v44 = vld [vmem:[%s21373_s1 + $0x988] ss:$48 sps:$4 sm:$0xff]   ;;  %v15029_v45 = vld [vmem:[%s21373_s1 + $0x92c] ss:$48 sps:$4 sm:$0xff]  }
 0x15d   : > { %v2736_v59 = vpop.f32.mrf.mxu1  ;;  %3028 = vmatpush1.bf16.msra.mxu1 %v14985_v46  ;;  %v14943_v46 = vld [vmem:[%s21373_s1 + $0x328] ss:$48 sps:$4 sm:$0xff]  }
 0x15e   : > { %3115 = vst [vmem:[#allocation2 + $0x8] sm:$0xff] %v14260_v56  ;;  %3029 = vmatprep.subr.bf16.mxu1 %v14990_v50 }
 0x15f   : > { %2989 = vmatpush1.bf16.msra.mxu0 %v14865_v53 }
 0x160   : > { %2990 = vmatprep.subr.bf16.mxu0 %v14873_v55 }
 0x161   : > { %3030 = vmatpush1.bf16.msra.mxu1 %v14988_v57 }
 0x162   : > { %3031 = vmatprep.subr.bf16.mxu1 %v14993_v52 }
 0x163   : > { %2991 = vmatpush1.bf16.msra.mxu0 %v14871_v60 }
 0x164   : > { %2992 = vmatprep.subr.bf16.mxu0 %v14879_v61 }
 0x165   : > { %3032 = vmatpush1.bf16.msra.mxu1 %v14991_v62 }
 0x166   : > { %3033 = vmatprep.subr.bf16.mxu1 %v14996_v63 }
 0x167   : > { %2993 = vmatpush1.bf16.msra.mxu0 %v14877_v0 }
 0x168   : > { %2994 = vmatprep.subr.bf16.mxu0 %v14885_v1 }
 0x169   : > { %3034 = vmatpush1.bf16.msra.mxu1 %v14994_v2 }
 0x16a   : > { %3035 = vmatprep.subr.bf16.mxu1 %v14999_v3 }
 0x16b   : > { %2995 = vmatpush1.bf16.msra.mxu0 %v14883_v4 }
 0x16c   : > { %2996 = vmatprep.subr.bf16.mxu0 %v14891_v5 }
 0x16d   : > { %3036 = vmatpush1.bf16.msra.mxu1 %v14997_v6 }
 0x16e   : > { %3037 = vmatprep.subr.bf16.mxu1 %v15002_v7 }
 0x16f   : > { %2997 = vmatpush1.bf16.msra.mxu0 %v14889_v10 }
 0x170   : > { %2998 = vmatprep.subr.bf16.mxu0 %v14897_v11 }
 0x171   : > { %3038 = vmatpush1.bf16.msra.mxu1 %v15000_v12 }
 0x172   : > { %3039 = vmatprep.subr.bf16.mxu1 %v15005_v13 }
 0x173   : > { %2999 = vmatpush1.bf16.msra.mxu0 %v14895_v14 }
 0x174   : > { %3000 = vmatprep.subr.bf16.mxu0 %v14903_v15 }
 0x175   : > { %3040 = vmatpush1.bf16.msra.mxu1 %v15003_v16 }
 0x176   : > { %3041 = vmatprep.subr.bf16.mxu1 %v15008_v17 }
 0x177   : > { %3001 = vmatpush2.bf16.msra.mxu0 %v14901_v18 }
 0x178   : > { %3002 = vmatprep.subr.bf16.mxu0 %v14909_v19 }
 0x179   : > { %3042 = vmatpush2.bf16.msra.mxu1 %v15006_v20 }
 0x17a   : > { %3043 = vmatprep.subr.bf16.mxu1 %v15011_v21 }
 0x17b   : > { %3003 = vmatpush2.bf16.msra.mxu0 %v14907_v22 }
 0x17c   : > { %3004 = vmatprep.subr.bf16.mxu0 %v14915_v23 }
 0x17d   : > { %3044 = vmatpush2.bf16.msra.mxu1 %v15009_v24 }
 0x17e   : > { %3045 = vmatprep.subr.bf16.mxu1 %v15014_v25 }
 0x17f   : > { %3005 = vmatpush2.bf16.msra.mxu0 %v14913_v26 }
 0x180   : > { %3006 = vmatprep.subr.bf16.mxu0 %v14921_v27 }
 0x181   : > { %3046 = vmatpush2.bf16.msra.mxu1 %v15012_v28 }
 0x182   : > { %3047 = vmatprep.subr.bf16.mxu1 %v15017_v29 }
 0x183   : > { %3007 = vmatpush2.bf16.msra.mxu0 %v14919_v30 }
 0x184   : > { %3008 = vmatprep.subr.bf16.mxu0 %v14927_v31 }
 0x185   : > { %3048 = vmatpush2.bf16.msra.mxu1 %v15015_v32 }
 0x186   : > { %3049 = vmatprep.subr.bf16.mxu1 %v15020_v33 }
 0x187   : > { %3009 = vmatpush2.bf16.msra.mxu0 %v14925_v34 }
 0x188   : > { %3010 = vmatprep.subr.bf16.mxu0 %v14933_v35 }
 0x189   : > { %3050 = vmatpush2.bf16.msra.mxu1 %v15018_v36 }
 0x18a   : > { %3051 = vmatprep.subr.bf16.mxu1 %v15023_v37 }
 0x18b   : > { %3011 = vmatpush2.bf16.msra.mxu0 %v14931_v38 }
 0x18c   : > { %3012 = vmatprep.subr.bf16.mxu0 %v14939_v39 }
 0x18d   : > { %3052 = vmatpush2.bf16.msra.mxu1 %v15021_v40 }
 0x18e   : > { %3053 = vmatprep.subr.bf16.mxu1 %v15026_v41 }
 0x18f   : > { %3013 = vmatpush2.bf16.msra.mxu0 %v14937_v42 }
 0x190   : > { %3014 = vmatprep.subr.bf16.mxu0 %v14945_v43 }
 0x191   : > { %3054 = vmatpush2.bf16.msra.mxu1 %v15024_v44 }
 0x192   : > { %3055 = vmatprep.subr.bf16.mxu1 %v15029_v45 }
 0x193   : > { %3015 = vmatpush2.bf16.msra.mxu0 %v14943_v46 }
 0x194   : > { %14299 = vmatprep.subr.bf16.mxu0 %v16126_v48 }
 0x195   : > { %3056 = vmatpush2.bf16.msra.mxu1 %v15027_v47 }
 0x196   : > { %v2772_v50 = vpop.f32.mrf.mxu0  ;;  %3017 = vmatmul.mubr.bf16.vlgmr.msra.gmra.mxu0 %v16431_v8  ;;  %14305 = vmatprep.subr.bf16.mxu1 %v16126_v48 }
 0x197   : > { %v2813_v51 = vpop.f32.mrf.mxu1  ;;  %14301 = vmatprep.mubr.msk.bf16.mxu0 %vm16127_vm0, %v16126_v48 }
 0x198   : > { %v2774_v53 = vpop.f32.mrf.mxu0  ;;  %3058 = vmatmul.mubr.bf16.vlgmr.msra.gmra.mxu1 %v16433_v9  ;;  %v2814_v54 = vadd.f32 %v2813_v51, %v2772_v50  ;;  %v3120_v9 = vld [vmem:[#allocation2] sm:$0xf] }
 0x199   : > { %v2815_v49 = vpop.f32.mrf.mxu1  ;;  %14307 = vmatprep.mubr.msk.bf16.mxu1 %vm16127_vm0, %v16126_v48 }
 0x19a   : > { %v2816_v55 = vadd.f32 %v2815_v49, %v2774_v53  ;;  %v2776_v56 = vpop.f32.mrf.mxu0  ;;  %v3354_v53 = vld [vmem:[#allocation2 + $0x4] sm:$0xf] }
 0x19b   : > { %v2817_v57 = vpop.f32.mrf.mxu1 }
 0x19c   : > { %v14261_v58 = vpack.c.bf16 %v2816_v55, %v2814_v54  ;;  %v2777_v59 = vpop.f32.mrf.mxu0 }
 0x19d   : > { %v2818_v8 = vpop.f32.mrf.mxu1 }
 0x19e   : > { %3116 = vst [vmem:[#allocation2 + $0x10] sm:$0xff] %v14261_v58 }
 0x1a5   : > { %v3121_v52 = vld [vmem:[#allocation2 + $0x10] sm:$0xf]  ;;  %v3355_v51 = vld [vmem:[#allocation2 + $0x14] sm:$0xf] }
 0x1a6   : > { %3127 = vrot.lane.b32.xlu0 %v3121_v52, %s16128_s20  ;;  %v3137_v60 = vsel %vm3132_vm1, %v3121_v52, 0 }
 0x1a7   : > { %14300 = vmatpush3.bf16.xpose.msra.mxu0 %v3137_v60 }
 0x1a8   : > { %14311 = vmatprep.subr.bf16.mxu0 %v16126_v48 }
 0x1aa   : > { %3124 = vrot.lane.b32.xlu0 %v3120_v9, %s16128_s20 }
 0x1ae   : > { %14302 = vmatmul.mubr.msk.bf16.vlgmr.msra.gmra.mxu0 %vm3132_vm1, %v3120_v9 }
 0x1af   : > { %14313 = vmatprep.mubr.msk.bf16.mxu0 %vm16127_vm0, %v16126_v48 }
 0x1d6   : > { %v2854_v61 = vpop.f32.mrf.mxu0 }
 0x1d8   : > { %v2895_v62 = vpop.f32.mrf.mxu1  ;;  %v2856_v63 = vpop.f32.mrf.mxu0 }
 0x1d9   : > { %v2896_v0 = vadd.f32 %v2895_v62, %v2854_v61 }
 0x1da   : > { %v2897_v1 = vpop.f32.mrf.mxu1  ;;  %v2858_v2 = vpop.f32.mrf.mxu0 }
 0x1db   : > { %v2898_v3 = vadd.f32 %v2897_v1, %v2856_v63 }
 0x1dc   : > { %v2899_v4 = vpop.f32.mrf.mxu1  ;;  %v2859_v5 = vpop.f32.mrf.mxu0 }
 0x1dd   : > { %v14262_v6 = vpack.c.bf16 %v2898_v3, %v2896_v0 }
 0x1de   : > { %v2900_v7 = vpop.f32.mrf.mxu1 }
 0x1df   : > { %3117 = vst [vmem:[#allocation2 + $0x18] sm:$0xff] %v14262_v6 }
 0x1e6   : > { %v17440_v62 = vld [vmem:[#allocation2 + $0x18] sm:$0xf] }
 0x216   : > { %v2936_v10 = vpop.f32.mrf.mxu0 }
 0x218   : > { %v3128_v11 = vpop.permute.xlu0 %3127  ;;  %v2938_v13 = vpop.f32.mrf.mxu0 }
 0x219   : > { %v3183_v12 = vsel %vm3132_vm1, %v3128_v11, 0  ;;  %v2977_v14 = vpop.f32.mrf.mxu1 }
 0x21a   : > { %14306 = vmatpush3.bf16.xpose.msra.mxu1 %v3183_v12  ;;  %v2978_v15 = vadd.f32 %v2977_v14, %v2936_v10  ;;  %v2940_v16 = vpop.f32.mrf.mxu0  ;;  %v3370_v12 = vsel %vm3132_vm1, %v3355_v51, 0 }
 0x21b   : > { %v2979_v17 = vpop.f32.mrf.mxu1  ;;  %14317 = vmatprep.subr.bf16.mxu1 %v16126_v48 }
 0x21c   : > { %v2980_v18 = vadd.f32 %v2979_v17, %v2938_v13  ;;  %v2941_v19 = vpop.f32.mrf.mxu0  ;;  %v3125_v23 = vpop.permute.xlu0 %3124 }
 0x21d   : > { %v2981_v20 = vpop.f32.mrf.mxu1 }
 0x21e   : > { %v14263_v21 = vpack.c.bf16 %v2980_v18, %v2978_v15 }
 0x21f   : > { %v2982_v22 = vpop.f32.mrf.mxu1 }
 0x220   : > { %3118 = vst [vmem:[#allocation2 + $0x20] sm:$0xff] %v14263_v21 }
 0x221   : > { %14308 = vmatmul.mubr.msk.bf16.vlgmr.msra.gmra.mxu1 %vm3132_vm1, %v3125_v23 }
 0x222   : > { %14319 = vmatprep.mubr.msk.bf16.mxu1 %vm16127_vm0, %v16126_v48 }
 0x227   : > { %v3122_v24 = vld [vmem:[#allocation2 + $0x20] sm:$0xf]  ;;  %v3356_v13 = vld [vmem:[#allocation2 + $0x24] sm:$0xf] }
 0x228   : > { %v3259_v25 = vsel %vm3257_vm2, %v3122_v24, 0  ;;  %v3491_v14 = vsel %vm3257_vm2, %v3356_v13, 0 }
 0x229   : > { %14312 = vmatpush3.bf16.msra.mxu0 %v3259_v25 }
 0x22a   : > { %14323 = vmatprep.subr.bf16.mxu0 %v16126_v48 }
 0x256   : > { %v3018_v26 = vpop.f32.mrf.mxu0 }
 0x258   : > { %v3020_v27 = vpop.f32.mrf.mxu0  ;;  %v3059_v28 = vpop.f32.mrf.mxu1 }
 0x259   : > { %v3060_v29 = vadd.f32 %v3059_v28, %v3018_v26 }
 0x25a   : > { %v3022_v30 = vpop.f32.mrf.mxu0  ;;  %v3061_v31 = vpop.f32.mrf.mxu1 }
 0x25b   : > { %v3062_v32 = vadd.f32 %v3061_v31, %v3020_v27 }
 0x25c   : > { %v3023_v33 = vpop.f32.mrf.mxu0  ;;  %v3063_v34 = vpop.f32.mrf.mxu1 }
 0x25d   : > { %v14264_v35 = vpack.c.bf16 %v3062_v32, %v3060_v29 }
 0x25e   : > { %v3064_v36 = vpop.f32.mrf.mxu1 }
 0x25f   : > { %3119 = vst [vmem:[#allocation2 + $0x28] sm:$0xff] %v14264_v35 }
 0x26e   : > { %v3173_v37 = vpop.f32.mrf.mxu0 }
 0x26f   : > { %v3225_v44 = vmul.f32 0.125, %v3173_v37 }
 0x270   : > { %v14303_v38 = vpop.f32.mrf.mxu0 }
 0x271   : > { %v3228_v50 = vsel %vm3227_vm3, %v3225_v44, -inf }
 0x272   : > { %v3176_v39 = vpop.f32.mrf.mxu0 }
 0x274   : > { %v14304_v40 = vpop.f32.mrf.mxu0 }
 0x275   : > { %v3586_v40 = vld [vmem:[#allocation2 + $0x8] sm:$0xf] }
 0x2e1   : > { %v3219_v41 = vpop.f32.mrf.mxu1 }
 0x2e2   : > { %v3226_v42 = vmul.f32 0.125, %v3219_v41 }
 0x2e3   : > { %v14309_v43 = vpop.f32.mrf.mxu1 }
 0x2e4   : > { %v3231_v45 = vsel %vm3227_vm3, %v3226_v42, -inf }
 0x2e5   : > { %3232 = vmax.xlane.f32.xlu1 %v3231_v45  ;;  %v3222_v46 = vpop.f32.mrf.mxu1 }
 0x2e7   : > { %v14310_v47 = vpop.f32.mrf.mxu1 }
 0x2e9   : > { %3229 = vmax.xlane.f32.xlu1 %v3228_v50 }
 0x2fa   : > { %3130 = vrot.lane.b32.xlu1 %v3122_v24, %s16128_s20 }
 0x2fe   : > { %3361 = vrot.lane.b32.xlu1 %v3355_v51, %s16128_s20 }
 0x302   : > { %3358 = vrot.lane.b32.xlu1 %v3354_v53, %s16128_s20 }
 0x36e   : > { %v3233_v49 = vpop.xlane.xlu1 %3232 }
 0x36f   : > { %v3235_v54 = vsub.f32 %v3226_v42, %v3233_v49 }
 0x371   : > { %v3238_v55 = vmul.f32 1.442695, %v3235_v54 }
 0x372   : > { %v3230_v56 = vpop.xlane.xlu1 %3229 }
 0x373   : > { %15994 = vpow2.f32 %v3238_v55  ;;  %v3234_v57 = vsub.f32 %v3225_v44, %v3230_v56 }
 0x375   : > { %v3236_v58 = vmul.f32 1.442695, %v3234_v57 }
 0x376   : > { %v3131_v59 = vpop.permute.xlu1 %3130 }
 0x377   : > { %15996 = vpow2.f32 %v3236_v58  ;;  %v3305_v8 = vsel %vm3257_vm2, %v3131_v59, 0 }
 0x378   : > { %14318 = vmatpush3.bf16.msra.mxu1 %v3305_v8 }
 0x379   : > { %14329 = vmatprep.subr.bf16.mxu1 %v16126_v48 }
 0x37a   : > { %v3362_v63 = vpop.permute.xlu1 %3361 }
 0x37b   : > { %v3416_v7 = vsel %vm3132_vm1, %v3362_v63, 0 }
 0x37e   : > { %v3359_v0 = vpop.permute.xlu1 %3358 }
 0x380   : > { %v15995_v52 = vpop.eup %15994 }
 0x381   : > { %v3243_v60 = vsel %vm3227_vm3, %v15995_v52, 0.0 }
 0x382   : > { %3244 = vadd.xlane.f32.xlu0 %v3243_v60  ;;  %v3588_v60 = vld [vmem:[#allocation2 + $0x28] sm:$0xf] }
 0x384   : > { %v15997_v9 = vpop.eup %15996 }
 0x385   : > { %v3240_v61 = vsel %vm3227_vm3, %v15997_v9, 0.0 }
 0x386   : > { %3241 = vadd.xlane.f32.xlu1 %v3240_v61 }
 0x397   : > { %3593 = vrot.lane.b32.xlu1 %v17440_v62, %s16128_s20 }
 0x40b   : > { %v3245_v1 = vpop.xlane.xlu0 %3244 }
 0x40c   : > { %15998 = vrcp.f32 %v3245_v1 }
 0x40f   : > { %v3242_v2 = vpop.xlane.xlu1 %3241 }
 0x410   : > { %16000 = vrcp.f32 %v3242_v2 }
 0x413   : > { %v3594_v49 = vpop.permute.xlu1 %3593 }
 0x414   : > { %v3648_v55 = vsel %vm3132_vm1, %v3594_v49, 0 }
 0x419   : > { %v15999_v3 = vpop.eup %15998 }
 0x41a   : > { %v3249_v4 = vmul.f32 %v15999_v3, %v15995_v52  ;;  %v3602_v52 = vsel %vm3132_vm1, %v17440_v62, 0 }
 0x41c   : > { %v3253_v5 = vpack.c.bf16 %v3249_v4, %v3249_v4  ;;  %3251 = vst.msk [vmem:[%s17448_s9 + $0x8] sm:$0xff] %vm3227_vm3, %v3249_v4 }
 0x41d   : > { %v16001_v6 = vpop.eup %16000 }
 0x41e   : > { %14320 = vmatmul.mubr.msk.bf16.vlgmr.msra.gmra.mxu1 %vm3227_vm3, %v3253_v5  ;;  %v3247_v10 = vmul.f32 %v16001_v6, %v15997_v9  ;;  %v3723_v9 = vsel %vm3257_vm2, %v3588_v60, 0 }
 0x41f   : > { %14330 = vmatpush3.bf16.xpose.msra.mxu1 %v3416_v7  ;;  %14331 = vmatprep.mubr.msk.bf16.mxu1 %vm16127_vm0, %v16126_v48  ;;  %v3819_v7 = vld [vmem:[#allocation2 + $0x1c] sm:$0xf] }
 0x420   : > { %v3252_v11 = vpack.c.bf16 %v3247_v10, %v3247_v10  ;;  %14341 = vmatprep.subr.bf16.mxu1 %v16126_v48  ;;  %3250 = vst.msk [vmem:[%s17448_s9] sm:$0xff] %vm3227_vm3, %v3247_v10 }
 0x422   : > { %14314 = vmatmul.mubr.msk.bf16.vlgmr.msra.gmra.mxu0 %vm3227_vm3, %v3252_v11 }
 0x423   : > { %14324 = vmatpush3.bf16.xpose.msra.mxu0 %v3370_v12  ;;  %14325 = vmatprep.mubr.msk.bf16.mxu0 %vm16127_vm0, %v16126_v48 }
 0x424   : > { %14335 = vmatprep.subr.bf16.mxu0 %v16126_v48 }
 0x426   : > { %14332 = vmatmul.mubr.msk.bf16.vlgmr.msra.gmra.mxu1 %vm3132_vm1, %v3359_v0 }
 0x427   : > { %14343 = vmatprep.mubr.msk.bf16.mxu1 %vm16127_vm0, %v16126_v48 }
 0x42a   : > { %14326 = vmatmul.mubr.msk.bf16.vlgmr.msra.gmra.mxu0 %vm3132_vm1, %v3354_v53 }
 0x42b   : > { %14336 = vmatpush3.bf16.msra.mxu0 %v3491_v14  ;;  %14337 = vmatprep.mubr.msk.bf16.mxu0 %vm16127_vm0, %v16126_v48 }
 0x42c   : > { %14347 = vmatprep.subr.bf16.mxu0 %v16126_v48 }
 0x4de   : > { %v17472_v15 = vpop.f32.mrf.mxu1 }
 0x4e0   : > { %v14321_v16 = vpop.f32.mrf.mxu1 }
 0x4e2   : > { %v17474_v17 = vpop.f32.mrf.mxu0  ;;  %v3344_v18 = vpop.f32.mrf.mxu1 }
 0x4e4   : > { %v14315_v19 = vpop.f32.mrf.mxu0  ;;  %v14322_v20 = vpop.f32.mrf.mxu1 }
 0x4e6   : > { %v3298_v21 = vpop.f32.mrf.mxu0  ;;  %v3452_v22 = vpop.f32.mrf.mxu1 }
 0x4e7   : > { %v3459_v23 = vmul.f32 0.125, %v3452_v22 }
 0x4e8   : > { %v14316_v24 = vpop.f32.mrf.mxu0  ;;  %v14333_v25 = vpop.f32.mrf.mxu1 }
 0x4e9   : > { %v3463_v26 = vsel %vm3227_vm3, %v3459_v23, -inf }
 0x4ea   : > { %3464 = vmax.xlane.f32.xlu0 %v3463_v26  ;;  %v3406_v27 = vpop.f32.mrf.mxu0  ;;  %v3455_v28 = vpop.f32.mrf.mxu1 }
 0x4eb   : > { %v3458_v29 = vmul.f32 0.125, %v3406_v27  ;;  %v3818_v27 = vld [vmem:[#allocation2 + $0xc] sm:$0xf] }
 0x4ec   : > { %v14327_v30 = vpop.f32.mrf.mxu0  ;;  %v14334_v31 = vpop.f32.mrf.mxu1 }
 0x4ed   : > { %v3460_v32 = vsel %vm3227_vm3, %v3458_v29, -inf }
 0x4ee   : > { %3461 = vmax.xlane.f32.xlu0 %v3460_v32  ;;  %v3409_v33 = vpop.f32.mrf.mxu0 }
 0x4f0   : > { %v14328_v34 = vpop.f32.mrf.mxu0 }
 0x573   : > { %v3465_v35 = vpop.xlane.xlu0 %3464 }
 0x574   : > { %v3467_v36 = vsub.f32 %v3459_v23, %v3465_v35 }
 0x576   : > { %v3470_v37 = vmul.f32 1.442695, %v3467_v36 }
 0x577   : > { %v3462_v41 = vpop.xlane.xlu0 %3461 }
 0x578   : > { %16002 = vpow2.f32 %v3470_v37  ;;  %v3466_v42 = vsub.f32 %v3458_v29, %v3462_v41 }
 0x57a   : > { %v3468_v43 = vmul.f32 1.442695, %v3466_v42 }
 0x57c   : > { %16004 = vpow2.f32 %v3468_v43 }
 0x585   : > { %v16003_v38 = vpop.eup %16002 }
 0x586   : > { %v3475_v39 = vsel %vm3227_vm3, %v16003_v38, 0.0 }
 0x587   : > { %3476 = vadd.xlane.f32.xlu0 %v3475_v39 }
 0x589   : > { %v16005_v44 = vpop.eup %16004 }
 0x58a   : > { %v3472_v45 = vsel %vm3227_vm3, %v16005_v44, 0.0 }
 0x59d   : > { %3364 = vrot.lane.b32.xlu0 %v3356_v13, %s16128_s20 }
 0x5a1   : > { %3590 = vrot.lane.b32.xlu0 %v3586_v40, %s16128_s20 }
 0x5c0   : > { %3473 = vadd.xlane.f32.xlu0 %v3472_v45 }
 0x610   : > { %v3477_v46 = vpop.xlane.xlu0 %3476 }
 0x611   : > { %16006 = vrcp.f32 %v3477_v46  ;;  %v3834_v46 = vsel %vm3132_vm1, %v3819_v7, 0 }
 0x614   : > { %v3365_v47 = vpop.permute.xlu0 %3364 }
 0x615   : > { %v3537_v50 = vsel %vm3257_vm2, %v3365_v47, 0  ;;  %v3820_v47 = vld [vmem:[#allocation2 + $0x2c] sm:$0xf] }
 0x616   : > { %14342 = vmatpush3.bf16.msra.mxu1 %v3537_v50  ;;  %v3955_v50 = vsel %vm3257_vm2, %v3820_v47, 0 }
 0x617   : > { %14353 = vmatprep.subr.bf16.mxu1 %v16126_v48 }
 0x618   : > { %v3591_v56 = vpop.permute.xlu0 %3590 }
 0x61e   : > { %v16007_v51 = vpop.eup %16006 }
 0x61f   : > { %v3481_v53 = vmul.f32 %v16007_v51, %v16003_v38 }
 0x621   : > { %v3486_v54 = vpack.c.bf16 %v3481_v53, %v3481_v53  ;;  %13079 = vst.msk [vmem:[%s17448_s9 + $0x18] sm:$0xff] %vm3227_vm3, %v3481_v53 }
 0x623   : > { %14344 = vmatmul.mubr.msk.bf16.vlgmr.msra.gmra.mxu1 %vm3227_vm3, %v3486_v54 }
 0x624   : > { %14354 = vmatpush3.bf16.xpose.msra.mxu1 %v3648_v55  ;;  %14355 = vmatprep.mubr.msk.bf16.mxu1 %vm16127_vm0, %v16126_v48 }
 0x625   : > { %14365 = vmatprep.subr.bf16.mxu1 %v16126_v48 }
 0x62b   : > { %14356 = vmatmul.mubr.msk.bf16.vlgmr.msra.gmra.mxu1 %vm3132_vm1, %v3591_v56 }
 0x62c   : > { %14367 = vmatprep.mubr.msk.bf16.mxu1 %vm16127_vm0, %v16126_v48 }
 0x649   : > { %v3474_v57 = vpop.xlane.xlu0 %3473 }
 0x64a   : > { %16008 = vrcp.f32 %v3474_v57 }
 0x657   : > { %v16009_v58 = vpop.eup %16008 }
 0x658   : > { %v3479_v59 = vmul.f32 %v16009_v58, %v16005_v44 }
 0x65a   : > { %v3485_v8 = vpack.c.bf16 %v3479_v59, %v3479_v59  ;;  %13078 = vst.msk [vmem:[%s17448_s9 + $0x10] sm:$0xff] %vm3227_vm3, %v3479_v59 }
 0x65c   : > { %14338 = vmatmul.mubr.msk.bf16.vlgmr.msra.gmra.mxu0 %vm3227_vm3, %v3485_v8 }
 0x65d   : > { %14348 = vmatpush3.bf16.xpose.msra.mxu0 %v3602_v52  ;;  %14349 = vmatprep.mubr.msk.bf16.mxu0 %vm16127_vm0, %v16126_v48 }
 0x65e   : > { %14359 = vmatprep.subr.bf16.mxu0 %v16126_v48 }
 0x664   : > { %14350 = vmatmul.mubr.msk.bf16.vlgmr.msra.gmra.mxu0 %vm3132_vm1, %v3586_v40 }
 0x665   : > { %14360 = vmatpush3.bf16.msra.mxu0 %v3723_v9  ;;  %14361 = vmatprep.mubr.msk.bf16.mxu0 %vm16127_vm0, %v16126_v48 }
 0x666   : > { %14371 = vmatprep.subr.bf16.mxu0 %v16126_v48 }
 0x6e3   : > { %v17507_v61 = vpop.f32.mrf.mxu1 }
 0x6e5   : > { %v14345_v62 = vpop.f32.mrf.mxu1 }
 0x6e7   : > { %v3576_v63 = vpop.f32.mrf.mxu1 }
 0x6e9   : > { %v14346_v0 = vpop.f32.mrf.mxu1 }
 0x6eb   : > { %v3684_v1 = vpop.f32.mrf.mxu1 }
 0x6ec   : > { %v3691_v2 = vmul.f32 0.125, %v3684_v1 }
 0x6ed   : > { %v14357_v3 = vpop.f32.mrf.mxu1 }
 0x6ee   : > { %v3695_v4 = vsel %vm3227_vm3, %v3691_v2, -inf }
 0x6ef   : > { %3696 = vmax.xlane.f32.xlu1 %v3695_v4  ;;  %v3687_v5 = vpop.f32.mrf.mxu1 }
 0x6f1   : > { %v14358_v6 = vpop.f32.mrf.mxu1 }
 0x700   : > { %3825 = vrot.lane.b32.xlu1 %v3819_v7, %s16128_s20 }
 0x71c   : > { %v17511_v10 = vpop.f32.mrf.mxu0 }
 0x71e   : > { %v14339_v11 = vpop.f32.mrf.mxu0 }
 0x720   : > { %v3530_v12 = vpop.f32.mrf.mxu0 }
 0x722   : > { %v14340_v13 = vpop.f32.mrf.mxu0 }
 0x724   : > { %v3638_v14 = vpop.f32.mrf.mxu0 }
 0x725   : > { %v3690_v16 = vmul.f32 0.125, %v3638_v14 }
 0x726   : > { %v14351_v18 = vpop.f32.mrf.mxu0 }
 0x727   : > { %v3692_v19 = vsel %vm3227_vm3, %v3690_v16, -inf }
 0x728   : > { %3693 = vmax.xlane.f32.xlu0 %v3692_v19  ;;  %v3641_v20 = vpop.f32.mrf.mxu0 }
 0x72a   : > { %v14352_v21 = vpop.f32.mrf.mxu0 }
 0x72b   : > { %v14444_v21 = vpack.i.bf16 %v17507_v61, %v17472_v15 }
 0x778   : > { %v3697_v22 = vpop.xlane.xlu1 %3696 }
 0x779   : > { %v3699_v23 = vsub.f32 %v3691_v2, %v3697_v22  ;;  %v15032_v22 = vld [vmem:[%s21374_s2 + $0xe4] ss:$16 sps:$4 sm:$0xff]  }
 0x77b   : > { %v3702_v24 = vmul.f32 1.442695, %v3699_v23 }
 0x77c   : > { %v3826_v38 = vpop.permute.xlu1 %3825 }
 0x77d   : > { %16010 = vpow2.f32 %v3702_v24  ;;  %v3880_v40 = vsel %vm3132_vm1, %v3826_v38, 0  ;;  %v15035_v38 = vld [vmem:[%s21374_s2 + $0xc0] ss:$16 sps:$4 sm:$0xff]  }
 0x78a   : > { %v16011_v25 = vpop.eup %16010 }
 0x78b   : > { %v3707_v26 = vsel %vm3227_vm3, %v16011_v25, 0.0 }
 0x78c   : > { %3708 = vadd.xlane.f32.xlu0 %v3707_v26 }
 0x7a2   : > { %3596 = vrot.lane.b32.xlu0 %v3588_v60, %s16128_s20 }
 0x7a6   : > { %3822 = vrot.lane.b32.xlu0 %v3818_v27, %s16128_s20 }
 0x7b1   : > { %v3694_v28 = vpop.xlane.xlu0 %3693 }
 0x7b2   : > { %v3698_v29 = vsub.f32 %v3690_v16, %v3694_v28 }
 0x7b4   : > { %v3700_v30 = vmul.f32 1.442695, %v3698_v29 }
 0x7b6   : > { %16012 = vpow2.f32 %v3700_v30 }
 0x7c3   : > { %v16013_v31 = vpop.eup %16012 }
 0x7c4   : > { %v3704_v32 = vsel %vm3227_vm3, %v16013_v31, 0.0 }
 0x7c5   : > { %3705 = vadd.xlane.f32.xlu1 %v3704_v32 }
 0x815   : > { %v3709_v33 = vpop.xlane.xlu0 %3708 }
 0x816   : > { %16014 = vrcp.f32 %v3709_v33 }
 0x819   : > { %v3597_v34 = vpop.permute.xlu0 %3596 }
 0x81a   : > { %v3769_v35 = vsel %vm3257_vm2, %v3597_v34, 0 }
 0x81b   : > { %14366 = vmatpush3.bf16.msra.mxu1 %v3769_v35  ;;  %v15030_v35 = vld [vmem:[%s21374_s2 + $0xe0] ss:$16 sps:$4 sm:$0xff]  }
 0x81c   : > { %14377 = vmatprep.subr.bf16.mxu1 %v16126_v48 }
 0x81d   : > { %v3823_v41 = vpop.permute.xlu0 %3822 }
 0x823   : > { %v16015_v36 = vpop.eup %16014 }
 0x824   : > { %v3713_v37 = vmul.f32 %v16015_v36, %v16011_v25 }
 0x826   : > { %v3718_v39 = vpack.c.bf16 %v3713_v37, %v3713_v37  ;;  %13085 = vst.msk [vmem:[%s17448_s9 + $0x28] sm:$0xff] %vm3227_vm3, %v3713_v37 }
 0x828   : > { %14368 = vmatmul.mubr.msk.bf16.vlgmr.msra.gmra.mxu1 %vm3227_vm3, %v3718_v39  ;;  %v15040_v39 = vld [vmem:[%s21374_s2 + $0xa4] ss:$16 sps:$4 sm:$0xff]  }
 0x829   : > { %14378 = vmatpush3.bf16.xpose.msra.mxu1 %v3880_v40  ;;  %14379 = vmatprep.mubr.msk.bf16.mxu1 %vm16127_vm0, %v16126_v48  ;;  %v15038_v40 = vld [vmem:[%s21374_s2 + $0xa0] ss:$16 sps:$4 sm:$0xff]  }
 0x82a   : > { %14389 = vmatprep.subr.bf16.mxu1 %v16126_v48 }
 0x830   : > { %14380 = vmatmul.mubr.msk.bf16.vlgmr.msra.gmra.mxu1 %vm3132_vm1, %v3823_v41  ;;  %v15043_v41 = vld [vmem:[%s21374_s2 + $0x84] ss:$16 sps:$4 sm:$0xff]  }
 0x831   : > { %14391 = vmatprep.mubr.msk.bf16.mxu1 %vm16127_vm0, %v16126_v48 }
 0x84e   : > { %v3706_v42 = vpop.xlane.xlu1 %3705 }
 0x84f   : > { %16016 = vrcp.f32 %v3706_v42  ;;  %v15041_v42 = vld [vmem:[%s21374_s2 + $0x80] ss:$16 sps:$4 sm:$0xff]  }
 0x85c   : > { %v16017_v43 = vpop.eup %16016 }
 0x85d   : > { %v3711_v44 = vmul.f32 %v16017_v43, %v16013_v31  ;;  %v15046_v43 = vld [vmem:[%s21374_s2 + $0x64] ss:$16 sps:$4 sm:$0xff]  }
 0x85f   : > { %v3717_v45 = vpack.c.bf16 %v3711_v44, %v3711_v44  ;;  %13084 = vst.msk [vmem:[%s17448_s9 + $0x20] sm:$0xff] %vm3227_vm3, %v3711_v44  ;;  %v15044_v44 = vld [vmem:[%s21374_s2 + $0x60] ss:$16 sps:$4 sm:$0xff]  }
 0x861   : > { %14362 = vmatmul.mubr.msk.bf16.vlgmr.msra.gmra.mxu0 %vm3227_vm3, %v3717_v45  ;;  %v15049_v45 = vld [vmem:[%s21374_s2 + $0x44] ss:$16 sps:$4 sm:$0xff]  }
 0x862   : > { %14372 = vmatpush3.bf16.xpose.msra.mxu0 %v3834_v46  ;;  %14373 = vmatprep.mubr.msk.bf16.mxu0 %vm16127_vm0, %v16126_v48  ;;  %v15047_v46 = vld [vmem:[%s21374_s2 + $0x40] ss:$16 sps:$4 sm:$0xff]  }
 0x863   : > { %14383 = vmatprep.subr.bf16.mxu0 %v16126_v48 }
 0x869   : > { %14374 = vmatmul.mubr.msk.bf16.vlgmr.msra.gmra.mxu0 %vm3132_vm1, %v3818_v27 }
 0x86a   : > { %14384 = vmatpush3.bf16.msra.mxu0 %v3955_v50  ;;  %14385 = vmatprep.mubr.msk.bf16.mxu0 %vm16127_vm0, %v16126_v48  ;;  %v15050_v50 = vld [vmem:[%s21374_s2 + $0x20] ss:$16 sps:$4 sm:$0xff]  }
 0x86b   : > { %4834 = vmatprep.subr.bf16.mxu0 %v15032_v22  ;;  %v15094_v22 = vld [vmem:[%s21374_s2 + $0x6c] ss:$16 sps:$4 sm:$0xff]  }
 0x8e8   : > { %v17541_v51 = vpop.f32.mrf.mxu1 }
 0x8ea   : > { %v14369_v53 = vpop.f32.mrf.mxu1 }
 0x8eb   : > { %v15055_v53 = vld [vmem:[%s21374_s2 + $0x4] ss:$16 sps:$4 sm:$0xff]  }
 0x8ec   : > { %v3808_v49 = vpop.f32.mrf.mxu1 }
 0x8ed   : > { %v15053_v49 = vld [vmem:[%s21374_s2] ss:$16 sps:$4 sm:$0xff]  }
 0x8ee   : > { %v14370_v54 = vpop.f32.mrf.mxu1 }
 0x8ef   : > { %v15058_v54 = vld [vmem:[%s21374_s2 + $0x1e4] ss:$16 sps:$4 sm:$0xff]  }
 0x8f0   : > { %v3916_v55 = vpop.f32.mrf.mxu1 }
 0x8f1   : > { %v3923_v56 = vmul.f32 0.125, %v3916_v55  ;;  %v15056_v55 = vld [vmem:[%s21374_s2 + $0x1e0] ss:$16 sps:$4 sm:$0xff]  }
 0x8f2   : > { %v14381_v57 = vpop.f32.mrf.mxu1 }
 0x8f3   : > { %v3927_v58 = vsel %vm3227_vm3, %v3923_v56, -inf  ;;  %v15059_v57 = vld [vmem:[%s21374_s2 + $0x1c0] ss:$16 sps:$4 sm:$0xff]  }
 0x8f4   : > { %3928 = vmax.xlane.f32.xlu0 %v3927_v58  ;;  %v3919_v59 = vpop.f32.mrf.mxu1  ;;  %v15064_v58 = vld [vmem:[%s21374_s2 + $0x1a4] ss:$16 sps:$4 sm:$0xff]  }
 0x8f5   : > { %v15062_v59 = vld [vmem:[%s21374_s2 + $0x1a0] ss:$16 sps:$4 sm:$0xff]  }
 0x8f6   : > { %v14382_v8 = vpop.f32.mrf.mxu1 }
 0x8f7   : > { %v15067_v8 = vld [vmem:[%s21374_s2 + $0x184] ss:$16 sps:$4 sm:$0xff]  }
 0x921   : > { %v17544_v52 = vpop.f32.mrf.mxu0 }
 0x923   : > { %v14363_v60 = vpop.f32.mrf.mxu0 }
 0x924   : > { %v15065_v60 = vld [vmem:[%s21374_s2 + $0x180] ss:$16 sps:$4 sm:$0xff]  }
 0x925   : > { %v3762_v9 = vpop.f32.mrf.mxu0 }
 0x926   : > { %v15070_v9 = vld [vmem:[%s21374_s2 + $0x164] ss:$16 sps:$4 sm:$0xff]  }
 0x927   : > { %v14364_v62 = vpop.f32.mrf.mxu0 }
 0x928   : > { %v15068_v62 = vld [vmem:[%s21374_s2 + $0x160] ss:$16 sps:$4 sm:$0xff]  }
 0x929   : > { %v3870_v63 = vpop.f32.mrf.mxu0 }
 0x92a   : > { %v3922_v48 = vmul.f32 0.125, %v3870_v63  ;;  %v15073_v63 = vld [vmem:[%s21374_s2 + $0x144] ss:$16 sps:$4 sm:$0xff]  }
 0x92b   : > { %v14375_v0 = vpop.f32.mrf.mxu0 }
 0x92c   : > { %v3924_v1 = vsel %vm3227_vm3, %v3922_v48, -inf  ;;  %v15076_v0 = vld [vmem:[%s21374_s2 + $0x124] ss:$16 sps:$4 sm:$0xff]  }
 0x92d   : > { %3925 = vmax.xlane.f32.xlu0 %v3924_v1  ;;  %v3873_v2 = vpop.f32.mrf.mxu0  ;;  %v15074_v1 = vld [vmem:[%s21374_s2 + $0x120] ss:$16 sps:$4 sm:$0xff]  }
 0x92e   : > { %v15079_v2 = vld [vmem:[%s21374_s2 + $0x104] ss:$16 sps:$4 sm:$0xff]  }
 0x92f   : > { %v14376_v3 = vpop.f32.mrf.mxu0 }
 0x930   : > { %v15077_v3 = vld [vmem:[%s21374_s2 + $0x100] ss:$16 sps:$4 sm:$0xff]  }
 0x943   : > { %3828 = vrot.lane.b32.xlu0 %v3820_v47, %s16128_s20  ;;  %v15052_v47 = vld [vmem:[%s21374_s2 + $0x24] ss:$16 sps:$4 sm:$0xff]  }
 0x97d   : > { %v3929_v4 = vpop.xlane.xlu0 %3928 }
 0x97e   : > { %v3931_v5 = vsub.f32 %v3923_v56, %v3929_v4  ;;  %v15061_v56 = vld [vmem:[%s21374_s2 + $0x1c4] ss:$16 sps:$4 sm:$0xff]   ;;  %v15082_v4 = vld [vmem:[%s21374_s2 + $0xec] ss:$16 sps:$4 sm:$0xff]  }
 0x980   : > { %v3934_v6 = vmul.f32 1.442695, %v3931_v5  ;;  %v15080_v5 = vld [vmem:[%s21374_s2 + $0xe8] ss:$16 sps:$4 sm:$0xff]  }
 0x982   : > { %16018 = vpow2.f32 %v3934_v6 }
 0x98f   : > { %v16019_v7 = vpop.eup %16018 }
 0x990   : > { %v3939_v11 = vsel %vm3227_vm3, %v16019_v7, 0.0 }
 0x991   : > { %3940 = vadd.xlane.f32.xlu1 %v3939_v11  ;;  %v15083_v11 = vld [vmem:[%s21374_s2 + $0xc8] ss:$16 sps:$4 sm:$0xff]  }
 0x9b6   : > { %v3926_v12 = vpop.xlane.xlu0 %3925 }
 0x9b7   : > { %v3930_v13 = vsub.f32 %v3922_v48, %v3926_v12  ;;  %v15071_v48 = vld [vmem:[%s21374_s2 + $0x140] ss:$16 sps:$4 sm:$0xff]   ;;  %v15088_v12 = vld [vmem:[%s21374_s2 + $0xac] ss:$16 sps:$4 sm:$0xff]  }
 0x9b9   : > { %v3932_v14 = vmul.f32 1.442695, %v3930_v13  ;;  %v15086_v13 = vld [vmem:[%s21374_s2 + $0xa8] ss:$16 sps:$4 sm:$0xff]  }
 0x9ba   : > { %v3829_v16 = vpop.permute.xlu0 %3828 }
 0x9bb   : > { %16020 = vpow2.f32 %v3932_v14  ;;  %v4001_v18 = vsel %vm3257_vm2, %v3829_v16, 0  ;;  %v15091_v14 = vld [vmem:[%s21374_s2 + $0x8c] ss:$16 sps:$4 sm:$0xff]   ;;  %v15128_v16 = vld [vmem:[%s21374_s2 + $0x2e0] ss:$16 sps:$4 sm:$0xff]  }
 0x9bc   : > { %14390 = vmatpush3.bf16.msra.mxu1 %v4001_v18  ;;  %v15130_v18 = vld [vmem:[%s21374_s2 + $0x2e4] ss:$16 sps:$4 sm:$0xff]  }
 0x9bd   : > { %4875 = vmatprep.subr.bf16.mxu1 %v15130_v18 }
 0x9c8   : > { %v16021_v19 = vpop.eup %16020 }
 0x9c9   : > { %v3936_v20 = vsel %vm3227_vm3, %v16021_v19, 0.0 }
 0x9ca   : > { %3937 = vadd.xlane.f32.xlu1 %v3936_v20  ;;  %v15089_v20 = vld [vmem:[%s21374_s2 + $0x88] ss:$16 sps:$4 sm:$0xff]  }
 0x9db   : > { %14445 = vrot.lane.b32.xlu1 %v14444_v21, %s16128_s20  ;;  %v15131_v21 = vld [vmem:[%s21374_s2 + $0x2c0] ss:$16 sps:$4 sm:$0xff]  }
 0xa1a   : > { %v3941_v23 = vpop.xlane.xlu1 %3940 }
 0xa1b   : > { %16022 = vrcp.f32 %v3941_v23  ;;  %v15136_v23 = vld [vmem:[%s21374_s2 + $0x2a4] ss:$16 sps:$4 sm:$0xff]  }
 0xa28   : > { %v16023_v24 = vpop.eup %16022 }
 0xa29   : > { %v3945_v25 = vmul.f32 %v16023_v24, %v16019_v7  ;;  %v15085_v7 = vld [vmem:[%s21374_s2 + $0xcc] ss:$16 sps:$4 sm:$0xff]   ;;  %v15092_v24 = vld [vmem:[%s21374_s2 + $0x68] ss:$16 sps:$4 sm:$0xff]  }
 0xa2b   : > { %v3950_v26 = vpack.c.bf16 %v3945_v25, %v3945_v25  ;;  %13091 = vst.msk [vmem:[%s17448_s9 + $0x38] sm:$0xff] %vm3227_vm3, %v3945_v25  ;;  %v15134_v25 = vld [vmem:[%s21374_s2 + $0x2a0] ss:$16 sps:$4 sm:$0xff]  }
 0xa2d   : > { %14392 = vmatmul.mubr.msk.bf16.vlgmr.msra.gmra.mxu1 %vm3227_vm3, %v3950_v26  ;;  %v15097_v26 = vld [vmem:[%s21374_s2 + $0x4c] ss:$16 sps:$4 sm:$0xff]  }
 0xa2e   : > { %4876 = vmatpush1.bf16.msra.mxu1 %v15128_v16 }
 0xa53   : > { %v3938_v27 = vpop.xlane.xlu1 %3937 }
 0xa54   : > { %16024 = vrcp.f32 %v3938_v27  ;;  %v15139_v27 = vld [vmem:[%s21374_s2 + $0x284] ss:$16 sps:$4 sm:$0xff]  }
 0xa57   : > { %v14446_v15 = vpop.permute.xlu1 %14445 }
 0xa58   : > { %v14448_v61 = vunpack.i.h.bf16 %v14446_v15  ;;  %v14447_v28 = vunpack.i.l.bf16 %v14446_v15  ;;  %v15095_v15 = vld [vmem:[%s21374_s2 + $0x48] ss:$16 sps:$4 sm:$0xff]  }
 0xa5a   : > { %v3583_v29 = vsel %vm3132_vm1, %v17511_v10, %v14448_v61  ;;  %v3351_v30 = vsel %vm3132_vm1, %v17474_v17, %v14447_v28  ;;  %v15037_v10 = vld [vmem:[%s21374_s2 + $0xc4] ss:$16 sps:$4 sm:$0xff]   ;;  %v15137_v61 = vld [vmem:[%s21374_s2 + $0x280] ss:$16 sps:$4 sm:$0xff]   ;;  %v15100_v28 = vld [vmem:[%s21374_s2 + $0x2c] ss:$16 sps:$4 sm:$0xff]  }
 0xa5b   : > { %v3584_v31 = vpack.c.bf16 %v3583_v29, %v3583_v29  ;;  %v3352_v32 = vpack.c.bf16 %v3351_v30, %v3351_v30  ;;  %v15142_v29 = vld [vmem:[%s21374_s2 + $0x264] ss:$16 sps:$4 sm:$0xff]   ;;  %v15098_v30 = vld [vmem:[%s21374_s2 + $0x28] ss:$16 sps:$4 sm:$0xff]  }
 0xa5d   : > { %3585 = vst [vmem:[#allocation3 + $0x4] sm:$0xf] %v3584_v31  ;;  %3353 = vst [vmem:[#allocation3] sm:$0xf] %v3352_v32  ;;  %v15140_v31 = vld [vmem:[%s21374_s2 + $0x260] ss:$16 sps:$4 sm:$0xff]  }
 0xa5e   : > { %v15103_v32 = vld [vmem:[%s21374_s2 + $0xc] ss:$16 sps:$4 sm:$0xff]  }
 0xa61   : > { %v16025_v33 = vpop.eup %16024 }
 0xa62   : > { %v3943_v34 = vmul.f32 %v16025_v33, %v16021_v19  ;;  %v15133_v19 = vld [vmem:[%s21374_s2 + $0x2c4] ss:$16 sps:$4 sm:$0xff]  }
 0xa63   : > { %4877 = vmatprep.subr.bf16.mxu1 %v15133_v19  ;;  %v15145_v33 = vld [vmem:[%s21374_s2 + $0x244] ss:$16 sps:$4 sm:$0xff]  }
 0xa64   : > { %v3949_v36 = vpack.c.bf16 %v3943_v34, %v3943_v34  ;;  %v17567_v37 = vld [vmem:[#allocation3] sm:$0xff]  ;;  %13090 = vst.msk [vmem:[%s17448_s9 + $0x30] sm:$0xff] %vm3227_vm3, %v3943_v34  ;;  %4878 = vmatpush1.bf16.msra.mxu1 %v15131_v21  ;;  %v15101_v34 = vld [vmem:[%s21374_s2 + $0x8] ss:$16 sps:$4 sm:$0xff]  }
 0xa65   : > { %v17576_v17 = vcombine.high %v17567_v37, %v17567_v37  ;;  %v17675_v6 = vcombine.low %v17567_v37, %v17567_v37  ;;  %4879 = vmatprep.subr.bf16.mxu1 %v15136_v23  ;;  %v15148_v37 = vld [vmem:[%s21374_s2 + $0x224] ss:$16 sps:$4 sm:$0xff]  }
 0xa66   : > { %14386 = vmatmul.mubr.msk.bf16.vlgmr.msra.gmra.mxu0 %vm3227_vm3, %v3949_v36  ;;  %v15106_v36 = vld [vmem:[%s21374_s2 + $0x1ec] ss:$16 sps:$4 sm:$0xff]  }
 0xa67   : > { %4835 = vmatpush1.bf16.msra.mxu0 %v15030_v35  ;;  %4866 = vmatprep.mubr.bf16.mxu0 %v17576_v17  ;;  %v15143_v35 = vld [vmem:[%s21374_s2 + $0x240] ss:$16 sps:$4 sm:$0xff]  }
 0xa68   : > { %4836 = vmatprep.subr.bf16.mxu0 %v15037_v10  ;;  %4880 = vmatpush1.bf16.msra.mxu1 %v15134_v25  ;;  %v15104_v10 = vld [vmem:[%s21374_s2 + $0x1e8] ss:$16 sps:$4 sm:$0xff]  }
 0xa69   : > { %4881 = vmatprep.subr.bf16.mxu1 %v15139_v27 }
 0xa6b   : > { %4837 = vmatpush1.bf16.msra.mxu0 %v15035_v38  ;;  %v15109_v38 = vld [vmem:[%s21374_s2 + $0x1cc] ss:$16 sps:$4 sm:$0xff]  }
 0xa6c   : > { %4838 = vmatprep.subr.bf16.mxu0 %v15040_v39  ;;  %4882 = vmatpush1.bf16.msra.mxu1 %v15137_v61  ;;  %v15151_v39 = vld [vmem:[%s21374_s2 + $0x204] ss:$16 sps:$4 sm:$0xff]  }
 0xa6d   : > { %4883 = vmatprep.subr.bf16.mxu1 %v15142_v29 }
 0xa6f   : > { %4839 = vmatpush1.bf16.msra.mxu0 %v15038_v40  ;;  %v15107_v40 = vld [vmem:[%s21374_s2 + $0x1c8] ss:$16 sps:$4 sm:$0xff]  }
 0xa70   : > { %4840 = vmatprep.subr.bf16.mxu0 %v15043_v41  ;;  %4884 = vmatpush1.bf16.msra.mxu1 %v15140_v31  ;;  %v15149_v41 = vld [vmem:[%s21374_s2 + $0x200] ss:$16 sps:$4 sm:$0xff]  }
 0xa71   : > { %4885 = vmatprep.subr.bf16.mxu1 %v15145_v33  ;;  %v15183_v33 = vld [vmem:[%s21374_s2 + $0x2cc] ss:$16 sps:$4 sm:$0xff]  }
 0xa73   : > { %4841 = vmatpush1.bf16.msra.mxu0 %v15041_v42  ;;  %v15112_v42 = vld [vmem:[%s21374_s2 + $0x1ac] ss:$16 sps:$4 sm:$0xff]  }
 0xa74   : > { %4842 = vmatprep.subr.bf16.mxu0 %v15046_v43  ;;  %4886 = vmatpush1.bf16.msra.mxu1 %v15143_v35  ;;  %v15154_v43 = vld [vmem:[%s21374_s2 + $0x3e4] ss:$16 sps:$4 sm:$0xff]   ;;  %v15186_v35 = vld [vmem:[%s21374_s2 + $0x2ac] ss:$16 sps:$4 sm:$0xff]  }
 0xa75   : > { %4887 = vmatprep.subr.bf16.mxu1 %v15148_v37  ;;  %v15189_v37 = vld [vmem:[%s21374_s2 + $0x28c] ss:$16 sps:$4 sm:$0xff]  }
 0xa77   : > { %4843 = vmatpush1.bf16.msra.mxu0 %v15044_v44  ;;  %v15110_v44 = vld [vmem:[%s21374_s2 + $0x1a8] ss:$16 sps:$4 sm:$0xff]  }
 0xa78   : > { %4844 = vmatprep.subr.bf16.mxu0 %v15049_v45  ;;  %v15152_v45 = vld [vmem:[%s21374_s2 + $0x3e0] ss:$16 sps:$4 sm:$0xff]  }
 0xa7b   : > { %4845 = vmatpush1.bf16.msra.mxu0 %v15047_v46  ;;  %v15115_v46 = vld [vmem:[%s21374_s2 + $0x18c] ss:$16 sps:$4 sm:$0xff]  }
 0xa7c   : > { %4846 = vmatprep.subr.bf16.mxu0 %v15052_v47  ;;  %v15157_v47 = vld [vmem:[%s21374_s2 + $0x3c4] ss:$16 sps:$4 sm:$0xff]  }
 0xa7f   : > { %4847 = vmatpush1.bf16.msra.mxu0 %v15050_v50  ;;  %v15113_v50 = vld [vmem:[%s21374_s2 + $0x188] ss:$16 sps:$4 sm:$0xff]  }
 0xa80   : > { %4848 = vmatprep.subr.bf16.mxu0 %v15055_v53  ;;  %v15155_v53 = vld [vmem:[%s21374_s2 + $0x3c0] ss:$16 sps:$4 sm:$0xff]  }
 0xa83   : > { %4849 = vmatpush1.bf16.msra.mxu0 %v15053_v49  ;;  %v15118_v49 = vld [vmem:[%s21374_s2 + $0x16c] ss:$16 sps:$4 sm:$0xff]  }
 0xa84   : > { %4850 = vmatprep.subr.bf16.mxu0 %v15058_v54  ;;  %v15160_v54 = vld [vmem:[%s21374_s2 + $0x3a4] ss:$16 sps:$4 sm:$0xff]  }
 0xa87   : > { %4851 = vmatpush2.bf16.msra.mxu0 %v15056_v55  ;;  %v15116_v55 = vld [vmem:[%s21374_s2 + $0x168] ss:$16 sps:$4 sm:$0xff]  }
 0xa88   : > { %4852 = vmatprep.subr.bf16.mxu0 %v15061_v56  ;;  %v15158_v56 = vld [vmem:[%s21374_s2 + $0x3a0] ss:$16 sps:$4 sm:$0xff]  }
 0xa8b   : > { %4853 = vmatpush2.bf16.msra.mxu0 %v15059_v57  ;;  %v15121_v57 = vld [vmem:[%s21374_s2 + $0x14c] ss:$16 sps:$4 sm:$0xff]  }
 0xa8c   : > { %4854 = vmatprep.subr.bf16.mxu0 %v15064_v58  ;;  %v15163_v58 = vld [vmem:[%s21374_s2 + $0x384] ss:$16 sps:$4 sm:$0xff]  }
 0xa8f   : > { %4855 = vmatpush2.bf16.msra.mxu0 %v15062_v59  ;;  %v15119_v59 = vld [vmem:[%s21374_s2 + $0x148] ss:$16 sps:$4 sm:$0xff]  }
 0xa90   : > { %4856 = vmatprep.subr.bf16.mxu0 %v15067_v8  ;;  %v15161_v8 = vld [vmem:[%s21374_s2 + $0x380] ss:$16 sps:$4 sm:$0xff]  }
 0xa93   : > { %4857 = vmatpush2.bf16.msra.mxu0 %v15065_v60  ;;  %v15124_v60 = vld [vmem:[%s21374_s2 + $0x12c] ss:$16 sps:$4 sm:$0xff]  }
 0xa94   : > { %4858 = vmatprep.subr.bf16.mxu0 %v15070_v9  ;;  %v15166_v9 = vld [vmem:[%s21374_s2 + $0x364] ss:$16 sps:$4 sm:$0xff]  }
 0xa97   : > { %4859 = vmatpush2.bf16.msra.mxu0 %v15068_v62  ;;  %v15122_v62 = vld [vmem:[%s21374_s2 + $0x128] ss:$16 sps:$4 sm:$0xff]  }
 0xa98   : > { %4860 = vmatprep.subr.bf16.mxu0 %v15073_v63  ;;  %v15164_v63 = vld [vmem:[%s21374_s2 + $0x360] ss:$16 sps:$4 sm:$0xff]  }
 0xa9b   : > { %4861 = vmatpush2.bf16.msra.mxu0 %v15071_v48  ;;  %v15127_v48 = vld [vmem:[%s21374_s2 + $0x10c] ss:$16 sps:$4 sm:$0xff]  }
 0xa9c   : > { %4862 = vmatprep.subr.bf16.mxu0 %v15076_v0  ;;  %v15125_v0 = vld [vmem:[%s21374_s2 + $0x108] ss:$16 sps:$4 sm:$0xff]  }
 0xa9f   : > { %4863 = vmatpush2.bf16.msra.mxu0 %v15074_v1  ;;  %v15169_v1 = vld [vmem:[%s21374_s2 + $0x344] ss:$16 sps:$4 sm:$0xff]  }
 0xaa0   : > { %4864 = vmatprep.subr.bf16.mxu0 %v15079_v2  ;;  %v15167_v2 = vld [vmem:[%s21374_s2 + $0x340] ss:$16 sps:$4 sm:$0xff]  }
 0xaa3   : > { %4865 = vmatpush2.bf16.msra.mxu0 %v15077_v3  ;;  %v15172_v3 = vld [vmem:[%s21374_s2 + $0x324] ss:$16 sps:$4 sm:$0xff]  }
 0xaa4   : > { %4916 = vmatprep.subr.bf16.mxu0 %v15082_v4  ;;  %v15170_v4 = vld [vmem:[%s21374_s2 + $0x320] ss:$16 sps:$4 sm:$0xff]  }
 0xaa6   : > { %4867 = vmatmul.mubr.bf16.vlgmr.msra.gmra.mxu0 %v17675_v6 }
 0xaa7   : > { %4917 = vmatpush1.bf16.msra.mxu0 %v15080_v5  ;;  %4948 = vmatprep.mubr.bf16.mxu0 %v17576_v17  ;;  %v15146_v17 = vld [vmem:[%s21374_s2 + $0x220] ss:$16 sps:$4 sm:$0xff]  }
 0xaa8   : > { %4918 = vmatprep.subr.bf16.mxu0 %v15085_v7  ;;  %4888 = vmatpush1.bf16.msra.mxu1 %v15146_v17  ;;  %v15173_v5 = vld [vmem:[%s21374_s2 + $0x300] ss:$16 sps:$4 sm:$0xff]   ;;  %v15192_v17 = vld [vmem:[%s21374_s2 + $0x26c] ss:$16 sps:$4 sm:$0xff]  }
 0xaa9   : > { %4889 = vmatprep.subr.bf16.mxu1 %v15151_v39  ;;  %v15195_v39 = vld [vmem:[%s21374_s2 + $0x24c] ss:$16 sps:$4 sm:$0xff]  }
 0xaab   : > { %4919 = vmatpush1.bf16.msra.mxu0 %v15083_v11 }
 0xaac   : > { %4920 = vmatprep.subr.bf16.mxu0 %v15088_v12  ;;  %4890 = vmatpush1.bf16.msra.mxu1 %v15149_v41  ;;  %v15198_v41 = vld [vmem:[%s21374_s2 + $0x22c] ss:$16 sps:$4 sm:$0xff]  }
 0xaad   : > { %4891 = vmatprep.subr.bf16.mxu1 %v15154_v43  ;;  %v15201_v43 = vld [vmem:[%s21374_s2 + $0x20c] ss:$16 sps:$4 sm:$0xff]  }
 0xaaf   : > { %4921 = vmatpush1.bf16.msra.mxu0 %v15086_v13 }
 0xab0   : > { %4922 = vmatprep.subr.bf16.mxu0 %v15091_v14  ;;  %4892 = vmatpush2.bf16.msra.mxu1 %v15152_v45  ;;  %v15180_v14 = vld [vmem:[%s21374_s2 + $0x2ec] ss:$16 sps:$4 sm:$0xff]  }
 0xab1   : > { %4893 = vmatprep.subr.bf16.mxu1 %v15157_v47  ;;  %v15204_v45 = vld [vmem:[%s21374_s2 + $0x3ec] ss:$16 sps:$4 sm:$0xff]  }
 0xab2   : > { %v15207_v47 = vld [vmem:[%s21374_s2 + $0x3cc] ss:$16 sps:$4 sm:$0xff]  }
 0xab3   : > { %4923 = vmatpush1.bf16.msra.mxu0 %v15089_v20 }
 0xab4   : > { %4924 = vmatprep.subr.bf16.mxu0 %v15094_v22  ;;  %4894 = vmatpush2.bf16.msra.mxu1 %v15155_v53  ;;  %v15210_v53 = vld [vmem:[%s21374_s2 + $0x3ac] ss:$16 sps:$4 sm:$0xff]  }
 0xab5   : > { %4895 = vmatprep.subr.bf16.mxu1 %v15160_v54  ;;  %v15213_v54 = vld [vmem:[%s21374_s2 + $0x38c] ss:$16 sps:$4 sm:$0xff]  }
 0xab7   : > { %4925 = vmatpush1.bf16.msra.mxu0 %v15092_v24 }
 0xab8   : > { %4926 = vmatprep.subr.bf16.mxu0 %v15097_v26  ;;  %4896 = vmatpush2.bf16.msra.mxu1 %v15158_v56  ;;  %v15216_v56 = vld [vmem:[%s21374_s2 + $0x36c] ss:$16 sps:$4 sm:$0xff]  }
 0xab9   : > { %4897 = vmatprep.subr.bf16.mxu1 %v15163_v58  ;;  %v15219_v58 = vld [vmem:[%s21374_s2 + $0x34c] ss:$16 sps:$4 sm:$0xff]  }
 0xabb   : > { %4927 = vmatpush1.bf16.msra.mxu0 %v15095_v15 }
 0xabc   : > { %4928 = vmatprep.subr.bf16.mxu0 %v15100_v28  ;;  %4898 = vmatpush2.bf16.msra.mxu1 %v15161_v8  ;;  %v15222_v8 = vld [vmem:[%s21374_s2 + $0x32c] ss:$16 sps:$4 sm:$0xff]  }
 0xabd   : > { %4899 = vmatprep.subr.bf16.mxu1 %v15166_v9 }
 0xabf   : > { %4929 = vmatpush1.bf16.msra.mxu0 %v15098_v30 }
 0xac0   : > { %4930 = vmatprep.subr.bf16.mxu0 %v15103_v32  ;;  %4900 = vmatpush2.bf16.msra.mxu1 %v15164_v63  ;;  %v15225_v63 = vld [vmem:[%s21374_s2 + $0x30c] ss:$16 sps:$4 sm:$0xff]  }
 0xac1   : > { %4901 = vmatprep.subr.bf16.mxu1 %v15169_v1  ;;  %v15223_v1 = vld [vmem:[%s21374_s2 + $0x308] ss:$16 sps:$4 sm:$0xff]  }
 0xac3   : > { %4931 = vmatpush1.bf16.msra.mxu0 %v15101_v34  ;;  %v15181_v34 = vld [vmem:[%s21374_s2 + $0x2c8] ss:$16 sps:$4 sm:$0xff]  }
 0xac4   : > { %4932 = vmatprep.subr.bf16.mxu0 %v15106_v36  ;;  %4902 = vmatpush2.bf16.msra.mxu1 %v15167_v2  ;;  %v15184_v36 = vld [vmem:[%s21374_s2 + $0x2a8] ss:$16 sps:$4 sm:$0xff]  }
 0xac5   : > { %4903 = vmatprep.subr.bf16.mxu1 %v15172_v3 }
 0xac7   : > { %4933 = vmatpush2.bf16.msra.mxu0 %v15104_v10  ;;  %v15187_v10 = vld [vmem:[%s21374_s2 + $0x288] ss:$16 sps:$4 sm:$0xff]  }
 0xac8   : > { %4934 = vmatprep.subr.bf16.mxu0 %v15109_v38  ;;  %4904 = vmatpush2.bf16.msra.mxu1 %v15170_v4  ;;  %v15190_v38 = vld [vmem:[%s21374_s2 + $0x268] ss:$16 sps:$4 sm:$0xff]  }
 0xacb   : > { %4935 = vmatpush2.bf16.msra.mxu0 %v15107_v40  ;;  %v15193_v40 = vld [vmem:[%s21374_s2 + $0x248] ss:$16 sps:$4 sm:$0xff]  }
 0xacc   : > { %4936 = vmatprep.subr.bf16.mxu0 %v15112_v42  ;;  %v15196_v42 = vld [vmem:[%s21374_s2 + $0x228] ss:$16 sps:$4 sm:$0xff]  }
 0xacf   : > { %4937 = vmatpush2.bf16.msra.mxu0 %v15110_v44  ;;  %v15199_v44 = vld [vmem:[%s21374_s2 + $0x208] ss:$16 sps:$4 sm:$0xff]  }
 0xad0   : > { %4938 = vmatprep.subr.bf16.mxu0 %v15115_v46  ;;  %v15202_v46 = vld [vmem:[%s21374_s2 + $0x3e8] ss:$16 sps:$4 sm:$0xff]  }
 0xad3   : > { %4939 = vmatpush2.bf16.msra.mxu0 %v15113_v50  ;;  %v15205_v50 = vld [vmem:[%s21374_s2 + $0x3c8] ss:$16 sps:$4 sm:$0xff]  }
 0xad4   : > { %4940 = vmatprep.subr.bf16.mxu0 %v15118_v49  ;;  %v15208_v49 = vld [vmem:[%s21374_s2 + $0x3a8] ss:$16 sps:$4 sm:$0xff]  }
 0xad7   : > { %4941 = vmatpush2.bf16.msra.mxu0 %v15116_v55  ;;  %v15211_v55 = vld [vmem:[%s21374_s2 + $0x388] ss:$16 sps:$4 sm:$0xff]  }
 0xad8   : > { %4942 = vmatprep.subr.bf16.mxu0 %v15121_v57  ;;  %v15214_v57 = vld [vmem:[%s21374_s2 + $0x368] ss:$16 sps:$4 sm:$0xff]  }
 0xadb   : > { %4943 = vmatpush2.bf16.msra.mxu0 %v15119_v59  ;;  %v15217_v59 = vld [vmem:[%s21374_s2 + $0x348] ss:$16 sps:$4 sm:$0xff]  }
 0xadc   : > { %4944 = vmatprep.subr.bf16.mxu0 %v15124_v60 }
 0xadf   : > { %4945 = vmatpush2.bf16.msra.mxu0 %v15122_v62  ;;  %v15220_v62 = vld [vmem:[%s21374_s2 + $0x328] ss:$16 sps:$4 sm:$0xff]  }
 0xae0   : > { %4946 = vmatprep.subr.bf16.mxu0 %v15127_v48 }
 0xae3   : > { %4947 = vmatpush2.bf16.msra.mxu0 %v15125_v0 }
 0xae6   : > { %4949 = vmatmul.mubr.bf16.vlgmr.msra.gmra.mxu0 %v17675_v6  ;;  %v15175_v6 = vld [vmem:[%s21374_s2 + $0x304] ss:$16 sps:$4 sm:$0xff]  }
 0xae7   : > { %4905 = vmatprep.subr.bf16.mxu1 %v15175_v6  ;;  %v16030_v6 = vld [vmem:[%s16353_s12 + $0x8] sm:$0xff] }
 0xae8   : > { %4906 = vmatpush2.bf16.msra.mxu1 %v15173_v5 }
 0xae9   : > { %4957 = vmatprep.subr.bf16.mxu1 %v15180_v14  ;;  %v16032_v14 = vld [vmem:[%s16353_s12 + $0x10] sm:$0xff] }
 0xaed   : > { %v4037_v7 = vpop.f32.mrf.mxu1 }
 0xaee   : > { %v14449_v11 = vpack.i.bf16 %v4037_v7, %v17541_v51 }
 0xaef   : > { %v14393_v12 = vpop.f32.mrf.mxu1 }
 0xaf0   : > { %14450 = vrot.lane.b32.xlu0 %v14449_v11, %s16128_s20  ;;  %v16031_v11 = vld [vmem:[%s16353_s12] sm:$0xff]  ;;  %s21300_s20 = scalar_lea.hbm %s21378_s6, %s14266_s14 }
 0xaf1   : > { %v4040_v13 = vpop.f32.mrf.mxu1 }
 0xaf3   : > { %v14394_v16 = vpop.f32.mrf.mxu1 }
 0xb26   : > { %v3991_v18 = vpop.f32.mrf.mxu0 }
 0xb28   : > { %v14387_v19 = vpop.f32.mrf.mxu0 }
 0xb2a   : > { %v3994_v20 = vpop.f32.mrf.mxu0 }
 0xb2b   : > { %v16033_v20 = vld [vmem:[%s16353_s12 + $0x18] sm:$0xff]  ;;  %s16038_s12 = sshll.u32 %s16129_s19, 4  ;;  %s16039_s12 = int_to_ptr.vmem [resolvable:$false] %s16038_s12 }
 0xb2c   : > { %v14388_v21 = vpop.f32.mrf.mxu0  ;;  %s16040_s9 = scalar_lea.vmem %s16039_s12, 2048  ;;  %p16041_p0 = scmp.lt.s32.totalorder %s21295_s13, %s16039_s12 }
 0xb2d   : > { %p16042_p1 = scmp.lt.s32.totalorder %s16040_s9, %s16034_s17 }
 0xb2f   : > { %p16043_p2 = por %p16042_p1, %p16041_p0 }
 0xb31   : > { %p16044_p3 = pnand %p16043_p2, %p16037_p13 }
 0xb62   : > { %v14451_v22 = vpop.permute.xlu0 %14450 }
 0xb63   : > { %v14453_v23 = vunpack.i.h.bf16 %v14451_v22  ;;  %v14452_v24 = vunpack.i.l.bf16 %v14451_v22 }
 0xb65   : > { %v3815_v51 = vsel %vm3132_vm1, %v17544_v52, %v14452_v24  ;;  %v4047_v25 = vsel %vm3132_vm1, %v3991_v18, %v14453_v23  ;;  %v15178_v52 = vld [vmem:[%s21374_s2 + $0x2e8] ss:$16 sps:$4 sm:$0xff]  }
 0xb66   : > { %v3816_v26 = vpack.c.bf16 %v3815_v51, %v3815_v51  ;;  %v4048_v27 = vpack.c.bf16 %v4047_v25, %v4047_v25  ;;  %v17874_v15 = vpop.f32.mrf.mxu0 }
 0xb67   : > { %v4869_v12 = vadd.f32 %v16031_v11, %v17874_v15  ;;  %v5053_v11 = vld [vmem:[%s21375_s3 + $0xc0] sm:$0xff] }
 0xb68   : > { %3817 = vst [vmem:[#allocation3 + $0x8] sm:$0xf] %v3816_v26  ;;  %4049 = vst [vmem:[#allocation3 + $0xc] sm:$0xf] %v4048_v27  ;;  %v17876_v61 = vpop.f32.mrf.mxu0 }
 0xb69   : > { %v4871_v7 = vadd.f32 %v16030_v6, %v17876_v61  ;;  %v5141_v61 = vld [vmem:[%s21375_s3 + $0x380] sm:$0xff] }
 0xb6a   : > { %v4872_v28 = vpop.f32.mrf.mxu0 }
 0xb6b   : > { %v5149_v28 = vld [vmem:[%s21375_s3 + $0x3c0] sm:$0xff] }
 0xb6c   : > { %v4873_v29 = vpop.f32.mrf.mxu0 }
 0xb6d   : > { %v5397_v29 = vld [vmem:[%s21375_s3 + $0xb80] sm:$0xff] }
 0xb6f   : > { %v4051_v30 = vld [vmem:[#allocation3 + $0x8] sm:$0xff] }
 0xb70   : > { %v17878_v31 = vcombine.low %v4051_v30, %v4051_v30  ;;  %v13097_v32 = vcombine.high %v4051_v30, %v4051_v30  ;;  %v13338_v30 = vcombine.low %v5141_v61, %v5149_v28 }
 0xb72   : > { %4907 = vmatprep.mubr.bf16.mxu1 %v13097_v32 }
 0xb73   : > { %4908 = vmatmul.mubr.bf16.vlgmr.msra.gmra.mxu1 %v17878_v31 }
 0xb74   : > { %4958 = vmatpush1.bf16.msra.mxu1 %v15178_v52  ;;  %4989 = vmatprep.mubr.bf16.mxu1 %v13097_v32  ;;  %v5405_v32 = vld [vmem:[%s21375_s3 + $0xbc0] sm:$0xff] }
 0xb75   : > { %4959 = vmatprep.subr.bf16.mxu1 %v15183_v33  ;;  %v5125_v52 = vld [vmem:[%s21375_s3 + $0x300] sm:$0xff] }
 0xb76   : > { %v5133_v33 = vld [vmem:[%s21375_s3 + $0x340] sm:$0xff] }
 0xb78   : > { %4960 = vmatpush1.bf16.msra.mxu1 %v15181_v34  ;;  %v13594_v34 = vcombine.low %v5397_v29, %v5405_v32 }
 0xb79   : > { %4961 = vmatprep.subr.bf16.mxu1 %v15186_v35  ;;  %v13595_v35 = vcombine.high %v5397_v29, %v5405_v32  ;;  %v5269_v29 = vld [vmem:[%s21375_s3 + $0x780] sm:$0xff] }
 0xb7a   : > { %v5533_v32 = vld [vmem:[%s21375_s3 + $0xfc0] sm:$0xff] }
 0xb7c   : > { %4962 = vmatpush1.bf16.msra.mxu1 %v15184_v36  ;;  %v13323_v36 = vcombine.high %v5125_v52, %v5133_v33 }
 0xb7d   : > { %4963 = vmatprep.subr.bf16.mxu1 %v15189_v37  ;;  %v5381_v37 = vld [vmem:[%s21375_s3 + $0xb00] sm:$0xff] }
 0xb80   : > { %4964 = vmatpush1.bf16.msra.mxu1 %v15187_v10  ;;  %v5389_v10 = vld [vmem:[%s21375_s3 + $0xb40] sm:$0xff] }
 0xb81   : > { %4965 = vmatprep.subr.bf16.mxu1 %v15192_v17  ;;  %v5109_v17 = vld [vmem:[%s21375_s3 + $0x280] sm:$0xff] }
 0xb84   : > { %4966 = vmatpush1.bf16.msra.mxu1 %v15190_v38  ;;  %v13579_v38 = vcombine.high %v5381_v37, %v5389_v10 }
 0xb85   : > { %4967 = vmatprep.subr.bf16.mxu1 %v15195_v39  ;;  %v5117_v39 = vld [vmem:[%s21375_s3 + $0x2c0] sm:$0xff] }
 0xb88   : > { %4968 = vmatpush1.bf16.msra.mxu1 %v15193_v40  ;;  %v5365_v40 = vld [vmem:[%s21375_s3 + $0xa80] sm:$0xff] }
 0xb89   : > { %4969 = vmatprep.subr.bf16.mxu1 %v15198_v41  ;;  %v5373_v41 = vld [vmem:[%s21375_s3 + $0xac0] sm:$0xff] }
 0xb8c   : > { %4970 = vmatpush1.bf16.msra.mxu1 %v15196_v42  ;;  %v13322_v42 = vcombine.low %v5125_v52, %v5133_v33 }
 0xb8d   : > { %4971 = vmatprep.subr.bf16.mxu1 %v15201_v43  ;;  %v13578_v43 = vcombine.low %v5381_v37, %v5389_v10  ;;  %v5261_v37 = vld [vmem:[%s21375_s3 + $0x740] sm:$0xff] }
 0xb8e   : > { %v5509_v10 = vld [vmem:[%s21375_s3 + $0xf00] sm:$0xff] }
 0xb90   : > { %4972 = vmatpush1.bf16.msra.mxu1 %v15199_v44  ;;  %v13307_v44 = vcombine.high %v5109_v17, %v5117_v39 }
 0xb91   : > { %4973 = vmatprep.subr.bf16.mxu1 %v15204_v45  ;;  %v13563_v45 = vcombine.high %v5365_v40, %v5373_v41 }
 0xb94   : > { %4974 = vmatpush2.bf16.msra.mxu1 %v15202_v46  ;;  %v5093_v46 = vld [vmem:[%s21375_s3 + $0x200] sm:$0xff] }
 0xb95   : > { %4975 = vmatprep.subr.bf16.mxu1 %v15207_v47  ;;  %v5101_v47 = vld [vmem:[%s21375_s3 + $0x240] sm:$0xff] }
 0xb98   : > { %4976 = vmatpush2.bf16.msra.mxu1 %v15205_v50  ;;  %v5349_v50 = vld [vmem:[%s21375_s3 + $0xa00] sm:$0xff] }
 0xb99   : > { %4977 = vmatprep.subr.bf16.mxu1 %v15210_v53  ;;  %v5357_v53 = vld [vmem:[%s21375_s3 + $0xa40] sm:$0xff] }
 0xb9c   : > { %4978 = vmatpush2.bf16.msra.mxu1 %v15208_v49  ;;  %v13306_v49 = vcombine.low %v5109_v17, %v5117_v39  ;;  %v5517_v17 = vld [vmem:[%s21375_s3 + $0xf40] sm:$0xff] }
 0xb9d   : > { %4979 = vmatprep.subr.bf16.mxu1 %v15213_v54  ;;  %v13562_v54 = vcombine.low %v5365_v40, %v5373_v41  ;;  %v13707_v41 = vcombine.high %v5509_v10, %v5517_v17 }
 0xba0   : > { %4980 = vmatpush2.bf16.msra.mxu1 %v15211_v55  ;;  %v13291_v55 = vcombine.high %v5093_v46, %v5101_v47 }
 0xba1   : > { %4981 = vmatprep.subr.bf16.mxu1 %v15216_v56  ;;  %v13547_v56 = vcombine.high %v5349_v50, %v5357_v53 }
 0xba4   : > { %4982 = vmatpush2.bf16.msra.mxu1 %v15214_v57  ;;  %v5077_v57 = vld [vmem:[%s21375_s3 + $0x180] sm:$0xff] }
 0xba5   : > { %4983 = vmatprep.subr.bf16.mxu1 %v15219_v58  ;;  %v5085_v58 = vld [vmem:[%s21375_s3 + $0x1c0] sm:$0xff] }
 0xba6   : > { %v4950_v60 = vpop.f32.mrf.mxu0 }
 0xba7   : > { %v4951_v16 = vadd.f32 %v16032_v14, %v4950_v60  ;;  %v13290_v60 = vcombine.low %v5093_v46, %v5101_v47  ;;  %v5309_v14 = vld [vmem:[%s21375_s3 + $0x8c0] sm:$0xff]  ;;  %v13706_v47 = vcombine.low %v5509_v10, %v5517_v17 }
 0xba8   : > { %v4952_v9 = vpop.f32.mrf.mxu0  ;;  %4984 = vmatpush2.bf16.msra.mxu1 %v15217_v59  ;;  %v5333_v59 = vld [vmem:[%s21375_s3 + $0x980] sm:$0xff] }
 0xba9   : > { %4985 = vmatprep.subr.bf16.mxu1 %v15222_v8  ;;  %v4953_v21 = vadd.f32 %v16033_v20, %v4952_v9  ;;  %v5341_v8 = vld [vmem:[%s21375_s3 + $0x9c0] sm:$0xff]  ;;  %v13546_v9 = vcombine.low %v5349_v50, %v5357_v53 }
 0xbaa   : > { %v4954_v48 = vpop.f32.mrf.mxu0 }
 0xbab   : > { %v5061_v48 = vld [vmem:[%s21375_s3 + $0x100] sm:$0xff] }
 0xbac   : > { %v4955_v0 = vpop.f32.mrf.mxu0  ;;  %4986 = vmatpush2.bf16.msra.mxu1 %v15220_v62  ;;  %v13275_v62 = vcombine.high %v5077_v57, %v5085_v58 }
 0xbad   : > { %4987 = vmatprep.subr.bf16.mxu1 %v15225_v63  ;;  %v13531_v63 = vcombine.high %v5333_v59, %v5341_v8  ;;  %v5069_v0 = vld [vmem:[%s21375_s3 + $0x140] sm:$0xff] }
 0xbb0   : > { %4988 = vmatpush2.bf16.msra.mxu1 %v15223_v1  ;;  %v5317_v1 = vld [vmem:[%s21375_s3 + $0x900] sm:$0xff] }
 0xbb1   : > { %8142 = vmatprep.subr.bf16.mxu1 %v13595_v35 }
 0xbb3   : > { %4990 = vmatmul.mubr.bf16.vlgmr.msra.gmra.mxu1 %v17878_v31  ;;  %v13339_v31 = vcombine.high %v5141_v61, %v5149_v28 }
 0xbb4   : > { %8143 = vmatpush1.bf16.msra.mxu1 %v13594_v34 }
 0xbb5   : > { %8101 = vmatprep.subr.bf16.mxu0 %v13339_v31  ;;  %8144 = vmatprep.subr.bf16.mxu1 %v13579_v38  ;;  %v5525_v31 = vld [vmem:[%s21375_s3 + $0xf80] sm:$0xff] }
 0xbb6   : > { %8102 = vmatpush1.bf16.msra.mxu0 %v13338_v30  ;;  %v5277_v30 = vld [vmem:[%s21375_s3 + $0x7c0] sm:$0xff]  ;;  %v13723_v35 = vcombine.high %v5525_v31, %v5533_v32  ;;  %v13722_v39 = vcombine.low %v5525_v31, %v5533_v32 }
 0xbb7   : > { %8103 = vmatprep.subr.bf16.mxu0 %v13323_v36  ;;  %v13467_v34 = vcombine.high %v5269_v29, %v5277_v30  ;;  %v5253_v36 = vld [vmem:[%s21375_s3 + $0x700] sm:$0xff]  ;;  %v13466_v38 = vcombine.low %v5269_v29, %v5277_v30 }
 0xbb8   : > { %8145 = vmatpush1.bf16.msra.mxu1 %v13578_v43  ;;  %v13451_v40 = vcombine.high %v5253_v36, %v5261_v37  ;;  %v5245_v43 = vld [vmem:[%s21375_s3 + $0x6c0] sm:$0xff]  ;;  %v13450_v46 = vcombine.low %v5253_v36, %v5261_v37 }
 0xbb9   : > { %8146 = vmatprep.subr.bf16.mxu1 %v13563_v45  ;;  %v5501_v45 = vld [vmem:[%s21375_s3 + $0xec0] sm:$0xff] }
 0xbba   : > { %8104 = vmatpush1.bf16.msra.mxu0 %v13322_v42  ;;  %v5237_v42 = vld [vmem:[%s21375_s3 + $0x680] sm:$0xff] }
 0xbbb   : > { %8105 = vmatprep.subr.bf16.mxu0 %v13307_v44  ;;  %v5493_v44 = vld [vmem:[%s21375_s3 + $0xe80] sm:$0xff]  ;;  %v13435_v50 = vcombine.high %v5237_v42, %v5245_v43 }
 0xbbc   : > { %8147 = vmatpush1.bf16.msra.mxu1 %v13562_v54  ;;  %v13691_v53 = vcombine.high %v5493_v44, %v5501_v45  ;;  %v13690_v54 = vcombine.low %v5493_v44, %v5501_v45  ;;  %v5437_v29 = vld [vmem:[%s21375_s3 + $0xcc0] sm:$0xff]  ;;  %v5406_v45 = vld [vmem:[%s21375_s3 + $0xbc8] sm:$0xff] }
 0xbbd   : > { %8148 = vmatprep.subr.bf16.mxu1 %v13547_v56  ;;  %v5421_v36 = vld [vmem:[%s21375_s3 + $0xc40] sm:$0xff] }
 0xbbe   : > { %8106 = vmatpush1.bf16.msra.mxu0 %v13306_v49  ;;  %v13434_v49 = vcombine.low %v5237_v42, %v5245_v43  ;;  %v5150_v42 = vld [vmem:[%s21375_s3 + $0x3c8] sm:$0xff] }
 0xbbf   : > { %8107 = vmatprep.subr.bf16.mxu0 %v13291_v55  ;;  %v5398_v43 = vld [vmem:[%s21375_s3 + $0xb88] sm:$0xff] }
 0xbc0   : > { %8149 = vmatpush1.bf16.msra.mxu1 %v13546_v9 }
 0xbc1   : > { %8150 = vmatprep.subr.bf16.mxu1 %v13531_v63 }
 0xbc2   : > { %8108 = vmatpush1.bf16.msra.mxu0 %v13290_v60 }
 0xbc3   : > { %8109 = vmatprep.subr.bf16.mxu0 %v13275_v62 }
 0xc33   : > { %v4909_v2 = vpop.f32.mrf.mxu1 }
 0xc34   : > { %v17982_v18 = vadd.f32 %v4909_v2, %v4869_v12  ;;  %v5325_v2 = vld [vmem:[%s21375_s3 + $0x940] sm:$0xff] }
 0xc35   : > { %v4911_v3 = vpop.f32.mrf.mxu1  ;;  %v13515_v6 = vcombine.high %v5317_v1, %v5325_v2  ;;  %v5301_v12 = vld [vmem:[%s21375_s3 + $0x880] sm:$0xff] }
 0xc36   : > { %v17979_v13 = vadd.f32 %v4911_v3, %v4871_v7  ;;  %v13274_v3 = vcombine.low %v5077_v57, %v5085_v58  ;;  %v5045_v7 = vld [vmem:[%s21375_s3 + $0x80] sm:$0xff] }
 0xc37   : > { %v4913_v4 = vpop.f32.mrf.mxu1  ;;  %v13243_v20 = vcombine.high %v5045_v7, %v5053_v11 }
 0xc38   : > { %v4998_v22 = vadd.f32 %v17979_v13, %v17982_v18  ;;  %v13530_v4 = vcombine.low %v5333_v59, %v5341_v8  ;;  %8110 = vmatpush1.bf16.msra.mxu0 %v13274_v3 }
 0xc39   : > { %v4914_v5 = vpop.f32.mrf.mxu1 }
 0xc3a   : > { %v13259_v5 = vcombine.high %v5061_v48, %v5069_v0  ;;  %8151 = vmatpush1.bf16.msra.mxu1 %v13530_v4 }
 0xc3b   : > { %8152 = vmatprep.subr.bf16.mxu1 %v13515_v6  ;;  %v5205_v6 = vld [vmem:[%s21375_s3 + $0x580] sm:$0xff] }
 0xc3c   : > { %8111 = vmatprep.subr.bf16.mxu0 %v13259_v5 }
 0xc73   : > { %v4991_v19 = vpop.f32.mrf.mxu1 }
 0xc74   : > { %v17987_v23 = vadd.f32 %v4991_v19, %v4951_v16  ;;  %v13258_v16 = vcombine.low %v5061_v48, %v5069_v0  ;;  %v13514_v19 = vcombine.low %v5317_v1, %v5325_v2  ;;  %v5477_v0 = vld [vmem:[%s21375_s3 + $0xe00] sm:$0xff] }
 0xc75   : > { %v4993_v24 = vpop.f32.mrf.mxu1  ;;  %v5485_v2 = vld [vmem:[%s21375_s3 + $0xe40] sm:$0xff] }
 0xc76   : > { %v4999_v51 = vadd.f32 %v4998_v22, %v17987_v23  ;;  %v17990_v25 = vadd.f32 %v4993_v24, %v4953_v21  ;;  %v13499_v21 = vcombine.high %v5301_v12, %v5309_v14  ;;  %v5029_v22 = vld [vmem:[%s21375_s3] sm:$0xff]  ;;  %8112 = vmatpush1.bf16.msra.mxu0 %v13258_v16  ;;  %8153 = vmatpush1.bf16.msra.mxu1 %v13514_v19 }
 0xc77   : > { %v4995_v26 = vpop.f32.mrf.mxu1  ;;  %v5037_v24 = vld [vmem:[%s21375_s3 + $0x40] sm:$0xff]  ;;  %8113 = vmatprep.subr.bf16.mxu0 %v13243_v20  ;;  %v13674_v4 = vcombine.low %v5477_v0, %v5485_v2  ;;  %v13675_v5 = vcombine.high %v5477_v0, %v5485_v2  ;;  %v5366_v2 = vld [vmem:[%s21375_s3 + $0xa88] sm:$0xff] }
 0xc78   : > { %v5000_v27 = vadd.f32 %v4999_v51, %v17990_v25  ;;  %v5285_v51 = vld [vmem:[%s21375_s3 + $0x800] sm:$0xff]  ;;  %v13227_v61 = vcombine.high %v5029_v22, %v5037_v24  ;;  %8154 = vmatprep.subr.bf16.mxu1 %v13499_v21  ;;  %v13226_v52 = vcombine.low %v5029_v22, %v5037_v24 }
 0xc79   : > { %v4996_v15 = vpop.f32.mrf.mxu1  ;;  %v5293_v26 = vld [vmem:[%s21375_s3 + $0x840] sm:$0xff] }
 0xc7a   : > { %5001 = vadd.xlane.f32.xlu1 %v5000_v27  ;;  %v13242_v27 = vcombine.low %v5045_v7, %v5053_v11  ;;  %v13498_v15 = vcombine.low %v5301_v12, %v5309_v14  ;;  %v13483_v28 = vcombine.high %v5285_v51, %v5293_v26  ;;  %v13482_v33 = vcombine.low %v5285_v51, %v5293_v26  ;;  %v5213_v7 = vld [vmem:[%s21375_s3 + $0x5c0] sm:$0xff] }
 0xc7b   : > { %v5461_v11 = vld [vmem:[%s21375_s3 + $0xd80] sm:$0xff]  ;;  %v13402_v12 = vcombine.low %v5205_v6, %v5213_v7  ;;  %v13403_v14 = vcombine.high %v5205_v6, %v5213_v7 }
 0xc7c   : > { %8114 = vmatpush1.bf16.msra.mxu0 %v13242_v27  ;;  %8155 = vmatpush1.bf16.msra.mxu1 %v13498_v15  ;;  %v5469_v16 = vld [vmem:[%s21375_s3 + $0xdc0] sm:$0xff] }
 0xc7d   : > { %8115 = vmatprep.subr.bf16.mxu0 %v13227_v61  ;;  %8156 = vmatprep.subr.bf16.mxu1 %v13483_v28  ;;  %v5189_v19 = vld [vmem:[%s21375_s3 + $0x500] sm:$0xff]  ;;  %v13658_v21 = vcombine.low %v5461_v11, %v5469_v16  ;;  %v13659_v22 = vcombine.high %v5461_v11, %v5469_v16  ;;  %v5094_v11 = vld [vmem:[%s21375_s3 + $0x208] sm:$0xff] }
 0xc7e   : > { %v5197_v20 = vld [vmem:[%s21375_s3 + $0x540] sm:$0xff]  ;;  %v5358_v16 = vld [vmem:[%s21375_s3 + $0xa48] sm:$0xff] }
 0xc7f   : > { %v13387_v24 = vcombine.high %v5189_v19, %v5197_v20  ;;  %v5445_v51 = vld [vmem:[%s21375_s3 + $0xd00] sm:$0xff]  ;;  %v13386_v30 = vcombine.low %v5189_v19, %v5197_v20 }
 0xc80   : > { %8116 = vmatpush1.bf16.msra.mxu0 %v13226_v52  ;;  %8157 = vmatpush1.bf16.msra.mxu1 %v13482_v33  ;;  %v5453_v26 = vld [vmem:[%s21375_s3 + $0xd40] sm:$0xff] }
 0xc81   : > { %8117 = vmatprep.subr.bf16.mxu0 %v13467_v34  ;;  %8158 = vmatprep.subr.bf16.mxu1 %v13723_v35  ;;  %v5173_v27 = vld [vmem:[%s21375_s3 + $0x480] sm:$0xff]  ;;  %v13643_v15 = vcombine.high %v5445_v51, %v5453_v26  ;;  %v13642_v31 = vcombine.low %v5445_v51, %v5453_v26  ;;  %v5086_v51 = vld [vmem:[%s21375_s3 + $0x1c8] sm:$0xff] }
 0xc82   : > { %v5181_v61 = vld [vmem:[%s21375_s3 + $0x4c0] sm:$0xff]  ;;  %v5334_v26 = vld [vmem:[%s21375_s3 + $0x988] sm:$0xff] }
 0xc83   : > { %v5429_v28 = vld [vmem:[%s21375_s3 + $0xc80] sm:$0xff]  ;;  %v13371_v32 = vcombine.high %v5173_v27, %v5181_v61  ;;  %v13370_v37 = vcombine.low %v5173_v27, %v5181_v61  ;;  %v5342_v27 = vld [vmem:[%s21375_s3 + $0x9c8] sm:$0xff] }
 0xc84   : > { %8118 = vmatpush2.bf16.msra.mxu0 %v13466_v38  ;;  %8159 = vmatpush2.bf16.msra.mxu1 %v13722_v39  ;;  %v13627_v52 = vcombine.high %v5429_v28, %v5437_v29  ;;  %v5157_v33 = vld [vmem:[%s21375_s3 + $0x400] sm:$0xff]  ;;  %v13626_v10 = vcombine.low %v5429_v28, %v5437_v29  ;;  %v13533_v29 = vcombine.high %v5334_v26, %v5342_v27 }
 0xc85   : > { %8119 = vmatprep.subr.bf16.mxu0 %v13451_v40  ;;  %8160 = vmatprep.subr.bf16.mxu1 %v13707_v41  ;;  %v5165_v34 = vld [vmem:[%s21375_s3 + $0x440] sm:$0xff]  ;;  %v5142_v41 = vld [vmem:[%s21375_s3 + $0x388] sm:$0xff] }
 0xc86   : > { %v5413_v35 = vld [vmem:[%s21375_s3 + $0xc00] sm:$0xff]  ;;  %v13355_v17 = vcombine.high %v5157_v33, %v5165_v34  ;;  %v13354_v39 = vcombine.low %v5157_v33, %v5165_v34  ;;  %v13341_v44 = vcombine.high %v5142_v41, %v5150_v42  ;;  %v13532_v34 = vcombine.low %v5334_v26, %v5342_v27  ;;  %v5478_v26 = vld [vmem:[%s21375_s3 + $0xe08] sm:$0xff] }
 0xc87   : > { %v13611_v38 = vcombine.high %v5413_v35, %v5421_v36  ;;  %v13610_v40 = vcombine.low %v5413_v35, %v5421_v36  ;;  %v5486_v27 = vld [vmem:[%s21375_s3 + $0xe48] sm:$0xff] }
 0xc88   : > { %8120 = vmatpush2.bf16.msra.mxu0 %v13450_v46  ;;  %8161 = vmatpush2.bf16.msra.mxu1 %v13706_v47  ;;  %v13340_v46 = vcombine.low %v5142_v41, %v5150_v42  ;;  %v13596_v47 = vcombine.low %v5398_v43, %v5406_v45 }
 0xc89   : > { %8121 = vmatprep.subr.bf16.mxu0 %v13435_v50  ;;  %8162 = vmatprep.subr.bf16.mxu1 %v13691_v53  ;;  %v13597_v50 = vcombine.high %v5398_v43, %v5406_v45  ;;  %v5030_v43 = vld [vmem:[%s21375_s3 + $0x8] sm:$0xff] }
 0xc8a   : > { %v5286_v45 = vld [vmem:[%s21375_s3 + $0x808] sm:$0xff] }
 0xc8c   : > { %8122 = vmatpush2.bf16.msra.mxu0 %v13434_v49  ;;  %8163 = vmatpush2.bf16.msra.mxu1 %v13690_v54 }
 0xc8d   : > { %8164 = vmatprep.subr.bf16.mxu1 %v13675_v5 }
 0xc90   : > { %8165 = vmatpush2.bf16.msra.mxu1 %v13674_v4 }
 0xc91   : > { %8166 = vmatprep.subr.bf16.mxu1 %v13659_v22 }
 0xc94   : > { %8167 = vmatpush2.bf16.msra.mxu1 %v13658_v21 }
 0xc95   : > { %8168 = vmatprep.subr.bf16.mxu1 %v13643_v15 }
 0xc98   : > { %8169 = vmatpush2.bf16.msra.mxu1 %v13642_v31  ;;  %v5070_v31 = vld [vmem:[%s21375_s3 + $0x148] sm:$0xff] }
 0xc99   : > { %8170 = vmatprep.subr.bf16.mxu1 %v13627_v52  ;;  %v5326_v52 = vld [vmem:[%s21375_s3 + $0x948] sm:$0xff] }
 0xc9c   : > { %8171 = vmatpush2.bf16.msra.mxu1 %v13626_v10  ;;  %v5054_v10 = vld [vmem:[%s21375_s3 + $0xc8] sm:$0xff] }
 0xc9d   : > { %8172 = vmatprep.subr.bf16.mxu1 %v13611_v38  ;;  %v5310_v38 = vld [vmem:[%s21375_s3 + $0x8c8] sm:$0xff] }
 0xca0   : > { %8173 = vmatpush2.bf16.msra.mxu1 %v13610_v40 }
 0xca1   : > { %8224 = vmatprep.subr.bf16.mxu1 %v13597_v50 }
 0xd03   : > { %v5002_v55 = vpop.xlane.xlu1 %5001 }
 0xd04   : > { %v5004_v56 = vmul.f32 0.001953125, %v5002_v55 }
 0xd06   : > { %v18126_v57 = vsub.f32 %v17982_v18, %v5004_v56  ;;  %v18129_v58 = vsub.f32 %v17979_v13, %v5004_v56  ;;  %v18132_v59 = vsub.f32 %v17987_v23, %v5004_v56  ;;  %v18135_v8 = vsub.f32 %v17990_v25, %v5004_v56  ;;  %v5221_v23 = vld [vmem:[%s21375_s3 + $0x600] sm:$0xff] }
 0xd07   : > { %v5229_v25 = vld [vmem:[%s21375_s3 + $0x640] sm:$0xff] }
 0xd08   : > { %v5009_v60 = vmul.f32 %v18126_v57, %v18126_v57  ;;  %v5010_v9 = vmul.f32 %v18129_v58, %v18129_v58  ;;  %v5011_v62 = vmul.f32 %v18132_v59, %v18132_v59  ;;  %v5012_v13 = vmul.f32 %v18135_v8, %v18135_v8 }
 0xd09   : > { %v13419_v1 = vcombine.high %v5221_v23, %v5229_v25  ;;  %v13418_v3 = vcombine.low %v5221_v23, %v5229_v25  ;;  %v5110_v23 = vld [vmem:[%s21375_s3 + $0x288] sm:$0xff] }
 0xd0a   : > { %v5013_v18 = vadd.f32 %v5010_v9, %v5009_v60 }
 0xd0b   : > { %8123 = vmatprep.subr.bf16.mxu0 %v13419_v1  ;;  %v5118_v1 = vld [vmem:[%s21375_s3 + $0x2c8] sm:$0xff] }
 0xd0c   : > { %v5014_v63 = vadd.f32 %v5013_v18, %v5011_v62  ;;  %8124 = vmatpush2.bf16.msra.mxu0 %v13418_v3  ;;  %v5126_v18 = vld [vmem:[%s21375_s3 + $0x308] sm:$0xff]  ;;  %v13309_v6 = vcombine.high %v5110_v23, %v5118_v1  ;;  %v13308_v19 = vcombine.low %v5110_v23, %v5118_v1 }
 0xd0d   : > { %8125 = vmatprep.subr.bf16.mxu0 %v13403_v14  ;;  %v5374_v3 = vld [vmem:[%s21375_s3 + $0xac8] sm:$0xff] }
 0xd0e   : > { %v5015_v48 = vadd.f32 %v5014_v63, %v5012_v13  ;;  %v5134_v13 = vld [vmem:[%s21375_s3 + $0x348] sm:$0xff]  ;;  %v13565_v7 = vcombine.high %v5366_v2, %v5374_v3  ;;  %v13564_v20 = vcombine.low %v5366_v2, %v5374_v3 }
 0xd0f   : > { %v13325_v25 = vcombine.high %v5126_v18, %v5134_v13  ;;  %v13324_v4 = vcombine.low %v5126_v18, %v5134_v13  ;;  %v5350_v14 = vld [vmem:[%s21375_s3 + $0xa08] sm:$0xff] }
 0xd10   : > { %5016 = vadd.xlane.f32.xlu0 %v5015_v48  ;;  %8126 = vmatpush2.bf16.msra.mxu0 %v13402_v12  ;;  %v5102_v12 = vld [vmem:[%s21375_s3 + $0x248] sm:$0xff]  ;;  %v13549_v22 = vcombine.high %v5350_v14, %v5358_v16  ;;  %v13548_v61 = vcombine.low %v5350_v14, %v5358_v16 }
 0xd11   : > { %8127 = vmatprep.subr.bf16.mxu0 %v13387_v24  ;;  %v13293_v21 = vcombine.high %v5094_v11, %v5102_v12  ;;  %v5078_v24 = vld [vmem:[%s21375_s3 + $0x188] sm:$0xff]  ;;  %v13292_v15 = vcombine.low %v5094_v11, %v5102_v12 }
 0xd12   : > { %v13277_v28 = vcombine.high %v5078_v24, %v5086_v51  ;;  %v13276_v33 = vcombine.low %v5078_v24, %v5086_v51  ;;  %v5526_v18 = vld [vmem:[%s21375_s3 + $0xf88] sm:$0xff] }
 0xd13   : > { %v5534_v13 = vld [vmem:[%s21375_s3 + $0xfc8] sm:$0xff] }
 0xd14   : > { %8128 = vmatpush2.bf16.msra.mxu0 %v13386_v30  ;;  %v5062_v30 = vld [vmem:[%s21375_s3 + $0x108] sm:$0xff] }
 0xd15   : > { %8129 = vmatprep.subr.bf16.mxu0 %v13371_v32  ;;  %v5318_v32 = vld [vmem:[%s21375_s3 + $0x908] sm:$0xff]  ;;  %v13261_v35 = vcombine.high %v5062_v30, %v5070_v31 }
 0xd16   : > { %v13517_v36 = vcombine.high %v5318_v32, %v5326_v52  ;;  %v13516_v40 = vcombine.low %v5318_v32, %v5326_v52  ;;  %v5262_v1 = vld [vmem:[%s21375_s3 + $0x748] sm:$0xff] }
 0xd17   : > { %v5510_v2 = vld [vmem:[%s21375_s3 + $0xf08] sm:$0xff] }
 0xd18   : > { %8130 = vmatpush2.bf16.msra.mxu0 %v13370_v37  ;;  %v5046_v37 = vld [vmem:[%s21375_s3 + $0x88] sm:$0xff] }
 0xd19   : > { %8131 = vmatprep.subr.bf16.mxu0 %v13355_v17  ;;  %v5302_v17 = vld [vmem:[%s21375_s3 + $0x888] sm:$0xff]  ;;  %v13245_v41 = vcombine.high %v5046_v37, %v5054_v10 }
 0xd1a   : > { %v13501_v42 = vcombine.high %v5302_v17, %v5310_v38  ;;  %v13500_v50 = vcombine.low %v5302_v17, %v5310_v38  ;;  %v5518_v3 = vld [vmem:[%s21375_s3 + $0xf48] sm:$0xff] }
 0xd1b   : > { %v5238_v11 = vld [vmem:[%s21375_s3 + $0x688] sm:$0xff] }
 0xd1c   : > { %8132 = vmatpush2.bf16.msra.mxu0 %v13354_v39  ;;  %v13260_v39 = vcombine.low %v5062_v30, %v5070_v31  ;;  %v5246_v12 = vld [vmem:[%s21375_s3 + $0x6c8] sm:$0xff] }
 0xd1d   : > { %8183 = vmatprep.subr.bf16.mxu0 %v13341_v44  ;;  %v5038_v44 = vld [vmem:[%s21375_s3 + $0x48] sm:$0xff] }
 0xd1e   : > { %v5494_v14 = vld [vmem:[%s21375_s3 + $0xe88] sm:$0xff] }
 0xd1f   : > { %v5502_v16 = vld [vmem:[%s21375_s3 + $0xec8] sm:$0xff] }
 0xd20   : > { %v5222_v24 = vld [vmem:[%s21375_s3 + $0x608] sm:$0xff] }
 0xd21   : > { %v5230_v51 = vld [vmem:[%s21375_s3 + $0x648] sm:$0xff] }
 0xd22   : > { %v5206_v30 = vld [vmem:[%s21375_s3 + $0x588] sm:$0xff] }
 0xd23   : > { %v5214_v31 = vld [vmem:[%s21375_s3 + $0x5c8] sm:$0xff] }
 0xd24   : > { %v5462_v32 = vld [vmem:[%s21375_s3 + $0xd88] sm:$0xff] }
 0xd25   : > { %v5470_v52 = vld [vmem:[%s21375_s3 + $0xdc8] sm:$0xff] }
 0xd26   : > { %v5446_v17 = vld [vmem:[%s21375_s3 + $0xd08] sm:$0xff] }
 0xd27   : > { %v5454_v38 = vld [vmem:[%s21375_s3 + $0xd48] sm:$0xff] }
 0xd99   : > { %v5017_v53 = vpop.xlane.xlu0 %5016 }
 0xd9a   : > { %v5018_v49 = vmul.f32 0.001953125, %v5017_v53  ;;  %v13229_v53 = vcombine.high %v5030_v43, %v5038_v44 }
 0xd9c   : > { %v5019_v54 = vadd.f32 1e-05, %v5018_v49 }
 0xd9e   : > { %16026 = vrsqrt.f32 %v5019_v54  ;;  %v5270_v54 = vld [vmem:[%s21375_s3 + $0x788] sm:$0xff] }
 0xdab   : > { %v16027_v55 = vpop.eup %16026 }
 0xdac   : > { %v18218_v56 = vmul.f32 %v16027_v55, %v18129_v58  ;;  %v18221_v60 = vmul.f32 %v16027_v55, %v18135_v8  ;;  %v18224_v9 = vmul.f32 %v16027_v55, %v18126_v57  ;;  %v18227_v62 = vmul.f32 %v16027_v55, %v18132_v59  ;;  %v5382_v58 = vld [vmem:[%s21375_s3 + $0xb08] sm:$0xff] }
 0xdad   : > { %v5390_v57 = vld [vmem:[%s21375_s3 + $0xb48] sm:$0xff] }
 0xdae   : > { %v18243_v59 = vpack.c.bf16 %v18218_v56, %v18218_v56  ;;  %v18247_v8 = vpack.c.bf16 %v18221_v60, %v18221_v60  ;;  %v18251_v63 = vpack.c.bf16 %v18224_v9, %v18224_v9  ;;  %v18255_v48 = vpack.c.bf16 %v18227_v62, %v18227_v62  ;;  %v5278_v55 = vld [vmem:[%s21375_s3 + $0x7c8] sm:$0xff] }
 0xdaf   : > { %v13581_v0 = vcombine.high %v5382_v58, %v5390_v57  ;;  %v13580_v5 = vcombine.low %v5382_v58, %v5390_v57  ;;  %v13228_v58 = vcombine.low %v5030_v43, %v5038_v44  ;;  %v13469_v23 = vcombine.high %v5270_v54, %v5278_v55  ;;  %v5174_v43 = vld [vmem:[%s21375_s3 + $0x488] sm:$0xff] }
 0xdb0   : > { %8133 = vmatprep.mubr.bf16.mxu0 %v18243_v59  ;;  %8174 = vmatprep.mubr.bf16.mxu1 %v18247_v8  ;;  %v5182_v44 = vld [vmem:[%s21375_s3 + $0x4c8] sm:$0xff] }
 0xdb1   : > { %8134 = vmatmul.mubr.bf16.vlgmr.msra.gmra.mxu0 %v18251_v63  ;;  %8175 = vmatmul.mubr.bf16.vlgmr.msra.gmra.mxu1 %v18255_v48 }
 0xdb2   : > { %8184 = vmatpush1.bf16.msra.mxu0 %v13340_v46  ;;  %8225 = vmatpush1.bf16.msra.mxu1 %v13596_v47  ;;  %v5294_v46 = vld [vmem:[%s21375_s3 + $0x848] sm:$0xff]  ;;  %v13244_v47 = vcombine.low %v5046_v37, %v5054_v10 }
 0xdb3   : > { %8215 = vmatprep.mubr.bf16.mxu0 %v18243_v59  ;;  %8256 = vmatprep.mubr.bf16.mxu1 %v18247_v8  ;;  %v13485_v49 = vcombine.high %v5286_v45, %v5294_v46  ;;  %v13484_v57 = vcombine.low %v5286_v45, %v5294_v46  ;;  %v5190_v37 = vld [vmem:[%s21375_s3 + $0x508] sm:$0xff] }
 0xdb4   : > { %8185 = vmatprep.subr.bf16.mxu0 %v13325_v25  ;;  %8226 = vmatprep.subr.bf16.mxu1 %v13581_v0  ;;  %v13725_v25 = vcombine.high %v5526_v18, %v5534_v13  ;;  %v5254_v0 = vld [vmem:[%s21375_s3 + $0x708] sm:$0xff] }
 0xdb5   : > { %v5198_v10 = vld [vmem:[%s21375_s3 + $0x548] sm:$0xff] }
 0xdb6   : > { %8186 = vmatpush1.bf16.msra.mxu0 %v13324_v4  ;;  %8227 = vmatpush1.bf16.msra.mxu1 %v13580_v5  ;;  %v13468_v4 = vcombine.low %v5270_v54, %v5278_v55  ;;  %v13724_v5 = vcombine.low %v5526_v18, %v5534_v13  ;;  %v5430_v45 = vld [vmem:[%s21375_s3 + $0xc88] sm:$0xff] }
 0xdb7   : > { %8187 = vmatprep.subr.bf16.mxu0 %v13309_v6  ;;  %8228 = vmatprep.subr.bf16.mxu1 %v13565_v7  ;;  %v13453_v6 = vcombine.high %v5254_v0, %v5262_v1  ;;  %v13709_v7 = vcombine.high %v5510_v2, %v5518_v3  ;;  %v5438_v46 = vld [vmem:[%s21375_s3 + $0xcc8] sm:$0xff] }
 0xdb8   : > { %v5158_v54 = vld [vmem:[%s21375_s3 + $0x408] sm:$0xff] }
 0xdb9   : > { %v5166_v55 = vld [vmem:[%s21375_s3 + $0x448] sm:$0xff] }
 0xdba   : > { %8188 = vmatpush1.bf16.msra.mxu0 %v13308_v19  ;;  %8229 = vmatpush1.bf16.msra.mxu1 %v13564_v20  ;;  %v13452_v19 = vcombine.low %v5254_v0, %v5262_v1  ;;  %v13708_v20 = vcombine.low %v5510_v2, %v5518_v3  ;;  %v5414_v18 = vld [vmem:[%s21375_s3 + $0xc08] sm:$0xff]  ;;  %v5143_v0 = vld [vmem:[%s21375_s3 + $0x390] sm:$0xff] }
 0xdbb   : > { %8189 = vmatprep.subr.bf16.mxu0 %v13293_v21  ;;  %8230 = vmatprep.subr.bf16.mxu1 %v13549_v22  ;;  %v13437_v21 = vcombine.high %v5238_v11, %v5246_v12  ;;  %v13693_v22 = vcombine.high %v5494_v14, %v5502_v16  ;;  %v5422_v13 = vld [vmem:[%s21375_s3 + $0xc48] sm:$0xff]  ;;  %v5151_v1 = vld [vmem:[%s21375_s3 + $0x3d0] sm:$0xff] }
 0xdbc   : > { %v5399_v2 = vld [vmem:[%s21375_s3 + $0xb90] sm:$0xff] }
 0xdbd   : > { %v5407_v3 = vld [vmem:[%s21375_s3 + $0xbd0] sm:$0xff] }
 0xdbe   : > { %8190 = vmatpush1.bf16.msra.mxu0 %v13292_v15  ;;  %8231 = vmatpush1.bf16.msra.mxu1 %v13548_v61  ;;  %v13436_v15 = vcombine.low %v5238_v11, %v5246_v12  ;;  %v13692_v61 = vcombine.low %v5494_v14, %v5502_v16  ;;  %v5127_v11 = vld [vmem:[%s21375_s3 + $0x310] sm:$0xff] }
 0xdbf   : > { %8191 = vmatprep.subr.bf16.mxu0 %v13277_v28  ;;  %8232 = vmatprep.subr.bf16.mxu1 %v13533_v29  ;;  %v13421_v28 = vcombine.high %v5222_v24, %v5230_v51  ;;  %v13677_v29 = vcombine.high %v5478_v26, %v5486_v27  ;;  %v5135_v12 = vld [vmem:[%s21375_s3 + $0x350] sm:$0xff] }
 0xdc0   : > { %v5383_v14 = vld [vmem:[%s21375_s3 + $0xb10] sm:$0xff] }
 0xdc1   : > { %v5391_v16 = vld [vmem:[%s21375_s3 + $0xb50] sm:$0xff] }
 0xdc2   : > { %8192 = vmatpush1.bf16.msra.mxu0 %v13276_v33  ;;  %8233 = vmatpush1.bf16.msra.mxu1 %v13532_v34  ;;  %v13420_v33 = vcombine.low %v5222_v24, %v5230_v51  ;;  %v13676_v34 = vcombine.low %v5478_v26, %v5486_v27  ;;  %v5111_v24 = vld [vmem:[%s21375_s3 + $0x290] sm:$0xff] }
 0xdc3   : > { %8193 = vmatprep.subr.bf16.mxu0 %v13261_v35  ;;  %8234 = vmatprep.subr.bf16.mxu1 %v13517_v36  ;;  %v13405_v35 = vcombine.high %v5206_v30, %v5214_v31  ;;  %v13661_v36 = vcombine.high %v5462_v32, %v5470_v52  ;;  %v5119_v51 = vld [vmem:[%s21375_s3 + $0x2d0] sm:$0xff] }
 0xdc4   : > { %v5367_v26 = vld [vmem:[%s21375_s3 + $0xa90] sm:$0xff] }
 0xdc5   : > { %v5375_v27 = vld [vmem:[%s21375_s3 + $0xad0] sm:$0xff] }
 0xdc6   : > { %8194 = vmatpush1.bf16.msra.mxu0 %v13260_v39  ;;  %8235 = vmatpush1.bf16.msra.mxu1 %v13516_v40  ;;  %v13404_v39 = vcombine.low %v5206_v30, %v5214_v31  ;;  %v13660_v40 = vcombine.low %v5462_v32, %v5470_v52  ;;  %v5095_v30 = vld [vmem:[%s21375_s3 + $0x210] sm:$0xff] }
 0xdc7   : > { %8195 = vmatprep.subr.bf16.mxu0 %v13245_v41  ;;  %8236 = vmatprep.subr.bf16.mxu1 %v13501_v42  ;;  %v13389_v41 = vcombine.high %v5190_v37, %v5198_v10  ;;  %v13645_v42 = vcombine.high %v5446_v17, %v5454_v38  ;;  %v5103_v31 = vld [vmem:[%s21375_s3 + $0x250] sm:$0xff] }
 0xdc8   : > { %v5351_v32 = vld [vmem:[%s21375_s3 + $0xa10] sm:$0xff] }
 0xdc9   : > { %v5359_v52 = vld [vmem:[%s21375_s3 + $0xa50] sm:$0xff] }
 0xdca   : > { %8196 = vmatpush1.bf16.msra.mxu0 %v13244_v47  ;;  %8237 = vmatpush1.bf16.msra.mxu1 %v13500_v50  ;;  %v13388_v47 = vcombine.low %v5190_v37, %v5198_v10  ;;  %v13644_v50 = vcombine.low %v5446_v17, %v5454_v38  ;;  %v5079_v37 = vld [vmem:[%s21375_s3 + $0x190] sm:$0xff] }
 0xdcb   : > { %8197 = vmatprep.subr.bf16.mxu0 %v13229_v53  ;;  %8238 = vmatprep.subr.bf16.mxu1 %v13485_v49  ;;  %v13373_v53 = vcombine.high %v5174_v43, %v5182_v44  ;;  %v13629_v49 = vcombine.high %v5430_v45, %v5438_v46  ;;  %v5087_v10 = vld [vmem:[%s21375_s3 + $0x1d0] sm:$0xff] }
 0xdcc   : > { %v5335_v17 = vld [vmem:[%s21375_s3 + $0x990] sm:$0xff] }
 0xdcd   : > { %v5343_v38 = vld [vmem:[%s21375_s3 + $0x9d0] sm:$0xff] }
 0xdce   : > { %8198 = vmatpush1.bf16.msra.mxu0 %v13228_v58  ;;  %8239 = vmatpush1.bf16.msra.mxu1 %v13484_v57  ;;  %v13372_v58 = vcombine.low %v5174_v43, %v5182_v44  ;;  %v13628_v57 = vcombine.low %v5430_v45, %v5438_v46  ;;  %v5063_v43 = vld [vmem:[%s21375_s3 + $0x110] sm:$0xff] }
 0xdcf   : > { %8199 = vmatprep.subr.bf16.mxu0 %v13469_v23  ;;  %8240 = vmatprep.subr.bf16.mxu1 %v13725_v25  ;;  %v13357_v23 = vcombine.high %v5158_v54, %v5166_v55  ;;  %v13613_v25 = vcombine.high %v5414_v18, %v5422_v13  ;;  %v5071_v44 = vld [vmem:[%s21375_s3 + $0x150] sm:$0xff] }
 0xdd0   : > { %v5319_v45 = vld [vmem:[%s21375_s3 + $0x910] sm:$0xff] }
 0xdd1   : > { %v5327_v46 = vld [vmem:[%s21375_s3 + $0x950] sm:$0xff] }
 0xdd2   : > { %8200 = vmatpush2.bf16.msra.mxu0 %v13468_v4  ;;  %8241 = vmatpush2.bf16.msra.mxu1 %v13724_v5  ;;  %v13356_v4 = vcombine.low %v5158_v54, %v5166_v55  ;;  %v13612_v5 = vcombine.low %v5414_v18, %v5422_v13  ;;  %v5047_v54 = vld [vmem:[%s21375_s3 + $0x90] sm:$0xff] }
 0xdd3   : > { %8201 = vmatprep.subr.bf16.mxu0 %v13453_v6  ;;  %8242 = vmatprep.subr.bf16.mxu1 %v13709_v7  ;;  %v13343_v6 = vcombine.high %v5143_v0, %v5151_v1  ;;  %v13599_v7 = vcombine.high %v5399_v2, %v5407_v3  ;;  %v5055_v55 = vld [vmem:[%s21375_s3 + $0xd0] sm:$0xff] }
 0xdd4   : > { %v5303_v18 = vld [vmem:[%s21375_s3 + $0x890] sm:$0xff] }
 0xdd5   : > { %v5311_v13 = vld [vmem:[%s21375_s3 + $0x8d0] sm:$0xff] }
 0xdd6   : > { %8202 = vmatpush2.bf16.msra.mxu0 %v13452_v19  ;;  %8243 = vmatpush2.bf16.msra.mxu1 %v13708_v20  ;;  %v13342_v19 = vcombine.low %v5143_v0, %v5151_v1  ;;  %v13598_v20 = vcombine.low %v5399_v2, %v5407_v3  ;;  %v5031_v0 = vld [vmem:[%s21375_s3 + $0x10] sm:$0xff] }
 0xdd7   : > { %8203 = vmatprep.subr.bf16.mxu0 %v13437_v21  ;;  %8244 = vmatprep.subr.bf16.mxu1 %v13693_v22  ;;  %v13327_v21 = vcombine.high %v5127_v11, %v5135_v12  ;;  %v13583_v22 = vcombine.high %v5383_v14, %v5391_v16  ;;  %v5039_v1 = vld [vmem:[%s21375_s3 + $0x50] sm:$0xff] }
 0xdd8   : > { %v5287_v2 = vld [vmem:[%s21375_s3 + $0x810] sm:$0xff] }
 0xdd9   : > { %v5295_v3 = vld [vmem:[%s21375_s3 + $0x850] sm:$0xff] }
 0xdda   : > { %8204 = vmatpush2.bf16.msra.mxu0 %v13436_v15  ;;  %8245 = vmatpush2.bf16.msra.mxu1 %v13692_v61  ;;  %v13326_v15 = vcombine.low %v5127_v11, %v5135_v12  ;;  %v13582_v61 = vcombine.low %v5383_v14, %v5391_v16  ;;  %v5271_v11 = vld [vmem:[%s21375_s3 + $0x790] sm:$0xff] }
 0xddb   : > { %8205 = vmatprep.subr.bf16.mxu0 %v13421_v28  ;;  %8246 = vmatprep.subr.bf16.mxu1 %v13677_v29  ;;  %v13311_v28 = vcombine.high %v5111_v24, %v5119_v51  ;;  %v13567_v29 = vcombine.high %v5367_v26, %v5375_v27  ;;  %v5279_v12 = vld [vmem:[%s21375_s3 + $0x7d0] sm:$0xff] }
 0xddc   : > { %v5527_v14 = vld [vmem:[%s21375_s3 + $0xf90] sm:$0xff] }
 0xddd   : > { %v5535_v16 = vld [vmem:[%s21375_s3 + $0xfd0] sm:$0xff] }
 0xdde   : > { %8206 = vmatpush2.bf16.msra.mxu0 %v13420_v33  ;;  %8247 = vmatpush2.bf16.msra.mxu1 %v13676_v34  ;;  %v13310_v33 = vcombine.low %v5111_v24, %v5119_v51  ;;  %v13566_v34 = vcombine.low %v5367_v26, %v5375_v27  ;;  %v5255_v24 = vld [vmem:[%s21375_s3 + $0x710] sm:$0xff] }
 0xddf   : > { %8207 = vmatprep.subr.bf16.mxu0 %v13405_v35  ;;  %8248 = vmatprep.subr.bf16.mxu1 %v13661_v36  ;;  %v13295_v35 = vcombine.high %v5095_v30, %v5103_v31  ;;  %v13551_v36 = vcombine.high %v5351_v32, %v5359_v52  ;;  %v5263_v51 = vld [vmem:[%s21375_s3 + $0x750] sm:$0xff] }
 0xde0   : > { %v5511_v26 = vld [vmem:[%s21375_s3 + $0xf10] sm:$0xff] }
 0xde1   : > { %v5519_v27 = vld [vmem:[%s21375_s3 + $0xf50] sm:$0xff] }
 0xde2   : > { %8208 = vmatpush2.bf16.msra.mxu0 %v13404_v39  ;;  %8249 = vmatpush2.bf16.msra.mxu1 %v13660_v40  ;;  %v13294_v39 = vcombine.low %v5095_v30, %v5103_v31  ;;  %v13550_v40 = vcombine.low %v5351_v32, %v5359_v52  ;;  %v5239_v30 = vld [vmem:[%s21375_s3 + $0x690] sm:$0xff] }
 0xde3   : > { %8209 = vmatprep.subr.bf16.mxu0 %v13389_v41  ;;  %8250 = vmatprep.subr.bf16.mxu1 %v13645_v42  ;;  %v13279_v41 = vcombine.high %v5079_v37, %v5087_v10  ;;  %v13535_v42 = vcombine.high %v5335_v17, %v5343_v38  ;;  %v5247_v31 = vld [vmem:[%s21375_s3 + $0x6d0] sm:$0xff] }
 0xde4   : > { %v5495_v32 = vld [vmem:[%s21375_s3 + $0xe90] sm:$0xff] }
 0xde5   : > { %v5503_v52 = vld [vmem:[%s21375_s3 + $0xed0] sm:$0xff] }
 0xde6   : > { %8210 = vmatpush2.bf16.msra.mxu0 %v13388_v47  ;;  %8251 = vmatpush2.bf16.msra.mxu1 %v13644_v50  ;;  %v13278_v47 = vcombine.low %v5079_v37, %v5087_v10  ;;  %v13534_v50 = vcombine.low %v5335_v17, %v5343_v38  ;;  %v5223_v37 = vld [vmem:[%s21375_s3 + $0x610] sm:$0xff] }
 0xde7   : > { %8211 = vmatprep.subr.bf16.mxu0 %v13373_v53  ;;  %8252 = vmatprep.subr.bf16.mxu1 %v13629_v49  ;;  %v13263_v53 = vcombine.high %v5063_v43, %v5071_v44  ;;  %v13519_v49 = vcombine.high %v5319_v45, %v5327_v46  ;;  %v5231_v10 = vld [vmem:[%s21375_s3 + $0x650] sm:$0xff] }
 0xde8   : > { %v5479_v17 = vld [vmem:[%s21375_s3 + $0xe10] sm:$0xff] }
 0xde9   : > { %v5487_v38 = vld [vmem:[%s21375_s3 + $0xe50] sm:$0xff] }
 0xdea   : > { %8212 = vmatpush2.bf16.msra.mxu0 %v13372_v58  ;;  %8253 = vmatpush2.bf16.msra.mxu1 %v13628_v57  ;;  %v13262_v58 = vcombine.low %v5063_v43, %v5071_v44  ;;  %v13518_v57 = vcombine.low %v5319_v45, %v5327_v46  ;;  %v5207_v43 = vld [vmem:[%s21375_s3 + $0x590] sm:$0xff] }
 0xdeb   : > { %8213 = vmatprep.subr.bf16.mxu0 %v13357_v23  ;;  %8254 = vmatprep.subr.bf16.mxu1 %v13613_v25  ;;  %v13247_v23 = vcombine.high %v5047_v54, %v5055_v55  ;;  %v13503_v25 = vcombine.high %v5303_v18, %v5311_v13  ;;  %v5215_v44 = vld [vmem:[%s21375_s3 + $0x5d0] sm:$0xff] }
 0xdec   : > { %v5463_v45 = vld [vmem:[%s21375_s3 + $0xd90] sm:$0xff] }
 0xded   : > { %v5471_v46 = vld [vmem:[%s21375_s3 + $0xdd0] sm:$0xff] }
 0xdee   : > { %8214 = vmatpush2.bf16.msra.mxu0 %v13356_v4  ;;  %8255 = vmatpush2.bf16.msra.mxu1 %v13612_v5  ;;  %v13246_v4 = vcombine.low %v5047_v54, %v5055_v55  ;;  %v13502_v5 = vcombine.low %v5303_v18, %v5311_v13  ;;  %v5191_v54 = vld [vmem:[%s21375_s3 + $0x510] sm:$0xff] }
 0xdef   : > { %8265 = vmatprep.subr.bf16.mxu0 %v13343_v6  ;;  %8306 = vmatprep.subr.bf16.mxu1 %v13599_v7  ;;  %v13231_v6 = vcombine.high %v5031_v0, %v5039_v1  ;;  %v13487_v7 = vcombine.high %v5287_v2, %v5295_v3  ;;  %v5199_v55 = vld [vmem:[%s21375_s3 + $0x550] sm:$0xff] }
 0xdf0   : > { %v5447_v18 = vld [vmem:[%s21375_s3 + $0xd10] sm:$0xff] }
 0xdf1   : > { %8216 = vmatmul.mubr.bf16.vlgmr.msra.gmra.mxu0 %v18251_v63  ;;  %8257 = vmatmul.mubr.bf16.vlgmr.msra.gmra.mxu1 %v18255_v48  ;;  %v5455_v13 = vld [vmem:[%s21375_s3 + $0xd50] sm:$0xff] }
 0xdf2   : > { %8266 = vmatpush1.bf16.msra.mxu0 %v13342_v19  ;;  %8297 = vmatprep.mubr.bf16.mxu0 %v18243_v59  ;;  %v13230_v19 = vcombine.low %v5031_v0, %v5039_v1  ;;  %v5175_v0 = vld [vmem:[%s21375_s3 + $0x490] sm:$0xff] }
 0xdf3   : > { %8307 = vmatpush1.bf16.msra.mxu1 %v13598_v20  ;;  %8338 = vmatprep.mubr.bf16.mxu1 %v18247_v8  ;;  %v13486_v20 = vcombine.low %v5287_v2, %v5295_v3  ;;  %v5183_v1 = vld [vmem:[%s21375_s3 + $0x4d0] sm:$0xff] }
 0xdf4   : > { %8267 = vmatprep.subr.bf16.mxu0 %v13327_v21  ;;  %8308 = vmatprep.subr.bf16.mxu1 %v13583_v22  ;;  %v13471_v21 = vcombine.high %v5271_v11, %v5279_v12  ;;  %v13727_v22 = vcombine.high %v5527_v14, %v5535_v16  ;;  %v5431_v2 = vld [vmem:[%s21375_s3 + $0xc90] sm:$0xff] }
 0xdf5   : > { %v5439_v3 = vld [vmem:[%s21375_s3 + $0xcd0] sm:$0xff] }
 0xdf6   : > { %8268 = vmatpush1.bf16.msra.mxu0 %v13326_v15  ;;  %v13470_v15 = vcombine.low %v5271_v11, %v5279_v12  ;;  %v5159_v11 = vld [vmem:[%s21375_s3 + $0x410] sm:$0xff] }
 0xdf7   : > { %8309 = vmatpush1.bf16.msra.mxu1 %v13582_v61  ;;  %8269 = vmatprep.subr.bf16.mxu0 %v13311_v28  ;;  %v13726_v61 = vcombine.low %v5527_v14, %v5535_v16  ;;  %v13455_v28 = vcombine.high %v5255_v24, %v5263_v51  ;;  %v5167_v12 = vld [vmem:[%s21375_s3 + $0x450] sm:$0xff] }
 0xdf8   : > { %8310 = vmatprep.subr.bf16.mxu1 %v13567_v29  ;;  %v13711_v29 = vcombine.high %v5511_v26, %v5519_v27  ;;  %v5415_v14 = vld [vmem:[%s21375_s3 + $0xc10] sm:$0xff] }
 0xdf9   : > { %v5423_v16 = vld [vmem:[%s21375_s3 + $0xc50] sm:$0xff] }
 0xdfa   : > { %8270 = vmatpush1.bf16.msra.mxu0 %v13310_v33  ;;  %v13454_v33 = vcombine.low %v5255_v24, %v5263_v51  ;;  %v5144_v24 = vld [vmem:[%s21375_s3 + $0x398] sm:$0xff] }
 0xdfb   : > { %8311 = vmatpush1.bf16.msra.mxu1 %v13566_v34  ;;  %8271 = vmatprep.subr.bf16.mxu0 %v13295_v35  ;;  %v13710_v34 = vcombine.low %v5511_v26, %v5519_v27  ;;  %v13439_v35 = vcombine.high %v5239_v30, %v5247_v31  ;;  %v5152_v51 = vld [vmem:[%s21375_s3 + $0x3d8] sm:$0xff] }
 0xdfc   : > { %8312 = vmatprep.subr.bf16.mxu1 %v13551_v36  ;;  %v13695_v36 = vcombine.high %v5495_v32, %v5503_v52  ;;  %v5400_v26 = vld [vmem:[%s21375_s3 + $0xb98] sm:$0xff] }
 0xdfd   : > { %v5408_v27 = vld [vmem:[%s21375_s3 + $0xbd8] sm:$0xff] }
 0xdfe   : > { %8272 = vmatpush1.bf16.msra.mxu0 %v13294_v39  ;;  %v13438_v39 = vcombine.low %v5239_v30, %v5247_v31  ;;  %v5128_v30 = vld [vmem:[%s21375_s3 + $0x318] sm:$0xff] }
 0xdff   : > { %8313 = vmatpush1.bf16.msra.mxu1 %v13550_v40  ;;  %8273 = vmatprep.subr.bf16.mxu0 %v13279_v41  ;;  %v13694_v40 = vcombine.low %v5495_v32, %v5503_v52  ;;  %v13423_v41 = vcombine.high %v5223_v37, %v5231_v10  ;;  %v5136_v31 = vld [vmem:[%s21375_s3 + $0x358] sm:$0xff]  ;;  %v13344_v32 = vcombine.low %v5144_v24, %v5152_v51 }
 0xe00   : > { %8314 = vmatprep.subr.bf16.mxu1 %v13535_v42  ;;  %v13679_v42 = vcombine.high %v5479_v17, %v5487_v38  ;;  %v5384_v52 = vld [vmem:[%s21375_s3 + $0xb18] sm:$0xff] }
 0xe02   : > { %8274 = vmatpush1.bf16.msra.mxu0 %v13278_v47  ;;  %v13422_v47 = vcombine.low %v5223_v37, %v5231_v10  ;;  %v5120_v37 = vld [vmem:[%s21375_s3 + $0x2d8] sm:$0xff] }
 0xe03   : > { %8315 = vmatpush1.bf16.msra.mxu1 %v13534_v50  ;;  %8275 = vmatprep.subr.bf16.mxu0 %v13263_v53  ;;  %v13678_v50 = vcombine.low %v5479_v17, %v5487_v38  ;;  %v13407_v53 = vcombine.high %v5207_v43, %v5215_v44  ;;  %v5368_v17 = vld [vmem:[%s21375_s3 + $0xa98] sm:$0xff] }
 0xe04   : > { %8316 = vmatprep.subr.bf16.mxu1 %v13519_v49  ;;  %v13663_v49 = vcombine.high %v5463_v45, %v5471_v46  ;;  %v5376_v38 = vld [vmem:[%s21375_s3 + $0xad8] sm:$0xff] }
 0xe06   : > { %8276 = vmatpush1.bf16.msra.mxu0 %v13262_v58  ;;  %v13406_v58 = vcombine.low %v5207_v43, %v5215_v44  ;;  %v5096_v43 = vld [vmem:[%s21375_s3 + $0x218] sm:$0xff] }
 0xe07   : > { %8317 = vmatpush1.bf16.msra.mxu1 %v13518_v57  ;;  %8277 = vmatprep.subr.bf16.mxu0 %v13247_v23  ;;  %v13662_v57 = vcombine.low %v5463_v45, %v5471_v46  ;;  %v13391_v23 = vcombine.high %v5191_v54, %v5199_v55  ;;  %v5104_v44 = vld [vmem:[%s21375_s3 + $0x258] sm:$0xff] }
 0xe08   : > { %8318 = vmatprep.subr.bf16.mxu1 %v13503_v25  ;;  %v13647_v25 = vcombine.high %v5447_v18, %v5455_v13  ;;  %v5352_v45 = vld [vmem:[%s21375_s3 + $0xa18] sm:$0xff] }
 0xe09   : > { %v5360_v46 = vld [vmem:[%s21375_s3 + $0xa58] sm:$0xff] }
 0xe0a   : > { %8278 = vmatpush1.bf16.msra.mxu0 %v13246_v4  ;;  %v13390_v4 = vcombine.low %v5191_v54, %v5199_v55  ;;  %v5080_v54 = vld [vmem:[%s21375_s3 + $0x198] sm:$0xff] }
 0xe0b   : > { %8319 = vmatpush1.bf16.msra.mxu1 %v13502_v5  ;;  %8279 = vmatprep.subr.bf16.mxu0 %v13231_v6  ;;  %v13646_v5 = vcombine.low %v5447_v18, %v5455_v13  ;;  %v13375_v6 = vcombine.high %v5175_v0, %v5183_v1  ;;  %v5088_v55 = vld [vmem:[%s21375_s3 + $0x1d8] sm:$0xff] }
 0xe0c   : > { %8320 = vmatprep.subr.bf16.mxu1 %v13487_v7  ;;  %v13631_v7 = vcombine.high %v5431_v2, %v5439_v3  ;;  %v5336_v18 = vld [vmem:[%s21375_s3 + $0x998] sm:$0xff] }
 0xe0d   : > { %v5344_v13 = vld [vmem:[%s21375_s3 + $0x9d8] sm:$0xff] }
 0xe0e   : > { %8280 = vmatpush1.bf16.msra.mxu0 %v13230_v19  ;;  %v13374_v19 = vcombine.low %v5175_v0, %v5183_v1  ;;  %v5064_v0 = vld [vmem:[%s21375_s3 + $0x118] sm:$0xff] }
 0xe0f   : > { %8321 = vmatpush1.bf16.msra.mxu1 %v13486_v20  ;;  %8281 = vmatprep.subr.bf16.mxu0 %v13471_v21  ;;  %v13630_v20 = vcombine.low %v5431_v2, %v5439_v3  ;;  %v13359_v21 = vcombine.high %v5159_v11, %v5167_v12  ;;  %v5072_v1 = vld [vmem:[%s21375_s3 + $0x158] sm:$0xff] }
 0xe10   : > { %8322 = vmatprep.subr.bf16.mxu1 %v13727_v22  ;;  %v13615_v22 = vcombine.high %v5415_v14, %v5423_v16  ;;  %v5320_v2 = vld [vmem:[%s21375_s3 + $0x918] sm:$0xff] }
 0xe11   : > { %v5328_v3 = vld [vmem:[%s21375_s3 + $0x958] sm:$0xff] }
 0xe12   : > { %8282 = vmatpush2.bf16.msra.mxu0 %v13470_v15  ;;  %v13358_v15 = vcombine.low %v5159_v11, %v5167_v12  ;;  %v5048_v11 = vld [vmem:[%s21375_s3 + $0x98] sm:$0xff] }
 0xe13   : > { %8323 = vmatpush2.bf16.msra.mxu1 %v13726_v61  ;;  %8283 = vmatprep.subr.bf16.mxu0 %v13455_v28  ;;  %v13614_v61 = vcombine.low %v5415_v14, %v5423_v16  ;;  %v13345_v28 = vcombine.high %v5144_v24, %v5152_v51  ;;  %v5056_v12 = vld [vmem:[%s21375_s3 + $0xd8] sm:$0xff] }
 0xe14   : > { %8324 = vmatprep.subr.bf16.mxu1 %v13711_v29  ;;  %v13601_v29 = vcombine.high %v5400_v26, %v5408_v27  ;;  %v5304_v14 = vld [vmem:[%s21375_s3 + $0x898] sm:$0xff] }
 0xe15   : > { %v5312_v16 = vld [vmem:[%s21375_s3 + $0x8d8] sm:$0xff] }
 0xe16   : > { %8284 = vmatpush2.bf16.msra.mxu0 %v13454_v33  ;;  %v5392_v33 = vld [vmem:[%s21375_s3 + $0xb58] sm:$0xff] }
 0xe17   : > { %8325 = vmatpush2.bf16.msra.mxu1 %v13710_v34  ;;  %8285 = vmatprep.subr.bf16.mxu0 %v13439_v35  ;;  %v13600_v34 = vcombine.low %v5400_v26, %v5408_v27  ;;  %v13329_v35 = vcombine.high %v5128_v30, %v5136_v31  ;;  %v13585_v10 = vcombine.high %v5384_v52, %v5392_v33  ;;  %v5032_v24 = vld [vmem:[%s21375_s3 + $0x18] sm:$0xff] }
 0xe18   : > { %8326 = vmatprep.subr.bf16.mxu1 %v13695_v36  ;;  %v5112_v36 = vld [vmem:[%s21375_s3 + $0x298] sm:$0xff] }
 0xe19   : > { %v5040_v51 = vld [vmem:[%s21375_s3 + $0x58] sm:$0xff] }
 0xe1a   : > { %8286 = vmatpush2.bf16.msra.mxu0 %v13438_v39  ;;  %v13328_v39 = vcombine.low %v5128_v30, %v5136_v31  ;;  %v5288_v26 = vld [vmem:[%s21375_s3 + $0x818] sm:$0xff] }
 0xe1b   : > { %8327 = vmatpush2.bf16.msra.mxu1 %v13694_v40  ;;  %8287 = vmatprep.subr.bf16.mxu0 %v13423_v41  ;;  %v13584_v40 = vcombine.low %v5384_v52, %v5392_v33  ;;  %v13313_v41 = vcombine.high %v5112_v36, %v5120_v37  ;;  %v5296_v27 = vld [vmem:[%s21375_s3 + $0x858] sm:$0xff]  ;;  %v13232_v33 = vcombine.low %v5032_v24, %v5040_v51 }
 0xe1c   : > { %8328 = vmatprep.subr.bf16.mxu1 %v13679_v42  ;;  %v13569_v42 = vcombine.high %v5368_v17, %v5376_v38  ;;  %v5272_v30 = vld [vmem:[%s21375_s3 + $0x798] sm:$0xff] }
 0xe1d   : > { %v5280_v31 = vld [vmem:[%s21375_s3 + $0x7d8] sm:$0xff] }
 0xe1e   : > { %8288 = vmatpush2.bf16.msra.mxu0 %v13422_v47  ;;  %v13312_v47 = vcombine.low %v5112_v36, %v5120_v37  ;;  %v5536_v52 = vld [vmem:[%s21375_s3 + $0xfd8] sm:$0xff] }
 0xe1f   : > { %8329 = vmatpush2.bf16.msra.mxu1 %v13678_v50  ;;  %8289 = vmatprep.subr.bf16.mxu0 %v13407_v53  ;;  %v13568_v50 = vcombine.low %v5368_v17, %v5376_v38  ;;  %v13297_v53 = vcombine.high %v5096_v43, %v5104_v44  ;;  %v5256_v37 = vld [vmem:[%s21375_s3 + $0x718] sm:$0xff] }
 0xe20   : > { %8330 = vmatprep.subr.bf16.mxu1 %v13663_v49  ;;  %v13553_v49 = vcombine.high %v5352_v45, %v5360_v46  ;;  %v5512_v17 = vld [vmem:[%s21375_s3 + $0xf18] sm:$0xff] }
 0xe21   : > { %v5520_v38 = vld [vmem:[%s21375_s3 + $0xf58] sm:$0xff] }
 0xe22   : > { %8290 = vmatpush2.bf16.msra.mxu0 %v13406_v58  ;;  %v13296_v58 = vcombine.low %v5096_v43, %v5104_v44  ;;  %v5240_v43 = vld [vmem:[%s21375_s3 + $0x698] sm:$0xff] }
 0xe23   : > { %8331 = vmatpush2.bf16.msra.mxu1 %v13662_v57  ;;  %8291 = vmatprep.subr.bf16.mxu0 %v13391_v23  ;;  %v13552_v57 = vcombine.low %v5352_v45, %v5360_v46  ;;  %v13281_v23 = vcombine.high %v5080_v54, %v5088_v55  ;;  %v5248_v44 = vld [vmem:[%s21375_s3 + $0x6d8] sm:$0xff] }
 0xe24   : > { %8332 = vmatprep.subr.bf16.mxu1 %v13647_v25  ;;  %v13537_v25 = vcombine.high %v5336_v18, %v5344_v13  ;;  %v5496_v45 = vld [vmem:[%s21375_s3 + $0xe98] sm:$0xff] }
 0xe25   : > { %v5504_v46 = vld [vmem:[%s21375_s3 + $0xed8] sm:$0xff] }
 0xe26   : > { %8292 = vmatpush2.bf16.msra.mxu0 %v13390_v4  ;;  %v13280_v4 = vcombine.low %v5080_v54, %v5088_v55  ;;  %v5224_v54 = vld [vmem:[%s21375_s3 + $0x618] sm:$0xff] }
 0xe27   : > { %8333 = vmatpush2.bf16.msra.mxu1 %v13646_v5  ;;  %8293 = vmatprep.subr.bf16.mxu0 %v13375_v6  ;;  %v13536_v5 = vcombine.low %v5336_v18, %v5344_v13  ;;  %v13265_v6 = vcombine.high %v5064_v0, %v5072_v1  ;;  %v5232_v55 = vld [vmem:[%s21375_s3 + $0x658] sm:$0xff] }
 0xe28   : > { %8334 = vmatprep.subr.bf16.mxu1 %v13631_v7  ;;  %v13521_v7 = vcombine.high %v5320_v2, %v5328_v3  ;;  %v5480_v18 = vld [vmem:[%s21375_s3 + $0xe18] sm:$0xff] }
 0xe29   : > { %v5488_v13 = vld [vmem:[%s21375_s3 + $0xe58] sm:$0xff] }
 0xe2a   : > { %8294 = vmatpush2.bf16.msra.mxu0 %v13374_v19  ;;  %v13264_v19 = vcombine.low %v5064_v0, %v5072_v1  ;;  %v5208_v0 = vld [vmem:[%s21375_s3 + $0x598] sm:$0xff] }
 0xe2b   : > { %8335 = vmatpush2.bf16.msra.mxu1 %v13630_v20  ;;  %8295 = vmatprep.subr.bf16.mxu0 %v13359_v21  ;;  %v13520_v20 = vcombine.low %v5320_v2, %v5328_v3  ;;  %v13249_v21 = vcombine.high %v5048_v11, %v5056_v12  ;;  %v5216_v1 = vld [vmem:[%s21375_s3 + $0x5d8] sm:$0xff] }
 0xe2c   : > { %8336 = vmatprep.subr.bf16.mxu1 %v13615_v22  ;;  %v13505_v22 = vcombine.high %v5304_v14, %v5312_v16  ;;  %v5464_v2 = vld [vmem:[%s21375_s3 + $0xd98] sm:$0xff] }
 0xe2d   : > { %v5472_v3 = vld [vmem:[%s21375_s3 + $0xdd8] sm:$0xff] }
 0xe2e   : > { %8296 = vmatpush2.bf16.msra.mxu0 %v13358_v15  ;;  %v13248_v15 = vcombine.low %v5048_v11, %v5056_v12  ;;  %v5192_v11 = vld [vmem:[%s21375_s3 + $0x518] sm:$0xff] }
 0xe2f   : > { %8337 = vmatpush2.bf16.msra.mxu1 %v13614_v61  ;;  %8347 = vmatprep.subr.bf16.mxu0 %v13345_v28  ;;  %v13504_v61 = vcombine.low %v5304_v14, %v5312_v16  ;;  %v13233_v28 = vcombine.high %v5032_v24, %v5040_v51  ;;  %v5200_v12 = vld [vmem:[%s21375_s3 + $0x558] sm:$0xff] }
 0xe30   : > { %8388 = vmatprep.subr.bf16.mxu1 %v13601_v29  ;;  %v13489_v29 = vcombine.high %v5288_v26, %v5296_v27  ;;  %v5448_v14 = vld [vmem:[%s21375_s3 + $0xd18] sm:$0xff] }
 0xe31   : > { %8298 = vmatmul.mubr.bf16.vlgmr.msra.gmra.mxu0 %v18251_v63  ;;  %v5456_v16 = vld [vmem:[%s21375_s3 + $0xd58] sm:$0xff] }
 0xe32   : > { %8339 = vmatmul.mubr.bf16.vlgmr.msra.gmra.mxu1 %v18255_v48  ;;  %8348 = vmatpush1.bf16.msra.mxu0 %v13344_v32  ;;  %v5528_v32 = vld [vmem:[%s21375_s3 + $0xf98] sm:$0xff] }
 0xe33   : > { %8379 = vmatprep.mubr.bf16.mxu0 %v18243_v59  ;;  %8389 = vmatpush1.bf16.msra.mxu1 %v13600_v34  ;;  %v13488_v34 = vcombine.low %v5288_v26, %v5296_v27  ;;  %v13729_v36 = vcombine.high %v5528_v32, %v5536_v52  ;;  %v5176_v24 = vld [vmem:[%s21375_s3 + $0x498] sm:$0xff] }
 0xe34   : > { %8420 = vmatprep.mubr.bf16.mxu1 %v18247_v8  ;;  %8349 = vmatprep.subr.bf16.mxu0 %v13329_v35  ;;  %v13473_v35 = vcombine.high %v5272_v30, %v5280_v31  ;;  %v5184_v51 = vld [vmem:[%s21375_s3 + $0x4d8] sm:$0xff] }
 0xe35   : > { %8390 = vmatprep.subr.bf16.mxu1 %v13585_v10  ;;  %v5264_v10 = vld [vmem:[%s21375_s3 + $0x758] sm:$0xff] }
 0xe36   : > { %8350 = vmatpush1.bf16.msra.mxu0 %v13328_v39  ;;  %v13472_v39 = vcombine.low %v5272_v30, %v5280_v31  ;;  %v5432_v26 = vld [vmem:[%s21375_s3 + $0xc98] sm:$0xff] }
 0xe37   : > { %8391 = vmatpush1.bf16.msra.mxu1 %v13584_v40  ;;  %8351 = vmatprep.subr.bf16.mxu0 %v13313_v41  ;;  %v13728_v40 = vcombine.low %v5528_v32, %v5536_v52  ;;  %v13457_v41 = vcombine.high %v5256_v37, %v5264_v10  ;;  %v5440_v27 = vld [vmem:[%s21375_s3 + $0xcd8] sm:$0xff] }
 0xe38   : > { %8392 = vmatprep.subr.bf16.mxu1 %v13569_v42  ;;  %v13713_v42 = vcombine.high %v5512_v17, %v5520_v38  ;;  %v5160_v30 = vld [vmem:[%s21375_s3 + $0x418] sm:$0xff] }
 0xe39   : > { %v5168_v31 = vld [vmem:[%s21375_s3 + $0x458] sm:$0xff] }
 0xe3a   : > { %8352 = vmatpush1.bf16.msra.mxu0 %v13312_v47  ;;  %v13456_v47 = vcombine.low %v5256_v37, %v5264_v10  ;;  %v5416_v32 = vld [vmem:[%s21375_s3 + $0xc18] sm:$0xff]  ;;  %v5145_v37 = vld [vmem:[%s21375_s3 + $0x3a0] sm:$0xff] }
 0xe3b   : > { %8393 = vmatpush1.bf16.msra.mxu1 %v13568_v50  ;;  %8353 = vmatprep.subr.bf16.mxu0 %v13297_v53  ;;  %v13712_v50 = vcombine.low %v5512_v17, %v5520_v38  ;;  %v13441_v53 = vcombine.high %v5240_v43, %v5248_v44  ;;  %v5424_v52 = vld [vmem:[%s21375_s3 + $0xc58] sm:$0xff]  ;;  %v5153_v10 = vld [vmem:[%s21375_s3 + $0x3e0] sm:$0xff] }
 0xe3c   : > { %8394 = vmatprep.subr.bf16.mxu1 %v13553_v49  ;;  %v13697_v49 = vcombine.high %v5496_v45, %v5504_v46  ;;  %v5401_v17 = vld [vmem:[%s21375_s3 + $0xba0] sm:$0xff] }
 0xe3d   : > { %v5409_v38 = vld [vmem:[%s21375_s3 + $0xbe0] sm:$0xff] }
 0xe3e   : > { %8354 = vmatpush1.bf16.msra.mxu0 %v13296_v58  ;;  %v13440_v58 = vcombine.low %v5240_v43, %v5248_v44  ;;  %v5129_v43 = vld [vmem:[%s21375_s3 + $0x320] sm:$0xff] }
 0xe3f   : > { %8395 = vmatpush1.bf16.msra.mxu1 %v13552_v57  ;;  %8355 = vmatprep.subr.bf16.mxu0 %v13281_v23  ;;  %v13696_v57 = vcombine.low %v5496_v45, %v5504_v46  ;;  %v13425_v23 = vcombine.high %v5224_v54, %v5232_v55  ;;  %v5137_v44 = vld [vmem:[%s21375_s3 + $0x360] sm:$0xff]  ;;  %v13346_v45 = vcombine.low %v5145_v37, %v5153_v10 }
 0xe40   : > { %8396 = vmatprep.subr.bf16.mxu1 %v13537_v25  ;;  %v13681_v25 = vcombine.high %v5480_v18, %v5488_v13  ;;  %v5385_v46 = vld [vmem:[%s21375_s3 + $0xb20] sm:$0xff] }
 0xe42   : > { %8356 = vmatpush1.bf16.msra.mxu0 %v13280_v4  ;;  %v13424_v4 = vcombine.low %v5224_v54, %v5232_v55  ;;  %v5121_v54 = vld [vmem:[%s21375_s3 + $0x2e0] sm:$0xff] }
 0xe43   : > { %8397 = vmatpush1.bf16.msra.mxu1 %v13536_v5  ;;  %8357 = vmatprep.subr.bf16.mxu0 %v13265_v6  ;;  %v13680_v5 = vcombine.low %v5480_v18, %v5488_v13  ;;  %v13409_v6 = vcombine.high %v5208_v0, %v5216_v1 }
 0xe44   : > { %8398 = vmatprep.subr.bf16.mxu1 %v13521_v7  ;;  %v13665_v7 = vcombine.high %v5464_v2, %v5472_v3 }
 0xe46   : > { %8358 = vmatpush1.bf16.msra.mxu0 %v13264_v19  ;;  %v13408_v19 = vcombine.low %v5208_v0, %v5216_v1 }
 0xe47   : > { %8399 = vmatpush1.bf16.msra.mxu1 %v13520_v20  ;;  %8359 = vmatprep.subr.bf16.mxu0 %v13249_v21  ;;  %v13664_v20 = vcombine.low %v5464_v2, %v5472_v3  ;;  %v13393_v21 = vcombine.high %v5192_v11, %v5200_v12 }
 0xe48   : > { %8400 = vmatprep.subr.bf16.mxu1 %v13505_v22  ;;  %v13649_v22 = vcombine.high %v5448_v14, %v5456_v16 }
 0xe4a   : > { %8360 = vmatpush1.bf16.msra.mxu0 %v13248_v15  ;;  %v13392_v15 = vcombine.low %v5192_v11, %v5200_v12 }
 0xe4b   : > { %8401 = vmatpush1.bf16.msra.mxu1 %v13504_v61  ;;  %8361 = vmatprep.subr.bf16.mxu0 %v13233_v28  ;;  %v13648_v61 = vcombine.low %v5448_v14, %v5456_v16  ;;  %v13377_v28 = vcombine.high %v5176_v24, %v5184_v51  ;;  %v5353_v14 = vld [vmem:[%s21375_s3 + $0xa20] sm:$0xff] }
 0xe4c   : > { %8402 = vmatprep.subr.bf16.mxu1 %v13489_v29  ;;  %v13633_v29 = vcombine.high %v5432_v26, %v5440_v27  ;;  %v5361_v16 = vld [vmem:[%s21375_s3 + $0xa60] sm:$0xff] }
 0xe4e   : > { %8362 = vmatpush1.bf16.msra.mxu0 %v13232_v33  ;;  %v13376_v33 = vcombine.low %v5176_v24, %v5184_v51  ;;  %v13555_v51 = vcombine.high %v5353_v14, %v5361_v16 }
 0xe4f   : > { %8403 = vmatpush1.bf16.msra.mxu1 %v13488_v34  ;;  %8363 = vmatprep.subr.bf16.mxu0 %v13473_v35  ;;  %v13632_v34 = vcombine.low %v5432_v26, %v5440_v27  ;;  %v13361_v35 = vcombine.high %v5160_v30, %v5168_v31  ;;  %v5081_v26 = vld [vmem:[%s21375_s3 + $0x1a0] sm:$0xff] }
 0xe50   : > { %8404 = vmatprep.subr.bf16.mxu1 %v13729_v36  ;;  %v13617_v36 = vcombine.high %v5416_v32, %v5424_v52  ;;  %v5089_v27 = vld [vmem:[%s21375_s3 + $0x1e0] sm:$0xff] }
 0xe52   : > { %8364 = vmatpush2.bf16.msra.mxu0 %v13472_v39  ;;  %v13360_v39 = vcombine.low %v5160_v30, %v5168_v31  ;;  %v13283_v30 = vcombine.high %v5081_v26, %v5089_v27 }
 0xe53   : > { %8405 = vmatpush2.bf16.msra.mxu1 %v13728_v40  ;;  %8365 = vmatprep.subr.bf16.mxu0 %v13457_v41  ;;  %v13616_v40 = vcombine.low %v5416_v32, %v5424_v52  ;;  %v13347_v41 = vcombine.high %v5145_v37, %v5153_v10  ;;  %v5065_v32 = vld [vmem:[%s21375_s3 + $0x120] sm:$0xff] }
 0xe54   : > { %8406 = vmatprep.subr.bf16.mxu1 %v13713_v42  ;;  %v13603_v42 = vcombine.high %v5401_v17, %v5409_v38  ;;  %v5073_v52 = vld [vmem:[%s21375_s3 + $0x160] sm:$0xff] }
 0xe55   : > { %v13267_v37 = vcombine.high %v5065_v32, %v5073_v52 }
 0xe56   : > { %8366 = vmatpush2.bf16.msra.mxu0 %v13456_v47  ;;  %v5393_v47 = vld [vmem:[%s21375_s3 + $0xb60] sm:$0xff] }
 0xe57   : > { %8407 = vmatpush2.bf16.msra.mxu1 %v13712_v50  ;;  %8367 = vmatprep.subr.bf16.mxu0 %v13441_v53  ;;  %v13602_v50 = vcombine.low %v5401_v17, %v5409_v38  ;;  %v13331_v53 = vcombine.high %v5129_v43, %v5137_v44  ;;  %v13587_v13 = vcombine.high %v5385_v46, %v5393_v47  ;;  %v5049_v17 = vld [vmem:[%s21375_s3 + $0xa0] sm:$0xff] }
 0xe58   : > { %8408 = vmatprep.subr.bf16.mxu1 %v13697_v49  ;;  %v5113_v49 = vld [vmem:[%s21375_s3 + $0x2a0] sm:$0xff]  ;;  %v13586_v2 = vcombine.low %v5385_v46, %v5393_v47 }
 0xe59   : > { %v13315_v3 = vcombine.high %v5113_v49, %v5121_v54  ;;  %v5057_v38 = vld [vmem:[%s21375_s3 + $0xe0] sm:$0xff] }
 0xe5a   : > { %8368 = vmatpush2.bf16.msra.mxu0 %v13440_v58  ;;  %v5369_v58 = vld [vmem:[%s21375_s3 + $0xaa0] sm:$0xff] }
 0xe5b   : > { %8409 = vmatpush2.bf16.msra.mxu1 %v13696_v57  ;;  %8369 = vmatprep.subr.bf16.mxu0 %v13425_v23  ;;  %v5377_v57 = vld [vmem:[%s21375_s3 + $0xae0] sm:$0xff] }
 0xe5c   : > { %8410 = vmatprep.subr.bf16.mxu1 %v13681_v25  ;;  %v13330_v25 = vcombine.low %v5129_v43, %v5137_v44  ;;  %v13251_v43 = vcombine.high %v5049_v17, %v5057_v38  ;;  %v5041_v46 = vld [vmem:[%s21375_s3 + $0x60] sm:$0xff] }
 0xe5d   : > { %v5289_v47 = vld [vmem:[%s21375_s3 + $0x820] sm:$0xff] }
 0xe5e   : > { %8370 = vmatpush2.bf16.msra.mxu0 %v13424_v4 }
 0xe5f   : > { %8411 = vmatpush2.bf16.msra.mxu1 %v13680_v5  ;;  %8371 = vmatprep.subr.bf16.mxu0 %v13409_v6  ;;  %v13571_v5 = vcombine.high %v5369_v58, %v5377_v57  ;;  %v5097_v6 = vld [vmem:[%s21375_s3 + $0x220] sm:$0xff] }
 0xe60   : > { %8412 = vmatprep.subr.bf16.mxu1 %v13665_v7  ;;  %v5105_v7 = vld [vmem:[%s21375_s3 + $0x260] sm:$0xff] }
 0xe61   : > { %v13299_v24 = vcombine.high %v5097_v6, %v5105_v7 }
 0xe62   : > { %8372 = vmatpush2.bf16.msra.mxu0 %v13408_v19  ;;  %v13314_v19 = vcombine.low %v5113_v49, %v5121_v54 }
 0xe63   : > { %8413 = vmatpush2.bf16.msra.mxu1 %v13664_v20  ;;  %8373 = vmatprep.subr.bf16.mxu0 %v13393_v21 }
 0xe64   : > { %8414 = vmatprep.subr.bf16.mxu1 %v13649_v22  ;;  %v13570_v22 = vcombine.low %v5369_v58, %v5377_v57  ;;  %v5529_v58 = vld [vmem:[%s21375_s3 + $0xfa0] sm:$0xff] }
 0xe65   : > { %v5537_v57 = vld [vmem:[%s21375_s3 + $0xfe0] sm:$0xff] }
 0xe66   : > { %8374 = vmatpush2.bf16.msra.mxu0 %v13392_v15  ;;  %v5337_v15 = vld [vmem:[%s21375_s3 + $0x9a0] sm:$0xff] }
 0xe67   : > { %8415 = vmatpush2.bf16.msra.mxu1 %v13648_v61  ;;  %8375 = vmatprep.subr.bf16.mxu0 %v13377_v28  ;;  %v5345_v61 = vld [vmem:[%s21375_s3 + $0x9e0] sm:$0xff]  ;;  %v13298_v28 = vcombine.low %v5097_v6, %v5105_v7 }
 0xe68   : > { %8416 = vmatprep.subr.bf16.mxu1 %v13633_v29  ;;  %v13554_v29 = vcombine.low %v5353_v14, %v5361_v16  ;;  %v13539_v31 = vcombine.high %v5337_v15, %v5345_v61  ;;  %v5513_v6 = vld [vmem:[%s21375_s3 + $0xf20] sm:$0xff] }
 0xe69   : > { %v5521_v7 = vld [vmem:[%s21375_s3 + $0xf60] sm:$0xff] }
 0xe6a   : > { %8376 = vmatpush2.bf16.msra.mxu0 %v13376_v33  ;;  %v5321_v33 = vld [vmem:[%s21375_s3 + $0x920] sm:$0xff]  ;;  %v13715_v16 = vcombine.high %v5513_v6, %v5521_v7 }
 0xe6b   : > { %8417 = vmatpush2.bf16.msra.mxu1 %v13632_v34  ;;  %8377 = vmatprep.subr.bf16.mxu0 %v13361_v35  ;;  %v5329_v34 = vld [vmem:[%s21375_s3 + $0x960] sm:$0xff]  ;;  %v13282_v35 = vcombine.low %v5081_v26, %v5089_v27 }
 0xe6c   : > { %8418 = vmatprep.subr.bf16.mxu1 %v13617_v36  ;;  %v13538_v36 = vcombine.low %v5337_v15, %v5345_v61  ;;  %v13523_v10 = vcombine.high %v5321_v33, %v5329_v34  ;;  %v5225_v15 = vld [vmem:[%s21375_s3 + $0x620] sm:$0xff] }
 0xe6d   : > { %v5233_v61 = vld [vmem:[%s21375_s3 + $0x660] sm:$0xff] }
 0xe6e   : > { %8378 = vmatpush2.bf16.msra.mxu0 %v13360_v39  ;;  %v5305_v39 = vld [vmem:[%s21375_s3 + $0x8a0] sm:$0xff] }
 0xe6f   : > { %8419 = vmatpush2.bf16.msra.mxu1 %v13616_v40  ;;  %8429 = vmatprep.subr.bf16.mxu0 %v13347_v41  ;;  %v5313_v40 = vld [vmem:[%s21375_s3 + $0x8e0] sm:$0xff]  ;;  %v13266_v41 = vcombine.low %v5065_v32, %v5073_v52  ;;  %v13427_v32 = vcombine.high %v5225_v15, %v5233_v61 }
 0xe70   : > { %8470 = vmatprep.subr.bf16.mxu1 %v13603_v42  ;;  %v13522_v42 = vcombine.low %v5321_v33, %v5329_v34  ;;  %v13507_v44 = vcombine.high %v5305_v39, %v5313_v40  ;;  %v13506_v49 = vcombine.low %v5305_v39, %v5313_v40  ;;  %v5209_v33 = vld [vmem:[%s21375_s3 + $0x5a0] sm:$0xff] }
 0xe71   : > { %8380 = vmatmul.mubr.bf16.vlgmr.msra.gmra.mxu0 %v18251_v63  ;;  %v8135_v55 = vpop.f32.mrf.mxu0  ;;  %v8176_v18 = vpop.f32.mrf.mxu1  ;;  %v5217_v34 = vld [vmem:[%s21375_s3 + $0x5e0] sm:$0xff] }
 0xe72   : > { %8421 = vmatmul.mubr.bf16.vlgmr.msra.gmra.mxu1 %v18255_v48  ;;  %v18861_v23 = vadd.f32 %v8176_v18, %v8135_v55  ;;  %8430 = vmatpush1.bf16.msra.mxu0 %v13346_v45  ;;  %v5033_v45 = vld [vmem:[%s21375_s3 + $0x20] sm:$0xff] }
 0xe73   : > { %8461 = vmatprep.mubr.bf16.mxu0 %v18243_v59  ;;  %8471 = vmatpush1.bf16.msra.mxu1 %v13602_v50  ;;  %v8137_v0 = vpop.f32.mrf.mxu0  ;;  %v8178_v1 = vpop.f32.mrf.mxu1  ;;  %v5297_v50 = vld [vmem:[%s21375_s3 + $0x860] sm:$0xff]  ;;  %v13235_v54 = vcombine.high %v5033_v45, %v5041_v46 }
 0xe74   : > { %8502 = vmatprep.mubr.bf16.mxu1 %v18247_v8  ;;  %v18865_v4 = vadd.f32 %v8178_v1, %v8137_v0  ;;  %8431 = vmatprep.subr.bf16.mxu0 %v13331_v53  ;;  %v13250_v53 = vcombine.low %v5049_v17, %v5057_v38  ;;  %v13491_v55 = vcombine.high %v5289_v47, %v5297_v50  ;;  %v5273_v18 = vld [vmem:[%s21375_s3 + $0x7a0] sm:$0xff] }
 0xe75   : > { %8472 = vmatprep.subr.bf16.mxu1 %v13587_v13  ;;  %v8139_v11 = vpop.f32.mrf.mxu0  ;;  %v8180_v12 = vpop.f32.mrf.mxu1  ;;  %v5281_v13 = vld [vmem:[%s21375_s3 + $0x7e0] sm:$0xff]  ;;  %v13490_v0 = vcombine.low %v5289_v47, %v5297_v50  ;;  %v13411_v17 = vcombine.high %v5209_v33, %v5217_v34 }
 0xe76   : > { %8432 = vmatpush1.bf16.msra.mxu0 %v13330_v25  ;;  %v13234_v25 = vcombine.low %v5033_v45, %v5041_v46  ;;  %v13475_v1 = vcombine.high %v5273_v18, %v5281_v13  ;;  %v13474_v11 = vcombine.low %v5273_v18, %v5281_v13  ;;  %v13730_v12 = vcombine.low %v5529_v58, %v5537_v57  ;;  %v5193_v39 = vld [vmem:[%s21375_s3 + $0x520] sm:$0xff] }
 0xe77   : > { %8473 = vmatpush1.bf16.msra.mxu1 %v13586_v2  ;;  %v8140_v20 = vpop.f32.mrf.mxu0  ;;  %v8181_v21 = vpop.f32.mrf.mxu1  ;;  %8433 = vmatprep.subr.bf16.mxu0 %v13315_v3  ;;  %v13731_v2 = vcombine.high %v5529_v58, %v5537_v57  ;;  %v5257_v3 = vld [vmem:[%s21375_s3 + $0x720] sm:$0xff] }
 0xe78   : > { %8474 = vmatprep.subr.bf16.mxu1 %v13571_v5  ;;  %v5265_v5 = vld [vmem:[%s21375_s3 + $0x760] sm:$0xff] }
 0xe79   : > { %v13459_v14 = vcombine.high %v5257_v3, %v5265_v5  ;;  %v5249_v20 = vld [vmem:[%s21375_s3 + $0x6e0] sm:$0xff] }
 0xe7a   : > { %8434 = vmatpush1.bf16.msra.mxu0 %v13314_v19  ;;  %v5241_v19 = vld [vmem:[%s21375_s3 + $0x6a0] sm:$0xff] }
 0xe7b   : > { %8475 = vmatpush1.bf16.msra.mxu1 %v13570_v22  ;;  %8435 = vmatprep.subr.bf16.mxu0 %v13299_v24  ;;  %v5497_v21 = vld [vmem:[%s21375_s3 + $0xea0] sm:$0xff]  ;;  %v13458_v24 = vcombine.low %v5257_v3, %v5265_v5  ;;  %v13443_v26 = vcombine.high %v5241_v19, %v5249_v20 }
 0xe7c   : > { %8476 = vmatprep.subr.bf16.mxu1 %v13555_v51  ;;  %v5505_v22 = vld [vmem:[%s21375_s3 + $0xee0] sm:$0xff]  ;;  %v13714_v51 = vcombine.low %v5513_v6, %v5521_v7  ;;  %v5146_v6 = vld [vmem:[%s21375_s3 + $0x3a8] sm:$0xff] }
 0xe7d   : > { %v13699_v27 = vcombine.high %v5497_v21, %v5505_v22  ;;  %v5201_v40 = vld [vmem:[%s21375_s3 + $0x560] sm:$0xff]  ;;  %v5154_v7 = vld [vmem:[%s21375_s3 + $0x3e8] sm:$0xff] }
 0xe7e   : > { %8436 = vmatpush1.bf16.msra.mxu0 %v13298_v28  ;;  %v5481_v28 = vld [vmem:[%s21375_s3 + $0xe20] sm:$0xff]  ;;  %v13395_v45 = vcombine.high %v5193_v39, %v5201_v40 }
 0xe7f   : > { %8477 = vmatpush1.bf16.msra.mxu1 %v13554_v29  ;;  %8437 = vmatprep.subr.bf16.mxu0 %v13283_v30  ;;  %v5489_v29 = vld [vmem:[%s21375_s3 + $0xe60] sm:$0xff]  ;;  %v13442_v30 = vcombine.low %v5241_v19, %v5249_v20  ;;  %v13349_v19 = vcombine.high %v5146_v6, %v5154_v7 }
 0xe80   : > { %8478 = vmatprep.subr.bf16.mxu1 %v13539_v31  ;;  %v13698_v31 = vcombine.low %v5497_v21, %v5505_v22  ;;  %v13683_v52 = vcombine.high %v5481_v28, %v5489_v29  ;;  %v5177_v47 = vld [vmem:[%s21375_s3 + $0x4a0] sm:$0xff]  ;;  %v5130_v21 = vld [vmem:[%s21375_s3 + $0x328] sm:$0xff] }
 0xe81   : > { %v5185_v50 = vld [vmem:[%s21375_s3 + $0x4e0] sm:$0xff]  ;;  %v5138_v22 = vld [vmem:[%s21375_s3 + $0x368] sm:$0xff] }
 0xe82   : > { %8438 = vmatpush1.bf16.msra.mxu0 %v13282_v35  ;;  %v5465_v35 = vld [vmem:[%s21375_s3 + $0xda0] sm:$0xff]  ;;  %v13379_v18 = vcombine.high %v5177_v47, %v5185_v50 }
 0xe83   : > { %8479 = vmatpush1.bf16.msra.mxu1 %v13538_v36  ;;  %8439 = vmatprep.subr.bf16.mxu0 %v13267_v37  ;;  %v5473_v36 = vld [vmem:[%s21375_s3 + $0xde0] sm:$0xff]  ;;  %v13426_v37 = vcombine.low %v5225_v15, %v5233_v61  ;;  %v13333_v15 = vcombine.high %v5130_v21, %v5138_v22  ;;  %v5114_v61 = vld [vmem:[%s21375_s3 + $0x2a8] sm:$0xff] }
 0xe84   : > { %8480 = vmatprep.subr.bf16.mxu1 %v13523_v10  ;;  %v13682_v10 = vcombine.low %v5481_v28, %v5489_v29  ;;  %v13667_v38 = vcombine.high %v5465_v35, %v5473_v36  ;;  %v5161_v58 = vld [vmem:[%s21375_s3 + $0x420] sm:$0xff]  ;;  %v5122_v28 = vld [vmem:[%s21375_s3 + $0x2e8] sm:$0xff] }
 0xe85   : > { %v5169_v57 = vld [vmem:[%s21375_s3 + $0x460] sm:$0xff] }
 0xe86   : > { %8440 = vmatpush1.bf16.msra.mxu0 %v13266_v41  ;;  %v5449_v41 = vld [vmem:[%s21375_s3 + $0xd20] sm:$0xff]  ;;  %v13363_v3 = vcombine.high %v5161_v58, %v5169_v57 }
 0xe87   : > { %8481 = vmatpush1.bf16.msra.mxu1 %v13522_v42  ;;  %8441 = vmatprep.subr.bf16.mxu0 %v13251_v43  ;;  %v5457_v42 = vld [vmem:[%s21375_s3 + $0xd60] sm:$0xff]  ;;  %v13410_v43 = vcombine.low %v5209_v33, %v5217_v34  ;;  %v13332_v34 = vcombine.low %v5130_v21, %v5138_v22 }
 0xe88   : > { %8482 = vmatprep.subr.bf16.mxu1 %v13507_v44  ;;  %v13666_v44 = vcombine.low %v5465_v35, %v5473_v36  ;;  %v13651_v46 = vcombine.high %v5449_v41, %v5457_v42 }
 0xe8a   : > { %8442 = vmatpush1.bf16.msra.mxu0 %v13250_v53  ;;  %v5433_v53 = vld [vmem:[%s21375_s3 + $0xca0] sm:$0xff] }
 0xe8b   : > { %8483 = vmatpush1.bf16.msra.mxu1 %v13506_v49  ;;  %8443 = vmatprep.subr.bf16.mxu0 %v13235_v54  ;;  %v5441_v49 = vld [vmem:[%s21375_s3 + $0xce0] sm:$0xff]  ;;  %v13394_v54 = vcombine.low %v5193_v39, %v5201_v40  ;;  %v5098_v39 = vld [vmem:[%s21375_s3 + $0x228] sm:$0xff] }
 0xe8c   : > { %8484 = vmatprep.subr.bf16.mxu1 %v13491_v55  ;;  %v13650_v55 = vcombine.low %v5449_v41, %v5457_v42  ;;  %v13635_v13 = vcombine.high %v5433_v53, %v5441_v49  ;;  %v5106_v40 = vld [vmem:[%s21375_s3 + $0x268] sm:$0xff] }
 0xe8e   : > { %8444 = vmatpush1.bf16.msra.mxu0 %v13234_v25  ;;  %v5417_v25 = vld [vmem:[%s21375_s3 + $0xc20] sm:$0xff] }
 0xe8f   : > { %8485 = vmatpush1.bf16.msra.mxu1 %v13490_v0  ;;  %8445 = vmatprep.subr.bf16.mxu0 %v13475_v1  ;;  %v5425_v0 = vld [vmem:[%s21375_s3 + $0xc60] sm:$0xff]  ;;  %v13378_v1 = vcombine.low %v5177_v47, %v5185_v50 }
 0xe90   : > { %8486 = vmatprep.subr.bf16.mxu1 %v13731_v2  ;;  %v13634_v2 = vcombine.low %v5433_v53, %v5441_v49  ;;  %v13619_v5 = vcombine.high %v5417_v25, %v5425_v0  ;;  %v13301_v53 = vcombine.high %v5098_v39, %v5106_v40 }
 0xe92   : > { %8446 = vmatpush2.bf16.msra.mxu0 %v13474_v11  ;;  %v5402_v11 = vld [vmem:[%s21375_s3 + $0xba8] sm:$0xff] }
 0xe93   : > { %8487 = vmatpush2.bf16.msra.mxu1 %v13730_v12  ;;  %8447 = vmatprep.subr.bf16.mxu0 %v13459_v14  ;;  %v5410_v12 = vld [vmem:[%s21375_s3 + $0xbe8] sm:$0xff]  ;;  %v13362_v14 = vcombine.low %v5161_v58, %v5169_v57  ;;  %v13300_v58 = vcombine.low %v5098_v39, %v5106_v40 }
 0xe94   : > { %8488 = vmatprep.subr.bf16.mxu1 %v13715_v16  ;;  %v13618_v16 = vcombine.low %v5417_v25, %v5425_v0  ;;  %v13605_v20 = vcombine.high %v5402_v11, %v5410_v12  ;;  %v5258_v39 = vld [vmem:[%s21375_s3 + $0x728] sm:$0xff] }
 0xe95   : > { %v5266_v40 = vld [vmem:[%s21375_s3 + $0x768] sm:$0xff] }
 0xe96   : > { %8448 = vmatpush2.bf16.msra.mxu0 %v13458_v24  ;;  %v13348_v24 = vcombine.low %v5146_v6, %v5154_v7 }
 0xe97   : > { %8489 = vmatpush2.bf16.msra.mxu1 %v13714_v51  ;;  %8449 = vmatprep.subr.bf16.mxu0 %v13443_v26  ;;  %v5386_v51 = vld [vmem:[%s21375_s3 + $0xb28] sm:$0xff] }
 0xe98   : > { %8490 = vmatprep.subr.bf16.mxu1 %v13699_v27  ;;  %v5394_v26 = vld [vmem:[%s21375_s3 + $0xb68] sm:$0xff]  ;;  %v13604_v27 = vcombine.low %v5402_v11, %v5410_v12 }
 0xe9a   : > { %8450 = vmatpush2.bf16.msra.mxu0 %v13442_v30 }
 0xe9b   : > { %8491 = vmatpush2.bf16.msra.mxu1 %v13698_v31  ;;  %8451 = vmatprep.subr.bf16.mxu0 %v13427_v32  ;;  %v13589_v31 = vcombine.high %v5386_v51, %v5394_v26  ;;  %v5370_v32 = vld [vmem:[%s21375_s3 + $0xaa8] sm:$0xff] }
 0xe9c   : > { %8492 = vmatprep.subr.bf16.mxu1 %v13683_v52  ;;  %v5378_v52 = vld [vmem:[%s21375_s3 + $0xae8] sm:$0xff] }
 0xe9d   : > { %v13572_v50 = vcombine.low %v5370_v32, %v5378_v52 }
 0xe9e   : > { %8452 = vmatpush2.bf16.msra.mxu0 %v13426_v37  ;;  %v13588_v37 = vcombine.low %v5386_v51, %v5394_v26  ;;  %v5034_v26 = vld [vmem:[%s21375_s3 + $0x28] sm:$0xff] }
 0xe9f   : > { %8493 = vmatpush2.bf16.msra.mxu1 %v13682_v10  ;;  %8453 = vmatprep.subr.bf16.mxu0 %v13411_v17  ;;  %v13317_v10 = vcombine.high %v5114_v61, %v5122_v28 }
 0xea0   : > { %8494 = vmatprep.subr.bf16.mxu1 %v13667_v38  ;;  %v13573_v38 = vcombine.high %v5370_v32, %v5378_v52  ;;  %v5274_v32 = vld [vmem:[%s21375_s3 + $0x7a8] sm:$0xff] }
 0xea1   : > { %v5282_v52 = vld [vmem:[%s21375_s3 + $0x7e8] sm:$0xff] }
 0xea2   : > { %8454 = vmatpush2.bf16.msra.mxu0 %v13410_v43  ;;  %v5354_v43 = vld [vmem:[%s21375_s3 + $0xa28] sm:$0xff] }
 0xea3   : > { %8495 = vmatpush2.bf16.msra.mxu1 %v13666_v44  ;;  %8455 = vmatprep.subr.bf16.mxu0 %v13395_v45  ;;  %v5362_v44 = vld [vmem:[%s21375_s3 + $0xa68] sm:$0xff]  ;;  %v13316_v45 = vcombine.low %v5114_v61, %v5122_v28 }
 0xea4   : > { %8496 = vmatprep.subr.bf16.mxu1 %v13651_v46  ;;  %v13557_v49 = vcombine.high %v5354_v43, %v5362_v44  ;;  %v13556_v57 = vcombine.low %v5354_v43, %v5362_v44  ;;  %v5298_v61 = vld [vmem:[%s21375_s3 + $0x868] sm:$0xff]  ;;  %v13476_v43 = vcombine.low %v5274_v32, %v5282_v52 }
 0xea6   : > { %8456 = vmatpush2.bf16.msra.mxu0 %v13394_v54  ;;  %v5082_v54 = vld [vmem:[%s21375_s3 + $0x1a8] sm:$0xff] }
 0xea7   : > { %8497 = vmatpush2.bf16.msra.mxu1 %v13650_v55  ;;  %8457 = vmatprep.subr.bf16.mxu0 %v13379_v18  ;;  %v5090_v55 = vld [vmem:[%s21375_s3 + $0x1e8] sm:$0xff] }
 0xea8   : > { %8498 = vmatprep.subr.bf16.mxu1 %v13635_v13  ;;  %v5338_v18 = vld [vmem:[%s21375_s3 + $0x9a8] sm:$0xff]  ;;  %v13285_v25 = vcombine.high %v5082_v54, %v5090_v55  ;;  %v13284_v6 = vcombine.low %v5082_v54, %v5090_v55  ;;  %v13460_v54 = vcombine.low %v5258_v39, %v5266_v40 }
 0xea9   : > { %v5346_v13 = vld [vmem:[%s21375_s3 + $0x9e8] sm:$0xff] }
 0xeaa   : > { %8458 = vmatpush2.bf16.msra.mxu0 %v13378_v1  ;;  %v13541_v0 = vcombine.high %v5338_v18, %v5346_v13  ;;  %v5066_v1 = vld [vmem:[%s21375_s3 + $0x128] sm:$0xff]  ;;  %v13540_v7 = vcombine.low %v5338_v18, %v5346_v13 }
 0xeab   : > { %8499 = vmatpush2.bf16.msra.mxu1 %v13634_v2  ;;  %8459 = vmatprep.subr.bf16.mxu0 %v13363_v3  ;;  %v5074_v2 = vld [vmem:[%s21375_s3 + $0x168] sm:$0xff] }
 0xeac   : > { %8500 = vmatprep.subr.bf16.mxu1 %v13619_v5  ;;  %v5322_v3 = vld [vmem:[%s21375_s3 + $0x928] sm:$0xff]  ;;  %v13269_v11 = vcombine.high %v5066_v1, %v5074_v2  ;;  %v13268_v21 = vcombine.low %v5066_v1, %v5074_v2 }
 0xead   : > { %v5330_v5 = vld [vmem:[%s21375_s3 + $0x968] sm:$0xff] }
 0xeae   : > { %8460 = vmatpush2.bf16.msra.mxu0 %v13362_v14  ;;  %v13525_v12 = vcombine.high %v5322_v3, %v5330_v5  ;;  %v5050_v14 = vld [vmem:[%s21375_s3 + $0xa8] sm:$0xff]  ;;  %v13524_v22 = vcombine.low %v5322_v3, %v5330_v5 }
 0xeaf   : > { %8501 = vmatpush2.bf16.msra.mxu1 %v13618_v16  ;;  %8511 = vmatprep.subr.bf16.mxu0 %v13349_v19  ;;  %v5058_v16 = vld [vmem:[%s21375_s3 + $0xe8] sm:$0xff] }
 0xeb0   : > { %8552 = vmatprep.subr.bf16.mxu1 %v13605_v20  ;;  %v5306_v19 = vld [vmem:[%s21375_s3 + $0x8a8] sm:$0xff]  ;;  %v13252_v28 = vcombine.low %v5050_v14, %v5058_v16 }
 0xeb1   : > { %v8217_v29 = vpop.f32.mrf.mxu0  ;;  %v8258_v30 = vpop.f32.mrf.mxu1  ;;  %8462 = vmatmul.mubr.bf16.vlgmr.msra.gmra.mxu0 %v18251_v63  ;;  %v5314_v20 = vld [vmem:[%s21375_s3 + $0x8e8] sm:$0xff] }
 0xeb2   : > { %v19060_v33 = vadd.f32 %v8258_v30, %v8217_v29  ;;  %8503 = vmatmul.mubr.bf16.vlgmr.msra.gmra.mxu1 %v18255_v48  ;;  %8512 = vmatpush1.bf16.msra.mxu0 %v13348_v24  ;;  %v13253_v24 = vcombine.high %v5050_v14, %v5058_v16  ;;  %v13509_v51 = vcombine.high %v5306_v19, %v5314_v20 }
 0xeb3   : > { %8543 = vmatprep.mubr.bf16.mxu0 %v18243_v59  ;;  %8553 = vmatpush1.bf16.msra.mxu1 %v13604_v27  ;;  %v8219_v35 = vpop.f32.mrf.mxu0  ;;  %v8260_v36 = vpop.f32.mrf.mxu1  ;;  %v5042_v27 = vld [vmem:[%s21375_s3 + $0x68] sm:$0xff]  ;;  %v13508_v29 = vcombine.low %v5306_v19, %v5314_v20 }
 0xeb4   : > { %8584 = vmatprep.mubr.bf16.mxu1 %v18247_v8  ;;  %v19065_v17 = vadd.f32 %v8260_v36, %v8219_v35  ;;  %8513 = vmatprep.subr.bf16.mxu0 %v13333_v15  ;;  %v5290_v15 = vld [vmem:[%s21375_s3 + $0x828] sm:$0xff]  ;;  %v13237_v30 = vcombine.high %v5034_v26, %v5042_v27  ;;  %v13236_v36 = vcombine.low %v5034_v26, %v5042_v27 }
 0xeb5   : > { %v8221_v41 = vpop.f32.mrf.mxu0  ;;  %v8262_v42 = vpop.f32.mrf.mxu1  ;;  %8554 = vmatprep.subr.bf16.mxu1 %v13589_v31  ;;  %v13493_v31 = vcombine.high %v5290_v15, %v5298_v61  ;;  %v5538_v35 = vld [vmem:[%s21375_s3 + $0xfe8] sm:$0xff] }
 0xeb6   : > { %8514 = vmatpush1.bf16.msra.mxu0 %v13332_v34  ;;  %v5530_v34 = vld [vmem:[%s21375_s3 + $0xfa8] sm:$0xff] }
 0xeb7   : > { %8555 = vmatpush1.bf16.msra.mxu1 %v13588_v37  ;;  %v8222_v46 = vpop.f32.mrf.mxu0  ;;  %v8263_v47 = vpop.f32.mrf.mxu1  ;;  %8515 = vmatprep.subr.bf16.mxu0 %v13317_v10  ;;  %v13492_v37 = vcombine.low %v5290_v15, %v5298_v61  ;;  %v13477_v10 = vcombine.high %v5274_v32, %v5282_v52  ;;  %v5514_v41 = vld [vmem:[%s21375_s3 + $0xf28] sm:$0xff]  ;;  %v13732_v44 = vcombine.low %v5530_v34, %v5538_v35 }
 0xeb8   : > { %8556 = vmatprep.subr.bf16.mxu1 %v13573_v38  ;;  %v13733_v38 = vcombine.high %v5530_v34, %v5538_v35  ;;  %v5522_v42 = vld [vmem:[%s21375_s3 + $0xf68] sm:$0xff] }
 0xeb9   : > { %v13717_v46 = vcombine.high %v5514_v41, %v5522_v42  ;;  %v5242_v47 = vld [vmem:[%s21375_s3 + $0x6a8] sm:$0xff]  ;;  %v13716_v55 = vcombine.low %v5514_v41, %v5522_v42 }
 0xeba   : > { %8516 = vmatpush1.bf16.msra.mxu0 %v13316_v45  ;;  %v13461_v45 = vcombine.high %v5258_v39, %v5266_v40 }
 0xebb   : > { %8557 = vmatpush1.bf16.msra.mxu1 %v13572_v50  ;;  %8517 = vmatprep.subr.bf16.mxu0 %v13301_v53  ;;  %v5250_v50 = vld [vmem:[%s21375_s3 + $0x6e8] sm:$0xff] }
 0xebc   : > { %8558 = vmatprep.subr.bf16.mxu1 %v13557_v49  ;;  %v5498_v53 = vld [vmem:[%s21375_s3 + $0xea8] sm:$0xff]  ;;  %v13445_v18 = vcombine.high %v5242_v47, %v5250_v50  ;;  %v13444_v1 = vcombine.low %v5242_v47, %v5250_v50 }
 0xebd   : > { %v5506_v49 = vld [vmem:[%s21375_s3 + $0xee8] sm:$0xff] }
 0xebe   : > { %8518 = vmatpush1.bf16.msra.mxu0 %v13300_v58  ;;  %v13701_v13 = vcombine.high %v5498_v53, %v5506_v49  ;;  %v5226_v58 = vld [vmem:[%s21375_s3 + $0x628] sm:$0xff]  ;;  %v13700_v2 = vcombine.low %v5498_v53, %v5506_v49 }
 0xebf   : > { %8559 = vmatpush1.bf16.msra.mxu1 %v13556_v57  ;;  %8519 = vmatprep.subr.bf16.mxu0 %v13285_v25  ;;  %v5234_v57 = vld [vmem:[%s21375_s3 + $0x668] sm:$0xff] }
 0xec0   : > { %8560 = vmatprep.subr.bf16.mxu1 %v13541_v0  ;;  %v5482_v25 = vld [vmem:[%s21375_s3 + $0xe28] sm:$0xff]  ;;  %v13429_v3 = vcombine.high %v5226_v58, %v5234_v57  ;;  %v13428_v14 = vcombine.low %v5226_v58, %v5234_v57  ;;  %v5395_v58 = vld [vmem:[%s21375_s3 + $0xb70] sm:$0xff] }
 0xec1   : > { %v5490_v0 = vld [vmem:[%s21375_s3 + $0xe68] sm:$0xff] }
 0xec2   : > { %8520 = vmatpush1.bf16.msra.mxu0 %v13284_v6  ;;  %v13685_v5 = vcombine.high %v5482_v25, %v5490_v0  ;;  %v5210_v6 = vld [vmem:[%s21375_s3 + $0x5a8] sm:$0xff]  ;;  %v13684_v16 = vcombine.low %v5482_v25, %v5490_v0  ;;  %v5115_v0 = vld [vmem:[%s21375_s3 + $0x2b0] sm:$0xff] }
 0xec3   : > { %8561 = vmatpush1.bf16.msra.mxu1 %v13540_v7  ;;  %8521 = vmatprep.subr.bf16.mxu0 %v13269_v11  ;;  %v5218_v7 = vld [vmem:[%s21375_s3 + $0x5e8] sm:$0xff] }
 0xec4   : > { %8562 = vmatprep.subr.bf16.mxu1 %v13525_v12  ;;  %v5466_v11 = vld [vmem:[%s21375_s3 + $0xda8] sm:$0xff]  ;;  %v13413_v19 = vcombine.high %v5210_v6, %v5218_v7  ;;  %v13412_v26 = vcombine.low %v5210_v6, %v5218_v7  ;;  %v5379_v6 = vld [vmem:[%s21375_s3 + $0xaf0] sm:$0xff] }
 0xec5   : > { %v5474_v12 = vld [vmem:[%s21375_s3 + $0xde8] sm:$0xff] }
 0xec6   : > { %8522 = vmatpush1.bf16.msra.mxu0 %v13268_v21  ;;  %v13669_v20 = vcombine.high %v5466_v11, %v5474_v12  ;;  %v5194_v21 = vld [vmem:[%s21375_s3 + $0x528] sm:$0xff]  ;;  %v13668_v27 = vcombine.low %v5466_v11, %v5474_v12 }
 0xec7   : > { %8563 = vmatpush1.bf16.msra.mxu1 %v13524_v22  ;;  %8523 = vmatprep.subr.bf16.mxu0 %v13253_v24  ;;  %v5202_v22 = vld [vmem:[%s21375_s3 + $0x568] sm:$0xff] }
 0xec8   : > { %8564 = vmatprep.subr.bf16.mxu1 %v13509_v51  ;;  %v5450_v24 = vld [vmem:[%s21375_s3 + $0xd28] sm:$0xff]  ;;  %v13397_v15 = vcombine.high %v5194_v21, %v5202_v22  ;;  %v13396_v32 = vcombine.low %v5194_v21, %v5202_v22  ;;  %v5099_v22 = vld [vmem:[%s21375_s3 + $0x230] sm:$0xff] }
 0xec9   : > { %v5458_v51 = vld [vmem:[%s21375_s3 + $0xd68] sm:$0xff] }
 0xeca   : > { %8524 = vmatpush1.bf16.msra.mxu0 %v13252_v28  ;;  %v13653_v61 = vcombine.high %v5450_v24, %v5458_v51  ;;  %v5178_v28 = vld [vmem:[%s21375_s3 + $0x4a8] sm:$0xff]  ;;  %v13652_v52 = vcombine.low %v5450_v24, %v5458_v51  ;;  %v5107_v24 = vld [vmem:[%s21375_s3 + $0x270] sm:$0xff] }
 0xecb   : > { %8565 = vmatpush1.bf16.msra.mxu1 %v13508_v29  ;;  %8525 = vmatprep.subr.bf16.mxu0 %v13237_v30  ;;  %v5186_v29 = vld [vmem:[%s21375_s3 + $0x4e8] sm:$0xff] }
 0xecc   : > { %8566 = vmatprep.subr.bf16.mxu1 %v13493_v31  ;;  %v5434_v30 = vld [vmem:[%s21375_s3 + $0xca8] sm:$0xff]  ;;  %v13381_v34 = vcombine.high %v5178_v28, %v5186_v29  ;;  %v13380_v39 = vcombine.low %v5178_v28, %v5186_v29 }
 0xecd   : > { %v5442_v31 = vld [vmem:[%s21375_s3 + $0xce8] sm:$0xff] }
 0xece   : > { %8526 = vmatpush1.bf16.msra.mxu0 %v13236_v36  ;;  %v13637_v35 = vcombine.high %v5434_v30, %v5442_v31  ;;  %v5162_v36 = vld [vmem:[%s21375_s3 + $0x428] sm:$0xff]  ;;  %v13636_v40 = vcombine.low %v5434_v30, %v5442_v31  ;;  %v13303_v31 = vcombine.high %v5099_v22, %v5107_v24 }
 0xecf   : > { %8567 = vmatpush1.bf16.msra.mxu1 %v13492_v37  ;;  %8527 = vmatprep.subr.bf16.mxu0 %v13477_v10  ;;  %v5170_v37 = vld [vmem:[%s21375_s3 + $0x468] sm:$0xff] }
 0xed0   : > { %8568 = vmatprep.subr.bf16.mxu1 %v13733_v38  ;;  %v5418_v10 = vld [vmem:[%s21375_s3 + $0xc28] sm:$0xff]  ;;  %v13365_v41 = vcombine.high %v5162_v36, %v5170_v37  ;;  %v13364_v47 = vcombine.low %v5162_v36, %v5170_v37  ;;  %v5339_v36 = vld [vmem:[%s21375_s3 + $0x9b0] sm:$0xff] }
 0xed1   : > { %v5426_v38 = vld [vmem:[%s21375_s3 + $0xc68] sm:$0xff]  ;;  %v5347_v37 = vld [vmem:[%s21375_s3 + $0x9f0] sm:$0xff] }
 0xed2   : > { %8528 = vmatpush2.bf16.msra.mxu0 %v13476_v43  ;;  %v13621_v42 = vcombine.high %v5418_v10, %v5426_v38  ;;  %v5147_v43 = vld [vmem:[%s21375_s3 + $0x3b0] sm:$0xff]  ;;  %v13620_v50 = vcombine.low %v5418_v10, %v5426_v38  ;;  %v13302_v10 = vcombine.low %v5099_v22, %v5107_v24 }
 0xed3   : > { %8569 = vmatpush2.bf16.msra.mxu1 %v13732_v44  ;;  %8529 = vmatprep.subr.bf16.mxu0 %v13461_v45  ;;  %v5155_v44 = vld [vmem:[%s21375_s3 + $0x3f0] sm:$0xff] }
 0xed4   : > { %8570 = vmatprep.subr.bf16.mxu1 %v13717_v46  ;;  %v5403_v45 = vld [vmem:[%s21375_s3 + $0xbb0] sm:$0xff]  ;;  %v13351_v53 = vcombine.high %v5147_v43, %v5155_v44 }
 0xed5   : > { %v5411_v46 = vld [vmem:[%s21375_s3 + $0xbf0] sm:$0xff] }
 0xed6   : > { %8530 = vmatpush2.bf16.msra.mxu0 %v13460_v54  ;;  %v13607_v49 = vcombine.high %v5403_v45, %v5411_v46  ;;  %v5131_v54 = vld [vmem:[%s21375_s3 + $0x330] sm:$0xff]  ;;  %v13606_v57 = vcombine.low %v5403_v45, %v5411_v46  ;;  %v13542_v46 = vcombine.low %v5339_v36, %v5347_v37 }
 0xed7   : > { %8571 = vmatpush2.bf16.msra.mxu1 %v13716_v55  ;;  %8531 = vmatprep.subr.bf16.mxu0 %v13445_v18  ;;  %v5139_v55 = vld [vmem:[%s21375_s3 + $0x370] sm:$0xff]  ;;  %v13350_v18 = vcombine.low %v5147_v43, %v5155_v44 }
 0xed8   : > { %8572 = vmatprep.subr.bf16.mxu1 %v13701_v13  ;;  %v5387_v13 = vld [vmem:[%s21375_s3 + $0xb30] sm:$0xff]  ;;  %v13335_v25 = vcombine.high %v5131_v54, %v5139_v55  ;;  %v13334_v11 = vcombine.low %v5131_v54, %v5139_v55 }
 0xed9   : > { %v5323_v43 = vld [vmem:[%s21375_s3 + $0x930] sm:$0xff] }
 0xeda   : > { %8532 = vmatpush2.bf16.msra.mxu0 %v13444_v1  ;;  %v5123_v1 = vld [vmem:[%s21375_s3 + $0x2f0] sm:$0xff] }
 0xedb   : > { %8573 = vmatpush2.bf16.msra.mxu1 %v13700_v2  ;;  %8533 = vmatprep.subr.bf16.mxu0 %v13429_v3  ;;  %v13591_v3 = vcombine.high %v5387_v13, %v5395_v58  ;;  %v13318_v28 = vcombine.low %v5115_v0, %v5123_v1  ;;  %v5331_v44 = vld [vmem:[%s21375_s3 + $0x970] sm:$0xff] }
 0xedc   : > { %8574 = vmatprep.subr.bf16.mxu1 %v13685_v5  ;;  %v5371_v5 = vld [vmem:[%s21375_s3 + $0xab0] sm:$0xff] }
 0xedd   : > { %v13575_v21 = vcombine.high %v5371_v5, %v5379_v6  ;;  %v13574_v30 = vcombine.low %v5371_v5, %v5379_v6  ;;  %v5307_v54 = vld [vmem:[%s21375_s3 + $0x8b0] sm:$0xff] }
 0xede   : > { %8534 = vmatpush2.bf16.msra.mxu0 %v13428_v14  ;;  %v5315_v55 = vld [vmem:[%s21375_s3 + $0x8f0] sm:$0xff] }
 0xedf   : > { %8575 = vmatpush2.bf16.msra.mxu1 %v13684_v16  ;;  %8535 = vmatprep.subr.bf16.mxu0 %v13413_v19  ;;  %v13590_v16 = vcombine.low %v5387_v13, %v5395_v58  ;;  %v13319_v19 = vcombine.high %v5115_v0, %v5123_v1  ;;  %v13526_v13 = vcombine.low %v5323_v43, %v5331_v44  ;;  %v5043_v0 = vld [vmem:[%s21375_s3 + $0x70] sm:$0xff] }
 0xee0   : > { %8576 = vmatprep.subr.bf16.mxu1 %v13669_v20  ;;  %v5291_v1 = vld [vmem:[%s21375_s3 + $0x830] sm:$0xff]  ;;  %v13510_v5 = vcombine.low %v5307_v54, %v5315_v55 }
 0xee2   : > { %8536 = vmatpush2.bf16.msra.mxu0 %v13412_v26 }
 0xee3   : > { %8577 = vmatpush2.bf16.msra.mxu1 %v13668_v27  ;;  %8537 = vmatprep.subr.bf16.mxu0 %v13397_v15  ;;  %v5355_v27 = vld [vmem:[%s21375_s3 + $0xa30] sm:$0xff] }
 0xee4   : > { %8578 = vmatprep.subr.bf16.mxu1 %v13653_v61  ;;  %v5363_v15 = vld [vmem:[%s21375_s3 + $0xa70] sm:$0xff] }
 0xee5   : > { %v13558_v38 = vcombine.low %v5355_v27, %v5363_v15 }
 0xee6   : > { %8538 = vmatpush2.bf16.msra.mxu0 %v13396_v32 }
 0xee7   : > { %8579 = vmatpush2.bf16.msra.mxu1 %v13652_v52  ;;  %8539 = vmatprep.subr.bf16.mxu0 %v13381_v34  ;;  %v13559_v52 = vcombine.high %v5355_v27, %v5363_v15  ;;  %v5083_v34 = vld [vmem:[%s21375_s3 + $0x1b0] sm:$0xff] }
 0xee8   : > { %8580 = vmatprep.subr.bf16.mxu1 %v13637_v35  ;;  %v5091_v35 = vld [vmem:[%s21375_s3 + $0x1f0] sm:$0xff] }
 0xee9   : > { %v13286_v45 = vcombine.low %v5083_v34, %v5091_v35  ;;  %v5267_v27 = vld [vmem:[%s21375_s3 + $0x770] sm:$0xff] }
 0xeea   : > { %8540 = vmatpush2.bf16.msra.mxu0 %v13380_v39  ;;  %v13287_v39 = vcombine.high %v5083_v34, %v5091_v35  ;;  %v5515_v15 = vld [vmem:[%s21375_s3 + $0xf30] sm:$0xff] }
 0xeeb   : > { %8581 = vmatpush2.bf16.msra.mxu1 %v13636_v40  ;;  %8541 = vmatprep.subr.bf16.mxu0 %v13365_v41  ;;  %v13543_v40 = vcombine.high %v5339_v36, %v5347_v37  ;;  %v5067_v41 = vld [vmem:[%s21375_s3 + $0x130] sm:$0xff] }
 0xeec   : > { %8582 = vmatprep.subr.bf16.mxu1 %v13621_v42  ;;  %v5075_v42 = vld [vmem:[%s21375_s3 + $0x170] sm:$0xff] }
 0xeed   : > { %v5499_v34 = vld [vmem:[%s21375_s3 + $0xeb0] sm:$0xff] }
 0xeee   : > { %8542 = vmatpush2.bf16.msra.mxu0 %v13364_v47  ;;  %v13271_v47 = vcombine.high %v5067_v41, %v5075_v42  ;;  %v5507_v35 = vld [vmem:[%s21375_s3 + $0xef0] sm:$0xff] }
 0xeef   : > { %8583 = vmatpush2.bf16.msra.mxu1 %v13620_v50  ;;  %8593 = vmatprep.subr.bf16.mxu0 %v13351_v53  ;;  %v13527_v50 = vcombine.high %v5323_v43, %v5331_v44  ;;  %v5051_v53 = vld [vmem:[%s21375_s3 + $0xb0] sm:$0xff]  ;;  %v13702_v44 = vcombine.low %v5499_v34, %v5507_v35 }
 0xef0   : > { %8634 = vmatprep.subr.bf16.mxu1 %v13607_v49  ;;  %v5059_v49 = vld [vmem:[%s21375_s3 + $0xf0] sm:$0xff] }
 0xef1   : > { %v8299_v2 = vpop.f32.mrf.mxu0  ;;  %8544 = vmatmul.mubr.bf16.vlgmr.msra.gmra.mxu0 %v18251_v63  ;;  %v13255_v58 = vcombine.high %v5051_v53, %v5059_v49 }
 0xef2   : > { %v8340_v7 = vpop.f32.mrf.mxu1  ;;  %8585 = vmatmul.mubr.bf16.vlgmr.msra.gmra.mxu1 %v18255_v48  ;;  %8594 = vmatpush1.bf16.msra.mxu0 %v13350_v18  ;;  %v13270_v18 = vcombine.low %v5067_v41, %v5075_v42  ;;  %v5483_v41 = vld [vmem:[%s21375_s3 + $0xe30] sm:$0xff] }
 0xef3   : > { %v19261_v12 = vadd.f32 %v8340_v7, %v8299_v2  ;;  %8625 = vmatprep.mubr.bf16.mxu0 %v18243_v59  ;;  %8635 = vmatpush1.bf16.msra.mxu1 %v13606_v57  ;;  %v8301_v14 = vpop.f32.mrf.mxu0  ;;  %v13511_v57 = vcombine.high %v5307_v54, %v5315_v55  ;;  %v5299_v2 = vld [vmem:[%s21375_s3 + $0x870] sm:$0xff] }
 0xef4   : > { %8666 = vmatprep.mubr.bf16.mxu1 %v18247_v8  ;;  %v8342_v20 = vpop.f32.mrf.mxu1  ;;  %8595 = vmatprep.subr.bf16.mxu0 %v13335_v25  ;;  %v5035_v25 = vld [vmem:[%s21375_s3 + $0x30] sm:$0xff]  ;;  %v13495_v7 = vcombine.high %v5291_v1, %v5299_v2 }
 0xef5   : > { %v19271_v51 = vadd.f32 %v8342_v20, %v8301_v14  ;;  %v8303_v26 = vpop.f32.mrf.mxu0  ;;  %8636 = vmatprep.subr.bf16.mxu1 %v13591_v3  ;;  %v13254_v3 = vcombine.low %v5051_v53, %v5059_v49  ;;  %v13239_v6 = vcombine.high %v5035_v25, %v5043_v0  ;;  %v5283_v14 = vld [vmem:[%s21375_s3 + $0x7f0] sm:$0xff]  ;;  %v13238_v20 = vcombine.low %v5035_v25, %v5043_v0 }
 0xef6   : > { %v8344_v61 = vpop.f32.mrf.mxu1  ;;  %8596 = vmatpush1.bf16.msra.mxu0 %v13334_v11  ;;  %v5275_v11 = vld [vmem:[%s21375_s3 + $0x7b0] sm:$0xff] }
 0xef7   : > { %8637 = vmatpush1.bf16.msra.mxu1 %v13590_v16  ;;  %v8304_v29 = vpop.f32.mrf.mxu0  ;;  %8597 = vmatprep.subr.bf16.mxu0 %v13319_v19  ;;  %v5531_v16 = vld [vmem:[%s21375_s3 + $0xfb0] sm:$0xff]  ;;  %v13479_v22 = vcombine.high %v5275_v11, %v5283_v14 }
 0xef8   : > { %v8345_v32 = vpop.f32.mrf.mxu1  ;;  %8638 = vmatprep.subr.bf16.mxu1 %v13575_v21  ;;  %v5539_v19 = vld [vmem:[%s21375_s3 + $0xff0] sm:$0xff]  ;;  %v13494_v21 = vcombine.low %v5291_v1, %v5299_v2 }
 0xef9   : > { %v13735_v24 = vcombine.high %v5531_v16, %v5539_v19  ;;  %v5259_v26 = vld [vmem:[%s21375_s3 + $0x730] sm:$0xff]  ;;  %v13734_v29 = vcombine.low %v5531_v16, %v5539_v19 }
 0xefa   : > { %8598 = vmatpush1.bf16.msra.mxu0 %v13318_v28  ;;  %v5523_v61 = vld [vmem:[%s21375_s3 + $0xf70] sm:$0xff]  ;;  %v13478_v28 = vcombine.low %v5275_v11, %v5283_v14  ;;  %v13462_v36 = vcombine.low %v5259_v26, %v5267_v27 }
 0xefb   : > { %8639 = vmatpush1.bf16.msra.mxu1 %v13574_v30  ;;  %8599 = vmatprep.subr.bf16.mxu0 %v13303_v31  ;;  %v13463_v30 = vcombine.high %v5259_v26, %v5267_v27  ;;  %v13719_v31 = vcombine.high %v5515_v15, %v5523_v61  ;;  %v5243_v32 = vld [vmem:[%s21375_s3 + $0x6b0] sm:$0xff]  ;;  %v13718_v37 = vcombine.low %v5515_v15, %v5523_v61 }
 0xefc   : > { %8640 = vmatprep.subr.bf16.mxu1 %v13559_v52  ;;  %v5251_v52 = vld [vmem:[%s21375_s3 + $0x6f0] sm:$0xff] }
 0xefd   : > { %v5491_v42 = vld [vmem:[%s21375_s3 + $0xe70] sm:$0xff]  ;;  %v13446_v43 = vcombine.low %v5243_v32, %v5251_v52 }
 0xefe   : > { %8600 = vmatpush1.bf16.msra.mxu0 %v13302_v10  ;;  %v13447_v10 = vcombine.high %v5243_v32, %v5251_v52  ;;  %v5467_v53 = vld [vmem:[%s21375_s3 + $0xdb0] sm:$0xff]  ;;  %v13686_v55 = vcombine.low %v5483_v41, %v5491_v42  ;;  %v5404_v32 = vld [vmem:[%s21375_s3 + $0xbb8] sm:$0xff] }
 0xeff   : > { %8641 = vmatpush1.bf16.msra.mxu1 %v13558_v38  ;;  %8601 = vmatprep.subr.bf16.mxu0 %v13287_v39  ;;  %v13703_v38 = vcombine.high %v5499_v34, %v5507_v35  ;;  %v5227_v39 = vld [vmem:[%s21375_s3 + $0x630] sm:$0xff]  ;;  %v5412_v52 = vld [vmem:[%s21375_s3 + $0xbf8] sm:$0xff] }
 0xf00   : > { %8642 = vmatprep.subr.bf16.mxu1 %v13543_v40  ;;  %v5235_v40 = vld [vmem:[%s21375_s3 + $0x670] sm:$0xff] }
 0xf01   : > { %v5475_v49 = vld [vmem:[%s21375_s3 + $0xdf0] sm:$0xff]  ;;  %v13430_v54 = vcombine.low %v5227_v39, %v5235_v40 }
 0xf02   : > { %8602 = vmatpush1.bf16.msra.mxu0 %v13286_v45  ;;  %v13431_v45 = vcombine.high %v5227_v39, %v5235_v40  ;;  %v5451_v25 = vld [vmem:[%s21375_s3 + $0xd30] sm:$0xff]  ;;  %v13670_v2 = vcombine.low %v5467_v53, %v5475_v49  ;;  %v5388_v40 = vld [vmem:[%s21375_s3 + $0xb38] sm:$0xff] }
 0xf03   : > { %8643 = vmatpush1.bf16.msra.mxu1 %v13542_v46  ;;  %8603 = vmatprep.subr.bf16.mxu0 %v13271_v47  ;;  %v13687_v46 = vcombine.high %v5483_v41, %v5491_v42  ;;  %v5211_v47 = vld [vmem:[%s21375_s3 + $0x5b0] sm:$0xff]  ;;  %v5396_v41 = vld [vmem:[%s21375_s3 + $0xb78] sm:$0xff]  ;;  %v13608_v42 = vcombine.low %v5404_v32, %v5412_v52 }
 0xf04   : > { %8644 = vmatprep.subr.bf16.mxu1 %v13527_v50  ;;  %v5219_v50 = vld [vmem:[%s21375_s3 + $0x5f0] sm:$0xff] }
 0xf05   : > { %v5459_v0 = vld [vmem:[%s21375_s3 + $0xd70] sm:$0xff]  ;;  %v13414_v1 = vcombine.low %v5211_v47, %v5219_v50 }
 0xf06   : > { %8604 = vmatpush1.bf16.msra.mxu0 %v13270_v18  ;;  %v13415_v18 = vcombine.high %v5211_v47, %v5219_v50  ;;  %v5435_v11 = vld [vmem:[%s21375_s3 + $0xcb0] sm:$0xff]  ;;  %v13654_v19 = vcombine.low %v5451_v25, %v5459_v0  ;;  %v13593_v47 = vcombine.high %v5388_v40, %v5396_v41  ;;  %v5372_v50 = vld [vmem:[%s21375_s3 + $0xab8] sm:$0xff] }
 0xf07   : > { %8645 = vmatpush1.bf16.msra.mxu1 %v13526_v13  ;;  %8605 = vmatprep.subr.bf16.mxu0 %v13255_v58  ;;  %v13671_v13 = vcombine.high %v5467_v53, %v5475_v49  ;;  %v5195_v58 = vld [vmem:[%s21375_s3 + $0x530] sm:$0xff]  ;;  %v5380_v53 = vld [vmem:[%s21375_s3 + $0xaf8] sm:$0xff] }
 0xf08   : > { %8646 = vmatprep.subr.bf16.mxu1 %v13511_v57  ;;  %v5203_v57 = vld [vmem:[%s21375_s3 + $0x570] sm:$0xff] }
 0xf09   : > { %v5443_v14 = vld [vmem:[%s21375_s3 + $0xcf0] sm:$0xff]  ;;  %v13398_v16 = vcombine.low %v5195_v58, %v5203_v57 }
 0xf0a   : > { %8606 = vmatpush1.bf16.msra.mxu0 %v13254_v3  ;;  %v13399_v3 = vcombine.high %v5195_v58, %v5203_v57  ;;  %v5419_v26 = vld [vmem:[%s21375_s3 + $0xc30] sm:$0xff]  ;;  %v13638_v61 = vcombine.low %v5435_v11, %v5443_v14 }
 0xf0b   : > { %8647 = vmatpush1.bf16.msra.mxu1 %v13510_v5  ;;  %8607 = vmatprep.subr.bf16.mxu0 %v13239_v6  ;;  %v13655_v5 = vcombine.high %v5451_v25, %v5459_v0  ;;  %v5179_v6 = vld [vmem:[%s21375_s3 + $0x4b0] sm:$0xff]  ;;  %v13577_v25 = vcombine.high %v5372_v50, %v5380_v53  ;;  %v5100_v0 = vld [vmem:[%s21375_s3 + $0x238] sm:$0xff] }
 0xf0c   : > { %8648 = vmatprep.subr.bf16.mxu1 %v13495_v7  ;;  %v5187_v7 = vld [vmem:[%s21375_s3 + $0x4f0] sm:$0xff] }
 0xf0d   : > { %v5427_v27 = vld [vmem:[%s21375_s3 + $0xc70] sm:$0xff]  ;;  %v13382_v15 = vcombine.low %v5179_v6, %v5187_v7 }
 0xf0e   : > { %8608 = vmatpush1.bf16.msra.mxu0 %v13238_v20  ;;  %v13383_v20 = vcombine.high %v5179_v6, %v5187_v7  ;;  %v13622_v35 = vcombine.low %v5419_v26, %v5427_v27 }
 0xf0f   : > { %8649 = vmatpush1.bf16.msra.mxu1 %v13494_v21  ;;  %8609 = vmatprep.subr.bf16.mxu0 %v13479_v22  ;;  %v13639_v21 = vcombine.high %v5435_v11, %v5443_v14  ;;  %v5163_v22 = vld [vmem:[%s21375_s3 + $0x430] sm:$0xff]  ;;  %v13576_v11 = vcombine.low %v5372_v50, %v5380_v53 }
 0xf10   : > { %8650 = vmatprep.subr.bf16.mxu1 %v13735_v24  ;;  %v5171_v24 = vld [vmem:[%s21375_s3 + $0x470] sm:$0xff] }
 0xf11   : > { %v13366_v34 = vcombine.low %v5163_v22, %v5171_v24 }
 0xf12   : > { %8610 = vmatpush2.bf16.msra.mxu0 %v13478_v28  ;;  %v13367_v28 = vcombine.high %v5163_v22, %v5171_v24  ;;  %v5340_v22 = vld [vmem:[%s21375_s3 + $0x9b8] sm:$0xff] }
 0xf13   : > { %8651 = vmatpush2.bf16.msra.mxu1 %v13734_v29  ;;  %8611 = vmatprep.subr.bf16.mxu0 %v13463_v30  ;;  %v13623_v29 = vcombine.high %v5419_v26, %v5427_v27  ;;  %v5148_v30 = vld [vmem:[%s21375_s3 + $0x3b8] sm:$0xff] }
 0xf14   : > { %8652 = vmatprep.subr.bf16.mxu1 %v13719_v31  ;;  %v5156_v31 = vld [vmem:[%s21375_s3 + $0x3f8] sm:$0xff] }
 0xf15   : > { %v13352_v39 = vcombine.low %v5148_v30, %v5156_v31  ;;  %v5348_v24 = vld [vmem:[%s21375_s3 + $0x9f8] sm:$0xff] }
 0xf16   : > { %8612 = vmatpush2.bf16.msra.mxu0 %v13462_v36  ;;  %v13353_v36 = vcombine.high %v5148_v30, %v5156_v31  ;;  %v5324_v30 = vld [vmem:[%s21375_s3 + $0x938] sm:$0xff] }
 0xf17   : > { %8653 = vmatpush2.bf16.msra.mxu1 %v13718_v37  ;;  %8613 = vmatprep.subr.bf16.mxu0 %v13447_v10  ;;  %v13609_v37 = vcombine.high %v5404_v32, %v5412_v52  ;;  %v5132_v10 = vld [vmem:[%s21375_s3 + $0x338] sm:$0xff]  ;;  %v13544_v52 = vcombine.low %v5340_v22, %v5348_v24 }
 0xf18   : > { %8654 = vmatprep.subr.bf16.mxu1 %v13703_v38  ;;  %v5140_v38 = vld [vmem:[%s21375_s3 + $0x378] sm:$0xff] }
 0xf19   : > { %v5332_v31 = vld [vmem:[%s21375_s3 + $0x978] sm:$0xff] }
 0xf1a   : > { %8614 = vmatpush2.bf16.msra.mxu0 %v13446_v43  ;;  %v13337_v43 = vcombine.high %v5132_v10, %v5140_v38 }
 0xf1b   : > { %8655 = vmatpush2.bf16.msra.mxu1 %v13702_v44  ;;  %8615 = vmatprep.subr.bf16.mxu0 %v13431_v45  ;;  %v5116_v44 = vld [vmem:[%s21375_s3 + $0x2b8] sm:$0xff] }
 0xf1c   : > { %8656 = vmatprep.subr.bf16.mxu1 %v13687_v46  ;;  %v5124_v45 = vld [vmem:[%s21375_s3 + $0x2f8] sm:$0xff] }
 0xf1d   : > { %v13321_v58 = vcombine.high %v5116_v44, %v5124_v45  ;;  %v13320_v6 = vcombine.low %v5116_v44, %v5124_v45  ;;  %v5044_v44 = vld [vmem:[%s21375_s3 + $0x78] sm:$0xff] }
 0xf1e   : > { %8616 = vmatpush2.bf16.msra.mxu0 %v13430_v54  ;;  %v13336_v54 = vcombine.low %v5132_v10, %v5140_v38  ;;  %v5308_v10 = vld [vmem:[%s21375_s3 + $0x8b8] sm:$0xff] }
 0xf1f   : > { %8657 = vmatpush2.bf16.msra.mxu1 %v13686_v55  ;;  %8617 = vmatprep.subr.bf16.mxu0 %v13415_v18  ;;  %v5316_v38 = vld [vmem:[%s21375_s3 + $0x8f8] sm:$0xff] }
 0xf20   : > { %8658 = vmatprep.subr.bf16.mxu1 %v13671_v13  ;;  %v13592_v13 = vcombine.low %v5388_v40, %v5396_v41  ;;  %v13528_v40 = vcombine.low %v5324_v30, %v5332_v31  ;;  %v5292_v45 = vld [vmem:[%s21375_s3 + $0x838] sm:$0xff]  ;;  %v13512_v50 = vcombine.low %v5308_v10, %v5316_v38 }
 0xf22   : > { %8618 = vmatpush2.bf16.msra.mxu0 %v13414_v1  ;;  %v5108_v1 = vld [vmem:[%s21375_s3 + $0x278] sm:$0xff] }
 0xf23   : > { %8659 = vmatpush2.bf16.msra.mxu1 %v13670_v2  ;;  %8619 = vmatprep.subr.bf16.mxu0 %v13399_v3  ;;  %v5356_v3 = vld [vmem:[%s21375_s3 + $0xa38] sm:$0xff]  ;;  %v13305_v14 = vcombine.high %v5100_v0, %v5108_v1  ;;  %v13304_v26 = vcombine.low %v5100_v0, %v5108_v1 }
 0xf24   : > { %8660 = vmatprep.subr.bf16.mxu1 %v13655_v5 }
 0xf26   : > { %8620 = vmatpush2.bf16.msra.mxu0 %v13398_v16 }
 0xf27   : > { %8661 = vmatpush2.bf16.msra.mxu1 %v13654_v19  ;;  %8621 = vmatprep.subr.bf16.mxu0 %v13383_v20  ;;  %v5084_v20 = vld [vmem:[%s21375_s3 + $0x1b8] sm:$0xff] }
 0xf28   : > { %8662 = vmatprep.subr.bf16.mxu1 %v13639_v21  ;;  %v5092_v21 = vld [vmem:[%s21375_s3 + $0x1f8] sm:$0xff] }
 0xf29   : > { %v13288_v32 = vcombine.low %v5084_v20, %v5092_v21 }
 0xf2a   : > { %8622 = vmatpush2.bf16.msra.mxu0 %v13382_v15  ;;  %v13289_v15 = vcombine.high %v5084_v20, %v5092_v21  ;;  %v5500_v20 = vld [vmem:[%s21375_s3 + $0xeb8] sm:$0xff] }
 0xf2b   : > { %8663 = vmatpush2.bf16.msra.mxu1 %v13638_v61  ;;  %8623 = vmatprep.subr.bf16.mxu0 %v13367_v28  ;;  %v13545_v61 = vcombine.high %v5340_v22, %v5348_v24  ;;  %v5068_v28 = vld [vmem:[%s21375_s3 + $0x138] sm:$0xff] }
 0xf2c   : > { %8664 = vmatprep.subr.bf16.mxu1 %v13623_v29  ;;  %v5076_v29 = vld [vmem:[%s21375_s3 + $0x178] sm:$0xff] }
 0xf2d   : > { %v5508_v21 = vld [vmem:[%s21375_s3 + $0xef8] sm:$0xff] }
 0xf2e   : > { %8624 = vmatpush2.bf16.msra.mxu0 %v13366_v34  ;;  %v13273_v34 = vcombine.high %v5068_v28, %v5076_v29 }
 0xf2f   : > { %8665 = vmatpush2.bf16.msra.mxu1 %v13622_v35  ;;  %8675 = vmatprep.subr.bf16.mxu0 %v13353_v36  ;;  %v13529_v35 = vcombine.high %v5324_v30, %v5332_v31  ;;  %v5052_v36 = vld [vmem:[%s21375_s3 + $0xb8] sm:$0xff]  ;;  %v13704_v31 = vcombine.low %v5500_v20, %v5508_v21 }
 0xf30   : > { %8716 = vmatprep.subr.bf16.mxu1 %v13609_v37  ;;  %v5060_v37 = vld [vmem:[%s21375_s3 + $0xf8] sm:$0xff] }
 0xf31   : > { %v8381_v46 = vpop.f32.mrf.mxu0  ;;  %8626 = vmatmul.mubr.bf16.vlgmr.msra.gmra.mxu0 %v18251_v63  ;;  %v13257_v41 = vcombine.high %v5052_v36, %v5060_v37 }
 0xf32   : > { %v8422_v49 = vpop.f32.mrf.mxu1  ;;  %8667 = vmatmul.mubr.bf16.vlgmr.msra.gmra.mxu1 %v18255_v48  ;;  %8676 = vmatpush1.bf16.msra.mxu0 %v13352_v39  ;;  %v13272_v39 = vcombine.low %v5068_v28, %v5076_v29  ;;  %v5484_v28 = vld [vmem:[%s21375_s3 + $0xe38] sm:$0xff] }
 0xf33   : > { %v19461_v55 = vadd.f32 %v8422_v49, %v8381_v46  ;;  %8707 = vmatprep.mubr.bf16.mxu0 %v18243_v59  ;;  %8717 = vmatpush1.bf16.msra.mxu1 %v13608_v42  ;;  %v8383_v18 = vpop.f32.mrf.mxu0  ;;  %v13513_v42 = vcombine.high %v5308_v10, %v5316_v38  ;;  %v5300_v46 = vld [vmem:[%s21375_s3 + $0x878] sm:$0xff] }
 0xf34   : > { %8748 = vmatprep.mubr.bf16.mxu1 %v18247_v8  ;;  %v8424_v57 = vpop.f32.mrf.mxu1  ;;  %8677 = vmatprep.subr.bf16.mxu0 %v13337_v43  ;;  %v5364_v8 = vld [vmem:[%s21375_s3 + $0xa78] sm:$0xff]  ;;  %v13497_v49 = vcombine.high %v5292_v45, %v5300_v46 }
 0xf35   : > { %v19471_v2 = vadd.f32 %v8424_v57, %v8383_v18  ;;  %v8385_v59 = vpop.f32.mrf.mxu0  ;;  %8718 = vmatprep.subr.bf16.mxu1 %v13593_v47  ;;  %v13561_v19 = vcombine.high %v5356_v3, %v5364_v8  ;;  %v13560_v27 = vcombine.low %v5356_v3, %v5364_v8  ;;  %v5036_v43 = vld [vmem:[%s21375_s3 + $0x38] sm:$0xff]  ;;  %v13256_v47 = vcombine.low %v5052_v36, %v5060_v37 }
 0xf36   : > { %v8426_v5 = vpop.f32.mrf.mxu1  ;;  %8678 = vmatpush1.bf16.msra.mxu0 %v13336_v54  ;;  %v13241_v53 = vcombine.high %v5036_v43, %v5044_v44  ;;  %v5276_v54 = vld [vmem:[%s21375_s3 + $0x7b8] sm:$0xff]  ;;  %v13240_v57 = vcombine.low %v5036_v43, %v5044_v44 }
 0xf37   : > { %8719 = vmatpush1.bf16.msra.mxu1 %v13592_v13  ;;  %v8386_v7 = vpop.f32.mrf.mxu0  ;;  %8679 = vmatprep.subr.bf16.mxu0 %v13321_v58  ;;  %v5284_v18 = vld [vmem:[%s21375_s3 + $0x7f8] sm:$0xff] }
 0xf38   : > { %v8427_v16 = vpop.f32.mrf.mxu1  ;;  %8720 = vmatprep.subr.bf16.mxu1 %v13577_v25  ;;  %v5532_v13 = vld [vmem:[%s21375_s3 + $0xfb8] sm:$0xff]  ;;  %v13496_v25 = vcombine.low %v5292_v45, %v5300_v46  ;;  %v13481_v0 = vcombine.high %v5276_v54, %v5284_v18 }
 0xf39   : > { %v5540_v58 = vld [vmem:[%s21375_s3 + $0xff8] sm:$0xff] }
 0xf3a   : > { %8680 = vmatpush1.bf16.msra.mxu0 %v13320_v6  ;;  %v13737_v1 = vcombine.high %v5532_v13, %v5540_v58  ;;  %v5260_v59 = vld [vmem:[%s21375_s3 + $0x738] sm:$0xff]  ;;  %v13480_v6 = vcombine.low %v5276_v54, %v5284_v18  ;;  %v13736_v7 = vcombine.low %v5532_v13, %v5540_v58 }
 0xf3b   : > { %8721 = vmatpush1.bf16.msra.mxu1 %v13576_v11  ;;  %8681 = vmatprep.subr.bf16.mxu0 %v13305_v14  ;;  %v5268_v3 = vld [vmem:[%s21375_s3 + $0x778] sm:$0xff] }
 0xf3c   : > { %8722 = vmatprep.subr.bf16.mxu1 %v13561_v19  ;;  %v5516_v8 = vld [vmem:[%s21375_s3 + $0xf38] sm:$0xff]  ;;  %v13465_v11 = vcombine.high %v5260_v59, %v5268_v3  ;;  %v13464_v22 = vcombine.low %v5260_v59, %v5268_v3 }
 0xf3d   : > { %v5524_v5 = vld [vmem:[%s21375_s3 + $0xf78] sm:$0xff] }
 0xf3e   : > { %8682 = vmatpush1.bf16.msra.mxu0 %v13304_v26  ;;  %v13721_v14 = vcombine.high %v5516_v8, %v5524_v5  ;;  %v5244_v16 = vld [vmem:[%s21375_s3 + $0x6b8] sm:$0xff]  ;;  %v13720_v24 = vcombine.low %v5516_v8, %v5524_v5 }
 0xf3f   : > { %8723 = vmatpush1.bf16.msra.mxu1 %v13560_v27  ;;  %8683 = vmatprep.subr.bf16.mxu0 %v13289_v15  ;;  %v5252_v19 = vld [vmem:[%s21375_s3 + $0x6f8] sm:$0xff]  ;;  %v13705_v27 = vcombine.high %v5500_v20, %v5508_v21  ;;  %v8758_v20 = vmax.f32 %v18865_v4, 0.0  ;;  %v8760_v21 = vmax.f32 %v19065_v17, 0.0  ;;  %v15237_v17 = vld [vmem:[%s21376_s4 + $0x2c4] ss:$16 sps:$4 sm:$0xff]  }
 0xf40   : > { %8724 = vmatprep.subr.bf16.mxu1 %v13545_v61  ;;  %v13449_v26 = vcombine.high %v5244_v16, %v5252_v19  ;;  %v5228_v15 = vld [vmem:[%s21375_s3 + $0x638] sm:$0xff]  ;;  %v13448_v30 = vcombine.low %v5244_v16, %v5252_v19  ;;  %v15228_v16 = vld [vmem:[%s21376_s4 + $0xe4] ss:$16 sps:$4 sm:$0xff]  }
 0xf41   : > { %v5236_v61 = vld [vmem:[%s21375_s3 + $0x678] sm:$0xff]  ;;  %v15231_v19 = vld [vmem:[%s21376_s4 + $0x2e4] ss:$16 sps:$4 sm:$0xff]  }
 0xf42   : > { %8684 = vmatpush1.bf16.msra.mxu0 %v13288_v32  ;;  %v5492_v29 = vld [vmem:[%s21375_s3 + $0xe78] sm:$0xff]  ;;  %v13433_v32 = vcombine.high %v5228_v15, %v5236_v61  ;;  %v13432_v10 = vcombine.low %v5228_v15, %v5236_v61  ;;  %v19646_v15 = vpack.c.bf16 %v8760_v21, %v8760_v21  ;;  %v15289_v21 = vld [vmem:[%s21376_s4 + $0x3a0] ss:$16 sps:$4 sm:$0xff]  }
 0xf43   : > { %8725 = vmatpush1.bf16.msra.mxu1 %v13544_v52  ;;  %8685 = vmatprep.subr.bf16.mxu0 %v13273_v34  ;;  %v13689_v52 = vcombine.high %v5484_v28, %v5492_v29  ;;  %v5212_v34 = vld [vmem:[%s21375_s3 + $0x5b8] sm:$0xff]  ;;  %v13688_v38 = vcombine.low %v5484_v28, %v5492_v29  ;;  %v15232_v28 = vld [vmem:[%s21376_s4 + $0xc0] ss:$16 sps:$4 sm:$0xff]  }
 0xf44   : > { %8726 = vmatprep.subr.bf16.mxu1 %v13529_v35  ;;  %v5220_v35 = vld [vmem:[%s21375_s3 + $0x5f8] sm:$0xff] }
 0xf45   : > { %v5468_v36 = vld [vmem:[%s21375_s3 + $0xdb8] sm:$0xff]  ;;  %v13416_v45 = vcombine.low %v5212_v34, %v5220_v35 }
 0xf46   : > { %8686 = vmatpush1.bf16.msra.mxu0 %v13272_v39  ;;  %v5476_v37 = vld [vmem:[%s21375_s3 + $0xdf8] sm:$0xff]  ;;  %v13417_v39 = vcombine.high %v5212_v34, %v5220_v35 }
 0xf47   : > { %8727 = vmatpush1.bf16.msra.mxu1 %v13528_v40  ;;  %8687 = vmatprep.subr.bf16.mxu0 %v13257_v41  ;;  %v13673_v40 = vcombine.high %v5468_v36, %v5476_v37  ;;  %v5196_v41 = vld [vmem:[%s21375_s3 + $0x538] sm:$0xff]  ;;  %v13672_v46 = vcombine.low %v5468_v36, %v5476_v37  ;;  %v15238_v36 = vld [vmem:[%s21376_s4 + $0xa0] ss:$16 sps:$4 sm:$0xff]  }
 0xf48   : > { %8728 = vmatprep.subr.bf16.mxu1 %v13513_v42  ;;  %v5204_v42 = vld [vmem:[%s21375_s3 + $0x578] sm:$0xff] }
 0xf49   : > { %v5452_v43 = vld [vmem:[%s21375_s3 + $0xd38] sm:$0xff]  ;;  %v13400_v13 = vcombine.low %v5196_v41, %v5204_v42 }
 0xf4a   : > { %8688 = vmatpush1.bf16.msra.mxu0 %v13256_v47  ;;  %v5460_v44 = vld [vmem:[%s21375_s3 + $0xd78] sm:$0xff]  ;;  %v13401_v47 = vcombine.high %v5196_v41, %v5204_v42  ;;  %v15244_v41 = vld [vmem:[%s21376_s4 + $0x80] ss:$16 sps:$4 sm:$0xff]  }
 0xf4b   : > { %8729 = vmatpush1.bf16.msra.mxu1 %v13512_v50  ;;  %8689 = vmatprep.subr.bf16.mxu0 %v13241_v53  ;;  %v13657_v50 = vcombine.high %v5452_v43, %v5460_v44  ;;  %v5180_v53 = vld [vmem:[%s21375_s3 + $0x4b8] sm:$0xff]  ;;  %v13656_v58 = vcombine.low %v5452_v43, %v5460_v44  ;;  %v15247_v42 = vld [vmem:[%s21376_s4 + $0x280] ss:$16 sps:$4 sm:$0xff]   ;;  %v15252_v43 = vld [vmem:[%s21376_s4 + $0x64] ss:$16 sps:$4 sm:$0xff]  }
 0xf4c   : > { %8730 = vmatprep.subr.bf16.mxu1 %v13497_v49  ;;  %v5188_v49 = vld [vmem:[%s21375_s3 + $0x4f8] sm:$0xff]  ;;  %v15255_v44 = vld [vmem:[%s21376_s4 + $0x264] ss:$16 sps:$4 sm:$0xff]  }
 0xf4d   : > { %v5436_v54 = vld [vmem:[%s21375_s3 + $0xcb8] sm:$0xff]  ;;  %v13384_v8 = vcombine.low %v5180_v53, %v5188_v49 }
 0xf4e   : > { %8690 = vmatpush1.bf16.msra.mxu0 %v13240_v57  ;;  %v5444_v18 = vld [vmem:[%s21375_s3 + $0xcf8] sm:$0xff]  ;;  %v13385_v57 = vcombine.high %v5180_v53, %v5188_v49  ;;  %v15256_v53 = vld [vmem:[%s21376_s4 + $0x40] ss:$16 sps:$4 sm:$0xff]  }
 0xf4f   : > { %8731 = vmatpush1.bf16.msra.mxu1 %v13496_v25  ;;  %8691 = vmatprep.subr.bf16.mxu0 %v13481_v0  ;;  %v13641_v25 = vcombine.high %v5436_v54, %v5444_v18  ;;  %v5164_v0 = vld [vmem:[%s21375_s3 + $0x438] sm:$0xff]  ;;  %v13640_v5 = vcombine.low %v5436_v54, %v5444_v18  ;;  %v15259_v49 = vld [vmem:[%s21376_s4 + $0x240] ss:$16 sps:$4 sm:$0xff]   ;;  %v15264_v54 = vld [vmem:[%s21376_s4 + $0x24] ss:$16 sps:$4 sm:$0xff]  }
 0xf50   : > { %8732 = vmatprep.subr.bf16.mxu1 %v13737_v1  ;;  %v5172_v1 = vld [vmem:[%s21375_s3 + $0x478] sm:$0xff]  ;;  %v15267_v18 = vld [vmem:[%s21376_s4 + $0x224] ss:$16 sps:$4 sm:$0xff]  }
 0xf51   : > { %v5420_v59 = vld [vmem:[%s21375_s3 + $0xc38] sm:$0xff] }
 0xf52   : > { %8692 = vmatpush2.bf16.msra.mxu0 %v13480_v6  ;;  %v5428_v3 = vld [vmem:[%s21375_s3 + $0xc78] sm:$0xff]  ;;  %v13369_v6 = vcombine.high %v5164_v0, %v5172_v1 }
 0xf53   : > { %8733 = vmatpush2.bf16.msra.mxu1 %v13736_v7  ;;  %8693 = vmatprep.subr.bf16.mxu0 %v13465_v11  ;;  %v13625_v7 = vcombine.high %v5420_v59, %v5428_v3  ;;  %v13368_v11 = vcombine.low %v5164_v0, %v5172_v1  ;;  %v15268_v0 = vld [vmem:[%s21376_s4] ss:$16 sps:$4 sm:$0xff]  }
 0xf54   : > { %8734 = vmatprep.subr.bf16.mxu1 %v13721_v14  ;;  %v13624_v14 = vcombine.low %v5420_v59, %v5428_v3  ;;  %v15271_v1 = vld [vmem:[%s21376_s4 + $0x200] ss:$16 sps:$4 sm:$0xff]   ;;  %v15276_v59 = vld [vmem:[%s21376_s4 + $0x1e4] ss:$16 sps:$4 sm:$0xff]  }
 0xf55   : > { %v15279_v3 = vld [vmem:[%s21376_s4 + $0x3e4] ss:$16 sps:$4 sm:$0xff]  }
 0xf56   : > { %8694 = vmatpush2.bf16.msra.mxu0 %v13464_v22  ;;  %v15226_v22 = vld [vmem:[%s21376_s4 + $0xe0] ss:$16 sps:$4 sm:$0xff]  }
 0xf57   : > { %8735 = vmatpush2.bf16.msra.mxu1 %v13720_v24  ;;  %8695 = vmatprep.subr.bf16.mxu0 %v13449_v26  ;;  %v15229_v24 = vld [vmem:[%s21376_s4 + $0x2e0] ss:$16 sps:$4 sm:$0xff]   ;;  %v15234_v26 = vld [vmem:[%s21376_s4 + $0xc4] ss:$16 sps:$4 sm:$0xff]  }
 0xf58   : > { %8736 = vmatprep.subr.bf16.mxu1 %v13705_v27  ;;  %v19640_v27 = vpack.c.bf16 %v8758_v20, %v8758_v20  ;;  %v15286_v20 = vld [vmem:[%s21376_s4 + $0x1a0] ss:$16 sps:$4 sm:$0xff]  }
 0xf5a   : > { %8696 = vmatpush2.bf16.msra.mxu0 %v13448_v30  ;;  %v15235_v30 = vld [vmem:[%s21376_s4 + $0x2c0] ss:$16 sps:$4 sm:$0xff]  }
 0xf5b   : > { %8737 = vmatpush2.bf16.msra.mxu1 %v13704_v31  ;;  %8697 = vmatprep.subr.bf16.mxu0 %v13433_v32  ;;  %v15240_v31 = vld [vmem:[%s21376_s4 + $0xa4] ss:$16 sps:$4 sm:$0xff]  }
 0xf5c   : > { %8738 = vmatprep.subr.bf16.mxu1 %v13689_v52  ;;  %v15243_v32 = vld [vmem:[%s21376_s4 + $0x2a4] ss:$16 sps:$4 sm:$0xff]  }
 0xf5e   : > { %8698 = vmatpush2.bf16.msra.mxu0 %v13432_v10  ;;  %v15241_v10 = vld [vmem:[%s21376_s4 + $0x2a0] ss:$16 sps:$4 sm:$0xff]  }
 0xf5f   : > { %8739 = vmatpush2.bf16.msra.mxu1 %v13688_v38  ;;  %8699 = vmatprep.subr.bf16.mxu0 %v13417_v39  ;;  %v15246_v38 = vld [vmem:[%s21376_s4 + $0x84] ss:$16 sps:$4 sm:$0xff]  }
 0xf60   : > { %8740 = vmatprep.subr.bf16.mxu1 %v13673_v40  ;;  %v15249_v40 = vld [vmem:[%s21376_s4 + $0x284] ss:$16 sps:$4 sm:$0xff]  }
 0xf62   : > { %8700 = vmatpush2.bf16.msra.mxu0 %v13416_v45  ;;  %v15250_v45 = vld [vmem:[%s21376_s4 + $0x60] ss:$16 sps:$4 sm:$0xff]  }
 0xf63   : > { %8741 = vmatpush2.bf16.msra.mxu1 %v13672_v46  ;;  %8701 = vmatprep.subr.bf16.mxu0 %v13401_v47  ;;  %v15253_v46 = vld [vmem:[%s21376_s4 + $0x260] ss:$16 sps:$4 sm:$0xff]   ;;  %v15258_v47 = vld [vmem:[%s21376_s4 + $0x44] ss:$16 sps:$4 sm:$0xff]  }
 0xf64   : > { %8742 = vmatprep.subr.bf16.mxu1 %v13657_v50  ;;  %v15261_v50 = vld [vmem:[%s21376_s4 + $0x244] ss:$16 sps:$4 sm:$0xff]  }
 0xf66   : > { %8702 = vmatpush2.bf16.msra.mxu0 %v13400_v13  ;;  %v15262_v13 = vld [vmem:[%s21376_s4 + $0x20] ss:$16 sps:$4 sm:$0xff]  }
 0xf67   : > { %8743 = vmatpush2.bf16.msra.mxu1 %v13656_v58  ;;  %8703 = vmatprep.subr.bf16.mxu0 %v13385_v57  ;;  %v15265_v58 = vld [vmem:[%s21376_s4 + $0x220] ss:$16 sps:$4 sm:$0xff]   ;;  %v15270_v57 = vld [vmem:[%s21376_s4 + $0x4] ss:$16 sps:$4 sm:$0xff]  }
 0xf68   : > { %8744 = vmatprep.subr.bf16.mxu1 %v13641_v25  ;;  %v15273_v25 = vld [vmem:[%s21376_s4 + $0x204] ss:$16 sps:$4 sm:$0xff]  }
 0xf6a   : > { %8704 = vmatpush2.bf16.msra.mxu0 %v13384_v8  ;;  %v15274_v8 = vld [vmem:[%s21376_s4 + $0x1e0] ss:$16 sps:$4 sm:$0xff]  }
 0xf6b   : > { %8745 = vmatpush2.bf16.msra.mxu1 %v13640_v5  ;;  %8705 = vmatprep.subr.bf16.mxu0 %v13369_v6  ;;  %v15277_v5 = vld [vmem:[%s21376_s4 + $0x3e0] ss:$16 sps:$4 sm:$0xff]   ;;  %v15282_v6 = vld [vmem:[%s21376_s4 + $0x1c4] ss:$16 sps:$4 sm:$0xff]  }
 0xf6c   : > { %8746 = vmatprep.subr.bf16.mxu1 %v13625_v7  ;;  %v15285_v7 = vld [vmem:[%s21376_s4 + $0x3c4] ss:$16 sps:$4 sm:$0xff]  }
 0xf6e   : > { %8706 = vmatpush2.bf16.msra.mxu0 %v13368_v11  ;;  %v15280_v11 = vld [vmem:[%s21376_s4 + $0x1c0] ss:$16 sps:$4 sm:$0xff]  }
 0xf6f   : > { %8747 = vmatpush2.bf16.msra.mxu1 %v13624_v14  ;;  %11861 = vmatprep.subr.bf16.mxu0 %v15228_v16  ;;  %v15283_v14 = vld [vmem:[%s21376_s4 + $0x3c0] ss:$16 sps:$4 sm:$0xff]   ;;  %v15288_v16 = vld [vmem:[%s21376_s4 + $0x1a4] ss:$16 sps:$4 sm:$0xff]  }
 0xf70   : > { %11902 = vmatprep.subr.bf16.mxu1 %v15231_v19  ;;  %v15291_v19 = vld [vmem:[%s21376_s4 + $0x3a4] ss:$16 sps:$4 sm:$0xff]  }
 0xf71   : > { %v8463_v4 = vpop.f32.mrf.mxu0  ;;  %8708 = vmatmul.mubr.bf16.vlgmr.msra.gmra.mxu0 %v18251_v63 }
 0xf72   : > { %v8504_v61 = vpop.f32.mrf.mxu1  ;;  %8749 = vmatmul.mubr.bf16.vlgmr.msra.gmra.mxu1 %v18255_v48  ;;  %11862 = vmatpush1.bf16.msra.mxu0 %v15226_v22  ;;  %v15294_v22 = vld [vmem:[%s21376_s4 + $0x184] ss:$16 sps:$4 sm:$0xff]  }
 0xf73   : > { %v19652_v29 = vadd.f32 %v8504_v61, %v8463_v4  ;;  %11893 = vmatprep.mubr.bf16.mxu0 %v19640_v27  ;;  %11903 = vmatpush1.bf16.msra.mxu1 %v15229_v24  ;;  %v8465_v63 = vpop.f32.mrf.mxu0  ;;  %v15297_v24 = vld [vmem:[%s21376_s4 + $0x384] ss:$16 sps:$4 sm:$0xff]   ;;  %v15295_v4 = vld [vmem:[%s21376_s4 + $0x380] ss:$16 sps:$4 sm:$0xff]  }
 0xf74   : > { %11934 = vmatprep.mubr.bf16.mxu1 %v19646_v15  ;;  %v8506_v48 = vpop.f32.mrf.mxu1  ;;  %11863 = vmatprep.subr.bf16.mxu0 %v15234_v26  ;;  %v15292_v26 = vld [vmem:[%s21376_s4 + $0x180] ss:$16 sps:$4 sm:$0xff]   ;;  %v15303_v61 = vld [vmem:[%s21376_s4 + $0x364] ss:$16 sps:$4 sm:$0xff]  }
 0xf75   : > { %v19665_v52 = vadd.f32 %v8506_v48, %v8465_v63  ;;  %v8467_v34 = vpop.f32.mrf.mxu0  ;;  %11904 = vmatprep.subr.bf16.mxu1 %v15237_v17  ;;  %v15300_v17 = vld [vmem:[%s21376_s4 + $0x164] ss:$16 sps:$4 sm:$0xff]   ;;  %v15301_v63 = vld [vmem:[%s21376_s4 + $0x360] ss:$16 sps:$4 sm:$0xff]  }
 0xf76   : > { %v8508_v35 = vpop.f32.mrf.mxu1  ;;  %11864 = vmatpush1.bf16.msra.mxu0 %v15232_v28  ;;  %v15298_v28 = vld [vmem:[%s21376_s4 + $0x160] ss:$16 sps:$4 sm:$0xff]   ;;  %v15312_v34 = vld [vmem:[%s21376_s4 + $0x124] ss:$16 sps:$4 sm:$0xff]  }
 0xf77   : > { %11905 = vmatpush1.bf16.msra.mxu1 %v15235_v30  ;;  %v8468_v37 = vpop.f32.mrf.mxu0  ;;  %11865 = vmatprep.subr.bf16.mxu0 %v15240_v31  ;;  %v15306_v30 = vld [vmem:[%s21376_s4 + $0x144] ss:$16 sps:$4 sm:$0xff]   ;;  %v15304_v48 = vld [vmem:[%s21376_s4 + $0x140] ss:$16 sps:$4 sm:$0xff]  }
 0xf78   : > { %v8509_v39 = vpop.f32.mrf.mxu1  ;;  %11906 = vmatprep.subr.bf16.mxu1 %v15243_v32  ;;  %v15309_v31 = vld [vmem:[%s21376_s4 + $0x344] ss:$16 sps:$4 sm:$0xff]   ;;  %v15307_v32 = vld [vmem:[%s21376_s4 + $0x340] ss:$16 sps:$4 sm:$0xff]  }
 0xf79   : > { %v15315_v35 = vld [vmem:[%s21376_s4 + $0x324] ss:$16 sps:$4 sm:$0xff]   ;;  %v15313_v37 = vld [vmem:[%s21376_s4 + $0x320] ss:$16 sps:$4 sm:$0xff]  }
 0xf7a   : > { %11866 = vmatpush1.bf16.msra.mxu0 %v15238_v36  ;;  %v15310_v36 = vld [vmem:[%s21376_s4 + $0x120] ss:$16 sps:$4 sm:$0xff]  }
 0xf7b   : > { %11907 = vmatpush1.bf16.msra.mxu1 %v15241_v10  ;;  %11867 = vmatprep.subr.bf16.mxu0 %v15246_v38  ;;  %v15318_v10 = vld [vmem:[%s21376_s4 + $0x104] ss:$16 sps:$4 sm:$0xff]   ;;  %v15316_v39 = vld [vmem:[%s21376_s4 + $0x100] ss:$16 sps:$4 sm:$0xff]  }
 0xf7c   : > { %11908 = vmatprep.subr.bf16.mxu1 %v15249_v40  ;;  %v15321_v38 = vld [vmem:[%s21376_s4 + $0x304] ss:$16 sps:$4 sm:$0xff]   ;;  %v8757_v40 = vmax.f32 %v18861_v23, 0.0  ;;  %v8764_v23 = vmax.f32 %v19471_v2, 0.0 }
 0xf7e   : > { %11868 = vmatpush1.bf16.msra.mxu0 %v15244_v41  ;;  %v15319_v41 = vld [vmem:[%s21376_s4 + $0x300] ss:$16 sps:$4 sm:$0xff]  }
 0xf7f   : > { %11909 = vmatpush1.bf16.msra.mxu1 %v15247_v42  ;;  %11869 = vmatprep.subr.bf16.mxu0 %v15252_v43  ;;  %v15324_v42 = vld [vmem:[%s21376_s4 + $0x4e4] ss:$16 sps:$4 sm:$0xff]   ;;  %v8759_v43 = vmax.f32 %v19060_v33, 0.0  ;;  %v15325_v33 = vld [vmem:[%s21376_s4 + $0x6e0] ss:$16 sps:$4 sm:$0xff]  }
 0xf80   : > { %11910 = vmatprep.subr.bf16.mxu1 %v15255_v44  ;;  %v15327_v44 = vld [vmem:[%s21376_s4 + $0x6e4] ss:$16 sps:$4 sm:$0xff]  }
 0xf82   : > { %11870 = vmatpush1.bf16.msra.mxu0 %v15250_v45  ;;  %v8762_v45 = vmax.f32 %v19271_v51, 0.0  ;;  %v15330_v51 = vld [vmem:[%s21376_s4 + $0x4c4] ss:$16 sps:$4 sm:$0xff]  }
 0xf83   : > { %11911 = vmatpush1.bf16.msra.mxu1 %v15253_v46  ;;  %11871 = vmatprep.subr.bf16.mxu0 %v15258_v47  ;;  %v15322_v46 = vld [vmem:[%s21376_s4 + $0x4e0] ss:$16 sps:$4 sm:$0xff]   ;;  %v19842_v47 = vpack.c.bf16 %v8757_v40, %v8757_v40  ;;  %v15378_v40 = vld [vmem:[%s21376_s4 + $0x5c4] ss:$16 sps:$4 sm:$0xff]  }
 0xf84   : > { %11912 = vmatprep.subr.bf16.mxu1 %v15261_v50  ;;  %v19847_v50 = vpack.c.bf16 %v8759_v43, %v8759_v43  ;;  %v19852_v2 = vpack.c.bf16 %v8762_v45, %v8762_v45  ;;  %v15379_v43 = vld [vmem:[%s21376_s4 + $0x7c0] ss:$16 sps:$4 sm:$0xff]   ;;  %v15387_v45 = vld [vmem:[%s21376_s4 + $0x7a4] ss:$16 sps:$4 sm:$0xff]  }
 0xf86   : > { %11872 = vmatpush1.bf16.msra.mxu0 %v15256_v53 }
 0xf87   : > { %11913 = vmatpush1.bf16.msra.mxu1 %v15259_v49  ;;  %11873 = vmatprep.subr.bf16.mxu0 %v15264_v54  ;;  %v15333_v49 = vld [vmem:[%s21376_s4 + $0x6c4] ss:$16 sps:$4 sm:$0xff]   ;;  %v19858_v54 = vpack.c.bf16 %v8764_v23, %v8764_v23  ;;  %v15382_v23 = vld [vmem:[%s21376_s4 + $0x5a0] ss:$16 sps:$4 sm:$0xff]  }
 0xf88   : > { %11914 = vmatprep.subr.bf16.mxu1 %v15267_v18 }
 0xf8a   : > { %11874 = vmatpush1.bf16.msra.mxu0 %v15262_v13  ;;  %v15328_v13 = vld [vmem:[%s21376_s4 + $0x4c0] ss:$16 sps:$4 sm:$0xff]  }
 0xf8b   : > { %11915 = vmatpush1.bf16.msra.mxu1 %v15265_v58  ;;  %11875 = vmatprep.subr.bf16.mxu0 %v15270_v57 }
 0xf8c   : > { %11916 = vmatprep.subr.bf16.mxu1 %v15273_v25  ;;  %v15331_v25 = vld [vmem:[%s21376_s4 + $0x6c0] ss:$16 sps:$4 sm:$0xff]  }
 0xf8e   : > { %11876 = vmatpush1.bf16.msra.mxu0 %v15268_v0  ;;  %v15336_v0 = vld [vmem:[%s21376_s4 + $0x4a4] ss:$16 sps:$4 sm:$0xff]  }
 0xf8f   : > { %11917 = vmatpush1.bf16.msra.mxu1 %v15271_v1  ;;  %11877 = vmatprep.subr.bf16.mxu0 %v15276_v59  ;;  %v15339_v59 = vld [vmem:[%s21376_s4 + $0x6a4] ss:$16 sps:$4 sm:$0xff]  }
 0xf90   : > { %11918 = vmatprep.subr.bf16.mxu1 %v15279_v3 }
 0xf92   : > { %11878 = vmatpush2.bf16.msra.mxu0 %v15274_v8 }
 0xf93   : > { %11919 = vmatpush2.bf16.msra.mxu1 %v15277_v5  ;;  %11879 = vmatprep.subr.bf16.mxu0 %v15282_v6  ;;  %v15334_v5 = vld [vmem:[%s21376_s4 + $0x4a0] ss:$16 sps:$4 sm:$0xff]  }
 0xf94   : > { %11920 = vmatprep.subr.bf16.mxu1 %v15285_v7  ;;  %v15337_v7 = vld [vmem:[%s21376_s4 + $0x6a0] ss:$16 sps:$4 sm:$0xff]  }
 0xf96   : > { %11880 = vmatpush2.bf16.msra.mxu0 %v15280_v11  ;;  %v15342_v11 = vld [vmem:[%s21376_s4 + $0x484] ss:$16 sps:$4 sm:$0xff]  }
 0xf97   : > { %11921 = vmatpush2.bf16.msra.mxu1 %v15283_v14  ;;  %11881 = vmatprep.subr.bf16.mxu0 %v15288_v16  ;;  %v15345_v16 = vld [vmem:[%s21376_s4 + $0x684] ss:$16 sps:$4 sm:$0xff]  }
 0xf98   : > { %11922 = vmatprep.subr.bf16.mxu1 %v15291_v19  ;;  %v15340_v19 = vld [vmem:[%s21376_s4 + $0x480] ss:$16 sps:$4 sm:$0xff]  }
 0xf9a   : > { %11882 = vmatpush2.bf16.msra.mxu0 %v15286_v20  ;;  %v15343_v20 = vld [vmem:[%s21376_s4 + $0x680] ss:$16 sps:$4 sm:$0xff]  }
 0xf9b   : > { %11923 = vmatpush2.bf16.msra.mxu1 %v15289_v21  ;;  %11883 = vmatprep.subr.bf16.mxu0 %v15294_v22  ;;  %v15348_v21 = vld [vmem:[%s21376_s4 + $0x464] ss:$16 sps:$4 sm:$0xff]  }
 0xf9c   : > { %11924 = vmatprep.subr.bf16.mxu1 %v15297_v24  ;;  %v15351_v22 = vld [vmem:[%s21376_s4 + $0x664] ss:$16 sps:$4 sm:$0xff]   ;;  %v15346_v24 = vld [vmem:[%s21376_s4 + $0x460] ss:$16 sps:$4 sm:$0xff]  }
 0xf9e   : > { %11884 = vmatpush2.bf16.msra.mxu0 %v15292_v26  ;;  %v15349_v26 = vld [vmem:[%s21376_s4 + $0x660] ss:$16 sps:$4 sm:$0xff]  }
 0xf9f   : > { %11925 = vmatpush2.bf16.msra.mxu1 %v15295_v4  ;;  %11885 = vmatprep.subr.bf16.mxu0 %v15300_v17  ;;  %v15354_v4 = vld [vmem:[%s21376_s4 + $0x444] ss:$16 sps:$4 sm:$0xff]  }
 0xfa0   : > { %11926 = vmatprep.subr.bf16.mxu1 %v15303_v61  ;;  %v15357_v17 = vld [vmem:[%s21376_s4 + $0x644] ss:$16 sps:$4 sm:$0xff]   ;;  %v15352_v61 = vld [vmem:[%s21376_s4 + $0x440] ss:$16 sps:$4 sm:$0xff]  }
 0xfa2   : > { %11886 = vmatpush2.bf16.msra.mxu0 %v15298_v28  ;;  %v15355_v28 = vld [vmem:[%s21376_s4 + $0x640] ss:$16 sps:$4 sm:$0xff]  }
 0xfa3   : > { %11927 = vmatpush2.bf16.msra.mxu1 %v15301_v63  ;;  %11887 = vmatprep.subr.bf16.mxu0 %v15306_v30  ;;  %v15360_v63 = vld [vmem:[%s21376_s4 + $0x424] ss:$16 sps:$4 sm:$0xff]  }
 0xfa4   : > { %11928 = vmatprep.subr.bf16.mxu1 %v15309_v31  ;;  %v15363_v30 = vld [vmem:[%s21376_s4 + $0x624] ss:$16 sps:$4 sm:$0xff]   ;;  %v15358_v31 = vld [vmem:[%s21376_s4 + $0x420] ss:$16 sps:$4 sm:$0xff]  }
 0xfa6   : > { %11888 = vmatpush2.bf16.msra.mxu0 %v15304_v48  ;;  %v15361_v48 = vld [vmem:[%s21376_s4 + $0x620] ss:$16 sps:$4 sm:$0xff]  }
 0xfa7   : > { %11929 = vmatpush2.bf16.msra.mxu1 %v15307_v32  ;;  %11889 = vmatprep.subr.bf16.mxu0 %v15312_v34  ;;  %v15366_v32 = vld [vmem:[%s21376_s4 + $0x404] ss:$16 sps:$4 sm:$0xff]  }
 0xfa8   : > { %11930 = vmatprep.subr.bf16.mxu1 %v15315_v35  ;;  %v15369_v34 = vld [vmem:[%s21376_s4 + $0x604] ss:$16 sps:$4 sm:$0xff]   ;;  %v15364_v35 = vld [vmem:[%s21376_s4 + $0x400] ss:$16 sps:$4 sm:$0xff]  }
 0xfaa   : > { %11890 = vmatpush2.bf16.msra.mxu0 %v15310_v36  ;;  %v15367_v36 = vld [vmem:[%s21376_s4 + $0x600] ss:$16 sps:$4 sm:$0xff]  }
 0xfab   : > { %11931 = vmatpush2.bf16.msra.mxu1 %v15313_v37  ;;  %11891 = vmatprep.subr.bf16.mxu0 %v15318_v10  ;;  %v15372_v37 = vld [vmem:[%s21376_s4 + $0x5e4] ss:$16 sps:$4 sm:$0xff]  }
 0xfac   : > { %11932 = vmatprep.subr.bf16.mxu1 %v15321_v38  ;;  %v15375_v10 = vld [vmem:[%s21376_s4 + $0x7e4] ss:$16 sps:$4 sm:$0xff]   ;;  %v15370_v38 = vld [vmem:[%s21376_s4 + $0x5e0] ss:$16 sps:$4 sm:$0xff]  }
 0xfae   : > { %11892 = vmatpush2.bf16.msra.mxu0 %v15316_v39  ;;  %v15373_v39 = vld [vmem:[%s21376_s4 + $0x7e0] ss:$16 sps:$4 sm:$0xff]  }
 0xfaf   : > { %11933 = vmatpush2.bf16.msra.mxu1 %v15319_v41  ;;  %11943 = vmatprep.subr.bf16.mxu0 %v15324_v42  ;;  %v15381_v41 = vld [vmem:[%s21376_s4 + $0x7c4] ss:$16 sps:$4 sm:$0xff]   ;;  %v15376_v42 = vld [vmem:[%s21376_s4 + $0x5c0] ss:$16 sps:$4 sm:$0xff]  }
 0xfb0   : > { %11984 = vmatprep.subr.bf16.mxu1 %v15327_v44  ;;  %v15384_v44 = vld [vmem:[%s21376_s4 + $0x5a4] ss:$16 sps:$4 sm:$0xff]  }
 0xfb1   : > { %v8545_v53 = vpop.f32.mrf.mxu0  ;;  %11894 = vmatmul.mubr.bf16.vlgmr.msra.gmra.mxu0 %v19842_v47 }
 0xfb2   : > { %v8586_v18 = vpop.f32.mrf.mxu1  ;;  %11935 = vmatmul.mubr.bf16.vlgmr.msra.gmra.mxu1 %v19847_v50  ;;  %11944 = vmatpush1.bf16.msra.mxu0 %v15322_v46  ;;  %v15385_v46 = vld [vmem:[%s21376_s4 + $0x7a0] ss:$16 sps:$4 sm:$0xff]  }
 0xfb3   : > { %v19864_v58 = vadd.f32 %v8586_v18, %v8545_v53  ;;  %11975 = vmatprep.mubr.bf16.mxu0 %v19852_v2  ;;  %11985 = vmatpush1.bf16.msra.mxu1 %v15325_v33  ;;  %v19867_v57 = vpop.f32.mrf.mxu0  ;;  %v15390_v33 = vld [vmem:[%s21376_s4 + $0x584] ss:$16 sps:$4 sm:$0xff]   ;;  %v15388_v53 = vld [vmem:[%s21376_s4 + $0x580] ss:$16 sps:$4 sm:$0xff]  }
 0xfb4   : > { %12016 = vmatprep.mubr.bf16.mxu1 %v19858_v54  ;;  %v19876_v1 = vpop.f32.mrf.mxu1  ;;  %11945 = vmatprep.subr.bf16.mxu0 %v15330_v51  ;;  %v15393_v51 = vld [vmem:[%s21376_s4 + $0x784] ss:$16 sps:$4 sm:$0xff]  }
 0xfb5   : > { %v8549_v3 = vpop.f32.mrf.mxu0  ;;  %11986 = vmatprep.subr.bf16.mxu1 %v15333_v49  ;;  %v15391_v49 = vld [vmem:[%s21376_s4 + $0x780] ss:$16 sps:$4 sm:$0xff]   ;;  %v15396_v18 = vld [vmem:[%s21376_s4 + $0x564] ss:$16 sps:$4 sm:$0xff]  }
 0xfb6   : > { %v8590_v8 = vpop.f32.mrf.mxu1  ;;  %11946 = vmatpush1.bf16.msra.mxu0 %v15328_v13  ;;  %v15399_v13 = vld [vmem:[%s21376_s4 + $0x764] ss:$16 sps:$4 sm:$0xff]  }
 0xfb7   : > { %11987 = vmatpush1.bf16.msra.mxu1 %v15331_v25  ;;  %v8550_v6 = vpop.f32.mrf.mxu0  ;;  %11947 = vmatprep.subr.bf16.mxu0 %v15336_v0  ;;  %v15394_v25 = vld [vmem:[%s21376_s4 + $0x560] ss:$16 sps:$4 sm:$0xff]   ;;  %v15405_v3 = vld [vmem:[%s21376_s4 + $0x744] ss:$16 sps:$4 sm:$0xff]  }
 0xfb8   : > { %v8591_v14 = vpop.f32.mrf.mxu1  ;;  %11988 = vmatprep.subr.bf16.mxu1 %v15339_v59  ;;  %v15397_v0 = vld [vmem:[%s21376_s4 + $0x760] ss:$16 sps:$4 sm:$0xff]   ;;  %v15402_v59 = vld [vmem:[%s21376_s4 + $0x544] ss:$16 sps:$4 sm:$0xff]  }
 0xfb9   : > { %v15400_v8 = vld [vmem:[%s21376_s4 + $0x540] ss:$16 sps:$4 sm:$0xff]   ;;  %v15408_v6 = vld [vmem:[%s21376_s4 + $0x524] ss:$16 sps:$4 sm:$0xff]  }
 0xfba   : > { %11948 = vmatpush1.bf16.msra.mxu0 %v15334_v5  ;;  %v15403_v5 = vld [vmem:[%s21376_s4 + $0x740] ss:$16 sps:$4 sm:$0xff]  }
 0xfbb   : > { %11989 = vmatpush1.bf16.msra.mxu1 %v15337_v7  ;;  %11949 = vmatprep.subr.bf16.mxu0 %v15342_v11  ;;  %v15411_v7 = vld [vmem:[%s21376_s4 + $0x724] ss:$16 sps:$4 sm:$0xff]   ;;  %v15406_v11 = vld [vmem:[%s21376_s4 + $0x520] ss:$16 sps:$4 sm:$0xff]  }
 0xfbc   : > { %11990 = vmatprep.subr.bf16.mxu1 %v15345_v16  ;;  %v15409_v14 = vld [vmem:[%s21376_s4 + $0x720] ss:$16 sps:$4 sm:$0xff]   ;;  %v15414_v16 = vld [vmem:[%s21376_s4 + $0x504] ss:$16 sps:$4 sm:$0xff]  }
 0xfbe   : > { %11950 = vmatpush1.bf16.msra.mxu0 %v15340_v19  ;;  %v15417_v19 = vld [vmem:[%s21376_s4 + $0x704] ss:$16 sps:$4 sm:$0xff]  }
 0xfbf   : > { %11991 = vmatpush1.bf16.msra.mxu1 %v15343_v20  ;;  %11951 = vmatprep.subr.bf16.mxu0 %v15348_v21  ;;  %v8589_v20 = vadd.f32 %v19876_v1, %v19867_v57  ;;  %v15412_v21 = vld [vmem:[%s21376_s4 + $0x500] ss:$16 sps:$4 sm:$0xff]   ;;  %v15423_v57 = vld [vmem:[%s21376_s4 + $0xae4] ss:$16 sps:$4 sm:$0xff]   ;;  %v8766_v1 = vmax.f32 %v19665_v52, 0.0 }
 0xfc0   : > { %11992 = vmatprep.subr.bf16.mxu1 %v15351_v22  ;;  %v8761_v22 = vmax.f32 %v19261_v12, 0.0  ;;  %v15426_v52 = vld [vmem:[%s21376_s4 + $0x8c4] ss:$16 sps:$4 sm:$0xff]  }
 0xfc1   : > { %v8768_v12 = vmax.f32 %v8589_v20, 0.0  ;;  %v15468_v20 = vld [vmem:[%s21376_s4 + $0x9e4] ss:$16 sps:$4 sm:$0xff]  }
 0xfc2   : > { %11952 = vmatpush1.bf16.msra.mxu0 %v15346_v24  ;;  %v15415_v24 = vld [vmem:[%s21376_s4 + $0x700] ss:$16 sps:$4 sm:$0xff]  }
 0xfc3   : > { %11993 = vmatpush1.bf16.msra.mxu1 %v15349_v26  ;;  %11953 = vmatprep.subr.bf16.mxu0 %v15354_v4  ;;  %v15420_v26 = vld [vmem:[%s21376_s4 + $0x8e4] ss:$16 sps:$4 sm:$0xff]   ;;  %v8763_v4 = vmax.f32 %v19461_v55, 0.0  ;;  %v15421_v55 = vld [vmem:[%s21376_s4 + $0xae0] ss:$16 sps:$4 sm:$0xff]  }
 0xfc4   : > { %11994 = vmatprep.subr.bf16.mxu1 %v15357_v17  ;;  %v15418_v17 = vld [vmem:[%s21376_s4 + $0x8e0] ss:$16 sps:$4 sm:$0xff]  }
 0xfc6   : > { %11954 = vmatpush1.bf16.msra.mxu0 %v15352_v61  ;;  %v20057_v61 = vpack.c.bf16 %v8761_v22, %v8761_v22  ;;  %v15466_v22 = vld [vmem:[%s21376_s4 + $0x9e0] ss:$16 sps:$4 sm:$0xff]  }
 0xfc7   : > { %11995 = vmatpush1.bf16.msra.mxu1 %v15355_v28  ;;  %11955 = vmatprep.subr.bf16.mxu0 %v15360_v63  ;;  %v20062_v28 = vpack.c.bf16 %v8763_v4, %v8763_v4  ;;  %v20067_v63 = vpack.c.bf16 %v8766_v1, %v8766_v1  ;;  %v15477_v4 = vld [vmem:[%s21376_s4 + $0xbc4] ss:$16 sps:$4 sm:$0xff]   ;;  %v15475_v1 = vld [vmem:[%s21376_s4 + $0xbc0] ss:$16 sps:$4 sm:$0xff]  }
 0xfc8   : > { %11996 = vmatprep.subr.bf16.mxu1 %v15363_v30 }
 0xfca   : > { %11956 = vmatpush1.bf16.msra.mxu0 %v15358_v31  ;;  %v15429_v31 = vld [vmem:[%s21376_s4 + $0xac4] ss:$16 sps:$4 sm:$0xff]  }
 0xfcb   : > { %11997 = vmatpush1.bf16.msra.mxu1 %v15361_v48  ;;  %11957 = vmatprep.subr.bf16.mxu0 %v15366_v32  ;;  %v20073_v48 = vpack.c.bf16 %v8768_v12, %v8768_v12  ;;  %v15480_v12 = vld [vmem:[%s21376_s4 + $0x9a4] ss:$16 sps:$4 sm:$0xff]  }
 0xfcc   : > { %11998 = vmatprep.subr.bf16.mxu1 %v15369_v34  ;;  %v15424_v34 = vld [vmem:[%s21376_s4 + $0x8c0] ss:$16 sps:$4 sm:$0xff]  }
 0xfce   : > { %11958 = vmatpush1.bf16.msra.mxu0 %v15364_v35 }
 0xfcf   : > { %11999 = vmatpush1.bf16.msra.mxu1 %v15367_v36  ;;  %11959 = vmatprep.subr.bf16.mxu0 %v15372_v37  ;;  %v15427_v37 = vld [vmem:[%s21376_s4 + $0xac0] ss:$16 sps:$4 sm:$0xff]  }
 0xfd0   : > { %12000 = vmatprep.subr.bf16.mxu1 %v15375_v10  ;;  %v15432_v10 = vld [vmem:[%s21376_s4 + $0x8a4] ss:$16 sps:$4 sm:$0xff]  }
 0xfd2   : > { %11960 = vmatpush2.bf16.msra.mxu0 %v15370_v38 }
 0xfd3   : > { %12001 = vmatpush2.bf16.msra.mxu1 %v15373_v39  ;;  %11961 = vmatprep.subr.bf16.mxu0 %v15378_v40  ;;  %v15435_v39 = vld [vmem:[%s21376_s4 + $0xaa4] ss:$16 sps:$4 sm:$0xff]  }
 0xfd4   : > { %12002 = vmatprep.subr.bf16.mxu1 %v15381_v41 }
 0xfd6   : > { %11962 = vmatpush2.bf16.msra.mxu0 %v15376_v42  ;;  %v15430_v42 = vld [vmem:[%s21376_s4 + $0x8a0] ss:$16 sps:$4 sm:$0xff]  }
 0xfd7   : > { %12003 = vmatpush2.bf16.msra.mxu1 %v15379_v43  ;;  %11963 = vmatprep.subr.bf16.mxu0 %v15384_v44  ;;  %v15433_v44 = vld [vmem:[%s21376_s4 + $0xaa0] ss:$16 sps:$4 sm:$0xff]  }
 0xfd8   : > { %12004 = vmatprep.subr.bf16.mxu1 %v15387_v45  ;;  %v15438_v45 = vld [vmem:[%s21376_s4 + $0x884] ss:$16 sps:$4 sm:$0xff]  }
 0xfda   : > { %11964 = vmatpush2.bf16.msra.mxu0 %v15382_v23 }
 0xfdb   : > { %12005 = vmatpush2.bf16.msra.mxu1 %v15385_v46  ;;  %11965 = vmatprep.subr.bf16.mxu0 %v15390_v33  ;;  %v15441_v46 = vld [vmem:[%s21376_s4 + $0xa84] ss:$16 sps:$4 sm:$0xff]   ;;  %v15436_v33 = vld [vmem:[%s21376_s4 + $0x880] ss:$16 sps:$4 sm:$0xff]  }
 0xfdc   : > { %12006 = vmatprep.subr.bf16.mxu1 %v15393_v51  ;;  %v15439_v51 = vld [vmem:[%s21376_s4 + $0xa80] ss:$16 sps:$4 sm:$0xff]  }
 0xfde   : > { %11966 = vmatpush2.bf16.msra.mxu0 %v15388_v53  ;;  %v15444_v53 = vld [vmem:[%s21376_s4 + $0x864] ss:$16 sps:$4 sm:$0xff]  }
 0xfdf   : > { %12007 = vmatpush2.bf16.msra.mxu1 %v15391_v49  ;;  %11967 = vmatprep.subr.bf16.mxu0 %v15396_v18  ;;  %v15447_v49 = vld [vmem:[%s21376_s4 + $0xa64] ss:$16 sps:$4 sm:$0xff]   ;;  %v15442_v18 = vld [vmem:[%s21376_s4 + $0x860] ss:$16 sps:$4 sm:$0xff]  }
 0xfe0   : > { %12008 = vmatprep.subr.bf16.mxu1 %v15399_v13  ;;  %v15445_v13 = vld [vmem:[%s21376_s4 + $0xa60] ss:$16 sps:$4 sm:$0xff]  }
 0xfe2   : > { %11968 = vmatpush2.bf16.msra.mxu0 %v15394_v25  ;;  %v15450_v25 = vld [vmem:[%s21376_s4 + $0x844] ss:$16 sps:$4 sm:$0xff]  }
 0xfe3   : > { %12009 = vmatpush2.bf16.msra.mxu1 %v15397_v0  ;;  %11969 = vmatprep.subr.bf16.mxu0 %v15402_v59  ;;  %v15453_v0 = vld [vmem:[%s21376_s4 + $0xa44] ss:$16 sps:$4 sm:$0xff]   ;;  %v15448_v59 = vld [vmem:[%s21376_s4 + $0x840] ss:$16 sps:$4 sm:$0xff]  }
 0xfe4   : > { %12010 = vmatprep.subr.bf16.mxu1 %v15405_v3  ;;  %v15451_v3 = vld [vmem:[%s21376_s4 + $0xa40] ss:$16 sps:$4 sm:$0xff]  }
 0xfe6   : > { %11970 = vmatpush2.bf16.msra.mxu0 %v15400_v8  ;;  %v15456_v8 = vld [vmem:[%s21376_s4 + $0x824] ss:$16 sps:$4 sm:$0xff]  }
 0xfe7   : > { %12011 = vmatpush2.bf16.msra.mxu1 %v15403_v5  ;;  %11971 = vmatprep.subr.bf16.mxu0 %v15408_v6  ;;  %v15459_v5 = vld [vmem:[%s21376_s4 + $0xa24] ss:$16 sps:$4 sm:$0xff]   ;;  %v15454_v6 = vld [vmem:[%s21376_s4 + $0x820] ss:$16 sps:$4 sm:$0xff]  }
 0xfe8   : > { %12012 = vmatprep.subr.bf16.mxu1 %v15411_v7  ;;  %v15457_v7 = vld [vmem:[%s21376_s4 + $0xa20] ss:$16 sps:$4 sm:$0xff]  }
 0xfea   : > { %11972 = vmatpush2.bf16.msra.mxu0 %v15406_v11  ;;  %v15462_v11 = vld [vmem:[%s21376_s4 + $0x804] ss:$16 sps:$4 sm:$0xff]  }
 0xfeb   : > { %12013 = vmatpush2.bf16.msra.mxu1 %v15409_v14  ;;  %11973 = vmatprep.subr.bf16.mxu0 %v15414_v16  ;;  %v15465_v14 = vld [vmem:[%s21376_s4 + $0xa04] ss:$16 sps:$4 sm:$0xff]   ;;  %v15460_v16 = vld [vmem:[%s21376_s4 + $0x800] ss:$16 sps:$4 sm:$0xff]  }
 0xfec   : > { %12014 = vmatprep.subr.bf16.mxu1 %v15417_v19  ;;  %v15463_v19 = vld [vmem:[%s21376_s4 + $0xa00] ss:$16 sps:$4 sm:$0xff]  }
 0xfee   : > { %11974 = vmatpush2.bf16.msra.mxu0 %v15412_v21  ;;  %v15471_v21 = vld [vmem:[%s21376_s4 + $0xbe4] ss:$16 sps:$4 sm:$0xff]  }
 0xfef   : > { %12015 = vmatpush2.bf16.msra.mxu1 %v15415_v24  ;;  %12025 = vmatprep.subr.bf16.mxu0 %v15420_v26  ;;  %v15469_v24 = vld [vmem:[%s21376_s4 + $0xbe0] ss:$16 sps:$4 sm:$0xff]   ;;  %v15474_v26 = vld [vmem:[%s21376_s4 + $0x9c4] ss:$16 sps:$4 sm:$0xff]  }
 0xff0   : > { %12066 = vmatprep.subr.bf16.mxu1 %v15423_v57  ;;  %v15472_v57 = vld [vmem:[%s21376_s4 + $0x9c0] ss:$16 sps:$4 sm:$0xff]  }
 0xff1   : > { %v8627_v30 = vpop.f32.mrf.mxu0  ;;  %11976 = vmatmul.mubr.bf16.vlgmr.msra.gmra.mxu0 %v20057_v61 }
 0xff2   : > { %v8668_v32 = vpop.f32.mrf.mxu1  ;;  %12017 = vmatmul.mubr.bf16.vlgmr.msra.gmra.mxu1 %v20062_v28  ;;  %12026 = vmatpush1.bf16.msra.mxu0 %v15418_v17  ;;  %v15483_v17 = vld [vmem:[%s21376_s4 + $0xba4] ss:$16 sps:$4 sm:$0xff]  }
 0xff3   : > { %v20079_v35 = vadd.f32 %v8668_v32, %v8627_v30  ;;  %12057 = vmatprep.mubr.bf16.mxu0 %v20067_v63  ;;  %12067 = vmatpush1.bf16.msra.mxu1 %v15421_v55  ;;  %v20082_v36 = vpop.f32.mrf.mxu0  ;;  %v15478_v55 = vld [vmem:[%s21376_s4 + $0x9a0] ss:$16 sps:$4 sm:$0xff]   ;;  %v15486_v30 = vld [vmem:[%s21376_s4 + $0x984] ss:$16 sps:$4 sm:$0xff]  }
 0xff4   : > { %12098 = vmatprep.mubr.bf16.mxu1 %v20073_v48  ;;  %v20091_v38 = vpop.f32.mrf.mxu1  ;;  %12027 = vmatprep.subr.bf16.mxu0 %v15426_v52  ;;  %v15481_v52 = vld [vmem:[%s21376_s4 + $0xba0] ss:$16 sps:$4 sm:$0xff]  }
 0xff5   : > { %v8631_v40 = vpop.f32.mrf.mxu0  ;;  %12068 = vmatprep.subr.bf16.mxu1 %v15429_v31  ;;  %v15489_v31 = vld [vmem:[%s21376_s4 + $0xb84] ss:$16 sps:$4 sm:$0xff]   ;;  %v15484_v32 = vld [vmem:[%s21376_s4 + $0x980] ss:$16 sps:$4 sm:$0xff]  }
 0xff6   : > { %v8672_v41 = vpop.f32.mrf.mxu1  ;;  %12028 = vmatpush1.bf16.msra.mxu0 %v15424_v34  ;;  %v15487_v34 = vld [vmem:[%s21376_s4 + $0xb80] ss:$16 sps:$4 sm:$0xff]  }
 0xff7   : > { %12069 = vmatpush1.bf16.msra.mxu1 %v15427_v37  ;;  %v8632_v43 = vpop.f32.mrf.mxu0  ;;  %12029 = vmatprep.subr.bf16.mxu0 %v15432_v10  ;;  %v15492_v37 = vld [vmem:[%s21376_s4 + $0x964] ss:$16 sps:$4 sm:$0xff]   ;;  %v15493_v40 = vld [vmem:[%s21376_s4 + $0xb60] ss:$16 sps:$4 sm:$0xff]  }
 0xff8   : > { %v8673_v23 = vpop.f32.mrf.mxu1  ;;  %12070 = vmatprep.subr.bf16.mxu1 %v15435_v39  ;;  %v15495_v10 = vld [vmem:[%s21376_s4 + $0xb64] ss:$16 sps:$4 sm:$0xff]   ;;  %v15490_v39 = vld [vmem:[%s21376_s4 + $0x960] ss:$16 sps:$4 sm:$0xff]  }
 0xff9   : > { %v15498_v41 = vld [vmem:[%s21376_s4 + $0x944] ss:$16 sps:$4 sm:$0xff]   ;;  %v15496_v43 = vld [vmem:[%s21376_s4 + $0x940] ss:$16 sps:$4 sm:$0xff]  }
 0xffa   : > { %12030 = vmatpush1.bf16.msra.mxu0 %v15430_v42  ;;  %v15501_v42 = vld [vmem:[%s21376_s4 + $0xb44] ss:$16 sps:$4 sm:$0xff]  }
 0xffb   : > { %12071 = vmatpush1.bf16.msra.mxu1 %v15433_v44  ;;  %12031 = vmatprep.subr.bf16.mxu0 %v15438_v45  ;;  %v15499_v44 = vld [vmem:[%s21376_s4 + $0xb40] ss:$16 sps:$4 sm:$0xff]   ;;  %v15504_v45 = vld [vmem:[%s21376_s4 + $0x924] ss:$16 sps:$4 sm:$0xff]  }
 0xffc   : > { %12072 = vmatprep.subr.bf16.mxu1 %v15441_v46  ;;  %v15507_v23 = vld [vmem:[%s21376_s4 + $0xb24] ss:$16 sps:$4 sm:$0xff]   ;;  %v15502_v46 = vld [vmem:[%s21376_s4 + $0x920] ss:$16 sps:$4 sm:$0xff]  }
 0xffe   : > { %12032 = vmatpush1.bf16.msra.mxu0 %v15436_v33  ;;  %v15505_v33 = vld [vmem:[%s21376_s4 + $0xb20] ss:$16 sps:$4 sm:$0xff]  }
 0xfff   : > { %12073 = vmatpush1.bf16.msra.mxu1 %v15439_v51  ;;  %12033 = vmatprep.subr.bf16.mxu0 %v15444_v53  ;;  %v15510_v51 = vld [vmem:[%s21376_s4 + $0x904] ss:$16 sps:$4 sm:$0xff]  }
0x1000   : > { %12074 = vmatprep.subr.bf16.mxu1 %v15447_v49  ;;  %v15513_v53 = vld [vmem:[%s21376_s4 + $0xb04] ss:$16 sps:$4 sm:$0xff]   ;;  %v8671_v49 = vadd.f32 %v20091_v38, %v20082_v36 }
0x1001   : > { %v15519_v36 = vld [vmem:[%s21376_s4 + $0xee4] ss:$16 sps:$4 sm:$0xff]  }
0x1002   : > { %12034 = vmatpush1.bf16.msra.mxu0 %v15442_v18  ;;  %v15508_v18 = vld [vmem:[%s21376_s4 + $0x900] ss:$16 sps:$4 sm:$0xff]   ;;  %v8770_v38 = vmax.f32 %v8671_v49, 0.0  ;;  %v15561_v49 = vld [vmem:[%s21376_s4 + $0xe04] ss:$16 sps:$4 sm:$0xff]  }
0x1003   : > { %12075 = vmatpush1.bf16.msra.mxu1 %v15445_v13  ;;  %12035 = vmatprep.subr.bf16.mxu0 %v15450_v25  ;;  %v8765_v13 = vmax.f32 %v19652_v29, 0.0  ;;  %v15511_v25 = vld [vmem:[%s21376_s4 + $0xb00] ss:$16 sps:$4 sm:$0xff]  }
0x1004   : > { %12076 = vmatprep.subr.bf16.mxu1 %v15453_v0  ;;  %v15516_v0 = vld [vmem:[%s21376_s4 + $0xce4] ss:$16 sps:$4 sm:$0xff]   ;;  %v15514_v29 = vld [vmem:[%s21376_s4 + $0xce0] ss:$16 sps:$4 sm:$0xff]  }
0x1006   : > { %12036 = vmatpush1.bf16.msra.mxu0 %v15448_v59  ;;  %v8767_v59 = vmax.f32 %v19864_v58, 0.0 }
0x1007   : > { %12077 = vmatpush1.bf16.msra.mxu1 %v15451_v3  ;;  %12037 = vmatprep.subr.bf16.mxu0 %v15456_v8  ;;  %v20271_v3 = vpack.c.bf16 %v8765_v13, %v8765_v13  ;;  %v15517_v8 = vld [vmem:[%s21376_s4 + $0xee0] ss:$16 sps:$4 sm:$0xff]  }
0x1008   : > { %12078 = vmatprep.subr.bf16.mxu1 %v15459_v5  ;;  %v20276_v58 = vpack.c.bf16 %v8767_v59, %v8767_v59  ;;  %v15522_v5 = vld [vmem:[%s21376_s4 + $0xcc4] ss:$16 sps:$4 sm:$0xff]   ;;  %v15559_v13 = vld [vmem:[%s21376_s4 + $0xe00] ss:$16 sps:$4 sm:$0xff]  }
0x1009   : > { %v15562_v59 = vld [vmem:[%s21376_s4 + $0xde0] ss:$16 sps:$4 sm:$0xff]  }
0x100a   : > { %12038 = vmatpush1.bf16.msra.mxu0 %v15454_v6  ;;  %v15525_v6 = vld [vmem:[%s21376_s4 + $0xec4] ss:$16 sps:$4 sm:$0xff]  }
0x100b   : > { %12079 = vmatpush1.bf16.msra.mxu1 %v15457_v7  ;;  %12039 = vmatprep.subr.bf16.mxu0 %v15462_v11  ;;  %v20284_v7 = vpack.c.bf16 %v8770_v38, %v8770_v38  ;;  %v15570_v38 = vld [vmem:[%s21376_s4 + $0xdc4] ss:$16 sps:$4 sm:$0xff]  }
0x100c   : > { %12080 = vmatprep.subr.bf16.mxu1 %v15465_v14 }
0x100e   : > { %12040 = vmatpush1.bf16.msra.mxu0 %v15460_v16  ;;  %v15520_v16 = vld [vmem:[%s21376_s4 + $0xcc0] ss:$16 sps:$4 sm:$0xff]  }
0x100f   : > { %12081 = vmatpush1.bf16.msra.mxu1 %v15463_v19  ;;  %12041 = vmatprep.subr.bf16.mxu0 %v15468_v20  ;;  %v15523_v20 = vld [vmem:[%s21376_s4 + $0xec0] ss:$16 sps:$4 sm:$0xff]  }
0x1010   : > { %12082 = vmatprep.subr.bf16.mxu1 %v15471_v21  ;;  %v15528_v21 = vld [vmem:[%s21376_s4 + $0xca4] ss:$16 sps:$4 sm:$0xff]  }
0x1012   : > { %12042 = vmatpush2.bf16.msra.mxu0 %v15466_v22 }
0x1013   : > { %12083 = vmatpush2.bf16.msra.mxu1 %v15469_v24  ;;  %12043 = vmatprep.subr.bf16.mxu0 %v15474_v26  ;;  %v15531_v24 = vld [vmem:[%s21376_s4 + $0xea4] ss:$16 sps:$4 sm:$0xff]  }
0x1014   : > { %12084 = vmatprep.subr.bf16.mxu1 %v15477_v4 }
0x1016   : > { %12044 = vmatpush2.bf16.msra.mxu0 %v15472_v57 }
0x1017   : > { %12085 = vmatpush2.bf16.msra.mxu1 %v15475_v1  ;;  %12045 = vmatprep.subr.bf16.mxu0 %v15480_v12  ;;  %v15526_v1 = vld [vmem:[%s21376_s4 + $0xca0] ss:$16 sps:$4 sm:$0xff]  }
0x1018   : > { %12086 = vmatprep.subr.bf16.mxu1 %v15483_v17 }
0x101a   : > { %12046 = vmatpush2.bf16.msra.mxu0 %v15478_v55  ;;  %v15529_v55 = vld [vmem:[%s21376_s4 + $0xea0] ss:$16 sps:$4 sm:$0xff]  }
0x101b   : > { %12087 = vmatpush2.bf16.msra.mxu1 %v15481_v52  ;;  %12047 = vmatprep.subr.bf16.mxu0 %v15486_v30  ;;  %v15534_v30 = vld [vmem:[%s21376_s4 + $0xc84] ss:$16 sps:$4 sm:$0xff]  }
0x101c   : > { %12088 = vmatprep.subr.bf16.mxu1 %v15489_v31  ;;  %v15537_v31 = vld [vmem:[%s21376_s4 + $0xe84] ss:$16 sps:$4 sm:$0xff]  }
0x101e   : > { %12048 = vmatpush2.bf16.msra.mxu0 %v15484_v32 }
0x101f   : > { %12089 = vmatpush2.bf16.msra.mxu1 %v15487_v34  ;;  %12049 = vmatprep.subr.bf16.mxu0 %v15492_v37  ;;  %v15532_v34 = vld [vmem:[%s21376_s4 + $0xc80] ss:$16 sps:$4 sm:$0xff]  }
0x1020   : > { %12090 = vmatprep.subr.bf16.mxu1 %v15495_v10  ;;  %v15535_v37 = vld [vmem:[%s21376_s4 + $0xe80] ss:$16 sps:$4 sm:$0xff]   ;;  %v15540_v10 = vld [vmem:[%s21376_s4 + $0xc64] ss:$16 sps:$4 sm:$0xff]  }
0x1022   : > { %12050 = vmatpush2.bf16.msra.mxu0 %v15490_v39  ;;  %v15543_v39 = vld [vmem:[%s21376_s4 + $0xe64] ss:$16 sps:$4 sm:$0xff]  }
0x1023   : > { %12091 = vmatpush2.bf16.msra.mxu1 %v15493_v40  ;;  %12051 = vmatprep.subr.bf16.mxu0 %v15498_v41  ;;  %v15538_v40 = vld [vmem:[%s21376_s4 + $0xc60] ss:$16 sps:$4 sm:$0xff]  }
0x1024   : > { %12092 = vmatprep.subr.bf16.mxu1 %v15501_v42  ;;  %v15541_v41 = vld [vmem:[%s21376_s4 + $0xe60] ss:$16 sps:$4 sm:$0xff]   ;;  %v15546_v42 = vld [vmem:[%s21376_s4 + $0xc44] ss:$16 sps:$4 sm:$0xff]  }
0x1026   : > { %12052 = vmatpush2.bf16.msra.mxu0 %v15496_v43  ;;  %v15549_v43 = vld [vmem:[%s21376_s4 + $0xe44] ss:$16 sps:$4 sm:$0xff]  }
0x1027   : > { %12093 = vmatpush2.bf16.msra.mxu1 %v15499_v44  ;;  %12053 = vmatprep.subr.bf16.mxu0 %v15504_v45  ;;  %v15544_v44 = vld [vmem:[%s21376_s4 + $0xc40] ss:$16 sps:$4 sm:$0xff]  }
0x1028   : > { %12094 = vmatprep.subr.bf16.mxu1 %v15507_v23  ;;  %v15547_v45 = vld [vmem:[%s21376_s4 + $0xe40] ss:$16 sps:$4 sm:$0xff]   ;;  %v15552_v23 = vld [vmem:[%s21376_s4 + $0xc24] ss:$16 sps:$4 sm:$0xff]  }
0x102a   : > { %12054 = vmatpush2.bf16.msra.mxu0 %v15502_v46  ;;  %v15555_v46 = vld [vmem:[%s21376_s4 + $0xe24] ss:$16 sps:$4 sm:$0xff]  }
0x102b   : > { %12095 = vmatpush2.bf16.msra.mxu1 %v15505_v33  ;;  %12055 = vmatprep.subr.bf16.mxu0 %v15510_v51  ;;  %v15550_v33 = vld [vmem:[%s21376_s4 + $0xc20] ss:$16 sps:$4 sm:$0xff]  }
0x102c   : > { %12096 = vmatprep.subr.bf16.mxu1 %v15513_v53  ;;  %v15553_v51 = vld [vmem:[%s21376_s4 + $0xe20] ss:$16 sps:$4 sm:$0xff]   ;;  %v15558_v53 = vld [vmem:[%s21376_s4 + $0xc04] ss:$16 sps:$4 sm:$0xff]  }
0x102e   : > { %12056 = vmatpush2.bf16.msra.mxu0 %v15508_v18  ;;  %v15556_v18 = vld [vmem:[%s21376_s4 + $0xc00] ss:$16 sps:$4 sm:$0xff]  }
0x102f   : > { %12097 = vmatpush2.bf16.msra.mxu1 %v15511_v25  ;;  %12107 = vmatprep.subr.bf16.mxu0 %v15516_v0  ;;  %v15564_v25 = vld [vmem:[%s21376_s4 + $0xde4] ss:$16 sps:$4 sm:$0xff]  }
0x1030   : > { %12148 = vmatprep.subr.bf16.mxu1 %v15519_v36  ;;  %v15567_v0 = vld [vmem:[%s21376_s4 + $0xfe4] ss:$16 sps:$4 sm:$0xff]   ;;  %v15565_v36 = vld [vmem:[%s21376_s4 + $0xfe0] ss:$16 sps:$4 sm:$0xff]  }
0x1031   : > { %v20286_v11 = vpop.f32.mrf.mxu0  ;;  %12058 = vmatmul.mubr.bf16.vlgmr.msra.gmra.mxu0 %v20271_v3 }
0x1032   : > { %v20289_v14 = vpop.f32.mrf.mxu1  ;;  %12099 = vmatmul.mubr.bf16.vlgmr.msra.gmra.mxu1 %v20276_v58  ;;  %12108 = vmatpush1.bf16.msra.mxu0 %v15514_v29  ;;  %v15573_v29 = vld [vmem:[%s21376_s4 + $0xfc4] ss:$16 sps:$4 sm:$0xff]  }
0x1033   : > { %12139 = vmatprep.mubr.bf16.mxu0 %v20284_v7  ;;  %12149 = vmatpush1.bf16.msra.mxu1 %v15517_v8  ;;  %v8711_v19 = vpop.f32.mrf.mxu0  ;;  %v15568_v8 = vld [vmem:[%s21376_s4 + $0xdc0] ss:$16 sps:$4 sm:$0xff]  }
0x1034   : > { %v8752_v22 = vpop.f32.mrf.mxu1  ;;  %12109 = vmatprep.subr.bf16.mxu0 %v15522_v5  ;;  %12150 = vmatprep.subr.bf16.mxu1 %v15525_v6  ;;  %v15571_v5 = vld [vmem:[%s21376_s4 + $0xfc0] ss:$16 sps:$4 sm:$0xff]   ;;  %v15576_v6 = vld [vmem:[%s21376_s4 + $0xda4] ss:$16 sps:$4 sm:$0xff]  }
0x1035   : > { %v8753_v26 = vadd.f32 %v8752_v22, %v8711_v19  ;;  %v8713_v4 = vpop.f32.mrf.mxu0  ;;  %v15574_v19 = vld [vmem:[%s21376_s4 + $0xda0] ss:$16 sps:$4 sm:$0xff]   ;;  %v15585_v22 = vld [vmem:[%s21376_s4 + $0xf84] ss:$16 sps:$4 sm:$0xff]  }
0x1036   : > { %v8754_v57 = vpop.f32.mrf.mxu1  ;;  %12110 = vmatpush1.bf16.msra.mxu0 %v15520_v16  ;;  %v15579_v16 = vld [vmem:[%s21376_s4 + $0xfa4] ss:$16 sps:$4 sm:$0xff]  }
0x1037   : > { %v8772_v12 = vmax.f32 %v8753_v26, 0.0  ;;  %12151 = vmatpush1.bf16.msra.mxu1 %v15523_v20  ;;  %v8714_v17 = vpop.f32.mrf.mxu0  ;;  %12111 = vmatprep.subr.bf16.mxu0 %v15528_v21  ;;  %v15577_v20 = vld [vmem:[%s21376_s4 + $0xfa0] ss:$16 sps:$4 sm:$0xff]   ;;  %v15582_v21 = vld [vmem:[%s21376_s4 + $0xd84] ss:$16 sps:$4 sm:$0xff]  }
0x1038   : > { %v8755_v52 = vpop.f32.mrf.mxu1  ;;  %12152 = vmatprep.subr.bf16.mxu1 %v15531_v24  ;;  %v15580_v24 = vld [vmem:[%s21376_s4 + $0xd80] ss:$16 sps:$4 sm:$0xff]   ;;  %v15588_v4 = vld [vmem:[%s21376_s4 + $0xd64] ss:$16 sps:$4 sm:$0xff]  }
0x1039   : > { %v20317_v32 = vpack.c.bf16 %v8772_v12, %v8772_v12  ;;  %v15583_v26 = vld [vmem:[%s21376_s4 + $0xf80] ss:$16 sps:$4 sm:$0xff]   ;;  %v15591_v57 = vld [vmem:[%s21376_s4 + $0xf64] ss:$16 sps:$4 sm:$0xff]  }
0x103a   : > { %12112 = vmatpush1.bf16.msra.mxu0 %v15526_v1  ;;  %v15586_v1 = vld [vmem:[%s21376_s4 + $0xd60] ss:$16 sps:$4 sm:$0xff]   ;;  %v15594_v17 = vld [vmem:[%s21376_s4 + $0xd44] ss:$16 sps:$4 sm:$0xff]  }
0x103b   : > { %12153 = vmatpush1.bf16.msra.mxu1 %v15529_v55  ;;  %12180 = vmatprep.mubr.bf16.mxu1 %v20317_v32  ;;  %v15589_v12 = vld [vmem:[%s21376_s4 + $0xf60] ss:$16 sps:$4 sm:$0xff]   ;;  %v15597_v55 = vld [vmem:[%s21376_s4 + $0xf44] ss:$16 sps:$4 sm:$0xff]  }
0x103c   : > { %12113 = vmatprep.subr.bf16.mxu0 %v15534_v30  ;;  %12154 = vmatprep.subr.bf16.mxu1 %v15537_v31  ;;  %v15592_v52 = vld [vmem:[%s21376_s4 + $0xd40] ss:$16 sps:$4 sm:$0xff]   ;;  %v15600_v31 = vld [vmem:[%s21376_s4 + $0xd24] ss:$16 sps:$4 sm:$0xff]  }
0x103d   : > { %v15595_v30 = vld [vmem:[%s21376_s4 + $0xf40] ss:$16 sps:$4 sm:$0xff]  }
0x103e   : > { %12114 = vmatpush1.bf16.msra.mxu0 %v15532_v34  ;;  %v15603_v34 = vld [vmem:[%s21376_s4 + $0xf24] ss:$16 sps:$4 sm:$0xff]  }
0x103f   : > { %12155 = vmatpush1.bf16.msra.mxu1 %v15535_v37  ;;  %12115 = vmatprep.subr.bf16.mxu0 %v15540_v10  ;;  %v15598_v37 = vld [vmem:[%s21376_s4 + $0xd20] ss:$16 sps:$4 sm:$0xff]  }
0x1040   : > { %12156 = vmatprep.subr.bf16.mxu1 %v15543_v39  ;;  %v15601_v10 = vld [vmem:[%s21376_s4 + $0xf20] ss:$16 sps:$4 sm:$0xff]   ;;  %v15606_v39 = vld [vmem:[%s21376_s4 + $0xd04] ss:$16 sps:$4 sm:$0xff]  }
0x1042   : > { %12116 = vmatpush1.bf16.msra.mxu0 %v15538_v40  ;;  %v8751_v40 = vadd.f32 %v20289_v14, %v20286_v11  ;;  %v15612_v11 = vld [vmem:[%s21376_s4 + $0xec] ss:$16 sps:$4 sm:$0xff]  }
0x1043   : > { %12157 = vmatpush1.bf16.msra.mxu1 %v15541_v41  ;;  %12117 = vmatprep.subr.bf16.mxu0 %v15546_v42  ;;  %v15609_v41 = vld [vmem:[%s21376_s4 + $0xf04] ss:$16 sps:$4 sm:$0xff]   ;;  %v15604_v42 = vld [vmem:[%s21376_s4 + $0xd00] ss:$16 sps:$4 sm:$0xff]  }
0x1044   : > { %12158 = vmatprep.subr.bf16.mxu1 %v15549_v43  ;;  %v8769_v43 = vmax.f32 %v20079_v35, 0.0  ;;  %v8771_v14 = vmax.f32 %v8751_v40, 0.0  ;;  %v15610_v35 = vld [vmem:[%s21376_s4 + $0xe8] ss:$16 sps:$4 sm:$0xff]  }
0x1045   : > { %v15652_v40 = vld [vmem:[%s21376_s4 + $0x8] ss:$16 sps:$4 sm:$0xff]  }
0x1046   : > { %12118 = vmatpush1.bf16.msra.mxu0 %v15544_v44  ;;  %v15607_v44 = vld [vmem:[%s21376_s4 + $0xf00] ss:$16 sps:$4 sm:$0xff]  }
0x1047   : > { %12159 = vmatpush1.bf16.msra.mxu1 %v15547_v45  ;;  %12119 = vmatprep.subr.bf16.mxu0 %v15552_v23  ;;  %v15615_v45 = vld [vmem:[%s21376_s4 + $0x2ec] ss:$16 sps:$4 sm:$0xff]   ;;  %v20482_v23 = vpack.c.bf16 %v8769_v43, %v8769_v43 }
0x1048   : > { %12160 = vmatprep.subr.bf16.mxu1 %v15555_v46  ;;  %v15613_v46 = vld [vmem:[%s21376_s4 + $0x2e8] ss:$16 sps:$4 sm:$0xff]   ;;  %v15663_v43 = vld [vmem:[%s21376_s4 + $0x3ec] ss:$16 sps:$4 sm:$0xff]  }
0x104a   : > { %12120 = vmatpush1.bf16.msra.mxu0 %v15550_v33  ;;  %v20487_v33 = vpack.c.bf16 %v8771_v14, %v8771_v14  ;;  %v15666_v14 = vld [vmem:[%s21376_s4 + $0x1cc] ss:$16 sps:$4 sm:$0xff]  }
0x104b   : > { %12161 = vmatpush1.bf16.msra.mxu1 %v15553_v51  ;;  %12121 = vmatprep.subr.bf16.mxu0 %v15558_v53  ;;  %v15618_v51 = vld [vmem:[%s21376_s4 + $0xcc] ss:$16 sps:$4 sm:$0xff]  }
0x104c   : > { %12162 = vmatprep.subr.bf16.mxu1 %v15561_v49  ;;  %v15621_v49 = vld [vmem:[%s21376_s4 + $0x2cc] ss:$16 sps:$4 sm:$0xff]  }
0x104e   : > { %12122 = vmatpush1.bf16.msra.mxu0 %v15556_v18 }
0x104f   : > { %12163 = vmatpush1.bf16.msra.mxu1 %v15559_v13  ;;  %12123 = vmatprep.subr.bf16.mxu0 %v15564_v25  ;;  %v15616_v25 = vld [vmem:[%s21376_s4 + $0xc8] ss:$16 sps:$4 sm:$0xff]  }
0x1050   : > { %12164 = vmatprep.subr.bf16.mxu1 %v15567_v0 }
0x1052   : > { %12124 = vmatpush2.bf16.msra.mxu0 %v15562_v59  ;;  %v15619_v59 = vld [vmem:[%s21376_s4 + $0x2c8] ss:$16 sps:$4 sm:$0xff]  }
0x1053   : > { %12165 = vmatpush2.bf16.msra.mxu1 %v15565_v36  ;;  %12125 = vmatprep.subr.bf16.mxu0 %v15570_v38 }
0x1054   : > { %12166 = vmatprep.subr.bf16.mxu1 %v15573_v29 }
0x1056   : > { %12126 = vmatpush2.bf16.msra.mxu0 %v15568_v8 }
0x1057   : > { %12167 = vmatpush2.bf16.msra.mxu1 %v15571_v5  ;;  %12127 = vmatprep.subr.bf16.mxu0 %v15576_v6 }
0x1058   : > { %12168 = vmatprep.subr.bf16.mxu1 %v15579_v16  ;;  %v15622_v16 = vld [vmem:[%s21376_s4 + $0xa8] ss:$16 sps:$4 sm:$0xff]  }
0x105a   : > { %12128 = vmatpush2.bf16.msra.mxu0 %v15574_v19  ;;  %v15630_v19 = vld [vmem:[%s21376_s4 + $0x8c] ss:$16 sps:$4 sm:$0xff]  }
0x105b   : > { %12169 = vmatpush2.bf16.msra.mxu1 %v15577_v20  ;;  %12129 = vmatprep.subr.bf16.mxu0 %v15582_v21  ;;  %v15633_v21 = vld [vmem:[%s21376_s4 + $0x28c] ss:$16 sps:$4 sm:$0xff]  }
0x105c   : > { %12170 = vmatprep.subr.bf16.mxu1 %v15585_v22  ;;  %v15628_v22 = vld [vmem:[%s21376_s4 + $0x88] ss:$16 sps:$4 sm:$0xff]  }
0x105e   : > { %12130 = vmatpush2.bf16.msra.mxu0 %v15580_v24  ;;  %v15631_v24 = vld [vmem:[%s21376_s4 + $0x288] ss:$16 sps:$4 sm:$0xff]  }
0x105f   : > { %12171 = vmatpush2.bf16.msra.mxu1 %v15583_v26  ;;  %12131 = vmatprep.subr.bf16.mxu0 %v15588_v4  ;;  %v15636_v26 = vld [vmem:[%s21376_s4 + $0x6c] ss:$16 sps:$4 sm:$0xff]  }
0x1060   : > { %12172 = vmatprep.subr.bf16.mxu1 %v15591_v57  ;;  %v15639_v4 = vld [vmem:[%s21376_s4 + $0x26c] ss:$16 sps:$4 sm:$0xff]   ;;  %v15634_v57 = vld [vmem:[%s21376_s4 + $0x68] ss:$16 sps:$4 sm:$0xff]  }
0x1062   : > { %12132 = vmatpush2.bf16.msra.mxu0 %v15586_v1  ;;  %v15637_v1 = vld [vmem:[%s21376_s4 + $0x268] ss:$16 sps:$4 sm:$0xff]  }
0x1063   : > { %12173 = vmatpush2.bf16.msra.mxu1 %v15589_v12  ;;  %12133 = vmatprep.subr.bf16.mxu0 %v15594_v17  ;;  %v15642_v12 = vld [vmem:[%s21376_s4 + $0x4c] ss:$16 sps:$4 sm:$0xff]  }
0x1064   : > { %12174 = vmatprep.subr.bf16.mxu1 %v15597_v55  ;;  %v15645_v17 = vld [vmem:[%s21376_s4 + $0x24c] ss:$16 sps:$4 sm:$0xff]   ;;  %v15640_v55 = vld [vmem:[%s21376_s4 + $0x48] ss:$16 sps:$4 sm:$0xff]  }
0x1066   : > { %12134 = vmatpush2.bf16.msra.mxu0 %v15592_v52  ;;  %v15643_v52 = vld [vmem:[%s21376_s4 + $0x248] ss:$16 sps:$4 sm:$0xff]  }
0x1067   : > { %12175 = vmatpush2.bf16.msra.mxu1 %v15595_v30  ;;  %12135 = vmatprep.subr.bf16.mxu0 %v15600_v31  ;;  %v15648_v30 = vld [vmem:[%s21376_s4 + $0x2c] ss:$16 sps:$4 sm:$0xff]  }
0x1068   : > { %12176 = vmatprep.subr.bf16.mxu1 %v15603_v34  ;;  %v15651_v31 = vld [vmem:[%s21376_s4 + $0x22c] ss:$16 sps:$4 sm:$0xff]   ;;  %v15646_v34 = vld [vmem:[%s21376_s4 + $0x28] ss:$16 sps:$4 sm:$0xff]  }
0x106a   : > { %12136 = vmatpush2.bf16.msra.mxu0 %v15598_v37  ;;  %v15649_v37 = vld [vmem:[%s21376_s4 + $0x228] ss:$16 sps:$4 sm:$0xff]  }
0x106b   : > { %12177 = vmatpush2.bf16.msra.mxu1 %v15601_v10  ;;  %12137 = vmatprep.subr.bf16.mxu0 %v15606_v39  ;;  %v15654_v10 = vld [vmem:[%s21376_s4 + $0xc] ss:$16 sps:$4 sm:$0xff]  }
0x106c   : > { %12178 = vmatprep.subr.bf16.mxu1 %v15609_v41  ;;  %v15657_v39 = vld [vmem:[%s21376_s4 + $0x20c] ss:$16 sps:$4 sm:$0xff]   ;;  %v15655_v41 = vld [vmem:[%s21376_s4 + $0x208] ss:$16 sps:$4 sm:$0xff]  }
0x106e   : > { %12138 = vmatpush2.bf16.msra.mxu0 %v15604_v42  ;;  %v15660_v42 = vld [vmem:[%s21376_s4 + $0x1ec] ss:$16 sps:$4 sm:$0xff]  }
0x106f   : > { %12179 = vmatpush2.bf16.msra.mxu1 %v15607_v44  ;;  %12189 = vmatprep.subr.bf16.mxu0 %v15612_v11  ;;  %v15658_v44 = vld [vmem:[%s21376_s4 + $0x1e8] ss:$16 sps:$4 sm:$0xff]  }
0x1070   : > { %12230 = vmatprep.subr.bf16.mxu1 %v15615_v45  ;;  %v15661_v11 = vld [vmem:[%s21376_s4 + $0x3e8] ss:$16 sps:$4 sm:$0xff]   ;;  %v15669_v45 = vld [vmem:[%s21376_s4 + $0x3cc] ss:$16 sps:$4 sm:$0xff]  }
0x1071   : > { %v11895_v53 = vpop.f32.mrf.mxu0  ;;  %12140 = vmatmul.mubr.bf16.vlgmr.msra.gmra.mxu0 %v20482_v23 }
0x1072   : > { %v11896_v18 = vadd.f32 %v11895_v53, %v18224_v9  ;;  %v11936_v13 = vpop.f32.mrf.mxu1  ;;  %12181 = vmatmul.mubr.bf16.vlgmr.msra.gmra.mxu1 %v20487_v33  ;;  %12190 = vmatpush1.bf16.msra.mxu0 %v15610_v35  ;;  %v15624_v9 = vld [vmem:[%s21376_s4 + $0xac] ss:$16 sps:$4 sm:$0xff]   ;;  %v15664_v35 = vld [vmem:[%s21376_s4 + $0x1c8] ss:$16 sps:$4 sm:$0xff]  }
0x1073   : > { %12221 = vmatprep.mubr.bf16.mxu0 %v19640_v27  ;;  %12231 = vmatpush1.bf16.msra.mxu1 %v15613_v46  ;;  %v11897_v0 = vpop.f32.mrf.mxu0  ;;  %v15627_v27 = vld [vmem:[%s21376_s4 + $0x2ac] ss:$16 sps:$4 sm:$0xff]   ;;  %v15667_v46 = vld [vmem:[%s21376_s4 + $0x3c8] ss:$16 sps:$4 sm:$0xff]  }
0x1074   : > { %v20508_v36 = vadd.f32 %v11936_v13, %v11896_v18  ;;  %12262 = vmatprep.mubr.bf16.mxu1 %v19646_v15  ;;  %v11898_v38 = vadd.f32 %v11897_v0, %v18218_v56  ;;  %v11938_v29 = vpop.f32.mrf.mxu1  ;;  %12191 = vmatprep.subr.bf16.mxu0 %v15618_v51  ;;  %v15625_v56 = vld [vmem:[%s21376_s4 + $0x2a8] ss:$16 sps:$4 sm:$0xff]   ;;  %v15672_v51 = vld [vmem:[%s21376_s4 + $0x1ac] ss:$16 sps:$4 sm:$0xff]  }
0x1075   : > { %v11899_v8 = vpop.f32.mrf.mxu0  ;;  %12232 = vmatprep.subr.bf16.mxu1 %v15621_v49  ;;  %v15675_v53 = vld [vmem:[%s21376_s4 + $0x3ac] ss:$16 sps:$4 sm:$0xff]   ;;  %v15670_v49 = vld [vmem:[%s21376_s4 + $0x1a8] ss:$16 sps:$4 sm:$0xff]  }
0x1076   : > { %v20515_v5 = vadd.f32 %v11938_v29, %v11898_v38  ;;  %v11940_v6 = vpop.f32.mrf.mxu1  ;;  %12192 = vmatpush1.bf16.msra.mxu0 %v15616_v25  ;;  %v15673_v18 = vld [vmem:[%s21376_s4 + $0x3a8] ss:$16 sps:$4 sm:$0xff]   ;;  %v15678_v13 = vld [vmem:[%s21376_s4 + $0x18c] ss:$16 sps:$4 sm:$0xff]  }
0x1077   : > { %12233 = vmatpush1.bf16.msra.mxu1 %v15619_v59  ;;  %v11900_v15 = vpop.f32.mrf.mxu0  ;;  %12193 = vmatprep.subr.bf16.mxu0 %v15624_v9  ;;  %v15681_v25 = vld [vmem:[%s21376_s4 + $0x38c] ss:$16 sps:$4 sm:$0xff]   ;;  %v15676_v0 = vld [vmem:[%s21376_s4 + $0x188] ss:$16 sps:$4 sm:$0xff]  }
0x1078   : > { %v11941_v20 = vpop.f32.mrf.mxu1  ;;  %12234 = vmatprep.subr.bf16.mxu1 %v15627_v27  ;;  %v15679_v59 = vld [vmem:[%s21376_s4 + $0x388] ss:$16 sps:$4 sm:$0xff]   ;;  %v15684_v9 = vld [vmem:[%s21376_s4 + $0x16c] ss:$16 sps:$4 sm:$0xff]  }
0x1079   : > { %v15687_v38 = vld [vmem:[%s21376_s4 + $0x36c] ss:$16 sps:$4 sm:$0xff]   ;;  %v15682_v29 = vld [vmem:[%s21376_s4 + $0x168] ss:$16 sps:$4 sm:$0xff]  }
0x107a   : > { %12194 = vmatpush1.bf16.msra.mxu0 %v15622_v16  ;;  %v15685_v27 = vld [vmem:[%s21376_s4 + $0x368] ss:$16 sps:$4 sm:$0xff]   ;;  %v15690_v8 = vld [vmem:[%s21376_s4 + $0x14c] ss:$16 sps:$4 sm:$0xff]  }
0x107b   : > { %12235 = vmatpush1.bf16.msra.mxu1 %v15625_v56  ;;  %12195 = vmatprep.subr.bf16.mxu0 %v15630_v19  ;;  %v15693_v6 = vld [vmem:[%s21376_s4 + $0x34c] ss:$16 sps:$4 sm:$0xff]   ;;  %v15688_v16 = vld [vmem:[%s21376_s4 + $0x148] ss:$16 sps:$4 sm:$0xff]  }
0x107c   : > { %12236 = vmatprep.subr.bf16.mxu1 %v15633_v21  ;;  %v15691_v15 = vld [vmem:[%s21376_s4 + $0x348] ss:$16 sps:$4 sm:$0xff]   ;;  %v15696_v56 = vld [vmem:[%s21376_s4 + $0x12c] ss:$16 sps:$4 sm:$0xff]  }
0x107d   : > { %v15699_v19 = vld [vmem:[%s21376_s4 + $0x32c] ss:$16 sps:$4 sm:$0xff]   ;;  %v15694_v20 = vld [vmem:[%s21376_s4 + $0x128] ss:$16 sps:$4 sm:$0xff]  }
0x107e   : > { %12196 = vmatpush1.bf16.msra.mxu0 %v15628_v22  ;;  %v15697_v21 = vld [vmem:[%s21376_s4 + $0x328] ss:$16 sps:$4 sm:$0xff]   ;;  %v15702_v22 = vld [vmem:[%s21376_s4 + $0x10c] ss:$16 sps:$4 sm:$0xff]  }
0x107f   : > { %12237 = vmatpush1.bf16.msra.mxu1 %v15631_v24  ;;  %12197 = vmatprep.subr.bf16.mxu0 %v15636_v26  ;;  %v15705_v24 = vld [vmem:[%s21376_s4 + $0x30c] ss:$16 sps:$4 sm:$0xff]   ;;  %v15700_v26 = vld [vmem:[%s21376_s4 + $0x108] ss:$16 sps:$4 sm:$0xff]  }
0x1080   : > { %12238 = vmatprep.subr.bf16.mxu1 %v15639_v4  ;;  %v15703_v4 = vld [vmem:[%s21376_s4 + $0x308] ss:$16 sps:$4 sm:$0xff]  }
0x1082   : > { %12198 = vmatpush1.bf16.msra.mxu0 %v15634_v57  ;;  %v15708_v57 = vld [vmem:[%s21376_s4 + $0x4ec] ss:$16 sps:$4 sm:$0xff]  }
0x1083   : > { %12239 = vmatpush1.bf16.msra.mxu1 %v15637_v1  ;;  %12199 = vmatprep.subr.bf16.mxu0 %v15642_v12  ;;  %v15711_v1 = vld [vmem:[%s21376_s4 + $0x6ec] ss:$16 sps:$4 sm:$0xff]   ;;  %v15706_v12 = vld [vmem:[%s21376_s4 + $0x4e8] ss:$16 sps:$4 sm:$0xff]  }
0x1084   : > { %12240 = vmatprep.subr.bf16.mxu1 %v15645_v17  ;;  %v15709_v17 = vld [vmem:[%s21376_s4 + $0x6e8] ss:$16 sps:$4 sm:$0xff]  }
0x1086   : > { %12200 = vmatpush1.bf16.msra.mxu0 %v15640_v55  ;;  %v15714_v55 = vld [vmem:[%s21376_s4 + $0x4cc] ss:$16 sps:$4 sm:$0xff]  }
0x1087   : > { %12241 = vmatpush1.bf16.msra.mxu1 %v15643_v52  ;;  %12201 = vmatprep.subr.bf16.mxu0 %v15648_v30  ;;  %v15717_v30 = vld [vmem:[%s21376_s4 + $0x6cc] ss:$16 sps:$4 sm:$0xff]  }
0x1088   : > { %12242 = vmatprep.subr.bf16.mxu1 %v15651_v31 }
0x108a   : > { %12202 = vmatpush1.bf16.msra.mxu0 %v15646_v34 }
0x108b   : > { %12243 = vmatpush1.bf16.msra.mxu1 %v15649_v37  ;;  %12203 = vmatprep.subr.bf16.mxu0 %v15654_v10  ;;  %v15712_v37 = vld [vmem:[%s21376_s4 + $0x4c8] ss:$16 sps:$4 sm:$0xff]  }
0x108c   : > { %12244 = vmatprep.subr.bf16.mxu1 %v15657_v39 }
0x108e   : > { %12204 = vmatpush1.bf16.msra.mxu0 %v15652_v40 }
0x108f   : > { %12245 = vmatpush1.bf16.msra.mxu1 %v15655_v41  ;;  %12205 = vmatprep.subr.bf16.mxu0 %v15660_v42 }
0x1090   : > { %12246 = vmatprep.subr.bf16.mxu1 %v15663_v43 }
0x1092   : > { %12206 = vmatpush2.bf16.msra.mxu0 %v15658_v44  ;;  %v15718_v44 = vld [vmem:[%s21376_s4 + $0x4a8] ss:$16 sps:$4 sm:$0xff]  }
0x1093   : > { %12247 = vmatpush2.bf16.msra.mxu1 %v15661_v11  ;;  %12207 = vmatprep.subr.bf16.mxu0 %v15666_v14  ;;  %v15726_v11 = vld [vmem:[%s21376_s4 + $0x48c] ss:$16 sps:$4 sm:$0xff]  }
0x1094   : > { %12248 = vmatprep.subr.bf16.mxu1 %v15669_v45  ;;  %v15729_v45 = vld [vmem:[%s21376_s4 + $0x68c] ss:$16 sps:$4 sm:$0xff]  }
0x1096   : > { %12208 = vmatpush2.bf16.msra.mxu0 %v15664_v35  ;;  %v15724_v35 = vld [vmem:[%s21376_s4 + $0x488] ss:$16 sps:$4 sm:$0xff]  }
0x1097   : > { %12249 = vmatpush2.bf16.msra.mxu1 %v15667_v46  ;;  %12209 = vmatprep.subr.bf16.mxu0 %v15672_v51  ;;  %v15727_v46 = vld [vmem:[%s21376_s4 + $0x688] ss:$16 sps:$4 sm:$0xff]   ;;  %v15732_v51 = vld [vmem:[%s21376_s4 + $0x46c] ss:$16 sps:$4 sm:$0xff]  }
0x1098   : > { %12250 = vmatprep.subr.bf16.mxu1 %v15675_v53  ;;  %v15735_v53 = vld [vmem:[%s21376_s4 + $0x66c] ss:$16 sps:$4 sm:$0xff]  }
0x109a   : > { %12210 = vmatpush2.bf16.msra.mxu0 %v15670_v49  ;;  %v15730_v49 = vld [vmem:[%s21376_s4 + $0x468] ss:$16 sps:$4 sm:$0xff]  }
0x109b   : > { %12251 = vmatpush2.bf16.msra.mxu1 %v15673_v18  ;;  %12211 = vmatprep.subr.bf16.mxu0 %v15678_v13  ;;  %v15733_v18 = vld [vmem:[%s21376_s4 + $0x668] ss:$16 sps:$4 sm:$0xff]   ;;  %v15738_v13 = vld [vmem:[%s21376_s4 + $0x44c] ss:$16 sps:$4 sm:$0xff]  }
0x109c   : > { %12252 = vmatprep.subr.bf16.mxu1 %v15681_v25  ;;  %v15741_v25 = vld [vmem:[%s21376_s4 + $0x64c] ss:$16 sps:$4 sm:$0xff]  }
0x109e   : > { %12212 = vmatpush2.bf16.msra.mxu0 %v15676_v0  ;;  %v15736_v0 = vld [vmem:[%s21376_s4 + $0x448] ss:$16 sps:$4 sm:$0xff]  }
0x109f   : > { %12253 = vmatpush2.bf16.msra.mxu1 %v15679_v59  ;;  %12213 = vmatprep.subr.bf16.mxu0 %v15684_v9  ;;  %v15739_v59 = vld [vmem:[%s21376_s4 + $0x648] ss:$16 sps:$4 sm:$0xff]   ;;  %v15744_v9 = vld [vmem:[%s21376_s4 + $0x42c] ss:$16 sps:$4 sm:$0xff]  }
0x10a0   : > { %12254 = vmatprep.subr.bf16.mxu1 %v15687_v38  ;;  %v15747_v38 = vld [vmem:[%s21376_s4 + $0x62c] ss:$16 sps:$4 sm:$0xff]  }
0x10a2   : > { %12214 = vmatpush2.bf16.msra.mxu0 %v15682_v29  ;;  %v15742_v29 = vld [vmem:[%s21376_s4 + $0x428] ss:$16 sps:$4 sm:$0xff]  }
0x10a3   : > { %12255 = vmatpush2.bf16.msra.mxu1 %v15685_v27  ;;  %12215 = vmatprep.subr.bf16.mxu0 %v15690_v8  ;;  %v15745_v27 = vld [vmem:[%s21376_s4 + $0x628] ss:$16 sps:$4 sm:$0xff]   ;;  %v15750_v8 = vld [vmem:[%s21376_s4 + $0x40c] ss:$16 sps:$4 sm:$0xff]  }
0x10a4   : > { %12256 = vmatprep.subr.bf16.mxu1 %v15693_v6  ;;  %v15753_v6 = vld [vmem:[%s21376_s4 + $0x60c] ss:$16 sps:$4 sm:$0xff]  }
0x10a6   : > { %12216 = vmatpush2.bf16.msra.mxu0 %v15688_v16  ;;  %v15748_v16 = vld [vmem:[%s21376_s4 + $0x408] ss:$16 sps:$4 sm:$0xff]  }
0x10a7   : > { %12257 = vmatpush2.bf16.msra.mxu1 %v15691_v15  ;;  %12217 = vmatprep.subr.bf16.mxu0 %v15696_v56  ;;  %v15751_v15 = vld [vmem:[%s21376_s4 + $0x608] ss:$16 sps:$4 sm:$0xff]   ;;  %v15756_v56 = vld [vmem:[%s21376_s4 + $0x5ec] ss:$16 sps:$4 sm:$0xff]  }
0x10a8   : > { %12258 = vmatprep.subr.bf16.mxu1 %v15699_v19  ;;  %v15759_v19 = vld [vmem:[%s21376_s4 + $0x7ec] ss:$16 sps:$4 sm:$0xff]  }
0x10aa   : > { %12218 = vmatpush2.bf16.msra.mxu0 %v15694_v20  ;;  %v15754_v20 = vld [vmem:[%s21376_s4 + $0x5e8] ss:$16 sps:$4 sm:$0xff]  }
0x10ab   : > { %12259 = vmatpush2.bf16.msra.mxu1 %v15697_v21  ;;  %12219 = vmatprep.subr.bf16.mxu0 %v15702_v22  ;;  %v15757_v21 = vld [vmem:[%s21376_s4 + $0x7e8] ss:$16 sps:$4 sm:$0xff]   ;;  %v15762_v22 = vld [vmem:[%s21376_s4 + $0x5cc] ss:$16 sps:$4 sm:$0xff]  }
0x10ac   : > { %12260 = vmatprep.subr.bf16.mxu1 %v15705_v24  ;;  %v15765_v24 = vld [vmem:[%s21376_s4 + $0x7cc] ss:$16 sps:$4 sm:$0xff]  }
0x10ae   : > { %12220 = vmatpush2.bf16.msra.mxu0 %v15700_v26  ;;  %v15760_v26 = vld [vmem:[%s21376_s4 + $0x5c8] ss:$16 sps:$4 sm:$0xff]  }
0x10af   : > { %12261 = vmatpush2.bf16.msra.mxu1 %v15703_v4  ;;  %12271 = vmatprep.subr.bf16.mxu0 %v15708_v57  ;;  %v15763_v4 = vld [vmem:[%s21376_s4 + $0x7c8] ss:$16 sps:$4 sm:$0xff]   ;;  %v15768_v57 = vld [vmem:[%s21376_s4 + $0x5ac] ss:$16 sps:$4 sm:$0xff]  }
0x10b0   : > { %12312 = vmatprep.subr.bf16.mxu1 %v15711_v1  ;;  %v15771_v1 = vld [vmem:[%s21376_s4 + $0x7ac] ss:$16 sps:$4 sm:$0xff]  }
0x10b1   : > { %v11977_v52 = vpop.f32.mrf.mxu0  ;;  %12222 = vmatmul.mubr.bf16.vlgmr.msra.gmra.mxu0 %v19842_v47  ;;  %v15715_v47 = vld [vmem:[%s21376_s4 + $0x6c8] ss:$16 sps:$4 sm:$0xff]  }
0x10b2   : > { %v11978_v31 = vadd.f32 %v11977_v52, %v20508_v36  ;;  %v12018_v34 = vpop.f32.mrf.mxu1  ;;  %12263 = vmatmul.mubr.bf16.vlgmr.msra.gmra.mxu1 %v19847_v50  ;;  %12272 = vmatpush1.bf16.msra.mxu0 %v15706_v12  ;;  %v15720_v36 = vld [vmem:[%s21376_s4 + $0x4ac] ss:$16 sps:$4 sm:$0xff]   ;;  %v15766_v12 = vld [vmem:[%s21376_s4 + $0x5a8] ss:$16 sps:$4 sm:$0xff]  }
0x10b3   : > { %12303 = vmatprep.mubr.bf16.mxu0 %v19852_v2  ;;  %12313 = vmatpush1.bf16.msra.mxu1 %v15709_v17  ;;  %v11979_v10 = vpop.f32.mrf.mxu0  ;;  %v15723_v2 = vld [vmem:[%s21376_s4 + $0x6ac] ss:$16 sps:$4 sm:$0xff]   ;;  %v15769_v17 = vld [vmem:[%s21376_s4 + $0x7a8] ss:$16 sps:$4 sm:$0xff]  }
0x10b4   : > { %v20710_v39 = vadd.f32 %v12018_v34, %v11978_v31  ;;  %12344 = vmatprep.mubr.bf16.mxu1 %v19858_v54  ;;  %v11980_v50 = vadd.f32 %v11979_v10, %v20515_v5  ;;  %v12020_v40 = vpop.f32.mrf.mxu1  ;;  %12273 = vmatprep.subr.bf16.mxu0 %v15714_v55  ;;  %v15721_v5 = vld [vmem:[%s21376_s4 + $0x6a8] ss:$16 sps:$4 sm:$0xff]   ;;  %v15774_v55 = vld [vmem:[%s21376_s4 + $0x58c] ss:$16 sps:$4 sm:$0xff]  }
0x10b5   : > { %v11981_v41 = vpop.f32.mrf.mxu0  ;;  %12314 = vmatprep.subr.bf16.mxu1 %v15717_v30  ;;  %v15777_v52 = vld [vmem:[%s21376_s4 + $0x78c] ss:$16 sps:$4 sm:$0xff]   ;;  %v15772_v30 = vld [vmem:[%s21376_s4 + $0x588] ss:$16 sps:$4 sm:$0xff]  }
0x10b6   : > { %v20717_v42 = vadd.f32 %v12020_v40, %v11980_v50  ;;  %v12022_v43 = vpop.f32.mrf.mxu1  ;;  %12274 = vmatpush1.bf16.msra.mxu0 %v15712_v37  ;;  %v15775_v31 = vld [vmem:[%s21376_s4 + $0x788] ss:$16 sps:$4 sm:$0xff]   ;;  %v15780_v34 = vld [vmem:[%s21376_s4 + $0x56c] ss:$16 sps:$4 sm:$0xff]  }
0x10b7   : > { %12315 = vmatpush1.bf16.msra.mxu1 %v15715_v47  ;;  %v11982_v54 = vpop.f32.mrf.mxu0  ;;  %12275 = vmatprep.subr.bf16.mxu0 %v15720_v36  ;;  %v15783_v37 = vld [vmem:[%s21376_s4 + $0x76c] ss:$16 sps:$4 sm:$0xff]   ;;  %v15778_v10 = vld [vmem:[%s21376_s4 + $0x568] ss:$16 sps:$4 sm:$0xff]  }
0x10b8   : > { %v12023_v14 = vpop.f32.mrf.mxu1  ;;  %12316 = vmatprep.subr.bf16.mxu1 %v15723_v2  ;;  %v15781_v47 = vld [vmem:[%s21376_s4 + $0x768] ss:$16 sps:$4 sm:$0xff]   ;;  %v15786_v36 = vld [vmem:[%s21376_s4 + $0x54c] ss:$16 sps:$4 sm:$0xff]  }
0x10b9   : > { %v15789_v50 = vld [vmem:[%s21376_s4 + $0x74c] ss:$16 sps:$4 sm:$0xff]   ;;  %v15784_v40 = vld [vmem:[%s21376_s4 + $0x548] ss:$16 sps:$4 sm:$0xff]  }
0x10ba   : > { %12276 = vmatpush1.bf16.msra.mxu0 %v15718_v44  ;;  %v15787_v2 = vld [vmem:[%s21376_s4 + $0x748] ss:$16 sps:$4 sm:$0xff]   ;;  %v15792_v41 = vld [vmem:[%s21376_s4 + $0x52c] ss:$16 sps:$4 sm:$0xff]  }
0x10bb   : > { %12317 = vmatpush1.bf16.msra.mxu1 %v15721_v5  ;;  %12277 = vmatprep.subr.bf16.mxu0 %v15726_v11  ;;  %v15795_v43 = vld [vmem:[%s21376_s4 + $0x72c] ss:$16 sps:$4 sm:$0xff]   ;;  %v15790_v44 = vld [vmem:[%s21376_s4 + $0x528] ss:$16 sps:$4 sm:$0xff]  }
0x10bc   : > { %12318 = vmatprep.subr.bf16.mxu1 %v15729_v45  ;;  %v15793_v54 = vld [vmem:[%s21376_s4 + $0x728] ss:$16 sps:$4 sm:$0xff]   ;;  %v15798_v5 = vld [vmem:[%s21376_s4 + $0x50c] ss:$16 sps:$4 sm:$0xff]  }
0x10bd   : > { %v15801_v11 = vld [vmem:[%s21376_s4 + $0x70c] ss:$16 sps:$4 sm:$0xff]   ;;  %v15796_v14 = vld [vmem:[%s21376_s4 + $0x508] ss:$16 sps:$4 sm:$0xff]  }
0x10be   : > { %12278 = vmatpush1.bf16.msra.mxu0 %v15724_v35  ;;  %v15799_v45 = vld [vmem:[%s21376_s4 + $0x708] ss:$16 sps:$4 sm:$0xff]   ;;  %v15804_v35 = vld [vmem:[%s21376_s4 + $0x8ec] ss:$16 sps:$4 sm:$0xff]  }
0x10bf   : > { %12319 = vmatpush1.bf16.msra.mxu1 %v15727_v46  ;;  %12279 = vmatprep.subr.bf16.mxu0 %v15732_v51  ;;  %v15807_v46 = vld [vmem:[%s21376_s4 + $0xaec] ss:$16 sps:$4 sm:$0xff]   ;;  %v15802_v51 = vld [vmem:[%s21376_s4 + $0x8e8] ss:$16 sps:$4 sm:$0xff]  }
0x10c0   : > { %12320 = vmatprep.subr.bf16.mxu1 %v15735_v53  ;;  %v15805_v53 = vld [vmem:[%s21376_s4 + $0xae8] ss:$16 sps:$4 sm:$0xff]  }
0x10c2   : > { %12280 = vmatpush1.bf16.msra.mxu0 %v15730_v49  ;;  %v15810_v49 = vld [vmem:[%s21376_s4 + $0x8cc] ss:$16 sps:$4 sm:$0xff]  }
0x10c3   : > { %12321 = vmatpush1.bf16.msra.mxu1 %v15733_v18  ;;  %12281 = vmatprep.subr.bf16.mxu0 %v15738_v13  ;;  %v15813_v13 = vld [vmem:[%s21376_s4 + $0xacc] ss:$16 sps:$4 sm:$0xff]  }
0x10c4   : > { %12322 = vmatprep.subr.bf16.mxu1 %v15741_v25 }
0x10c6   : > { %12282 = vmatpush1.bf16.msra.mxu0 %v15736_v0 }
0x10c7   : > { %12323 = vmatpush1.bf16.msra.mxu1 %v15739_v59  ;;  %12283 = vmatprep.subr.bf16.mxu0 %v15744_v9  ;;  %v15808_v59 = vld [vmem:[%s21376_s4 + $0x8c8] ss:$16 sps:$4 sm:$0xff]  }
0x10c8   : > { %12324 = vmatprep.subr.bf16.mxu1 %v15747_v38 }
0x10ca   : > { %12284 = vmatpush1.bf16.msra.mxu0 %v15742_v29 }
0x10cb   : > { %12325 = vmatpush1.bf16.msra.mxu1 %v15745_v27  ;;  %12285 = vmatprep.subr.bf16.mxu0 %v15750_v8 }
0x10cc   : > { %12326 = vmatprep.subr.bf16.mxu1 %v15753_v6 }
0x10ce   : > { %12286 = vmatpush1.bf16.msra.mxu0 %v15748_v16  ;;  %v15814_v16 = vld [vmem:[%s21376_s4 + $0x8a8] ss:$16 sps:$4 sm:$0xff]  }
0x10cf   : > { %12327 = vmatpush1.bf16.msra.mxu1 %v15751_v15  ;;  %12287 = vmatprep.subr.bf16.mxu0 %v15756_v56  ;;  %v15822_v15 = vld [vmem:[%s21376_s4 + $0x88c] ss:$16 sps:$4 sm:$0xff]  }
0x10d0   : > { %12328 = vmatprep.subr.bf16.mxu1 %v15759_v19  ;;  %v15825_v19 = vld [vmem:[%s21376_s4 + $0xa8c] ss:$16 sps:$4 sm:$0xff]  }
0x10d2   : > { %12288 = vmatpush2.bf16.msra.mxu0 %v15754_v20  ;;  %v15820_v20 = vld [vmem:[%s21376_s4 + $0x888] ss:$16 sps:$4 sm:$0xff]  }
0x10d3   : > { %12329 = vmatpush2.bf16.msra.mxu1 %v15757_v21  ;;  %12289 = vmatprep.subr.bf16.mxu0 %v15762_v22  ;;  %v15823_v21 = vld [vmem:[%s21376_s4 + $0xa88] ss:$16 sps:$4 sm:$0xff]   ;;  %v15828_v22 = vld [vmem:[%s21376_s4 + $0x86c] ss:$16 sps:$4 sm:$0xff]  }
0x10d4   : > { %12330 = vmatprep.subr.bf16.mxu1 %v15765_v24  ;;  %v15831_v24 = vld [vmem:[%s21376_s4 + $0xa6c] ss:$16 sps:$4 sm:$0xff]  }
0x10d6   : > { %12290 = vmatpush2.bf16.msra.mxu0 %v15760_v26  ;;  %v15826_v26 = vld [vmem:[%s21376_s4 + $0x868] ss:$16 sps:$4 sm:$0xff]  }
0x10d7   : > { %12331 = vmatpush2.bf16.msra.mxu1 %v15763_v4  ;;  %12291 = vmatprep.subr.bf16.mxu0 %v15768_v57  ;;  %v15829_v4 = vld [vmem:[%s21376_s4 + $0xa68] ss:$16 sps:$4 sm:$0xff]   ;;  %v15834_v57 = vld [vmem:[%s21376_s4 + $0x84c] ss:$16 sps:$4 sm:$0xff]  }
0x10d8   : > { %12332 = vmatprep.subr.bf16.mxu1 %v15771_v1  ;;  %v15837_v1 = vld [vmem:[%s21376_s4 + $0xa4c] ss:$16 sps:$4 sm:$0xff]  }
0x10da   : > { %12292 = vmatpush2.bf16.msra.mxu0 %v15766_v12  ;;  %v15832_v12 = vld [vmem:[%s21376_s4 + $0x848] ss:$16 sps:$4 sm:$0xff]  }
0x10db   : > { %12333 = vmatpush2.bf16.msra.mxu1 %v15769_v17  ;;  %12293 = vmatprep.subr.bf16.mxu0 %v15774_v55  ;;  %v15835_v17 = vld [vmem:[%s21376_s4 + $0xa48] ss:$16 sps:$4 sm:$0xff]   ;;  %v15840_v55 = vld [vmem:[%s21376_s4 + $0x82c] ss:$16 sps:$4 sm:$0xff]  }
0x10dc   : > { %12334 = vmatprep.subr.bf16.mxu1 %v15777_v52  ;;  %v15843_v52 = vld [vmem:[%s21376_s4 + $0xa2c] ss:$16 sps:$4 sm:$0xff]  }
0x10de   : > { %12294 = vmatpush2.bf16.msra.mxu0 %v15772_v30  ;;  %v15838_v30 = vld [vmem:[%s21376_s4 + $0x828] ss:$16 sps:$4 sm:$0xff]  }
0x10df   : > { %12335 = vmatpush2.bf16.msra.mxu1 %v15775_v31  ;;  %12295 = vmatprep.subr.bf16.mxu0 %v15780_v34  ;;  %v15841_v31 = vld [vmem:[%s21376_s4 + $0xa28] ss:$16 sps:$4 sm:$0xff]   ;;  %v15846_v34 = vld [vmem:[%s21376_s4 + $0x80c] ss:$16 sps:$4 sm:$0xff]  }
0x10e0   : > { %12336 = vmatprep.subr.bf16.mxu1 %v15783_v37  ;;  %v15849_v37 = vld [vmem:[%s21376_s4 + $0xa0c] ss:$16 sps:$4 sm:$0xff]  }
0x10e2   : > { %12296 = vmatpush2.bf16.msra.mxu0 %v15778_v10  ;;  %v15844_v10 = vld [vmem:[%s21376_s4 + $0x808] ss:$16 sps:$4 sm:$0xff]  }
0x10e3   : > { %12337 = vmatpush2.bf16.msra.mxu1 %v15781_v47  ;;  %12297 = vmatprep.subr.bf16.mxu0 %v15786_v36  ;;  %v15847_v47 = vld [vmem:[%s21376_s4 + $0xa08] ss:$16 sps:$4 sm:$0xff]   ;;  %v15852_v36 = vld [vmem:[%s21376_s4 + $0x9ec] ss:$16 sps:$4 sm:$0xff]  }
0x10e4   : > { %12338 = vmatprep.subr.bf16.mxu1 %v15789_v50  ;;  %v15855_v50 = vld [vmem:[%s21376_s4 + $0xbec] ss:$16 sps:$4 sm:$0xff]  }
0x10e6   : > { %12298 = vmatpush2.bf16.msra.mxu0 %v15784_v40  ;;  %v15850_v40 = vld [vmem:[%s21376_s4 + $0x9e8] ss:$16 sps:$4 sm:$0xff]  }
0x10e7   : > { %12339 = vmatpush2.bf16.msra.mxu1 %v15787_v2  ;;  %12299 = vmatprep.subr.bf16.mxu0 %v15792_v41  ;;  %v15853_v2 = vld [vmem:[%s21376_s4 + $0xbe8] ss:$16 sps:$4 sm:$0xff]   ;;  %v15858_v41 = vld [vmem:[%s21376_s4 + $0x9cc] ss:$16 sps:$4 sm:$0xff]  }
0x10e8   : > { %12340 = vmatprep.subr.bf16.mxu1 %v15795_v43  ;;  %v15861_v43 = vld [vmem:[%s21376_s4 + $0xbcc] ss:$16 sps:$4 sm:$0xff]  }
0x10ea   : > { %12300 = vmatpush2.bf16.msra.mxu0 %v15790_v44  ;;  %v15856_v44 = vld [vmem:[%s21376_s4 + $0x9c8] ss:$16 sps:$4 sm:$0xff]  }
0x10eb   : > { %12341 = vmatpush2.bf16.msra.mxu1 %v15793_v54  ;;  %12301 = vmatprep.subr.bf16.mxu0 %v15798_v5  ;;  %v15859_v54 = vld [vmem:[%s21376_s4 + $0xbc8] ss:$16 sps:$4 sm:$0xff]   ;;  %v15864_v5 = vld [vmem:[%s21376_s4 + $0x9ac] ss:$16 sps:$4 sm:$0xff]  }
0x10ec   : > { %12342 = vmatprep.subr.bf16.mxu1 %v15801_v11  ;;  %v15867_v11 = vld [vmem:[%s21376_s4 + $0xbac] ss:$16 sps:$4 sm:$0xff]  }
0x10ee   : > { %12302 = vmatpush2.bf16.msra.mxu0 %v15796_v14  ;;  %v15862_v14 = vld [vmem:[%s21376_s4 + $0x9a8] ss:$16 sps:$4 sm:$0xff]  }
0x10ef   : > { %12343 = vmatpush2.bf16.msra.mxu1 %v15799_v45  ;;  %12353 = vmatprep.subr.bf16.mxu0 %v15804_v35  ;;  %v15865_v45 = vld [vmem:[%s21376_s4 + $0xba8] ss:$16 sps:$4 sm:$0xff]   ;;  %v15870_v35 = vld [vmem:[%s21376_s4 + $0x98c] ss:$16 sps:$4 sm:$0xff]  }
0x10f0   : > { %12394 = vmatprep.subr.bf16.mxu1 %v15807_v46  ;;  %v15873_v46 = vld [vmem:[%s21376_s4 + $0xb8c] ss:$16 sps:$4 sm:$0xff]  }
0x10f1   : > { %v12059_v18 = vpop.f32.mrf.mxu0  ;;  %12304 = vmatmul.mubr.bf16.vlgmr.msra.gmra.mxu0 %v20057_v61  ;;  %v15811_v61 = vld [vmem:[%s21376_s4 + $0xac8] ss:$16 sps:$4 sm:$0xff]  }
0x10f2   : > { %v12060_v25 = vadd.f32 %v12059_v18, %v20710_v39  ;;  %v12100_v0 = vpop.f32.mrf.mxu1  ;;  %12345 = vmatmul.mubr.bf16.vlgmr.msra.gmra.mxu1 %v20062_v28  ;;  %12354 = vmatpush1.bf16.msra.mxu0 %v15802_v51  ;;  %v15816_v39 = vld [vmem:[%s21376_s4 + $0x8ac] ss:$16 sps:$4 sm:$0xff]   ;;  %v15868_v51 = vld [vmem:[%s21376_s4 + $0x988] ss:$16 sps:$4 sm:$0xff]  }
0x10f3   : > { %12385 = vmatprep.mubr.bf16.mxu0 %v20067_v63  ;;  %12395 = vmatpush1.bf16.msra.mxu1 %v15805_v53  ;;  %v12061_v9 = vpop.f32.mrf.mxu0  ;;  %v15819_v63 = vld [vmem:[%s21376_s4 + $0xaac] ss:$16 sps:$4 sm:$0xff]   ;;  %v15871_v53 = vld [vmem:[%s21376_s4 + $0xb88] ss:$16 sps:$4 sm:$0xff]  }
0x10f4   : > { %v20912_v38 = vadd.f32 %v12100_v0, %v12060_v25  ;;  %12426 = vmatprep.mubr.bf16.mxu1 %v20073_v48  ;;  %v12062_v28 = vadd.f32 %v12061_v9, %v20717_v42  ;;  %v12102_v29 = vpop.f32.mrf.mxu1  ;;  %12355 = vmatprep.subr.bf16.mxu0 %v15810_v49  ;;  %v15817_v42 = vld [vmem:[%s21376_s4 + $0xaa8] ss:$16 sps:$4 sm:$0xff]   ;;  %v15876_v49 = vld [vmem:[%s21376_s4 + $0x96c] ss:$16 sps:$4 sm:$0xff]  }
0x10f5   : > { %v12063_v27 = vpop.f32.mrf.mxu0  ;;  %12396 = vmatprep.subr.bf16.mxu1 %v15813_v13  ;;  %v15879_v18 = vld [vmem:[%s21376_s4 + $0xb6c] ss:$16 sps:$4 sm:$0xff]   ;;  %v15874_v13 = vld [vmem:[%s21376_s4 + $0x968] ss:$16 sps:$4 sm:$0xff]  }
0x10f6   : > { %v20919_v8 = vadd.f32 %v12102_v29, %v12062_v28  ;;  %v12104_v6 = vpop.f32.mrf.mxu1  ;;  %12356 = vmatpush1.bf16.msra.mxu0 %v15808_v59  ;;  %v15877_v25 = vld [vmem:[%s21376_s4 + $0xb68] ss:$16 sps:$4 sm:$0xff]   ;;  %v15882_v0 = vld [vmem:[%s21376_s4 + $0x94c] ss:$16 sps:$4 sm:$0xff]  }
0x10f7   : > { %12397 = vmatpush1.bf16.msra.mxu1 %v15811_v61  ;;  %v12064_v48 = vpop.f32.mrf.mxu0  ;;  %12357 = vmatprep.subr.bf16.mxu0 %v15816_v39  ;;  %v15885_v59 = vld [vmem:[%s21376_s4 + $0xb4c] ss:$16 sps:$4 sm:$0xff]   ;;  %v15880_v9 = vld [vmem:[%s21376_s4 + $0x948] ss:$16 sps:$4 sm:$0xff]  }
0x10f8   : > { %v12105_v56 = vpop.f32.mrf.mxu1  ;;  %12398 = vmatprep.subr.bf16.mxu1 %v15819_v63  ;;  %v15883_v61 = vld [vmem:[%s21376_s4 + $0xb48] ss:$16 sps:$4 sm:$0xff]   ;;  %v15888_v39 = vld [vmem:[%s21376_s4 + $0x92c] ss:$16 sps:$4 sm:$0xff]  }
0x10f9   : > { %v15891_v28 = vld [vmem:[%s21376_s4 + $0xb2c] ss:$16 sps:$4 sm:$0xff]   ;;  %v15886_v29 = vld [vmem:[%s21376_s4 + $0x928] ss:$16 sps:$4 sm:$0xff]  }
0x10fa   : > { %12358 = vmatpush1.bf16.msra.mxu0 %v15814_v16  ;;  %v15889_v63 = vld [vmem:[%s21376_s4 + $0xb28] ss:$16 sps:$4 sm:$0xff]   ;;  %v15894_v27 = vld [vmem:[%s21376_s4 + $0x90c] ss:$16 sps:$4 sm:$0xff]  }
0x10fb   : > { %12399 = vmatpush1.bf16.msra.mxu1 %v15817_v42  ;;  %12359 = vmatprep.subr.bf16.mxu0 %v15822_v15  ;;  %v15897_v6 = vld [vmem:[%s21376_s4 + $0xb0c] ss:$16 sps:$4 sm:$0xff]   ;;  %v15892_v16 = vld [vmem:[%s21376_s4 + $0x908] ss:$16 sps:$4 sm:$0xff]  }
0x10fc   : > { %12400 = vmatprep.subr.bf16.mxu1 %v15825_v19  ;;  %v15895_v48 = vld [vmem:[%s21376_s4 + $0xb08] ss:$16 sps:$4 sm:$0xff]   ;;  %v15900_v42 = vld [vmem:[%s21376_s4 + $0xcec] ss:$16 sps:$4 sm:$0xff]  }
0x10fd   : > { %v15903_v15 = vld [vmem:[%s21376_s4 + $0xeec] ss:$16 sps:$4 sm:$0xff]   ;;  %v15898_v56 = vld [vmem:[%s21376_s4 + $0xce8] ss:$16 sps:$4 sm:$0xff]  }
0x10fe   : > { %12360 = vmatpush1.bf16.msra.mxu0 %v15820_v20  ;;  %v15901_v19 = vld [vmem:[%s21376_s4 + $0xee8] ss:$16 sps:$4 sm:$0xff]   ;;  %v15906_v20 = vld [vmem:[%s21376_s4 + $0xccc] ss:$16 sps:$4 sm:$0xff]  }
0x10ff   : > { %12401 = vmatpush1.bf16.msra.mxu1 %v15823_v21  ;;  %12361 = vmatprep.subr.bf16.mxu0 %v15828_v22  ;;  %v15909_v22 = vld [vmem:[%s21376_s4 + $0xecc] ss:$16 sps:$4 sm:$0xff]  }
0x1100   : > { %12402 = vmatprep.subr.bf16.mxu1 %v15831_v24 }
0x1102   : > { %12362 = vmatpush1.bf16.msra.mxu0 %v15826_v26 }
0x1103   : > { %12403 = vmatpush1.bf16.msra.mxu1 %v15829_v4  ;;  %12363 = vmatprep.subr.bf16.mxu0 %v15834_v57  ;;  %v15904_v4 = vld [vmem:[%s21376_s4 + $0xcc8] ss:$16 sps:$4 sm:$0xff]  }
0x1104   : > { %12404 = vmatprep.subr.bf16.mxu1 %v15837_v1 }
0x1106   : > { %12364 = vmatpush1.bf16.msra.mxu0 %v15832_v12 }
0x1107   : > { %12405 = vmatpush1.bf16.msra.mxu1 %v15835_v17  ;;  %12365 = vmatprep.subr.bf16.mxu0 %v15840_v55 }
0x1108   : > { %12406 = vmatprep.subr.bf16.mxu1 %v15843_v52 }
0x110a   : > { %12366 = vmatpush1.bf16.msra.mxu0 %v15838_v30  ;;  %v15910_v30 = vld [vmem:[%s21376_s4 + $0xca8] ss:$16 sps:$4 sm:$0xff]  }
0x110b   : > { %12407 = vmatpush1.bf16.msra.mxu1 %v15841_v31  ;;  %12367 = vmatprep.subr.bf16.mxu0 %v15846_v34  ;;  %v15918_v31 = vld [vmem:[%s21376_s4 + $0xc8c] ss:$16 sps:$4 sm:$0xff]  }
0x110c   : > { %12408 = vmatprep.subr.bf16.mxu1 %v15849_v37  ;;  %v15921_v37 = vld [vmem:[%s21376_s4 + $0xe8c] ss:$16 sps:$4 sm:$0xff]  }
0x110e   : > { %12368 = vmatpush1.bf16.msra.mxu0 %v15844_v10  ;;  %v15916_v10 = vld [vmem:[%s21376_s4 + $0xc88] ss:$16 sps:$4 sm:$0xff]  }
0x110f   : > { %12409 = vmatpush1.bf16.msra.mxu1 %v15847_v47  ;;  %12369 = vmatprep.subr.bf16.mxu0 %v15852_v36  ;;  %v15919_v47 = vld [vmem:[%s21376_s4 + $0xe88] ss:$16 sps:$4 sm:$0xff]   ;;  %v15924_v36 = vld [vmem:[%s21376_s4 + $0xc6c] ss:$16 sps:$4 sm:$0xff]  }
0x1110   : > { %12410 = vmatprep.subr.bf16.mxu1 %v15855_v50  ;;  %v15927_v50 = vld [vmem:[%s21376_s4 + $0xe6c] ss:$16 sps:$4 sm:$0xff]  }
0x1112   : > { %12370 = vmatpush2.bf16.msra.mxu0 %v15850_v40  ;;  %v15922_v40 = vld [vmem:[%s21376_s4 + $0xc68] ss:$16 sps:$4 sm:$0xff]  }
0x1113   : > { %12411 = vmatpush2.bf16.msra.mxu1 %v15853_v2  ;;  %12371 = vmatprep.subr.bf16.mxu0 %v15858_v41  ;;  %v15925_v2 = vld [vmem:[%s21376_s4 + $0xe68] ss:$16 sps:$4 sm:$0xff]   ;;  %v15930_v41 = vld [vmem:[%s21376_s4 + $0xc4c] ss:$16 sps:$4 sm:$0xff]  }
0x1114   : > { %12412 = vmatprep.subr.bf16.mxu1 %v15861_v43  ;;  %v15933_v43 = vld [vmem:[%s21376_s4 + $0xe4c] ss:$16 sps:$4 sm:$0xff]  }
0x1116   : > { %12372 = vmatpush2.bf16.msra.mxu0 %v15856_v44  ;;  %v15928_v44 = vld [vmem:[%s21376_s4 + $0xc48] ss:$16 sps:$4 sm:$0xff]  }
0x1117   : > { %12413 = vmatpush2.bf16.msra.mxu1 %v15859_v54  ;;  %12373 = vmatprep.subr.bf16.mxu0 %v15864_v5  ;;  %v15931_v54 = vld [vmem:[%s21376_s4 + $0xe48] ss:$16 sps:$4 sm:$0xff]   ;;  %v15936_v5 = vld [vmem:[%s21376_s4 + $0xc2c] ss:$16 sps:$4 sm:$0xff]  }
0x1118   : > { %12414 = vmatprep.subr.bf16.mxu1 %v15867_v11  ;;  %v15939_v11 = vld [vmem:[%s21376_s4 + $0xe2c] ss:$16 sps:$4 sm:$0xff]  }
0x111a   : > { %12374 = vmatpush2.bf16.msra.mxu0 %v15862_v14  ;;  %v15934_v14 = vld [vmem:[%s21376_s4 + $0xc28] ss:$16 sps:$4 sm:$0xff]  }
0x111b   : > { %12415 = vmatpush2.bf16.msra.mxu1 %v15865_v45  ;;  %12375 = vmatprep.subr.bf16.mxu0 %v15870_v35  ;;  %v15937_v45 = vld [vmem:[%s21376_s4 + $0xe28] ss:$16 sps:$4 sm:$0xff]   ;;  %v15942_v35 = vld [vmem:[%s21376_s4 + $0xc0c] ss:$16 sps:$4 sm:$0xff]  }
0x111c   : > { %12416 = vmatprep.subr.bf16.mxu1 %v15873_v46  ;;  %v15945_v46 = vld [vmem:[%s21376_s4 + $0xe0c] ss:$16 sps:$4 sm:$0xff]  }
0x111e   : > { %12376 = vmatpush2.bf16.msra.mxu0 %v15868_v51  ;;  %v15940_v51 = vld [vmem:[%s21376_s4 + $0xc08] ss:$16 sps:$4 sm:$0xff]  }
0x111f   : > { %12417 = vmatpush2.bf16.msra.mxu1 %v15871_v53  ;;  %12377 = vmatprep.subr.bf16.mxu0 %v15876_v49  ;;  %v15943_v53 = vld [vmem:[%s21376_s4 + $0xe08] ss:$16 sps:$4 sm:$0xff]   ;;  %v15948_v49 = vld [vmem:[%s21376_s4 + $0xdec] ss:$16 sps:$4 sm:$0xff]  }
0x1120   : > { %12418 = vmatprep.subr.bf16.mxu1 %v15879_v18  ;;  %v15951_v18 = vld [vmem:[%s21376_s4 + $0xfec] ss:$16 sps:$4 sm:$0xff]  }
0x1122   : > { %12378 = vmatpush2.bf16.msra.mxu0 %v15874_v13  ;;  %v15946_v13 = vld [vmem:[%s21376_s4 + $0xde8] ss:$16 sps:$4 sm:$0xff]  }
0x1123   : > { %12419 = vmatpush2.bf16.msra.mxu1 %v15877_v25  ;;  %12379 = vmatprep.subr.bf16.mxu0 %v15882_v0  ;;  %v15949_v25 = vld [vmem:[%s21376_s4 + $0xfe8] ss:$16 sps:$4 sm:$0xff]   ;;  %v15954_v0 = vld [vmem:[%s21376_s4 + $0xdcc] ss:$16 sps:$4 sm:$0xff]  }
0x1124   : > { %12420 = vmatprep.subr.bf16.mxu1 %v15885_v59  ;;  %v15957_v59 = vld [vmem:[%s21376_s4 + $0xfcc] ss:$16 sps:$4 sm:$0xff]  }
0x1126   : > { %12380 = vmatpush2.bf16.msra.mxu0 %v15880_v9  ;;  %v15952_v9 = vld [vmem:[%s21376_s4 + $0xdc8] ss:$16 sps:$4 sm:$0xff]  }
0x1127   : > { %12421 = vmatpush2.bf16.msra.mxu1 %v15883_v61  ;;  %12381 = vmatprep.subr.bf16.mxu0 %v15888_v39  ;;  %v15955_v61 = vld [vmem:[%s21376_s4 + $0xfc8] ss:$16 sps:$4 sm:$0xff]   ;;  %v15960_v39 = vld [vmem:[%s21376_s4 + $0xdac] ss:$16 sps:$4 sm:$0xff]  }
0x1128   : > { %12422 = vmatprep.subr.bf16.mxu1 %v15891_v28  ;;  %v15963_v28 = vld [vmem:[%s21376_s4 + $0xfac] ss:$16 sps:$4 sm:$0xff]  }
0x112a   : > { %12382 = vmatpush2.bf16.msra.mxu0 %v15886_v29  ;;  %v15958_v29 = vld [vmem:[%s21376_s4 + $0xda8] ss:$16 sps:$4 sm:$0xff]  }
0x112b   : > { %12423 = vmatpush2.bf16.msra.mxu1 %v15889_v63  ;;  %12383 = vmatprep.subr.bf16.mxu0 %v15894_v27  ;;  %v15961_v63 = vld [vmem:[%s21376_s4 + $0xfa8] ss:$16 sps:$4 sm:$0xff]   ;;  %v15966_v27 = vld [vmem:[%s21376_s4 + $0xd8c] ss:$16 sps:$4 sm:$0xff]  }
0x112c   : > { %12424 = vmatprep.subr.bf16.mxu1 %v15897_v6  ;;  %v15969_v6 = vld [vmem:[%s21376_s4 + $0xf8c] ss:$16 sps:$4 sm:$0xff]  }
0x112e   : > { %12384 = vmatpush2.bf16.msra.mxu0 %v15892_v16  ;;  %v15964_v16 = vld [vmem:[%s21376_s4 + $0xd88] ss:$16 sps:$4 sm:$0xff]  }
0x112f   : > { %12425 = vmatpush2.bf16.msra.mxu1 %v15895_v48  ;;  %12435 = vmatprep.subr.bf16.mxu0 %v15900_v42  ;;  %v15967_v48 = vld [vmem:[%s21376_s4 + $0xf88] ss:$16 sps:$4 sm:$0xff]   ;;  %v15972_v42 = vld [vmem:[%s21376_s4 + $0xd6c] ss:$16 sps:$4 sm:$0xff]  }
0x1130   : > { %12476 = vmatprep.subr.bf16.mxu1 %v15903_v15  ;;  %v15975_v15 = vld [vmem:[%s21376_s4 + $0xf6c] ss:$16 sps:$4 sm:$0xff]  }
0x1131   : > { %v12141_v21 = vpop.f32.mrf.mxu0  ;;  %12386 = vmatmul.mubr.bf16.vlgmr.msra.gmra.mxu0 %v20271_v3  ;;  %v15907_v3 = vld [vmem:[%s21376_s4 + $0xec8] ss:$16 sps:$4 sm:$0xff]  }
0x1132   : > { %v12142_v24 = vadd.f32 %v12141_v21, %v20912_v38  ;;  %v12182_v26 = vpop.f32.mrf.mxu1  ;;  %12427 = vmatmul.mubr.bf16.vlgmr.msra.gmra.mxu1 %v20276_v58  ;;  %12436 = vmatpush1.bf16.msra.mxu0 %v15898_v56  ;;  %v15912_v38 = vld [vmem:[%s21376_s4 + $0xcac] ss:$16 sps:$4 sm:$0xff]   ;;  %v15970_v56 = vld [vmem:[%s21376_s4 + $0xd68] ss:$16 sps:$4 sm:$0xff]  }
0x1133   : > { %12467 = vmatprep.mubr.bf16.mxu0 %v20284_v7  ;;  %12477 = vmatpush1.bf16.msra.mxu1 %v15901_v19  ;;  %v12143_v57 = vpop.f32.mrf.mxu0  ;;  %v15915_v7 = vld [vmem:[%s21376_s4 + $0xeac] ss:$16 sps:$4 sm:$0xff]   ;;  %v15973_v19 = vld [vmem:[%s21376_s4 + $0xf68] ss:$16 sps:$4 sm:$0xff]  }
0x1134   : > { %v21114_v1 = vadd.f32 %v12182_v26, %v12142_v24  ;;  %12508 = vmatprep.mubr.bf16.mxu1 %v20317_v32  ;;  %v12144_v58 = vadd.f32 %v12143_v57, %v20919_v8  ;;  %v12184_v12 = vpop.f32.mrf.mxu1  ;;  %12437 = vmatprep.subr.bf16.mxu0 %v15906_v20  ;;  %v15913_v8 = vld [vmem:[%s21376_s4 + $0xea8] ss:$16 sps:$4 sm:$0xff]   ;;  %v15978_v20 = vld [vmem:[%s21376_s4 + $0xd4c] ss:$16 sps:$4 sm:$0xff]  }
0x1135   : > { %v12145_v17 = vpop.f32.mrf.mxu0  ;;  %12478 = vmatprep.subr.bf16.mxu1 %v15909_v22  ;;  %v15981_v21 = vld [vmem:[%s21376_s4 + $0xf4c] ss:$16 sps:$4 sm:$0xff]   ;;  %v15976_v22 = vld [vmem:[%s21376_s4 + $0xd48] ss:$16 sps:$4 sm:$0xff]  }
0x1136   : > { %v21121_v55 = vadd.f32 %v12184_v12, %v12144_v58  ;;  %v12186_v52 = vpop.f32.mrf.mxu1  ;;  %12438 = vmatpush1.bf16.msra.mxu0 %v15904_v4  ;;  %v15979_v24 = vld [vmem:[%s21376_s4 + $0xf48] ss:$16 sps:$4 sm:$0xff]   ;;  %v15984_v26 = vld [vmem:[%s21376_s4 + $0xd2c] ss:$16 sps:$4 sm:$0xff]  }
0x1137   : > { %12479 = vmatpush1.bf16.msra.mxu1 %v15907_v3  ;;  %v12146_v32 = vpop.f32.mrf.mxu0  ;;  %12439 = vmatprep.subr.bf16.mxu0 %v15912_v38  ;;  %v15987_v4 = vld [vmem:[%s21376_s4 + $0xf2c] ss:$16 sps:$4 sm:$0xff]   ;;  %v15982_v57 = vld [vmem:[%s21376_s4 + $0xd28] ss:$16 sps:$4 sm:$0xff]  }
0x1138   : > { %v12187_v34 = vpop.f32.mrf.mxu1  ;;  %12480 = vmatprep.subr.bf16.mxu1 %v15915_v7  ;;  %v15985_v3 = vld [vmem:[%s21376_s4 + $0xf28] ss:$16 sps:$4 sm:$0xff]   ;;  %v15990_v38 = vld [vmem:[%s21376_s4 + $0xd0c] ss:$16 sps:$4 sm:$0xff]  }
0x1139   : > { %v15993_v58 = vld [vmem:[%s21376_s4 + $0xf0c] ss:$16 sps:$4 sm:$0xff]   ;;  %v15988_v12 = vld [vmem:[%s21376_s4 + $0xd08] ss:$16 sps:$4 sm:$0xff]  }
0x113a   : > { %12440 = vmatpush1.bf16.msra.mxu0 %v15910_v30  ;;  %v15991_v7 = vld [vmem:[%s21376_s4 + $0xf08] ss:$16 sps:$4 sm:$0xff]  }
0x113b   : > { %12481 = vmatpush1.bf16.msra.mxu1 %v15913_v8  ;;  %12441 = vmatprep.subr.bf16.mxu0 %v15918_v31 }
0x113c   : > { %12482 = vmatprep.subr.bf16.mxu1 %v15921_v37 }
0x113e   : > { %12442 = vmatpush1.bf16.msra.mxu0 %v15916_v10 }
0x113f   : > { %12483 = vmatpush1.bf16.msra.mxu1 %v15919_v47  ;;  %12443 = vmatprep.subr.bf16.mxu0 %v15924_v36 }
0x1140   : > { %12484 = vmatprep.subr.bf16.mxu1 %v15927_v50 }
0x1142   : > { %12444 = vmatpush1.bf16.msra.mxu0 %v15922_v40 }
0x1143   : > { %12485 = vmatpush1.bf16.msra.mxu1 %v15925_v2  ;;  %12445 = vmatprep.subr.bf16.mxu0 %v15930_v41 }
0x1144   : > { %12486 = vmatprep.subr.bf16.mxu1 %v15933_v43 }
0x1146   : > { %12446 = vmatpush1.bf16.msra.mxu0 %v15928_v44 }
0x1147   : > { %12487 = vmatpush1.bf16.msra.mxu1 %v15931_v54  ;;  %12447 = vmatprep.subr.bf16.mxu0 %v15936_v5 }
0x1148   : > { %12488 = vmatprep.subr.bf16.mxu1 %v15939_v11 }
0x114a   : > { %12448 = vmatpush1.bf16.msra.mxu0 %v15934_v14 }
0x114b   : > { %12489 = vmatpush1.bf16.msra.mxu1 %v15937_v45  ;;  %12449 = vmatprep.subr.bf16.mxu0 %v15942_v35 }
0x114c   : > { %12490 = vmatprep.subr.bf16.mxu1 %v15945_v46 }
0x114e   : > { %12450 = vmatpush1.bf16.msra.mxu0 %v15940_v51 }
0x114f   : > { %12491 = vmatpush1.bf16.msra.mxu1 %v15943_v53  ;;  %12451 = vmatprep.subr.bf16.mxu0 %v15948_v49 }
0x1150   : > { %12492 = vmatprep.subr.bf16.mxu1 %v15951_v18 }
0x1152   : > { %12452 = vmatpush2.bf16.msra.mxu0 %v15946_v13 }
0x1153   : > { %12493 = vmatpush2.bf16.msra.mxu1 %v15949_v25  ;;  %12453 = vmatprep.subr.bf16.mxu0 %v15954_v0 }
0x1154   : > { %12494 = vmatprep.subr.bf16.mxu1 %v15957_v59 }
0x1156   : > { %12454 = vmatpush2.bf16.msra.mxu0 %v15952_v9 }
0x1157   : > { %12495 = vmatpush2.bf16.msra.mxu1 %v15955_v61  ;;  %12455 = vmatprep.subr.bf16.mxu0 %v15960_v39 }
0x1158   : > { %12496 = vmatprep.subr.bf16.mxu1 %v15963_v28 }
0x115a   : > { %12456 = vmatpush2.bf16.msra.mxu0 %v15958_v29  ;;  %v12517_v29 = vadd.f32 %v21121_v55, %v21114_v1 }
0x115b   : > { %12497 = vmatpush2.bf16.msra.mxu1 %v15961_v63  ;;  %12457 = vmatprep.subr.bf16.mxu0 %v15966_v27 }
0x115c   : > { %12498 = vmatprep.subr.bf16.mxu1 %v15969_v6 }
0x115e   : > { %12458 = vmatpush2.bf16.msra.mxu0 %v15964_v16 }
0x115f   : > { %12499 = vmatpush2.bf16.msra.mxu1 %v15967_v48  ;;  %12459 = vmatprep.subr.bf16.mxu0 %v15972_v42 }
0x1160   : > { %12500 = vmatprep.subr.bf16.mxu1 %v15975_v15 }
0x1162   : > { %12460 = vmatpush2.bf16.msra.mxu0 %v15970_v56 }
0x1163   : > { %12501 = vmatpush2.bf16.msra.mxu1 %v15973_v19  ;;  %12461 = vmatprep.subr.bf16.mxu0 %v15978_v20 }
0x1164   : > { %12502 = vmatprep.subr.bf16.mxu1 %v15981_v21 }
0x1166   : > { %12462 = vmatpush2.bf16.msra.mxu0 %v15976_v22 }
0x1167   : > { %12503 = vmatpush2.bf16.msra.mxu1 %v15979_v24  ;;  %12463 = vmatprep.subr.bf16.mxu0 %v15984_v26 }
0x1168   : > { %12504 = vmatprep.subr.bf16.mxu1 %v15987_v4 }
0x116a   : > { %12464 = vmatpush2.bf16.msra.mxu0 %v15982_v57 }
0x116b   : > { %12505 = vmatpush2.bf16.msra.mxu1 %v15985_v3  ;;  %12465 = vmatprep.subr.bf16.mxu0 %v15990_v38 }
0x116c   : > { %12506 = vmatprep.subr.bf16.mxu1 %v15993_v58 }
0x116e   : > { %12466 = vmatpush2.bf16.msra.mxu0 %v15988_v12 }
0x116f   : > { %12507 = vmatpush2.bf16.msra.mxu1 %v15991_v7 }
0x1171   : > { %v12223_v17 = vpop.f32.mrf.mxu0  ;;  %12468 = vmatmul.mubr.bf16.vlgmr.msra.gmra.mxu0 %v20482_v23 }
0x1172   : > { %v12224_v52 = vadd.f32 %v12223_v17, %v18227_v62  ;;  %v12264_v30 = vpop.f32.mrf.mxu1  ;;  %12509 = vmatmul.mubr.bf16.vlgmr.msra.gmra.mxu1 %v20487_v33 }
0x1173   : > { %v12225_v32 = vpop.f32.mrf.mxu0 }
0x1174   : > { %v12265_v8 = vadd.f32 %v12264_v30, %v12224_v52  ;;  %v12226_v31 = vadd.f32 %v12225_v32, %v18221_v60  ;;  %v12266_v34 = vpop.f32.mrf.mxu1 }
0x1175   : > { %v12227_v37 = vpop.f32.mrf.mxu0 }
0x1176   : > { %v12267_v10 = vadd.f32 %v12266_v34, %v12226_v31  ;;  %v12268_v47 = vpop.f32.mrf.mxu1 }
0x1177   : > { %v12228_v36 = vpop.f32.mrf.mxu0 }
0x1178   : > { %v12269_v50 = vpop.f32.mrf.mxu1 }
0x11b1   : > { %v12305_v40 = vpop.f32.mrf.mxu0 }
0x11b2   : > { %v12306_v2 = vadd.f32 %v12305_v40, %v12265_v8  ;;  %v12346_v41 = vpop.f32.mrf.mxu1 }
0x11b3   : > { %v12307_v43 = vpop.f32.mrf.mxu0 }
0x11b4   : > { %v12347_v23 = vadd.f32 %v12346_v41, %v12306_v2  ;;  %v12308_v44 = vadd.f32 %v12307_v43, %v12267_v10  ;;  %v12348_v62 = vpop.f32.mrf.mxu1 }
0x11b5   : > { %v12309_v54 = vpop.f32.mrf.mxu0 }
0x11b6   : > { %v12349_v5 = vadd.f32 %v12348_v62, %v12308_v44  ;;  %v12350_v33 = vpop.f32.mrf.mxu1 }
0x11b7   : > { %v12310_v11 = vpop.f32.mrf.mxu0 }
0x11b8   : > { %v12351_v14 = vpop.f32.mrf.mxu1 }
0x11f1   : > { %v12387_v45 = vpop.f32.mrf.mxu0 }
0x11f2   : > { %v12428_v60 = vpop.f32.mrf.mxu1  ;;  %v12388_v13 = vadd.f32 %v12387_v45, %v12347_v23 }
0x11f3   : > { %v12389_v35 = vpop.f32.mrf.mxu0 }
0x11f4   : > { %v12430_v46 = vpop.f32.mrf.mxu1  ;;  %v12390_v25 = vadd.f32 %v12389_v35, %v12349_v5  ;;  %v12429_v0 = vadd.f32 %v12428_v60, %v12388_v13 }
0x11f5   : > { %v12391_v51 = vpop.f32.mrf.mxu0 }
0x11f6   : > { %v12432_v53 = vpop.f32.mrf.mxu1  ;;  %v12431_v9 = vadd.f32 %v12430_v46, %v12390_v25 }
0x11f7   : > { %v12392_v49 = vpop.f32.mrf.mxu0 }
0x11f8   : > { %v12433_v18 = vpop.f32.mrf.mxu1 }
0x1231   : > { %v12469_v59 = vpop.f32.mrf.mxu0 }
0x1232   : > { %v12470_v61 = vadd.f32 %v12469_v59, %v12429_v0  ;;  %v12510_v39 = vpop.f32.mrf.mxu1 }
0x1233   : > { %v12471_v28 = vpop.f32.mrf.mxu0 }
0x1234   : > { %v12511_v63 = vadd.f32 %v12510_v39, %v12470_v61  ;;  %v12472_v27 = vadd.f32 %v12471_v28, %v12431_v9  ;;  %v12512_v6 = vpop.f32.mrf.mxu1 }
0x1235   : > { %v12473_v16 = vpop.f32.mrf.mxu0 }
0x1236   : > { %v12518_v48 = vadd.f32 %v12517_v29, %v12511_v63  ;;  %v12513_v42 = vadd.f32 %v12512_v6, %v12472_v27  ;;  %v12514_v15 = vpop.f32.mrf.mxu1 }
0x1237   : > { %v12474_v56 = vpop.f32.mrf.mxu0 }
0x1238   : > { %v12515_v19 = vpop.f32.mrf.mxu1  ;;  %v12519_v20 = vadd.f32 %v12518_v48, %v12513_v42 }
0x123a   : > { %12520 = vadd.xlane.f32.xlu0 %v12519_v20 }
0x12c3   : > { %v12521_v21 = vpop.xlane.xlu0 %12520 }
0x12c4   : > { %v12522_v22 = vmul.f32 0.001953125, %v12521_v21 }
0x12c6   : > { %v12523_v24 = vsub.f32 %v21114_v1, %v12522_v22  ;;  %v12524_v26 = vsub.f32 %v21121_v55, %v12522_v22  ;;  %v12525_v4 = vsub.f32 %v12511_v63, %v12522_v22  ;;  %v12526_v57 = vsub.f32 %v12513_v42, %v12522_v22 }
0x12c8   : > { %v12527_v3 = vmul.f32 %v12523_v24, %v12523_v24  ;;  %v12528_v38 = vmul.f32 %v12524_v26, %v12524_v26  ;;  %v12529_v58 = vmul.f32 %v12525_v4, %v12525_v4  ;;  %v12530_v7 = vmul.f32 %v12526_v57, %v12526_v57 }
0x12ca   : > { %v12531_v12 = vadd.f32 %v12528_v38, %v12527_v3 }
0x12cc   : > { %v12532_v17 = vadd.f32 %v12531_v12, %v12529_v58 }
0x12ce   : > { %v12533_v52 = vadd.f32 %v12532_v17, %v12530_v7 }
0x12d0   : > { %12534 = vadd.xlane.f32.xlu1 %v12533_v52 }
0x12d1   : > { %16047 = shalt.err (!%p16044_p3)
}
0x12d2   : > { %s16048_s28 = scalar_lea.hbm %s21300_s20, 1024  ;;  %s16052_s29 = scalar_lea.hbm %s21378_s6, 2048 }
0x12d3   : > { %p16049_p4 = scmp.ne.s32.totalorder %s21300_s20, %s16048_s28  ;;  %p16053_p9 = scmp.lt.s32.totalorder %s21300_s20, %s21378_s6 }
0x12d4   : > { %p16054_p10 = scmp.lt.s32.totalorder %s16052_s29, %s16048_s28 }
0x12d5   : > { %p16050_p7 = pnand %p16049_p4, %p16206_p5 }
0x12d6   : > { %p16055_p11 = por %p16054_p10, %p16053_p9 }
0x12d7   : > { %p16051_p8 = pneg %p16050_p7 }
0x12d9   : > { %p16056_p12 = pnand %p16055_p11, %p16051_p8 }
0x12db   : > { %16059 = shalt.err (!%p16056_p12)
}
0x12dc   : > { %s16130_s16 = smov 128   ;;  %s16131_s17 = smov 8  }
0x12dd   : > { %14396 = dma.vmem_to_hbm [thread:$0]  (%p16206_p5), %s21295_s13, 1024, %s21300_s20, %s12553_s18, %s16130_s16, %s16130_s16, %s16131_s17  }
0x12de   : > { %s12678_s19 = sshll.u32 %s17445_s26, 5  ;;  %s14265_s12 = sshll.u32 %s16189_s25, 9 }
0x12df   : > { %s248_s9 = scalar_lea.vmem [#allocation4], %s12678_s19  ;;  %s21330_s29 = scalar_lea.hbm %s21377_s5, %s14265_s12 }
0x12e0   : > { %s12567_s28 = sshll.u32 %s248_s9, 4  ;;  %s12548_s25 = scalar_lea.sflag [#allocation5], %s17445_s26  ;;  %s21332_s28 = int_to_ptr.vmem [resolvable:$true] %s12567_s28 }
0x12e1   : > { %s16060_s13 = scalar_lea.vmem %s21332_s28, 512  ;;  %s16132_s20 = smov [#allocation4]  }
0x12e2   : > { %p16061_p13 = scmp.ne.s32.totalorder %s21332_s28, %s16060_s13  ;;  %s16064_s18 = sshll.u32 %s16132_s20, 4  ;;  %s16065_s18 = int_to_ptr.vmem [resolvable:$false] %s16064_s18 }
0x12e3   : > { %s16066_s14 = scalar_lea.vmem %s16065_s18, 1024  ;;  %p16067_p2 = scmp.lt.s32.totalorder %s21332_s28, %s16065_s18 }
0x12e4   : > { %p16062_p0 = pnand %p16061_p13, %p16206_p5  ;;  %p16068_p3 = scmp.lt.s32.totalorder %s16066_s14, %s16060_s13 }
0x12e6   : > { %p16063_p1 = pneg %p16062_p0  ;;  %p16069_p4 = por %p16068_p3, %p16067_p2 }
0x12e8   : > { %p16070_p7 = pnand %p16069_p4, %p16063_p1 }
0x1359   : > { %v12535_v1 = vpop.xlane.xlu1 %12534 }
0x135a   : > { %v12536_v55 = vmul.f32 0.001953125, %v12535_v1 }
0x135c   : > { %v12537_v30 = vadd.f32 1e-05, %v12536_v55 }
0x135e   : > { %16028 = vrsqrt.f32 %v12537_v30 }
0x136b   : > { %v16029_v32 = vpop.eup %16028 }
0x136c   : > { %v12539_v8 = vmul.f32 %v16029_v32, %v12523_v24  ;;  %v12540_v31 = vmul.f32 %v16029_v32, %v12524_v26  ;;  %v12541_v34 = vmul.f32 %v16029_v32, %v12525_v4  ;;  %v12542_v37 = vmul.f32 %v16029_v32, %v12526_v57 }
0x136e   : > { %12543 = vst [vmem:[%s248_s9] sm:$0xff] %v12539_v8  ;;  %12544 = vst [vmem:[%s248_s9 + $0x8] sm:$0xff] %v12540_v31 }
0x136f   : > { %12545 = vst [vmem:[%s248_s9 + $0x10] sm:$0xff] %v12541_v34  ;;  %12546 = vst [vmem:[%s248_s9 + $0x18] sm:$0xff] %v12542_v37 }
0x1370   : > { %16073 = shalt.err (!%p16070_p7)
}
0x1371   : > { %s16074_s15 = scalar_lea.hbm %s21330_s29, 512  ;;  %s16078_s17 = scalar_lea.hbm %s21377_s5, 1024 }
0x1372   : > { %p16075_p8 = scmp.ne.s32.totalorder %s21330_s29, %s16074_s15  ;;  %p16079_p11 = scmp.lt.s32.totalorder %s21330_s29, %s21377_s5 }
0x1373   : > { %p16080_p12 = scmp.lt.s32.totalorder %s16078_s17, %s16074_s15 }
0x1374   : > { %p16076_p9 = pnand %p16075_p8, %p16206_p5 }
0x1375   : > { %p16081_p13 = por %p16080_p12, %p16079_p11 }
0x1376   : > { %p16077_p10 = pneg %p16076_p9 }
0x1378   : > { %p16082_p0 = pnand %p16081_p13, %p16077_p10 }
0x137a   : > { %16085 = shalt.err (!%p16082_p0)
}
0x137b   : > { %14395 = dma.vmem_to_hbm [thread:$0]  (%p16206_p5), %s21332_s28, 512, %s21330_s29, %s12548_s25  }
0x137c PF: > { %p14406_p1 = scmp.ge.s32.totalorder %s16124_s24, 2  ;;  %s12595_s9 = sand.u32 1, %s16112_s21  }
0x137d   : > { %s12596_s10 = scalar_lea.sflag [#allocation5], %s12595_s9 }
0x137e   : > { %p14400_p2 = pnand %p14406_p1, %p16210_p6 }
0x1380   : > { %p14401_p3 = pneg %p14400_p2 }
0x1382   : > { %16103 = dma.done.wait (%p14401_p3), %s12596_s10, 512  }
0x1383   : > { %16105 = vsyncadd (%p14401_p3), %s12596_s10, 4294966784  ;;  %s12605_s11 = scalar_lea.sflag [#allocation7], %s12595_s9 }
0x1384   : > { %16107 = dma.done.wait (%p14401_p3), %s12605_s11, 1024  }
0x1385   : > { %16109 = vsyncadd (%p14401_p3), %s12605_s11, 4294966272  ;;  %p20_p5 = scmp.ge.s32.totalorder %s16193_s27, 4   ;;  %s21381_s21 = smov %s16116_s22 }
0x1386   : > { %s21382_s22 = smov %s16120_s23  ;;  %s21383_s23 = smov %s16204_s30 }
0x1387   : > { %s21384_s24 = smov %s16193_s27  ;;  %22 = sbr.rel (!%p20_p5) target bundleno = 5 (0x5), region = 95 }
0x138c   :  { %12610 = vsyncpa [#allocation5], 1 }
0x138d   :  { %12612 = vsyncpa [#allocation5 + $0x1], 1 }
0x138e   :  { %12613 = vsyncpa [#allocation7], 1 }
0x138f   :  { %12615 = vsyncpa [#allocation7 + $0x1], 1 }

</bundles_post_ra>
